<compile_context>
chip_gen: v5e
topology: v5e:2x2
jax: 0.10.0
libtpu: 0.0.40
codegen_flags: <defaults>
</compile_context>

<pallas_src>
import jax
import jax.numpy as jnp
from jax.experimental import pallas as pl
from jax.experimental.pallas import tpu as pltpu


def _round_up(x, m):
    return ((x + m - 1) // m) * m


# ------------------------ tiled matmul + bias kernel -------------------------
# Used for both the per-layer input projection (x @ W_ih + b) and the decoder.
def matmul_bias_kernel(x_ref, w_ref, b_ref, o_ref, acc_ref):
    @pl.when(pl.program_id(2) == 0)
    def _():
        acc_ref[...] = jnp.zeros_like(acc_ref)

    acc_ref[...] += jnp.dot(x_ref[...], w_ref[...],
                            preferred_element_type=jnp.float32)

    @pl.when(pl.program_id(2) == pl.num_programs(2) - 1)
    def _():
        o_ref[...] = (acc_ref[...] + b_ref[...]).astype(o_ref.dtype)


def matmul_bias(x, w, b, *, tm=256, tn=512, tk=512, out_dtype=jnp.float32):
    """x: (M, K), w: (K, N), b: (N,) -> (M, N) out_dtype.

    Operands are cast to bf16 for the MXU; accumulation is f32. Inputs are
    zero-padded to tile-aligned shapes and the result is sliced back.
    """
    M, K = x.shape
    _, N = w.shape
    x = x.astype(jnp.bfloat16)
    w = w.astype(jnp.bfloat16)
    b = b.astype(jnp.float32)

    # M: sublane-align (16 for bf16), then tile.
    Mp = _round_up(M, 16)
    tm = min(tm, Mp)
    Mp = _round_up(Mp, tm)
    # N: lane-align to 128 so output stores are unmasked, then tile.
    Np = _round_up(N, 128)
    tn = min(tn, Np)
    Np = _round_up(Np, tn)
    # K: only tile if larger than tk (a full-extent block is always legal).
    if K <= tk:
        tk_eff, Kp = K, K
    else:
        tk_eff = tk
        Kp = _round_up(K, tk_eff)

    if (Mp, Kp) != (M, K):
        x = jnp.pad(x, ((0, Mp - M), (0, Kp - K)))
    if (Kp, Np) != (K, N):
        w = jnp.pad(w, ((0, Kp - K), (0, Np - N)))
    if Np != N:
        b = jnp.pad(b, (0, Np - N))
    b2 = b[None, :]

    out = pl.pallas_call(
        matmul_bias_kernel,
        out_shape=jax.ShapeDtypeStruct((Mp, Np), out_dtype),
        grid_spec=pltpu.PrefetchScalarGridSpec(
            num_scalar_prefetch=0,
            grid=(Mp // tm, Np // tn, Kp // tk_eff),
            in_specs=[
                pl.BlockSpec((tm, tk_eff), lambda i, j, k: (i, k)),
                pl.BlockSpec((tk_eff, tn), lambda i, j, k: (k, j)),
                pl.BlockSpec((1, tn), lambda i, j, k: (0, j)),
            ],
            out_specs=pl.BlockSpec((tm, tn), lambda i, j, k: (i, j)),
            scratch_shapes=[pltpu.VMEM((tm, tn), jnp.float32)],
        ),
        compiler_params=pltpu.CompilerParams(
            dimension_semantics=("parallel", "parallel", "arbitrary"),
            vmem_limit_bytes=48 << 20),
    )(x, w, b2)
    return out[:M, :N]


# ----------------------------- LSTM recurrence -------------------------------
# The input projection (x @ W_ih + b_ih + b_hh) is precomputed for every
# timestep; the serial loop only does h @ W_hh (one fused (B,Hp)x(Hp,4Hp)
# matmul per step) plus the elementwise gate math. Tc timesteps are processed
# per grid step to amortize per-step overhead; a leading batch-block axis is
# "parallel" so megacore chips can shard it. Hp is a multiple of 128, so gate
# slices are lane-aligned and output stores are unmasked.
def lstm_rec_kernel(xp_ref, whh_ref, out_ref, h_sc, c_sc):
    @pl.when(pl.program_id(1) == 0)     # new batch block -> zero initial state
    def _():
        h_sc[...] = jnp.zeros_like(h_sc)
        c_sc[...] = jnp.zeros_like(c_sc)

    H = h_sc.shape[-1]                  # lane-padded hidden size
    tc = xp_ref.shape[0]
    whh = whh_ref[...]                  # (Hp, 4Hp) bf16, hoisted out of the loop

    def step(t, carry):
        h, c = carry
        gates = xp_ref[t] + jnp.dot(h.astype(jnp.bfloat16), whh,
                                    preferred_element_type=jnp.float32)
        # PyTorch LSTM gate order: i, f, g, o (lane-aligned column blocks)
        i_g = jax.nn.sigmoid(gates[:, 0 * H:1 * H])
        f_g = jax.nn.sigmoid(gates[:, 1 * H:2 * H])
        g_g = jnp.tanh(gates[:, 2 * H:3 * H])
        o_g = jax.nn.sigmoid(gates[:, 3 * H:4 * H])
        c_new = f_g * c + i_g * g_g
        h_new = o_g * jnp.tanh(c_new)
        out_ref[t] = h_new.astype(out_ref.dtype)
        return h_new, c_new

    h, c = jax.lax.fori_loop(0, tc, step, (h_sc[...], c_sc[...]), unroll=True)
    h_sc[...] = h
    c_sc[...] = c


def lstm_recurrence(xp, w_hh_t, *, tc=16, bb=128):
    """xp: (T, Bp, 4Hp) precomputed input projection; w_hh_t: (Hp, 4Hp)."""
    T, Bp, G = xp.shape
    H = G // 4
    xp = xp.astype(jnp.bfloat16)
    w_hh_t = w_hh_t.astype(jnp.bfloat16)

    Bb = min(bb, Bp)
    if Bp % Bb != 0:
        Bb = Bp

    # Cap the timestep block so (xp block + out block) stays comfortably in VMEM
    # alongside the double-buffered W_hh tile.
    per_t_bytes = Bb * (G + H) * 2
    tc_cap = max(1, (6 << 20) // per_t_bytes)
    Tc = max(1, min(tc, T, tc_cap))
    Tp = _round_up(T, Tc)
    if Tp != T:
        xp = jnp.pad(xp, ((0, Tp - T), (0, 0), (0, 0)))

    out = pl.pallas_call(
        lstm_rec_kernel,
        out_shape=jax.ShapeDtypeStruct((Tp, Bp, H), jnp.bfloat16),
        grid_spec=pltpu.PrefetchScalarGridSpec(
            num_scalar_prefetch=0,
            grid=(Bp // Bb, Tp // Tc),
            in_specs=[
                pl.BlockSpec((Tc, Bb, G), lambda b, t: (t, b, 0)),
                pl.BlockSpec((H, G), lambda b, t: (0, 0)),
            ],
            out_specs=pl.BlockSpec((Tc, Bb, H), lambda b, t: (t, b, 0)),
            scratch_shapes=[
                pltpu.VMEM((Bb, H), jnp.float32),   # h state
                pltpu.VMEM((Bb, H), jnp.float32),   # c state
            ],
        ),
        compiler_params=pltpu.CompilerParams(
            dimension_semantics=("parallel", "arbitrary"),
            vmem_limit_bytes=48 << 20),
    )(xp, w_hh_t)
    return out[:T]


# ------------------------------ parameter init -------------------------------
def _pad_gate_cols(w, h, hp):
    """Last dim is fused gates [i,f,g,o] of width 4h -> 4hp, each gate padded."""
    parts = []
    for k in range(4):
        g = w[..., k * h:(k + 1) * h]
        pad = [(0, 0)] * (w.ndim - 1) + [(0, hp - h)]
        parts.append(jnp.pad(g, pad))
    return jnp.concatenate(parts, axis=-1)


def init_params(key, ntoken, ninp, nhid, nlayers):
    keys = jax.random.split(key, 2 + 4 * nlayers)
    hp = _round_up(nhid, 128)                           # lane-padded hidden size

    dec_w = jax.random.uniform(keys[1], (ntoken, nhid), jnp.float32, -0.1, 0.1)
    dec_w_t = jnp.pad(dec_w.T, ((0, hp - nhid), (0, 0)))  # (Hp, V), zero pad rows
    params = {
        # init_weights(): uniform(-0.1, 0.1), decoder bias 0
        "enc": jax.random.uniform(keys[0], (ntoken, ninp), jnp.float32, -0.1, 0.1),
        "dec_w_t": dec_w_t.astype(jnp.bfloat16),
        "dec_b": jnp.zeros((ntoken,), jnp.float32),
        "layers": [],
    }
    for l in range(nlayers):
        din = ninp if l == 0 else nhid
        din_p = ninp if l == 0 else hp
        h = nhid                               # tie_weights=False -> all layers nhid
        k = 1.0 / float(h) ** 0.5              # PyTorch LSTM default init
        kk = keys[2 + 4 * l: 2 + 4 * (l + 1)]
        w_ih = jax.random.uniform(kk[0], (4 * h, din), jnp.float32, -k, k)
        w_hh = jax.random.uniform(kk[1], (4 * h, h), jnp.float32, -k, k)
        b_ih = jax.random.uniform(kk[2], (4 * h,), jnp.float32, -k, k)
        b_hh = jax.random.uniform(kk[3], (4 * h,), jnp.float32, -k, k)
        # fused-gate, pre-transposed, lane-padded layouts; gates ordered [i,f,g,o]
        w_ih_t = _pad_gate_cols(w_ih.T, h, hp)                 # (din,  4Hp)
        w_ih_t = jnp.pad(w_ih_t, ((0, din_p - din), (0, 0)))   # (Dinp, 4Hp)
        w_hh_t = _pad_gate_cols(w_hh.T, h, hp)                 # (h,    4Hp)
        w_hh_t = jnp.pad(w_hh_t, ((0, hp - h), (0, 0)))        # (Hp,   4Hp)
        b = _pad_gate_cols((b_ih + b_hh)[None, :], h, hp)[0]   # (4Hp,)
        params["layers"].append({
            "w_ih_t": w_ih_t.astype(jnp.bfloat16),
            "w_hh_t": w_hh_t.astype(jnp.bfloat16),
            "b": b.astype(jnp.float32),
        })
    return params


# --------------------------------- forward -----------------------------------
def rnn_forward(params, tokens):
    """tokens: (B, T) int32 token ids -> logits (T*B, ntoken)."""
    B, T = tokens.shape
    # input.transpose(0, 1) + embedding lookup (gather kept as JAX glue).
    x = jnp.take(params["enc"], tokens.T, axis=0)          # (T, B, ninp) f32
    # Pad batch for bf16 sublane packing; padded rows are sliced off later.
    Bp = _round_up(B, 16)
    if Bp != B:
        x = jnp.pad(x, ((0, 0), (0, Bp - B), (0, 0)))

    for layer in params["layers"]:
        Tn, Bn, Din = x.shape
        G = layer["w_hh_t"].shape[-1]                      # 4*Hp
        # Hoisted input projection over all timesteps (one big MXU matmul).
        xp = matmul_bias(x.reshape(Tn * Bn, Din), layer["w_ih_t"], layer["b"],
                         out_dtype=jnp.bfloat16)
        xp = xp.reshape(Tn, Bn, G)
        # Serial recurrence: only h @ W_hh per step.
        x = lstm_recurrence(xp, layer["w_hh_t"])           # (T, Bp, Hp) bf16

    x = x[:, :B]                                           # drop batch padding
    T2, B2, Hp = x.shape
    logits = matmul_bias(x.reshape(T2 * B2, Hp),
                         params["dec_w_t"], params["dec_b"])   # (T*B, ntoken) f32
    return logits


if __name__ == "__main__":
    ntoken, ninp, nhid, nlayers = 100, 32, 32, 2
    B, T = 2, 8

    key = jax.random.PRNGKey(0)
    pkey, tkey = jax.random.split(key)
    params = init_params(pkey, ntoken, ninp, nhid, nlayers)
    tokens = jax.random.randint(tkey, (B, T), 0, ntoken, dtype=jnp.int32)

    out = jax.jit(rnn_forward)(params, tokens)
    out = jax.block_until_ready(out)
    assert out.shape == (T * B, ntoken), out.shape
    assert bool(jnp.all(jnp.isfinite(out)))
    print("KERNEL_OK")
</pallas_src>

<mosaic_0001>
module attributes {stable_mosaic.version = 11 : i64} {
  func.func @matmul_bias_kernel(%arg0: i32, %arg1: i32, %arg2: i32, %arg3: memref<128x32xbf16, #tpu.memory_space<vmem>>, %arg4: memref<32x512xbf16, #tpu.memory_space<vmem>>, %arg5: memref<1x512xf32, #tpu.memory_space<vmem>>, %arg6: memref<128x512xbf16, #tpu.memory_space<vmem>>, %arg7: memref<128x512xf32, #tpu.memory_space<vmem>>) attributes {dimension_semantics = [#tpu.dimension_semantics<parallel>, #tpu.dimension_semantics<parallel>, #tpu.dimension_semantics<arbitrary>], iteration_bounds = array<i64: 1, 1, 1>, scalar_prefetch = 0 : i64, scratch_operands = 1 : i64, tpu.core_type = #tpu.core_type<tc>, window_params = [{transform_indices = @transform_0, window_bounds = array<i64: 128, 32>}, {transform_indices = @transform_1, window_bounds = array<i64: 32, 512>}, {transform_indices = @transform_2, window_bounds = array<i64: 1, 512>}, {transform_indices = @transform_3, window_bounds = array<i64: 128, 512>}]} {
    %c0_i32 = arith.constant 0 : i32
    %0 = arith.cmpi eq, %arg2, %c0_i32 : i32
    %1 = arith.extui %0 : i1 to i32
    %c0_i32_0 = arith.constant 0 : i32
    %2 = arith.cmpi ne, %1, %c0_i32_0 : i32
    scf.if %2 {
      %cst_10 = arith.constant 0.000000e+00 : f32
      %12 = vector.broadcast %cst_10 : f32 to vector<128x512xf32>
      %c0_11 = arith.constant 0 : index
      %c0_12 = arith.constant 0 : index
      %13 = vector.load %arg7[%c0_11, %c0_12] : memref<128x512xf32, #tpu.memory_space<vmem>>, vector<128x512xf32>
      tpu.vector_store %arg7[%c0_11, %c0_12], %12 {strides = array<i32>} : memref<128x512xf32, #tpu.memory_space<vmem>>, vector<128x512xf32>,
    } else {
    }
    %c0 = arith.constant 0 : index
    %c0_1 = arith.constant 0 : index
    %3 = vector.load %arg7[%c0, %c0_1] : memref<128x512xf32, #tpu.memory_space<vmem>>, vector<128x512xf32>
    %c0_2 = arith.constant 0 : index
    %c0_3 = arith.constant 0 : index
    %4 = vector.load %arg3[%c0_2, %c0_3] : memref<128x32xbf16, #tpu.memory_space<vmem>>, vector<128x32xbf16>
    %c0_4 = arith.constant 0 : index
    %c0_5 = arith.constant 0 : index
    %5 = vector.load %arg4[%c0_4, %c0_5] : memref<32x512xbf16, #tpu.memory_space<vmem>>, vector<32x512xbf16>
    %cst = arith.constant dense<0.000000e+00> : vector<128x512xf32>
    %6 = tpu.matmul %4, %5, %cst {dimension_numbers = #tpu.dot_dimension_numbers<[1], [0], [0], [1], [0, 0, 1, 1], [], []>} : vector<128x32xbf16>, vector<32x512xbf16>, vector<128x512xf32> -> vector<128x512xf32>
    %7 = arith.addf %3, %6 : vector<128x512xf32>
    %c0_6 = arith.constant 0 : index
    %c0_7 = arith.constant 0 : index
    %8 = vector.load %arg7[%c0_6, %c0_7] : memref<128x512xf32, #tpu.memory_space<vmem>>, vector<128x512xf32>
    tpu.vector_store %arg7[%c0_6, %c0_7], %7 {strides = array<i32>} : memref<128x512xf32, #tpu.memory_space<vmem>>, vector<128x512xf32>,
    %c0_i32_8 = arith.constant 0 : i32
    %9 = arith.cmpi eq, %arg2, %c0_i32_8 : i32
    %10 = arith.extui %9 : i1 to i32
    %c0_i32_9 = arith.constant 0 : i32
    %11 = arith.cmpi ne, %10, %c0_i32_9 : i32
    scf.if %11 {
      %c0_10 = arith.constant 0 : index
      %c0_11 = arith.constant 0 : index
      %12 = vector.load %arg7[%c0_10, %c0_11] : memref<128x512xf32, #tpu.memory_space<vmem>>, vector<128x512xf32>
      %c0_12 = arith.constant 0 : index
      %c0_13 = arith.constant 0 : index
      %13 = vector.load %arg5[%c0_12, %c0_13] : memref<1x512xf32, #tpu.memory_space<vmem>>, vector<1x512xf32>
      %14 = vector.broadcast %13 : vector<1x512xf32> to vector<128x512xf32>
      %15 = arith.addf %12, %14 : vector<128x512xf32>
      %16 = arith.truncf %15 : vector<128x512xf32> to vector<128x512xbf16>
      %c0_14 = arith.constant 0 : index
      %c0_15 = arith.constant 0 : index
      %17 = vector.load %arg6[%c0_14, %c0_15] : memref<128x512xbf16, #tpu.memory_space<vmem>>, vector<128x512xbf16>
      tpu.vector_store %arg6[%c0_14, %c0_15], %16 {strides = array<i32>} : memref<128x512xbf16, #tpu.memory_space<vmem>>, vector<128x512xbf16>,
    } else {
    }
    return
  }
  func.func @transform_0(%arg0: i32, %arg1: i32, %arg2: i32) -> (i32, i32) {
    %c0_i32 = arith.constant 0 : i32
    return %arg0, %arg2 : i32, i32
  }
  func.func @transform_1(%arg0: i32, %arg1: i32, %arg2: i32) -> (i32, i32) {
    %c0_i32 = arith.constant 0 : i32
    return %arg2, %arg1 : i32, i32
  }
  func.func @transform_2(%arg0: i32, %arg1: i32, %arg2: i32) -> (i32, i32) {
    %c0_i32 = arith.constant 0 : i32
    %c0_i32_0 = arith.constant 0 : i32
    return %c0_i32, %arg1 : i32, i32
  }
  func.func @transform_3(%arg0: i32, %arg1: i32, %arg2: i32) -> (i32, i32) {
    %c0_i32 = arith.constant 0 : i32
    return %arg0, %arg1 : i32, i32
  }
}

module attributes {stable_mosaic.version = 11 : i64} {
  func.func @matmul_bias_kernel(%arg0: i32, %arg1: i32, %arg2: i32, %arg3: memref<128x128xbf16, #tpu.memory_space<vmem>>, %arg4: memref<128x512xbf16, #tpu.memory_space<vmem>>, %arg5: memref<1x512xf32, #tpu.memory_space<vmem>>, %arg6: memref<128x512xbf16, #tpu.memory_space<vmem>>, %arg7: memref<128x512xf32, #tpu.memory_space<vmem>>) attributes {dimension_semantics = [#tpu.dimension_semantics<parallel>, #tpu.dimension_semantics<parallel>, #tpu.dimension_semantics<arbitrary>], iteration_bounds = array<i64: 1, 1, 1>, scalar_prefetch = 0 : i64, scratch_operands = 1 : i64, tpu.core_type = #tpu.core_type<tc>, window_params = [{transform_indices = @transform_0, window_bounds = array<i64: 128, 128>}, {transform_indices = @transform_1, window_bounds = array<i64: 128, 512>}, {transform_indices = @transform_2, window_bounds = array<i64: 1, 512>}, {transform_indices = @transform_3, window_bounds = array<i64: 128, 512>}]} {
    %c0_i32 = arith.constant 0 : i32
    %0 = arith.cmpi eq, %arg2, %c0_i32 : i32
    %1 = arith.extui %0 : i1 to i32
    %c0_i32_0 = arith.constant 0 : i32
    %2 = arith.cmpi ne, %1, %c0_i32_0 : i32
    scf.if %2 {
      %cst_10 = arith.constant 0.000000e+00 : f32
      %12 = vector.broadcast %cst_10 : f32 to vector<128x512xf32>
      %c0_11 = arith.constant 0 : index
      %c0_12 = arith.constant 0 : index
      %13 = vector.load %arg7[%c0_11, %c0_12] : memref<128x512xf32, #tpu.memory_space<vmem>>, vector<128x512xf32>
      tpu.vector_store %arg7[%c0_11, %c0_12], %12 {strides = array<i32>} : memref<128x512xf32, #tpu.memory_space<vmem>>, vector<128x512xf32>,
    } else {
    }
    %c0 = arith.constant 0 : index
    %c0_1 = arith.constant 0 : index
    %3 = vector.load %arg7[%c0, %c0_1] : memref<128x512xf32, #tpu.memory_space<vmem>>, vector<128x512xf32>
    %c0_2 = arith.constant 0 : index
    %c0_3 = arith.constant 0 : index
    %4 = vector.load %arg3[%c0_2, %c0_3] : memref<128x128xbf16, #tpu.memory_space<vmem>>, vector<128x128xbf16>
    %c0_4 = arith.constant 0 : index
    %c0_5 = arith.constant 0 : index
    %5 = vector.load %arg4[%c0_4, %c0_5] : memref<128x512xbf16, #tpu.memory_space<vmem>>, vector<128x512xbf16>
    %cst = arith.constant dense<0.000000e+00> : vector<128x512xf32>
    %6 = tpu.matmul %4, %5, %cst {dimension_numbers = #tpu.dot_dimension_numbers<[1], [0], [0], [1], [0, 0, 1, 1], [], []>} : vector<128x128xbf16>, vector<128x512xbf16>, vector<128x512xf32> -> vector<128x512xf32>
    %7 = arith.addf %3, %6 : vector<128x512xf32>
    %c0_6 = arith.constant 0 : index
    %c0_7 = arith.constant 0 : index
    %8 = vector.load %arg7[%c0_6, %c0_7] : memref<128x512xf32, #tpu.memory_space<vmem>>, vector<128x512xf32>
    tpu.vector_store %arg7[%c0_6, %c0_7], %7 {strides = array<i32>} : memref<128x512xf32, #tpu.memory_space<vmem>>, vector<128x512xf32>,
    %c0_i32_8 = arith.constant 0 : i32
    %9 = arith.cmpi eq, %arg2, %c0_i32_8 : i32
    %10 = arith.extui %9 : i1 to i32
    %c0_i32_9 = arith.constant 0 : i32
    %11 = arith.cmpi ne, %10, %c0_i32_9 : i32
    scf.if %11 {
      %c0_10 = arith.constant 0 : index
      %c0_11 = arith.constant 0 : index
      %12 = vector.load %arg7[%c0_10, %c0_11] : memref<128x512xf32, #tpu.memory_space<vmem>>, vector<128x512xf32>
      %c0_12 = arith.constant 0 : index
      %c0_13 = arith.constant 0 : index
      %13 = vector.load %arg5[%c0_12, %c0_13] : memref<1x512xf32, #tpu.memory_space<vmem>>, vector<1x512xf32>
      %14 = vector.broadcast %13 : vector<1x512xf32> to vector<128x512xf32>
      %15 = arith.addf %12, %14 : vector<128x512xf32>
      %16 = arith.truncf %15 : vector<128x512xf32> to vector<128x512xbf16>
      %c0_14 = arith.constant 0 : index
      %c0_15 = arith.constant 0 : index
      %17 = vector.load %arg6[%c0_14, %c0_15] : memref<128x512xbf16, #tpu.memory_space<vmem>>, vector<128x512xbf16>
      tpu.vector_store %arg6[%c0_14, %c0_15], %16 {strides = array<i32>} : memref<128x512xbf16, #tpu.memory_space<vmem>>, vector<128x512xbf16>,
    } else {
    }
    return
  }
  func.func @transform_0(%arg0: i32, %arg1: i32, %arg2: i32) -> (i32, i32) {
    %c0_i32 = arith.constant 0 : i32
    return %arg0, %arg2 : i32, i32
  }
  func.func @transform_1(%arg0: i32, %arg1: i32, %arg2: i32) -> (i32, i32) {
    %c0_i32 = arith.constant 0 : i32
    return %arg2, %arg1 : i32, i32
  }
  func.func @transform_2(%arg0: i32, %arg1: i32, %arg2: i32) -> (i32, i32) {
    %c0_i32 = arith.constant 0 : i32
    %c0_i32_0 = arith.constant 0 : i32
    return %c0_i32, %arg1 : i32, i32
  }
  func.func @transform_3(%arg0: i32, %arg1: i32, %arg2: i32) -> (i32, i32) {
    %c0_i32 = arith.constant 0 : i32
    return %arg0, %arg1 : i32, i32
  }
}

module attributes {stable_mosaic.version = 11 : i64} {
  func.func @lstm_rec_kernel(%arg0: i32, %arg1: i32, %arg2: memref<8x16x512xbf16, #tpu.memory_space<vmem>>, %arg3: memref<128x512xbf16, #tpu.memory_space<vmem>>, %arg4: memref<8x16x128xbf16, #tpu.memory_space<vmem>>, %arg5: memref<16x128xf32, #tpu.memory_space<vmem>>, %arg6: memref<16x128xf32, #tpu.memory_space<vmem>>) attributes {dimension_semantics = [#tpu.dimension_semantics<parallel>, #tpu.dimension_semantics<arbitrary>], iteration_bounds = array<i64: 1, 1>, scalar_prefetch = 0 : i64, scratch_operands = 2 : i64, tpu.core_type = #tpu.core_type<tc>, window_params = [{transform_indices = @transform_0, window_bounds = array<i64: 8, 16, 512>}, {pipeline_mode = #tpu.pipeline_mode<synchronous>, transform_indices = @transform_1, window_bounds = array<i64: 128, 512>}, {transform_indices = @transform_2, window_bounds = array<i64: 8, 16, 128>}]} {
    %c0_i32 = arith.constant 0 : i32
    %0 = arith.cmpi eq, %arg1, %c0_i32 : i32
    %1 = arith.extui %0 : i1 to i32
    %c0_i32_0 = arith.constant 0 : i32
    %2 = arith.cmpi ne, %1, %c0_i32_0 : i32
    scf.if %2 {
      %cst_74 = arith.constant 0.000000e+00 : f32
      %304 = vector.broadcast %cst_74 : f32 to vector<16x128xf32>
      %c0_75 = arith.constant 0 : index
      %c0_76 = arith.constant 0 : index
      %305 = vector.load %arg5[%c0_75, %c0_76] : memref<16x128xf32, #tpu.memory_space<vmem>>, vector<16x128xf32>
      tpu.vector_store %arg5[%c0_75, %c0_76], %304 {strides = array<i32>} : memref<16x128xf32, #tpu.memory_space<vmem>>, vector<16x128xf32>,
      %cst_77 = arith.constant 0.000000e+00 : f32
      %306 = vector.broadcast %cst_77 : f32 to vector<16x128xf32>
      %c0_78 = arith.constant 0 : index
      %c0_79 = arith.constant 0 : index
      %307 = vector.load %arg6[%c0_78, %c0_79] : memref<16x128xf32, #tpu.memory_space<vmem>>, vector<16x128xf32>
      tpu.vector_store %arg6[%c0_78, %c0_79], %306 {strides = array<i32>} : memref<16x128xf32, #tpu.memory_space<vmem>>, vector<16x128xf32>,
    } else {
    }
    %c0 = arith.constant 0 : index
    %c0_1 = arith.constant 0 : index
    %3 = vector.load %arg3[%c0, %c0_1] : memref<128x512xbf16, #tpu.memory_space<vmem>>, vector<128x512xbf16>
    %c0_2 = arith.constant 0 : index
    %c0_3 = arith.constant 0 : index
    %4 = vector.load %arg5[%c0_2, %c0_3] : memref<16x128xf32, #tpu.memory_space<vmem>>, vector<16x128xf32>
    %c0_4 = arith.constant 0 : index
    %c0_5 = arith.constant 0 : index
    %5 = vector.load %arg6[%c0_4, %c0_5] : memref<16x128xf32, #tpu.memory_space<vmem>>, vector<16x128xf32>
    %c0_i32_6 = arith.constant 0 : i32
    %6 = arith.index_cast %c0_i32_6 : i32 to index
    %c0_7 = arith.constant 0 : index
    %c0_8 = arith.constant 0 : index
    %7 = vector.load %arg2[%6, %c0_7, %c0_8] : memref<8x16x512xbf16, #tpu.memory_space<vmem>>, vector<1x16x512xbf16>
    %8 = vector.shape_cast %7 : vector<1x16x512xbf16> to vector<16x512xbf16>
    %9 = arith.truncf %4 : vector<16x128xf32> to vector<16x128xbf16>
    %cst = arith.constant dense<0.000000e+00> : vector<16x512xf32>
    %10 = tpu.matmul %9, %3, %cst {dimension_numbers = #tpu.dot_dimension_numbers<[1], [0], [0], [1], [0, 0, 1, 1], [], []>} : vector<16x128xbf16>, vector<128x512xbf16>, vector<16x512xf32> -> vector<16x512xf32>
    %11 = arith.extf %8 : vector<16x512xbf16> to vector<16x512xf32>
    %12 = arith.addf %11, %10 : vector<16x512xf32>
    %13 = vector.extract_strided_slice %12 {offsets = [0, 0], sizes = [16, 128], strides = [1, 1]} : vector<16x512xf32> to vector<16x128xf32>
    %14 = arith.negf %13 : vector<16x128xf32>
    %15 = math.exp %14 : vector<16x128xf32>
    %cst_9 = arith.constant 1.000000e+00 : f32
    %16 = vector.broadcast %cst_9 : f32 to vector<16x128xf32>
    %17 = arith.addf %16, %15 : vector<16x128xf32>
    %18 = arith.divf %16, %17 : vector<16x128xf32>
    %19 = vector.extract_strided_slice %12 {offsets = [0, 128], sizes = [16, 128], strides = [1, 1]} : vector<16x512xf32> to vector<16x128xf32>
    %20 = arith.negf %19 : vector<16x128xf32>
    %21 = math.exp %20 : vector<16x128xf32>
    %cst_10 = arith.constant 1.000000e+00 : f32
    %22 = vector.broadcast %cst_10 : f32 to vector<16x128xf32>
    %23 = arith.addf %22, %21 : vector<16x128xf32>
    %24 = arith.divf %22, %23 : vector<16x128xf32>
    %25 = vector.extract_strided_slice %12 {offsets = [0, 256], sizes = [16, 128], strides = [1, 1]} : vector<16x512xf32> to vector<16x128xf32>
    %26 = math.tanh %25 : vector<16x128xf32>
    %27 = vector.extract_strided_slice %12 {offsets = [0, 384], sizes = [16, 128], strides = [1, 1]} : vector<16x512xf32> to vector<16x128xf32>
    %28 = arith.negf %27 : vector<16x128xf32>
    %29 = math.exp %28 : vector<16x128xf32>
    %cst_11 = arith.constant 1.000000e+00 : f32
    %30 = vector.broadcast %cst_11 : f32 to vector<16x128xf32>
    %31 = arith.addf %30, %29 : vector<16x128xf32>
    %32 = arith.divf %30, %31 : vector<16x128xf32>
    %33 = arith.mulf %24, %5 : vector<16x128xf32>
    %34 = arith.mulf %18, %26 : vector<16x128xf32>
    %35 = arith.addf %33, %34 : vector<16x128xf32>
    %36 = math.tanh %35 : vector<16x128xf32>
    %37 = arith.mulf %32, %36 : vector<16x128xf32>
    %38 = arith.truncf %37 : vector<16x128xf32> to vector<16x128xbf16>
    %39 = arith.index_cast %c0_i32_6 : i32 to index
    %c0_12 = arith.constant 0 : index
    %c0_13 = arith.constant 0 : index
    %40 = vector.load %arg4[%39, %c0_12, %c0_13] : memref<8x16x128xbf16, #tpu.memory_space<vmem>>, vector<1x16x128xbf16>
    %41 = vector.shape_cast %40 : vector<1x16x128xbf16> to vector<16x128xbf16>
    %42 = vector.shape_cast %38 : vector<16x128xbf16> to vector<1x16x128xbf16>
    tpu.vector_store %arg4[%39, %c0_12, %c0_13], %42 {strides = array<i32>} : memref<8x16x128xbf16, #tpu.memory_space<vmem>>, vector<1x16x128xbf16>,
    %c1_i32 = arith.constant 1 : i32
    %43 = arith.index_cast %c1_i32 : i32 to index
    %c0_14 = arith.constant 0 : index
    %c0_15 = arith.constant 0 : index
    %44 = vector.load %arg2[%43, %c0_14, %c0_15] : memref<8x16x512xbf16, #tpu.memory_space<vmem>>, vector<1x16x512xbf16>
    %45 = vector.shape_cast %44 : vector<1x16x512xbf16> to vector<16x512xbf16>
    %46 = arith.truncf %37 : vector<16x128xf32> to vector<16x128xbf16>
    %cst_16 = arith.constant dense<0.000000e+00> : vector<16x512xf32>
    %47 = tpu.matmul %46, %3, %cst_16 {dimension_numbers = #tpu.dot_dimension_numbers<[1], [0], [0], [1], [0, 0, 1, 1], [], []>} : vector<16x128xbf16>, vector<128x512xbf16>, vector<16x512xf32> -> vector<16x512xf32>
    %48 = arith.extf %45 : vector<16x512xbf16> to vector<16x512xf32>
    %49 = arith.addf %48, %47 : vector<16x512xf32>
    %50 = vector.extract_strided_slice %49 {offsets = [0, 0], sizes = [16, 128], strides = [1, 1]} : vector<16x512xf32> to vector<16x128xf32>
    %51 = arith.negf %50 : vector<16x128xf32>
    %52 = math.exp %51 : vector<16x128xf32>
    %cst_17 = arith.constant 1.000000e+00 : f32
    %53 = vector.broadcast %cst_17 : f32 to vector<16x128xf32>
    %54 = arith.addf %53, %52 : vector<16x128xf32>
    %55 = arith.divf %53, %54 : vector<16x128xf32>
    %56 = vector.extract_strided_slice %49 {offsets = [0, 128], sizes = [16, 128], strides = [1, 1]} : vector<16x512xf32> to vector<16x128xf32>
    %57 = arith.negf %56 : vector<16x128xf32>
    %58 = math.exp %57 : vector<16x128xf32>
    %cst_18 = arith.constant 1.000000e+00 : f32
    %59 = vector.broadcast %cst_18 : f32 to vector<16x128xf32>
    %60 = arith.addf %59, %58 : vector<16x128xf32>
    %61 = arith.divf %59, %60 : vector<16x128xf32>
    %62 = vector.extract_strided_slice %49 {offsets = [0, 256], sizes = [16, 128], strides = [1, 1]} : vector<16x512xf32> to vector<16x128xf32>
    %63 = math.tanh %62 : vector<16x128xf32>
    %64 = vector.extract_strided_slice %49 {offsets = [0, 384], sizes = [16, 128], strides = [1, 1]} : vector<16x512xf32> to vector<16x128xf32>
    %65 = arith.negf %64 : vector<16x128xf32>
    %66 = math.exp %65 : vector<16x128xf32>
    %cst_19 = arith.constant 1.000000e+00 : f32
    %67 = vector.broadcast %cst_19 : f32 to vector<16x128xf32>
    %68 = arith.addf %67, %66 : vector<16x128xf32>
    %69 = arith.divf %67, %68 : vector<16x128xf32>
    %70 = arith.mulf %61, %35 : vector<16x128xf32>
    %71 = arith.mulf %55, %63 : vector<16x128xf32>
    %72 = arith.addf %70, %71 : vector<16x128xf32>
    %73 = math.tanh %72 : vector<16x128xf32>
    %74 = arith.mulf %69, %73 : vector<16x128xf32>
    %75 = arith.truncf %74 : vector<16x128xf32> to vector<16x128xbf16>
    %76 = arith.index_cast %c1_i32 : i32 to index
    %c0_20 = arith.constant 0 : index
    %c0_21 = arith.constant 0 : index
    %77 = vector.load %arg4[%76, %c0_20, %c0_21] : memref<8x16x128xbf16, #tpu.memory_space<vmem>>, vector<1x16x128xbf16>
    %78 = vector.shape_cast %77 : vector<1x16x128xbf16> to vector<16x128xbf16>
    %79 = vector.shape_cast %75 : vector<16x128xbf16> to vector<1x16x128xbf16>
    tpu.vector_store %arg4[%76, %c0_20, %c0_21], %79 {strides = array<i32>} : memref<8x16x128xbf16, #tpu.memory_space<vmem>>, vector<1x16x128xbf16>,
    %c2_i32 = arith.constant 2 : i32
    %80 = arith.index_cast %c2_i32 : i32 to index
    %c0_22 = arith.constant 0 : index
    %c0_23 = arith.constant 0 : index
    %81 = vector.load %arg2[%80, %c0_22, %c0_23] : memref<8x16x512xbf16, #tpu.memory_space<vmem>>, vector<1x16x512xbf16>
    %82 = vector.shape_cast %81 : vector<1x16x512xbf16> to vector<16x512xbf16>
    %83 = arith.truncf %74 : vector<16x128xf32> to vector<16x128xbf16>
    %cst_24 = arith.constant dense<0.000000e+00> : vector<16x512xf32>
    %84 = tpu.matmul %83, %3, %cst_24 {dimension_numbers = #tpu.dot_dimension_numbers<[1], [0], [0], [1], [0, 0, 1, 1], [], []>} : vector<16x128xbf16>, vector<128x512xbf16>, vector<16x512xf32> -> vector<16x512xf32>
    %85 = arith.extf %82 : vector<16x512xbf16> to vector<16x512xf32>
    %86 = arith.addf %85, %84 : vector<16x512xf32>
    %87 = vector.extract_strided_slice %86 {offsets = [0, 0], sizes = [16, 128], strides = [1, 1]} : vector<16x512xf32> to vector<16x128xf32>
    %88 = arith.negf %87 : vector<16x128xf32>
    %89 = math.exp %88 : vector<16x128xf32>
    %cst_25 = arith.constant 1.000000e+00 : f32
    %90 = vector.broadcast %cst_25 : f32 to vector<16x128xf32>
    %91 = arith.addf %90, %89 : vector<16x128xf32>
    %92 = arith.divf %90, %91 : vector<16x128xf32>
    %93 = vector.extract_strided_slice %86 {offsets = [0, 128], sizes = [16, 128], strides = [1, 1]} : vector<16x512xf32> to vector<16x128xf32>
    %94 = arith.negf %93 : vector<16x128xf32>
    %95 = math.exp %94 : vector<16x128xf32>
    %cst_26 = arith.constant 1.000000e+00 : f32
    %96 = vector.broadcast %cst_26 : f32 to vector<16x128xf32>
    %97 = arith.addf %96, %95 : vector<16x128xf32>
    %98 = arith.divf %96, %97 : vector<16x128xf32>
    %99 = vector.extract_strided_slice %86 {offsets = [0, 256], sizes = [16, 128], strides = [1, 1]} : vector<16x512xf32> to vector<16x128xf32>
    %100 = math.tanh %99 : vector<16x128xf32>
    %101 = vector.extract_strided_slice %86 {offsets = [0, 384], sizes = [16, 128], strides = [1, 1]} : vector<16x512xf32> to vector<16x128xf32>
    %102 = arith.negf %101 : vector<16x128xf32>
    %103 = math.exp %102 : vector<16x128xf32>
    %cst_27 = arith.constant 1.000000e+00 : f32
    %104 = vector.broadcast %cst_27 : f32 to vector<16x128xf32>
    %105 = arith.addf %104, %103 : vector<16x128xf32>
    %106 = arith.divf %104, %105 : vector<16x128xf32>
    %107 = arith.mulf %98, %72 : vector<16x128xf32>
    %108 = arith.mulf %92, %100 : vector<16x128xf32>
    %109 = arith.addf %107, %108 : vector<16x128xf32>
    %110 = math.tanh %109 : vector<16x128xf32>
    %111 = arith.mulf %106, %110 : vector<16x128xf32>
    %112 = arith.truncf %111 : vector<16x128xf32> to vector<16x128xbf16>
    %113 = arith.index_cast %c2_i32 : i32 to index
    %c0_28 = arith.constant 0 : index
    %c0_29 = arith.constant 0 : index
    %114 = vector.load %arg4[%113, %c0_28, %c0_29] : memref<8x16x128xbf16, #tpu.memory_space<vmem>>, vector<1x16x128xbf16>
    %115 = vector.shape_cast %114 : vector<1x16x128xbf16> to vector<16x128xbf16>
    %116 = vector.shape_cast %112 : vector<16x128xbf16> to vector<1x16x128xbf16>
    tpu.vector_store %arg4[%113, %c0_28, %c0_29], %116 {strides = array<i32>} : memref<8x16x128xbf16, #tpu.memory_space<vmem>>, vector<1x16x128xbf16>,
    %c3_i32 = arith.constant 3 : i32
    %117 = arith.index_cast %c3_i32 : i32 to index
    %c0_30 = arith.constant 0 : index
    %c0_31 = arith.constant 0 : index
    %118 = vector.load %arg2[%117, %c0_30, %c0_31] : memref<8x16x512xbf16, #tpu.memory_space<vmem>>, vector<1x16x512xbf16>
    %119 = vector.shape_cast %118 : vector<1x16x512xbf16> to vector<16x512xbf16>
    %120 = arith.truncf %111 : vector<16x128xf32> to vector<16x128xbf16>
    %cst_32 = arith.constant dense<0.000000e+00> : vector<16x512xf32>
    %121 = tpu.matmul %120, %3, %cst_32 {dimension_numbers = #tpu.dot_dimension_numbers<[1], [0], [0], [1], [0, 0, 1, 1], [], []>} : vector<16x128xbf16>, vector<128x512xbf16>, vector<16x512xf32> -> vector<16x512xf32>
    %122 = arith.extf %119 : vector<16x512xbf16> to vector<16x512xf32>
    %123 = arith.addf %122, %121 : vector<16x512xf32>
    %124 = vector.extract_strided_slice %123 {offsets = [0, 0], sizes = [16, 128], strides = [1, 1]} : vector<16x512xf32> to vector<16x128xf32>
    %125 = arith.negf %124 : vector<16x128xf32>
    %126 = math.exp %125 : vector<16x128xf32>
    %cst_33 = arith.constant 1.000000e+00 : f32
    %127 = vector.broadcast %cst_33 : f32 to vector<16x128xf32>
    %128 = arith.addf %127, %126 : vector<16x128xf32>
    %129 = arith.divf %127, %128 : vector<16x128xf32>
    %130 = vector.extract_strided_slice %123 {offsets = [0, 128], sizes = [16, 128], strides = [1, 1]} : vector<16x512xf32> to vector<16x128xf32>
    %131 = arith.negf %130 : vector<16x128xf32>
    %132 = math.exp %131 : vector<16x128xf32>
    %cst_34 = arith.constant 1.000000e+00 : f32
    %133 = vector.broadcast %cst_34 : f32 to vector<16x128xf32>
    %134 = arith.addf %133, %132 : vector<16x128xf32>
    %135 = arith.divf %133, %134 : vector<16x128xf32>
    %136 = vector.extract_strided_slice %123 {offsets = [0, 256], sizes = [16, 128], strides = [1, 1]} : vector<16x512xf32> to vector<16x128xf32>
    %137 = math.tanh %136 : vector<16x128xf32>
    %138 = vector.extract_strided_slice %123 {offsets = [0, 384], sizes = [16, 128], strides = [1, 1]} : vector<16x512xf32> to vector<16x128xf32>
    %139 = arith.negf %138 : vector<16x128xf32>
    %140 = math.exp %139 : vector<16x128xf32>
    %cst_35 = arith.constant 1.000000e+00 : f32
    %141 = vector.broadcast %cst_35 : f32 to vector<16x128xf32>
    %142 = arith.addf %141, %140 : vector<16x128xf32>
    %143 = arith.divf %141, %142 : vector<16x128xf32>
    %144 = arith.mulf %135, %109 : vector<16x128xf32>
    %145 = arith.mulf %129, %137 : vector<16x128xf32>
    %146 = arith.addf %144, %145 : vector<16x128xf32>
    %147 = math.tanh %146 : vector<16x128xf32>
    %148 = arith.mulf %143, %147 : vector<16x128xf32>
    %149 = arith.truncf %148 : vector<16x128xf32> to vector<16x128xbf16>
    %150 = arith.index_cast %c3_i32 : i32 to index
    %c0_36 = arith.constant 0 : index
    %c0_37 = arith.constant 0 : index
    %151 = vector.load %arg4[%150, %c0_36, %c0_37] : memref<8x16x128xbf16, #tpu.memory_space<vmem>>, vector<1x16x128xbf16>
    %152 = vector.shape_cast %151 : vector<1x16x128xbf16> to vector<16x128xbf16>
    %153 = vector.shape_cast %149 : vector<16x128xbf16> to vector<1x16x128xbf16>
    tpu.vector_store %arg4[%150, %c0_36, %c0_37], %153 {strides = array<i32>} : memref<8x16x128xbf16, #tpu.memory_space<vmem>>, vector<1x16x128xbf16>,
    %c4_i32 = arith.constant 4 : i32
    %154 = arith.index_cast %c4_i32 : i32 to index
    %c0_38 = arith.constant 0 : index
    %c0_39 = arith.constant 0 : index
    %155 = vector.load %arg2[%154, %c0_38, %c0_39] : memref<8x16x512xbf16, #tpu.memory_space<vmem>>, vector<1x16x512xbf16>
    %156 = vector.shape_cast %155 : vector<1x16x512xbf16> to vector<16x512xbf16>
    %157 = arith.truncf %148 : vector<16x128xf32> to vector<16x128xbf16>
    %cst_40 = arith.constant dense<0.000000e+00> : vector<16x512xf32>
    %158 = tpu.matmul %157, %3, %cst_40 {dimension_numbers = #tpu.dot_dimension_numbers<[1], [0], [0], [1], [0, 0, 1, 1], [], []>} : vector<16x128xbf16>, vector<128x512xbf16>, vector<16x512xf32> -> vector<16x512xf32>
    %159 = arith.extf %156 : vector<16x512xbf16> to vector<16x512xf32>
    %160 = arith.addf %159, %158 : vector<16x512xf32>
    %161 = vector.extract_strided_slice %160 {offsets = [0, 0], sizes = [16, 128], strides = [1, 1]} : vector<16x512xf32> to vector<16x128xf32>
    %162 = arith.negf %161 : vector<16x128xf32>
    %163 = math.exp %162 : vector<16x128xf32>
    %cst_41 = arith.constant 1.000000e+00 : f32
    %164 = vector.broadcast %cst_41 : f32 to vector<16x128xf32>
    %165 = arith.addf %164, %163 : vector<16x128xf32>
    %166 = arith.divf %164, %165 : vector<16x128xf32>
    %167 = vector.extract_strided_slice %160 {offsets = [0, 128], sizes = [16, 128], strides = [1, 1]} : vector<16x512xf32> to vector<16x128xf32>
    %168 = arith.negf %167 : vector<16x128xf32>
    %169 = math.exp %168 : vector<16x128xf32>
    %cst_42 = arith.constant 1.000000e+00 : f32
    %170 = vector.broadcast %cst_42 : f32 to vector<16x128xf32>
    %171 = arith.addf %170, %169 : vector<16x128xf32>
    %172 = arith.divf %170, %171 : vector<16x128xf32>
    %173 = vector.extract_strided_slice %160 {offsets = [0, 256], sizes = [16, 128], strides = [1, 1]} : vector<16x512xf32> to vector<16x128xf32>
    %174 = math.tanh %173 : vector<16x128xf32>
    %175 = vector.extract_strided_slice %160 {offsets = [0, 384], sizes = [16, 128], strides = [1, 1]} : vector<16x512xf32> to vector<16x128xf32>
    %176 = arith.negf %175 : vector<16x128xf32>
    %177 = math.exp %176 : vector<16x128xf32>
    %cst_43 = arith.constant 1.000000e+00 : f32
    %178 = vector.broadcast %cst_43 : f32 to vector<16x128xf32>
    %179 = arith.addf %178, %177 : vector<16x128xf32>
    %180 = arith.divf %178, %179 : vector<16x128xf32>
    %181 = arith.mulf %172, %146 : vector<16x128xf32>
    %182 = arith.mulf %166, %174 : vector<16x128xf32>
    %183 = arith.addf %181, %182 : vector<16x128xf32>
    %184 = math.tanh %183 : vector<16x128xf32>
    %185 = arith.mulf %180, %184 : vector<16x128xf32>
    %186 = arith.truncf %185 : vector<16x128xf32> to vector<16x128xbf16>
    %187 = arith.index_cast %c4_i32 : i32 to index
    %c0_44 = arith.constant 0 : index
    %c0_45 = arith.constant 0 : index
    %188 = vector.load %arg4[%187, %c0_44, %c0_45] : memref<8x16x128xbf16, #tpu.memory_space<vmem>>, vector<1x16x128xbf16>
    %189 = vector.shape_cast %188 : vector<1x16x128xbf16> to vector<16x128xbf16>
    %190 = vector.shape_cast %186 : vector<16x128xbf16> to vector<1x16x128xbf16>
    tpu.vector_store %arg4[%187, %c0_44, %c0_45], %190 {strides = array<i32>} : memref<8x16x128xbf16, #tpu.memory_space<vmem>>, vector<1x16x128xbf16>,
    %c5_i32 = arith.constant 5 : i32
    %191 = arith.index_cast %c5_i32 : i32 to index
    %c0_46 = arith.constant 0 : index
    %c0_47 = arith.constant 0 : index
    %192 = vector.load %arg2[%191, %c0_46, %c0_47] : memref<8x16x512xbf16, #tpu.memory_space<vmem>>, vector<1x16x512xbf16>
    %193 = vector.shape_cast %192 : vector<1x16x512xbf16> to vector<16x512xbf16>
    %194 = arith.truncf %185 : vector<16x128xf32> to vector<16x128xbf16>
    %cst_48 = arith.constant dense<0.000000e+00> : vector<16x512xf32>
    %195 = tpu.matmul %194, %3, %cst_48 {dimension_numbers = #tpu.dot_dimension_numbers<[1], [0], [0], [1], [0, 0, 1, 1], [], []>} : vector<16x128xbf16>, vector<128x512xbf16>, vector<16x512xf32> -> vector<16x512xf32>
    %196 = arith.extf %193 : vector<16x512xbf16> to vector<16x512xf32>
    %197 = arith.addf %196, %195 : vector<16x512xf32>
    %198 = vector.extract_strided_slice %197 {offsets = [0, 0], sizes = [16, 128], strides = [1, 1]} : vector<16x512xf32> to vector<16x128xf32>
    %199 = arith.negf %198 : vector<16x128xf32>
    %200 = math.exp %199 : vector<16x128xf32>
    %cst_49 = arith.constant 1.000000e+00 : f32
    %201 = vector.broadcast %cst_49 : f32 to vector<16x128xf32>
    %202 = arith.addf %201, %200 : vector<16x128xf32>
    %203 = arith.divf %201, %202 : vector<16x128xf32>
    %204 = vector.extract_strided_slice %197 {offsets = [0, 128], sizes = [16, 128], strides = [1, 1]} : vector<16x512xf32> to vector<16x128xf32>
    %205 = arith.negf %204 : vector<16x128xf32>
    %206 = math.exp %205 : vector<16x128xf32>
    %cst_50 = arith.constant 1.000000e+00 : f32
    %207 = vector.broadcast %cst_50 : f32 to vector<16x128xf32>
    %208 = arith.addf %207, %206 : vector<16x128xf32>
    %209 = arith.divf %207, %208 : vector<16x128xf32>
    %210 = vector.extract_strided_slice %197 {offsets = [0, 256], sizes = [16, 128], strides = [1, 1]} : vector<16x512xf32> to vector<16x128xf32>
    %211 = math.tanh %210 : vector<16x128xf32>
    %212 = vector.extract_strided_slice %197 {offsets = [0, 384], sizes = [16, 128], strides = [1, 1]} : vector<16x512xf32> to vector<16x128xf32>
    %213 = arith.negf %212 : vector<16x128xf32>
    %214 = math.exp %213 : vector<16x128xf32>
    %cst_51 = arith.constant 1.000000e+00 : f32
    %215 = vector.broadcast %cst_51 : f32 to vector<16x128xf32>
    %216 = arith.addf %215, %214 : vector<16x128xf32>
    %217 = arith.divf %215, %216 : vector<16x128xf32>
    %218 = arith.mulf %209, %183 : vector<16x128xf32>
    %219 = arith.mulf %203, %211 : vector<16x128xf32>
    %220 = arith.addf %218, %219 : vector<16x128xf32>
    %221 = math.tanh %220 : vector<16x128xf32>
    %222 = arith.mulf %217, %221 : vector<16x128xf32>
    %223 = arith.truncf %222 : vector<16x128xf32> to vector<16x128xbf16>
    %224 = arith.index_cast %c5_i32 : i32 to index
    %c0_52 = arith.constant 0 : index
    %c0_53 = arith.constant 0 : index
    %225 = vector.load %arg4[%224, %c0_52, %c0_53] : memref<8x16x128xbf16, #tpu.memory_space<vmem>>, vector<1x16x128xbf16>
    %226 = vector.shape_cast %225 : vector<1x16x128xbf16> to vector<16x128xbf16>
    %227 = vector.shape_cast %223 : vector<16x128xbf16> to vector<1x16x128xbf16>
    tpu.vector_store %arg4[%224, %c0_52, %c0_53], %227 {strides = array<i32>} : memref<8x16x128xbf16, #tpu.memory_space<vmem>>, vector<1x16x128xbf16>,
    %c6_i32 = arith.constant 6 : i32
    %228 = arith.index_cast %c6_i32 : i32 to index
    %c0_54 = arith.constant 0 : index
    %c0_55 = arith.constant 0 : index
    %229 = vector.load %arg2[%228, %c0_54, %c0_55] : memref<8x16x512xbf16, #tpu.memory_space<vmem>>, vector<1x16x512xbf16>
    %230 = vector.shape_cast %229 : vector<1x16x512xbf16> to vector<16x512xbf16>
    %231 = arith.truncf %222 : vector<16x128xf32> to vector<16x128xbf16>
    %cst_56 = arith.constant dense<0.000000e+00> : vector<16x512xf32>
    %232 = tpu.matmul %231, %3, %cst_56 {dimension_numbers = #tpu.dot_dimension_numbers<[1], [0], [0], [1], [0, 0, 1, 1], [], []>} : vector<16x128xbf16>, vector<128x512xbf16>, vector<16x512xf32> -> vector<16x512xf32>
    %233 = arith.extf %230 : vector<16x512xbf16> to vector<16x512xf32>
    %234 = arith.addf %233, %232 : vector<16x512xf32>
    %235 = vector.extract_strided_slice %234 {offsets = [0, 0], sizes = [16, 128], strides = [1, 1]} : vector<16x512xf32> to vector<16x128xf32>
    %236 = arith.negf %235 : vector<16x128xf32>
    %237 = math.exp %236 : vector<16x128xf32>
    %cst_57 = arith.constant 1.000000e+00 : f32
    %238 = vector.broadcast %cst_57 : f32 to vector<16x128xf32>
    %239 = arith.addf %238, %237 : vector<16x128xf32>
    %240 = arith.divf %238, %239 : vector<16x128xf32>
    %241 = vector.extract_strided_slice %234 {offsets = [0, 128], sizes = [16, 128], strides = [1, 1]} : vector<16x512xf32> to vector<16x128xf32>
    %242 = arith.negf %241 : vector<16x128xf32>
    %243 = math.exp %242 : vector<16x128xf32>
    %cst_58 = arith.constant 1.000000e+00 : f32
    %244 = vector.broadcast %cst_58 : f32 to vector<16x128xf32>
    %245 = arith.addf %244, %243 : vector<16x128xf32>
    %246 = arith.divf %244, %245 : vector<16x128xf32>
    %247 = vector.extract_strided_slice %234 {offsets = [0, 256], sizes = [16, 128], strides = [1, 1]} : vector<16x512xf32> to vector<16x128xf32>
    %248 = math.tanh %247 : vector<16x128xf32>
    %249 = vector.extract_strided_slice %234 {offsets = [0, 384], sizes = [16, 128], strides = [1, 1]} : vector<16x512xf32> to vector<16x128xf32>
    %250 = arith.negf %249 : vector<16x128xf32>
    %251 = math.exp %250 : vector<16x128xf32>
    %cst_59 = arith.constant 1.000000e+00 : f32
    %252 = vector.broadcast %cst_59 : f32 to vector<16x128xf32>
    %253 = arith.addf %252, %251 : vector<16x128xf32>
    %254 = arith.divf %252, %253 : vector<16x128xf32>
    %255 = arith.mulf %246, %220 : vector<16x128xf32>
    %256 = arith.mulf %240, %248 : vector<16x128xf32>
    %257 = arith.addf %255, %256 : vector<16x128xf32>
    %258 = math.tanh %257 : vector<16x128xf32>
    %259 = arith.mulf %254, %258 : vector<16x128xf32>
    %260 = arith.truncf %259 : vector<16x128xf32> to vector<16x128xbf16>
    %261 = arith.index_cast %c6_i32 : i32 to index
    %c0_60 = arith.constant 0 : index
    %c0_61 = arith.constant 0 : index
    %262 = vector.load %arg4[%261, %c0_60, %c0_61] : memref<8x16x128xbf16, #tpu.memory_space<vmem>>, vector<1x16x128xbf16>
    %263 = vector.shape_cast %262 : vector<1x16x128xbf16> to vector<16x128xbf16>
    %264 = vector.shape_cast %260 : vector<16x128xbf16> to vector<1x16x128xbf16>
    tpu.vector_store %arg4[%261, %c0_60, %c0_61], %264 {strides = array<i32>} : memref<8x16x128xbf16, #tpu.memory_space<vmem>>, vector<1x16x128xbf16>,
    %c7_i32 = arith.constant 7 : i32
    %265 = arith.index_cast %c7_i32 : i32 to index
    %c0_62 = arith.constant 0 : index
    %c0_63 = arith.constant 0 : index
    %266 = vector.load %arg2[%265, %c0_62, %c0_63] : memref<8x16x512xbf16, #tpu.memory_space<vmem>>, vector<1x16x512xbf16>
    %267 = vector.shape_cast %266 : vector<1x16x512xbf16> to vector<16x512xbf16>
    %268 = arith.truncf %259 : vector<16x128xf32> to vector<16x128xbf16>
    %cst_64 = arith.constant dense<0.000000e+00> : vector<16x512xf32>
    %269 = tpu.matmul %268, %3, %cst_64 {dimension_numbers = #tpu.dot_dimension_numbers<[1], [0], [0], [1], [0, 0, 1, 1], [], []>} : vector<16x128xbf16>, vector<128x512xbf16>, vector<16x512xf32> -> vector<16x512xf32>
    %270 = arith.extf %267 : vector<16x512xbf16> to vector<16x512xf32>
    %271 = arith.addf %270, %269 : vector<16x512xf32>
    %272 = vector.extract_strided_slice %271 {offsets = [0, 0], sizes = [16, 128], strides = [1, 1]} : vector<16x512xf32> to vector<16x128xf32>
    %273 = arith.negf %272 : vector<16x128xf32>
    %274 = math.exp %273 : vector<16x128xf32>
    %cst_65 = arith.constant 1.000000e+00 : f32
    %275 = vector.broadcast %cst_65 : f32 to vector<16x128xf32>
    %276 = arith.addf %275, %274 : vector<16x128xf32>
    %277 = arith.divf %275, %276 : vector<16x128xf32>
    %278 = vector.extract_strided_slice %271 {offsets = [0, 128], sizes = [16, 128], strides = [1, 1]} : vector<16x512xf32> to vector<16x128xf32>
    %279 = arith.negf %278 : vector<16x128xf32>
    %280 = math.exp %279 : vector<16x128xf32>
    %cst_66 = arith.constant 1.000000e+00 : f32
    %281 = vector.broadcast %cst_66 : f32 to vector<16x128xf32>
    %282 = arith.addf %281, %280 : vector<16x128xf32>
    %283 = arith.divf %281, %282 : vector<16x128xf32>
    %284 = vector.extract_strided_slice %271 {offsets = [0, 256], sizes = [16, 128], strides = [1, 1]} : vector<16x512xf32> to vector<16x128xf32>
    %285 = math.tanh %284 : vector<16x128xf32>
    %286 = vector.extract_strided_slice %271 {offsets = [0, 384], sizes = [16, 128], strides = [1, 1]} : vector<16x512xf32> to vector<16x128xf32>
    %287 = arith.negf %286 : vector<16x128xf32>
    %288 = math.exp %287 : vector<16x128xf32>
    %cst_67 = arith.constant 1.000000e+00 : f32
    %289 = vector.broadcast %cst_67 : f32 to vector<16x128xf32>
    %290 = arith.addf %289, %288 : vector<16x128xf32>
    %291 = arith.divf %289, %290 : vector<16x128xf32>
    %292 = arith.mulf %283, %257 : vector<16x128xf32>
    %293 = arith.mulf %277, %285 : vector<16x128xf32>
    %294 = arith.addf %292, %293 : vector<16x128xf32>
    %295 = math.tanh %294 : vector<16x128xf32>
    %296 = arith.mulf %291, %295 : vector<16x128xf32>
    %297 = arith.truncf %296 : vector<16x128xf32> to vector<16x128xbf16>
    %298 = arith.index_cast %c7_i32 : i32 to index
    %c0_68 = arith.constant 0 : index
    %c0_69 = arith.constant 0 : index
    %299 = vector.load %arg4[%298, %c0_68, %c0_69] : memref<8x16x128xbf16, #tpu.memory_space<vmem>>, vector<1x16x128xbf16>
    %300 = vector.shape_cast %299 : vector<1x16x128xbf16> to vector<16x128xbf16>
    %301 = vector.shape_cast %297 : vector<16x128xbf16> to vector<1x16x128xbf16>
    tpu.vector_store %arg4[%298, %c0_68, %c0_69], %301 {strides = array<i32>} : memref<8x16x128xbf16, #tpu.memory_space<vmem>>, vector<1x16x128xbf16>,
    %c8_i32 = arith.constant 8 : i32
    %c0_70 = arith.constant 0 : index
    %c0_71 = arith.constant 0 : index
    %302 = vector.load %arg5[%c0_70, %c0_71] : memref<16x128xf32, #tpu.memory_space<vmem>>, vector<16x128xf32>
    tpu.vector_store %arg5[%c0_70, %c0_71], %296 {strides = array<i32>} : memref<16x128xf32, #tpu.memory_space<vmem>>, vector<16x128xf32>,
    %c0_72 = arith.constant 0 : index
    %c0_73 = arith.constant 0 : index
    %303 = vector.load %arg6[%c0_72, %c0_73] : memref<16x128xf32, #tpu.memory_space<vmem>>, vector<16x128xf32>
    tpu.vector_store %arg6[%c0_72, %c0_73], %294 {strides = array<i32>} : memref<16x128xf32, #tpu.memory_space<vmem>>, vector<16x128xf32>,
    return
  }
  func.func @transform_0(%arg0: i32, %arg1: i32) -> (i32, i32, i32) {
    %c0_i32 = arith.constant 0 : i32
    %c0_i32_0 = arith.constant 0 : i32
    return %arg1, %arg0, %c0_i32 : i32, i32, i32
  }
  func.func @transform_1(%arg0: i32, %arg1: i32) -> (i32, i32) {
    %c0_i32 = arith.constant 0 : i32
    %c0_i32_0 = arith.constant 0 : i32
    %c0_i32_1 = arith.constant 0 : i32
    return %c0_i32, %c0_i32_0 : i32, i32
  }
  func.func @transform_2(%arg0: i32, %arg1: i32) -> (i32, i32, i32) {
    %c0_i32 = arith.constant 0 : i32
    %c0_i32_0 = arith.constant 0 : i32
    return %arg1, %arg0, %c0_i32 : i32, i32, i32
  }
}

module attributes {stable_mosaic.version = 11 : i64} {
  func.func @lstm_rec_kernel(%arg0: i32, %arg1: i32, %arg2: memref<8x16x512xbf16, #tpu.memory_space<vmem>>, %arg3: memref<128x512xbf16, #tpu.memory_space<vmem>>, %arg4: memref<8x16x128xbf16, #tpu.memory_space<vmem>>, %arg5: memref<16x128xf32, #tpu.memory_space<vmem>>, %arg6: memref<16x128xf32, #tpu.memory_space<vmem>>) attributes {dimension_semantics = [#tpu.dimension_semantics<parallel>, #tpu.dimension_semantics<arbitrary>], iteration_bounds = array<i64: 1, 1>, scalar_prefetch = 0 : i64, scratch_operands = 2 : i64, tpu.core_type = #tpu.core_type<tc>, window_params = [{transform_indices = @transform_0, window_bounds = array<i64: 8, 16, 512>}, {pipeline_mode = #tpu.pipeline_mode<synchronous>, transform_indices = @transform_1, window_bounds = array<i64: 128, 512>}, {transform_indices = @transform_2, window_bounds = array<i64: 8, 16, 128>}]} {
    %c0_i32 = arith.constant 0 : i32
    %0 = arith.cmpi eq, %arg1, %c0_i32 : i32
    %1 = arith.extui %0 : i1 to i32
    %c0_i32_0 = arith.constant 0 : i32
    %2 = arith.cmpi ne, %1, %c0_i32_0 : i32
    scf.if %2 {
      %cst_74 = arith.constant 0.000000e+00 : f32
      %304 = vector.broadcast %cst_74 : f32 to vector<16x128xf32>
      %c0_75 = arith.constant 0 : index
      %c0_76 = arith.constant 0 : index
      %305 = vector.load %arg5[%c0_75, %c0_76] : memref<16x128xf32, #tpu.memory_space<vmem>>, vector<16x128xf32>
      tpu.vector_store %arg5[%c0_75, %c0_76], %304 {strides = array<i32>} : memref<16x128xf32, #tpu.memory_space<vmem>>, vector<16x128xf32>,
      %cst_77 = arith.constant 0.000000e+00 : f32
      %306 = vector.broadcast %cst_77 : f32 to vector<16x128xf32>
      %c0_78 = arith.constant 0 : index
      %c0_79 = arith.constant 0 : index
      %307 = vector.load %arg6[%c0_78, %c0_79] : memref<16x128xf32, #tpu.memory_space<vmem>>, vector<16x128xf32>
      tpu.vector_store %arg6[%c0_78, %c0_79], %306 {strides = array<i32>} : memref<16x128xf32, #tpu.memory_space<vmem>>, vector<16x128xf32>,
    } else {
    }
    %c0 = arith.constant 0 : index
    %c0_1 = arith.constant 0 : index
    %3 = vector.load %arg3[%c0, %c0_1] : memref<128x512xbf16, #tpu.memory_space<vmem>>, vector<128x512xbf16>
    %c0_2 = arith.constant 0 : index
    %c0_3 = arith.constant 0 : index
    %4 = vector.load %arg5[%c0_2, %c0_3] : memref<16x128xf32, #tpu.memory_space<vmem>>, vector<16x128xf32>
    %c0_4 = arith.constant 0 : index
    %c0_5 = arith.constant 0 : index
    %5 = vector.load %arg6[%c0_4, %c0_5] : memref<16x128xf32, #tpu.memory_space<vmem>>, vector<16x128xf32>
    %c0_i32_6 = arith.constant 0 : i32
    %6 = arith.index_cast %c0_i32_6 : i32 to index
    %c0_7 = arith.constant 0 : index
    %c0_8 = arith.constant 0 : index
    %7 = vector.load %arg2[%6, %c0_7, %c0_8] : memref<8x16x512xbf16, #tpu.memory_space<vmem>>, vector<1x16x512xbf16>
    %8 = vector.shape_cast %7 : vector<1x16x512xbf16> to vector<16x512xbf16>
    %9 = arith.truncf %4 : vector<16x128xf32> to vector<16x128xbf16>
    %cst = arith.constant dense<0.000000e+00> : vector<16x512xf32>
    %10 = tpu.matmul %9, %3, %cst {dimension_numbers = #tpu.dot_dimension_numbers<[1], [0], [0], [1], [0, 0, 1, 1], [], []>} : vector<16x128xbf16>, vector<128x512xbf16>, vector<16x512xf32> -> vector<16x512xf32>
    %11 = arith.extf %8 : vector<16x512xbf16> to vector<16x512xf32>
    %12 = arith.addf %11, %10 : vector<16x512xf32>
    %13 = vector.extract_strided_slice %12 {offsets = [0, 0], sizes = [16, 128], strides = [1, 1]} : vector<16x512xf32> to vector<16x128xf32>
    %14 = arith.negf %13 : vector<16x128xf32>
    %15 = math.exp %14 : vector<16x128xf32>
    %cst_9 = arith.constant 1.000000e+00 : f32
    %16 = vector.broadcast %cst_9 : f32 to vector<16x128xf32>
    %17 = arith.addf %16, %15 : vector<16x128xf32>
    %18 = arith.divf %16, %17 : vector<16x128xf32>
    %19 = vector.extract_strided_slice %12 {offsets = [0, 128], sizes = [16, 128], strides = [1, 1]} : vector<16x512xf32> to vector<16x128xf32>
    %20 = arith.negf %19 : vector<16x128xf32>
    %21 = math.exp %20 : vector<16x128xf32>
    %cst_10 = arith.constant 1.000000e+00 : f32
    %22 = vector.broadcast %cst_10 : f32 to vector<16x128xf32>
    %23 = arith.addf %22, %21 : vector<16x128xf32>
    %24 = arith.divf %22, %23 : vector<16x128xf32>
    %25 = vector.extract_strided_slice %12 {offsets = [0, 256], sizes = [16, 128], strides = [1, 1]} : vector<16x512xf32> to vector<16x128xf32>
    %26 = math.tanh %25 : vector<16x128xf32>
    %27 = vector.extract_strided_slice %12 {offsets = [0, 384], sizes = [16, 128], strides = [1, 1]} : vector<16x512xf32> to vector<16x128xf32>
    %28 = arith.negf %27 : vector<16x128xf32>
    %29 = math.exp %28 : vector<16x128xf32>
    %cst_11 = arith.constant 1.000000e+00 : f32
    %30 = vector.broadcast %cst_11 : f32 to vector<16x128xf32>
    %31 = arith.addf %30, %29 : vector<16x128xf32>
    %32 = arith.divf %30, %31 : vector<16x128xf32>
    %33 = arith.mulf %24, %5 : vector<16x128xf32>
    %34 = arith.mulf %18, %26 : vector<16x128xf32>
    %35 = arith.addf %33, %34 : vector<16x128xf32>
    %36 = math.tanh %35 : vector<16x128xf32>
    %37 = arith.mulf %32, %36 : vector<16x128xf32>
    %38 = arith.truncf %37 : vector<16x128xf32> to vector<16x128xbf16>
    %39 = arith.index_cast %c0_i32_6 : i32 to index
    %c0_12 = arith.constant 0 : index
    %c0_13 = arith.constant 0 : index
    %40 = vector.load %arg4[%39, %c0_12, %c0_13] : memref<8x16x128xbf16, #tpu.memory_space<vmem>>, vector<1x16x128xbf16>
    %41 = vector.shape_cast %40 : vector<1x16x128xbf16> to vector<16x128xbf16>
    %42 = vector.shape_cast %38 : vector<16x128xbf16> to vector<1x16x128xbf16>
    tpu.vector_store %arg4[%39, %c0_12, %c0_13], %42 {strides = array<i32>} : memref<8x16x128xbf16, #tpu.memory_space<vmem>>, vector<1x16x128xbf16>,
    %c1_i32 = arith.constant 1 : i32
    %43 = arith.index_cast %c1_i32 : i32 to index
    %c0_14 = arith.constant 0 : index
    %c0_15 = arith.constant 0 : index
    %44 = vector.load %arg2[%43, %c0_14, %c0_15] : memref<8x16x512xbf16, #tpu.memory_space<vmem>>, vector<1x16x512xbf16>
    %45 = vector.shape_cast %44 : vector<1x16x512xbf16> to vector<16x512xbf16>
    %46 = arith.truncf %37 : vector<16x128xf32> to vector<16x128xbf16>
    %cst_16 = arith.constant dense<0.000000e+00> : vector<16x512xf32>
    %47 = tpu.matmul %46, %3, %cst_16 {dimension_numbers = #tpu.dot_dimension_numbers<[1], [0], [0], [1], [0, 0, 1, 1], [], []>} : vector<16x128xbf16>, vector<128x512xbf16>, vector<16x512xf32> -> vector<16x512xf32>
    %48 = arith.extf %45 : vector<16x512xbf16> to vector<16x512xf32>
    %49 = arith.addf %48, %47 : vector<16x512xf32>
    %50 = vector.extract_strided_slice %49 {offsets = [0, 0], sizes = [16, 128], strides = [1, 1]} : vector<16x512xf32> to vector<16x128xf32>
    %51 = arith.negf %50 : vector<16x128xf32>
    %52 = math.exp %51 : vector<16x128xf32>
    %cst_17 = arith.constant 1.000000e+00 : f32
    %53 = vector.broadcast %cst_17 : f32 to vector<16x128xf32>
    %54 = arith.addf %53, %52 : vector<16x128xf32>
    %55 = arith.divf %53, %54 : vector<16x128xf32>
    %56 = vector.extract_strided_slice %49 {offsets = [0, 128], sizes = [16, 128], strides = [1, 1]} : vector<16x512xf32> to vector<16x128xf32>
    %57 = arith.negf %56 : vector<16x128xf32>
    %58 = math.exp %57 : vector<16x128xf32>
    %cst_18 = arith.constant 1.000000e+00 : f32
    %59 = vector.broadcast %cst_18 : f32 to vector<16x128xf32>
    %60 = arith.addf %59, %58 : vector<16x128xf32>
    %61 = arith.divf %59, %60 : vector<16x128xf32>
    %62 = vector.extract_strided_slice %49 {offsets = [0, 256], sizes = [16, 128], strides = [1, 1]} : vector<16x512xf32> to vector<16x128xf32>
    %63 = math.tanh %62 : vector<16x128xf32>
    %64 = vector.extract_strided_slice %49 {offsets = [0, 384], sizes = [16, 128], strides = [1, 1]} : vector<16x512xf32> to vector<16x128xf32>
    %65 = arith.negf %64 : vector<16x128xf32>
    %66 = math.exp %65 : vector<16x128xf32>
    %cst_19 = arith.constant 1.000000e+00 : f32
    %67 = vector.broadcast %cst_19 : f32 to vector<16x128xf32>
    %68 = arith.addf %67, %66 : vector<16x128xf32>
    %69 = arith.divf %67, %68 : vector<16x128xf32>
    %70 = arith.mulf %61, %35 : vector<16x128xf32>
    %71 = arith.mulf %55, %63 : vector<16x128xf32>
    %72 = arith.addf %70, %71 : vector<16x128xf32>
    %73 = math.tanh %72 : vector<16x128xf32>
    %74 = arith.mulf %69, %73 : vector<16x128xf32>
    %75 = arith.truncf %74 : vector<16x128xf32> to vector<16x128xbf16>
    %76 = arith.index_cast %c1_i32 : i32 to index
    %c0_20 = arith.constant 0 : index
    %c0_21 = arith.constant 0 : index
    %77 = vector.load %arg4[%76, %c0_20, %c0_21] : memref<8x16x128xbf16, #tpu.memory_space<vmem>>, vector<1x16x128xbf16>
    %78 = vector.shape_cast %77 : vector<1x16x128xbf16> to vector<16x128xbf16>
    %79 = vector.shape_cast %75 : vector<16x128xbf16> to vector<1x16x128xbf16>
    tpu.vector_store %arg4[%76, %c0_20, %c0_21], %79 {strides = array<i32>} : memref<8x16x128xbf16, #tpu.memory_space<vmem>>, vector<1x16x128xbf16>,
    %c2_i32 = arith.constant 2 : i32
    %80 = arith.index_cast %c2_i32 : i32 to index
    %c0_22 = arith.constant 0 : index
    %c0_23 = arith.constant 0 : index
    %81 = vector.load %arg2[%80, %c0_22, %c0_23] : memref<8x16x512xbf16, #tpu.memory_space<vmem>>, vector<1x16x512xbf16>
    %82 = vector.shape_cast %81 : vector<1x16x512xbf16> to vector<16x512xbf16>
    %83 = arith.truncf %74 : vector<16x128xf32> to vector<16x128xbf16>
    %cst_24 = arith.constant dense<0.000000e+00> : vector<16x512xf32>
    %84 = tpu.matmul %83, %3, %cst_24 {dimension_numbers = #tpu.dot_dimension_numbers<[1], [0], [0], [1], [0, 0, 1, 1], [], []>} : vector<16x128xbf16>, vector<128x512xbf16>, vector<16x512xf32> -> vector<16x512xf32>
    %85 = arith.extf %82 : vector<16x512xbf16> to vector<16x512xf32>
    %86 = arith.addf %85, %84 : vector<16x512xf32>
    %87 = vector.extract_strided_slice %86 {offsets = [0, 0], sizes = [16, 128], strides = [1, 1]} : vector<16x512xf32> to vector<16x128xf32>
    %88 = arith.negf %87 : vector<16x128xf32>
    %89 = math.exp %88 : vector<16x128xf32>
    %cst_25 = arith.constant 1.000000e+00 : f32
    %90 = vector.broadcast %cst_25 : f32 to vector<16x128xf32>
    %91 = arith.addf %90, %89 : vector<16x128xf32>
    %92 = arith.divf %90, %91 : vector<16x128xf32>
    %93 = vector.extract_strided_slice %86 {offsets = [0, 128], sizes = [16, 128], strides = [1, 1]} : vector<16x512xf32> to vector<16x128xf32>
    %94 = arith.negf %93 : vector<16x128xf32>
    %95 = math.exp %94 : vector<16x128xf32>
    %cst_26 = arith.constant 1.000000e+00 : f32
    %96 = vector.broadcast %cst_26 : f32 to vector<16x128xf32>
    %97 = arith.addf %96, %95 : vector<16x128xf32>
    %98 = arith.divf %96, %97 : vector<16x128xf32>
    %99 = vector.extract_strided_slice %86 {offsets = [0, 256], sizes = [16, 128], strides = [1, 1]} : vector<16x512xf32> to vector<16x128xf32>
    %100 = math.tanh %99 : vector<16x128xf32>
    %101 = vector.extract_strided_slice %86 {offsets = [0, 384], sizes = [16, 128], strides = [1, 1]} : vector<16x512xf32> to vector<16x128xf32>
    %102 = arith.negf %101 : vector<16x128xf32>
    %103 = math.exp %102 : vector<16x128xf32>
    %cst_27 = arith.constant 1.000000e+00 : f32
    %104 = vector.broadcast %cst_27 : f32 to vector<16x128xf32>
    %105 = arith.addf %104, %103 : vector<16x128xf32>
    %106 = arith.divf %104, %105 : vector<16x128xf32>
    %107 = arith.mulf %98, %72 : vector<16x128xf32>
    %108 = arith.mulf %92, %100 : vector<16x128xf32>
    %109 = arith.addf %107, %108 : vector<16x128xf32>
    %110 = math.tanh %109 : vector<16x128xf32>
    %111 = arith.mulf %106, %110 : vector<16x128xf32>
    %112 = arith.truncf %111 : vector<16x128xf32> to vector<16x128xbf16>
    %113 = arith.index_cast %c2_i32 : i32 to index
    %c0_28 = arith.constant 0 : index
    %c0_29 = arith.constant 0 : index
    %114 = vector.load %arg4[%113, %c0_28, %c0_29] : memref<8x16x128xbf16, #tpu.memory_space<vmem>>, vector<1x16x128xbf16>
    %115 = vector.shape_cast %114 : vector<1x16x128xbf16> to vector<16x128xbf16>
    %116 = vector.shape_cast %112 : vector<16x128xbf16> to vector<1x16x128xbf16>
    tpu.vector_store %arg4[%113, %c0_28, %c0_29], %116 {strides = array<i32>} : memref<8x16x128xbf16, #tpu.memory_space<vmem>>, vector<1x16x128xbf16>,
    %c3_i32 = arith.constant 3 : i32
    %117 = arith.index_cast %c3_i32 : i32 to index
    %c0_30 = arith.constant 0 : index
    %c0_31 = arith.constant 0 : index
    %118 = vector.load %arg2[%117, %c0_30, %c0_31] : memref<8x16x512xbf16, #tpu.memory_space<vmem>>, vector<1x16x512xbf16>
    %119 = vector.shape_cast %118 : vector<1x16x512xbf16> to vector<16x512xbf16>
    %120 = arith.truncf %111 : vector<16x128xf32> to vector<16x128xbf16>
    %cst_32 = arith.constant dense<0.000000e+00> : vector<16x512xf32>
    %121 = tpu.matmul %120, %3, %cst_32 {dimension_numbers = #tpu.dot_dimension_numbers<[1], [0], [0], [1], [0, 0, 1, 1], [], []>} : vector<16x128xbf16>, vector<128x512xbf16>, vector<16x512xf32> -> vector<16x512xf32>
    %122 = arith.extf %119 : vector<16x512xbf16> to vector<16x512xf32>
    %123 = arith.addf %122, %121 : vector<16x512xf32>
    %124 = vector.extract_strided_slice %123 {offsets = [0, 0], sizes = [16, 128], strides = [1, 1]} : vector<16x512xf32> to vector<16x128xf32>
    %125 = arith.negf %124 : vector<16x128xf32>
    %126 = math.exp %125 : vector<16x128xf32>
    %cst_33 = arith.constant 1.000000e+00 : f32
    %127 = vector.broadcast %cst_33 : f32 to vector<16x128xf32>
    %128 = arith.addf %127, %126 : vector<16x128xf32>
    %129 = arith.divf %127, %128 : vector<16x128xf32>
    %130 = vector.extract_strided_slice %123 {offsets = [0, 128], sizes = [16, 128], strides = [1, 1]} : vector<16x512xf32> to vector<16x128xf32>
    %131 = arith.negf %130 : vector<16x128xf32>
    %132 = math.exp %131 : vector<16x128xf32>
    %cst_34 = arith.constant 1.000000e+00 : f32
    %133 = vector.broadcast %cst_34 : f32 to vector<16x128xf32>
    %134 = arith.addf %133, %132 : vector<16x128xf32>
    %135 = arith.divf %133, %134 : vector<16x128xf32>
    %136 = vector.extract_strided_slice %123 {offsets = [0, 256], sizes = [16, 128], strides = [1, 1]} : vector<16x512xf32> to vector<16x128xf32>
    %137 = math.tanh %136 : vector<16x128xf32>
    %138 = vector.extract_strided_slice %123 {offsets = [0, 384], sizes = [16, 128], strides = [1, 1]} : vector<16x512xf32> to vector<16x128xf32>
    %139 = arith.negf %138 : vector<16x128xf32>
    %140 = math.exp %139 : vector<16x128xf32>
    %cst_35 = arith.constant 1.000000e+00 : f32
    %141 = vector.broadcast %cst_35 : f32 to vector<16x128xf32>
    %142 = arith.addf %141, %140 : vector<16x128xf32>
    %143 = arith.divf %141, %142 : vector<16x128xf32>
    %144 = arith.mulf %135, %109 : vector<16x128xf32>
    %145 = arith.mulf %129, %137 : vector<16x128xf32>
    %146 = arith.addf %144, %145 : vector<16x128xf32>
    %147 = math.tanh %146 : vector<16x128xf32>
    %148 = arith.mulf %143, %147 : vector<16x128xf32>
    %149 = arith.truncf %148 : vector<16x128xf32> to vector<16x128xbf16>
    %150 = arith.index_cast %c3_i32 : i32 to index
    %c0_36 = arith.constant 0 : index
    %c0_37 = arith.constant 0 : index
    %151 = vector.load %arg4[%150, %c0_36, %c0_37] : memref<8x16x128xbf16, #tpu.memory_space<vmem>>, vector<1x16x128xbf16>
    %152 = vector.shape_cast %151 : vector<1x16x128xbf16> to vector<16x128xbf16>
    %153 = vector.shape_cast %149 : vector<16x128xbf16> to vector<1x16x128xbf16>
    tpu.vector_store %arg4[%150, %c0_36, %c0_37], %153 {strides = array<i32>} : memref<8x16x128xbf16, #tpu.memory_space<vmem>>, vector<1x16x128xbf16>,
    %c4_i32 = arith.constant 4 : i32
    %154 = arith.index_cast %c4_i32 : i32 to index
    %c0_38 = arith.constant 0 : index
    %c0_39 = arith.constant 0 : index
    %155 = vector.load %arg2[%154, %c0_38, %c0_39] : memref<8x16x512xbf16, #tpu.memory_space<vmem>>, vector<1x16x512xbf16>
    %156 = vector.shape_cast %155 : vector<1x16x512xbf16> to vector<16x512xbf16>
    %157 = arith.truncf %148 : vector<16x128xf32> to vector<16x128xbf16>
    %cst_40 = arith.constant dense<0.000000e+00> : vector<16x512xf32>
    %158 = tpu.matmul %157, %3, %cst_40 {dimension_numbers = #tpu.dot_dimension_numbers<[1], [0], [0], [1], [0, 0, 1, 1], [], []>} : vector<16x128xbf16>, vector<128x512xbf16>, vector<16x512xf32> -> vector<16x512xf32>
    %159 = arith.extf %156 : vector<16x512xbf16> to vector<16x512xf32>
    %160 = arith.addf %159, %158 : vector<16x512xf32>
    %161 = vector.extract_strided_slice %160 {offsets = [0, 0], sizes = [16, 128], strides = [1, 1]} : vector<16x512xf32> to vector<16x128xf32>
    %162 = arith.negf %161 : vector<16x128xf32>
    %163 = math.exp %162 : vector<16x128xf32>
    %cst_41 = arith.constant 1.000000e+00 : f32
    %164 = vector.broadcast %cst_41 : f32 to vector<16x128xf32>
    %165 = arith.addf %164, %163 : vector<16x128xf32>
    %166 = arith.divf %164, %165 : vector<16x128xf32>
    %167 = vector.extract_strided_slice %160 {offsets = [0, 128], sizes = [16, 128], strides = [1, 1]} : vector<16x512xf32> to vector<16x128xf32>
    %168 = arith.negf %167 : vector<16x128xf32>
    %169 = math.exp %168 : vector<16x128xf32>
    %cst_42 = arith.constant 1.000000e+00 : f32
    %170 = vector.broadcast %cst_42 : f32 to vector<16x128xf32>
    %171 = arith.addf %170, %169 : vector<16x128xf32>
    %172 = arith.divf %170, %171 : vector<16x128xf32>
    %173 = vector.extract_strided_slice %160 {offsets = [0, 256], sizes = [16, 128], strides = [1, 1]} : vector<16x512xf32> to vector<16x128xf32>
    %174 = math.tanh %173 : vector<16x128xf32>
    %175 = vector.extract_strided_slice %160 {offsets = [0, 384], sizes = [16, 128], strides = [1, 1]} : vector<16x512xf32> to vector<16x128xf32>
    %176 = arith.negf %175 : vector<16x128xf32>
    %177 = math.exp %176 : vector<16x128xf32>
    %cst_43 = arith.constant 1.000000e+00 : f32
    %178 = vector.broadcast %cst_43 : f32 to vector<16x128xf32>
    %179 = arith.addf %178, %177 : vector<16x128xf32>
    %180 = arith.divf %178, %179 : vector<16x128xf32>
    %181 = arith.mulf %172, %146 : vector<16x128xf32>
    %182 = arith.mulf %166, %174 : vector<16x128xf32>
    %183 = arith.addf %181, %182 : vector<16x128xf32>
    %184 = math.tanh %183 : vector<16x128xf32>
    %185 = arith.mulf %180, %184 : vector<16x128xf32>
    %186 = arith.truncf %185 : vector<16x128xf32> to vector<16x128xbf16>
    %187 = arith.index_cast %c4_i32 : i32 to index
    %c0_44 = arith.constant 0 : index
    %c0_45 = arith.constant 0 : index
    %188 = vector.load %arg4[%187, %c0_44, %c0_45] : memref<8x16x128xbf16, #tpu.memory_space<vmem>>, vector<1x16x128xbf16>
    %189 = vector.shape_cast %188 : vector<1x16x128xbf16> to vector<16x128xbf16>
    %190 = vector.shape_cast %186 : vector<16x128xbf16> to vector<1x16x128xbf16>
    tpu.vector_store %arg4[%187, %c0_44, %c0_45], %190 {strides = array<i32>} : memref<8x16x128xbf16, #tpu.memory_space<vmem>>, vector<1x16x128xbf16>,
    %c5_i32 = arith.constant 5 : i32
    %191 = arith.index_cast %c5_i32 : i32 to index
    %c0_46 = arith.constant 0 : index
    %c0_47 = arith.constant 0 : index
    %192 = vector.load %arg2[%191, %c0_46, %c0_47] : memref<8x16x512xbf16, #tpu.memory_space<vmem>>, vector<1x16x512xbf16>
    %193 = vector.shape_cast %192 : vector<1x16x512xbf16> to vector<16x512xbf16>
    %194 = arith.truncf %185 : vector<16x128xf32> to vector<16x128xbf16>
    %cst_48 = arith.constant dense<0.000000e+00> : vector<16x512xf32>
    %195 = tpu.matmul %194, %3, %cst_48 {dimension_numbers = #tpu.dot_dimension_numbers<[1], [0], [0], [1], [0, 0, 1, 1], [], []>} : vector<16x128xbf16>, vector<128x512xbf16>, vector<16x512xf32> -> vector<16x512xf32>
    %196 = arith.extf %193 : vector<16x512xbf16> to vector<16x512xf32>
    %197 = arith.addf %196, %195 : vector<16x512xf32>
    %198 = vector.extract_strided_slice %197 {offsets = [0, 0], sizes = [16, 128], strides = [1, 1]} : vector<16x512xf32> to vector<16x128xf32>
    %199 = arith.negf %198 : vector<16x128xf32>
    %200 = math.exp %199 : vector<16x128xf32>
    %cst_49 = arith.constant 1.000000e+00 : f32
    %201 = vector.broadcast %cst_49 : f32 to vector<16x128xf32>
    %202 = arith.addf %201, %200 : vector<16x128xf32>
    %203 = arith.divf %201, %202 : vector<16x128xf32>
    %204 = vector.extract_strided_slice %197 {offsets = [0, 128], sizes = [16, 128], strides = [1, 1]} : vector<16x512xf32> to vector<16x128xf32>
    %205 = arith.negf %204 : vector<16x128xf32>
    %206 = math.exp %205 : vector<16x128xf32>
    %cst_50 = arith.constant 1.000000e+00 : f32
    %207 = vector.broadcast %cst_50 : f32 to vector<16x128xf32>
    %208 = arith.addf %207, %206 : vector<16x128xf32>
    %209 = arith.divf %207, %208 : vector<16x128xf32>
    %210 = vector.extract_strided_slice %197 {offsets = [0, 256], sizes = [16, 128], strides = [1, 1]} : vector<16x512xf32> to vector<16x128xf32>
    %211 = math.tanh %210 : vector<16x128xf32>
    %212 = vector.extract_strided_slice %197 {offsets = [0, 384], sizes = [16, 128], strides = [1, 1]} : vector<16x512xf32> to vector<16x128xf32>
    %213 = arith.negf %212 : vector<16x128xf32>
    %214 = math.exp %213 : vector<16x128xf32>
    %cst_51 = arith.constant 1.000000e+00 : f32
    %215 = vector.broadcast %cst_51 : f32 to vector<16x128xf32>
    %216 = arith.addf %215, %214 : vector<16x128xf32>
    %217 = arith.divf %215, %216 : vector<16x128xf32>
    %218 = arith.mulf %209, %183 : vector<16x128xf32>
    %219 = arith.mulf %203, %211 : vector<16x128xf32>
    %220 = arith.addf %218, %219 : vector<16x128xf32>
    %221 = math.tanh %220 : vector<16x128xf32>
    %222 = arith.mulf %217, %221 : vector<16x128xf32>
    %223 = arith.truncf %222 : vector<16x128xf32> to vector<16x128xbf16>
    %224 = arith.index_cast %c5_i32 : i32 to index
    %c0_52 = arith.constant 0 : index
    %c0_53 = arith.constant 0 : index
    %225 = vector.load %arg4[%224, %c0_52, %c0_53] : memref<8x16x128xbf16, #tpu.memory_space<vmem>>, vector<1x16x128xbf16>
    %226 = vector.shape_cast %225 : vector<1x16x128xbf16> to vector<16x128xbf16>
    %227 = vector.shape_cast %223 : vector<16x128xbf16> to vector<1x16x128xbf16>
    tpu.vector_store %arg4[%224, %c0_52, %c0_53], %227 {strides = array<i32>} : memref<8x16x128xbf16, #tpu.memory_space<vmem>>, vector<1x16x128xbf16>,
    %c6_i32 = arith.constant 6 : i32
    %228 = arith.index_cast %c6_i32 : i32 to index
    %c0_54 = arith.constant 0 : index
    %c0_55 = arith.constant 0 : index
    %229 = vector.load %arg2[%228, %c0_54, %c0_55] : memref<8x16x512xbf16, #tpu.memory_space<vmem>>, vector<1x16x512xbf16>
    %230 = vector.shape_cast %229 : vector<1x16x512xbf16> to vector<16x512xbf16>
    %231 = arith.truncf %222 : vector<16x128xf32> to vector<16x128xbf16>
    %cst_56 = arith.constant dense<0.000000e+00> : vector<16x512xf32>
    %232 = tpu.matmul %231, %3, %cst_56 {dimension_numbers = #tpu.dot_dimension_numbers<[1], [0], [0], [1], [0, 0, 1, 1], [], []>} : vector<16x128xbf16>, vector<128x512xbf16>, vector<16x512xf32> -> vector<16x512xf32>
    %233 = arith.extf %230 : vector<16x512xbf16> to vector<16x512xf32>
    %234 = arith.addf %233, %232 : vector<16x512xf32>
    %235 = vector.extract_strided_slice %234 {offsets = [0, 0], sizes = [16, 128], strides = [1, 1]} : vector<16x512xf32> to vector<16x128xf32>
    %236 = arith.negf %235 : vector<16x128xf32>
    %237 = math.exp %236 : vector<16x128xf32>
    %cst_57 = arith.constant 1.000000e+00 : f32
    %238 = vector.broadcast %cst_57 : f32 to vector<16x128xf32>
    %239 = arith.addf %238, %237 : vector<16x128xf32>
    %240 = arith.divf %238, %239 : vector<16x128xf32>
    %241 = vector.extract_strided_slice %234 {offsets = [0, 128], sizes = [16, 128], strides = [1, 1]} : vector<16x512xf32> to vector<16x128xf32>
    %242 = arith.negf %241 : vector<16x128xf32>
    %243 = math.exp %242 : vector<16x128xf32>
    %cst_58 = arith.constant 1.000000e+00 : f32
    %244 = vector.broadcast %cst_58 : f32 to vector<16x128xf32>
    %245 = arith.addf %244, %243 : vector<16x128xf32>
    %246 = arith.divf %244, %245 : vector<16x128xf32>
    %247 = vector.extract_strided_slice %234 {offsets = [0, 256], sizes = [16, 128], strides = [1, 1]} : vector<16x512xf32> to vector<16x128xf32>
    %248 = math.tanh %247 : vector<16x128xf32>
    %249 = vector.extract_strided_slice %234 {offsets = [0, 384], sizes = [16, 128], strides = [1, 1]} : vector<16x512xf32> to vector<16x128xf32>
    %250 = arith.negf %249 : vector<16x128xf32>
    %251 = math.exp %250 : vector<16x128xf32>
    %cst_59 = arith.constant 1.000000e+00 : f32
    %252 = vector.broadcast %cst_59 : f32 to vector<16x128xf32>
    %253 = arith.addf %252, %251 : vector<16x128xf32>
    %254 = arith.divf %252, %253 : vector<16x128xf32>
    %255 = arith.mulf %246, %220 : vector<16x128xf32>
    %256 = arith.mulf %240, %248 : vector<16x128xf32>
    %257 = arith.addf %255, %256 : vector<16x128xf32>
    %258 = math.tanh %257 : vector<16x128xf32>
    %259 = arith.mulf %254, %258 : vector<16x128xf32>
    %260 = arith.truncf %259 : vector<16x128xf32> to vector<16x128xbf16>
    %261 = arith.index_cast %c6_i32 : i32 to index
    %c0_60 = arith.constant 0 : index
    %c0_61 = arith.constant 0 : index
    %262 = vector.load %arg4[%261, %c0_60, %c0_61] : memref<8x16x128xbf16, #tpu.memory_space<vmem>>, vector<1x16x128xbf16>
    %263 = vector.shape_cast %262 : vector<1x16x128xbf16> to vector<16x128xbf16>
    %264 = vector.shape_cast %260 : vector<16x128xbf16> to vector<1x16x128xbf16>
    tpu.vector_store %arg4[%261, %c0_60, %c0_61], %264 {strides = array<i32>} : memref<8x16x128xbf16, #tpu.memory_space<vmem>>, vector<1x16x128xbf16>,
    %c7_i32 = arith.constant 7 : i32
    %265 = arith.index_cast %c7_i32 : i32 to index
    %c0_62 = arith.constant 0 : index
    %c0_63 = arith.constant 0 : index
    %266 = vector.load %arg2[%265, %c0_62, %c0_63] : memref<8x16x512xbf16, #tpu.memory_space<vmem>>, vector<1x16x512xbf16>
    %267 = vector.shape_cast %266 : vector<1x16x512xbf16> to vector<16x512xbf16>
    %268 = arith.truncf %259 : vector<16x128xf32> to vector<16x128xbf16>
    %cst_64 = arith.constant dense<0.000000e+00> : vector<16x512xf32>
    %269 = tpu.matmul %268, %3, %cst_64 {dimension_numbers = #tpu.dot_dimension_numbers<[1], [0], [0], [1], [0, 0, 1, 1], [], []>} : vector<16x128xbf16>, vector<128x512xbf16>, vector<16x512xf32> -> vector<16x512xf32>
    %270 = arith.extf %267 : vector<16x512xbf16> to vector<16x512xf32>
    %271 = arith.addf %270, %269 : vector<16x512xf32>
    %272 = vector.extract_strided_slice %271 {offsets = [0, 0], sizes = [16, 128], strides = [1, 1]} : vector<16x512xf32> to vector<16x128xf32>
    %273 = arith.negf %272 : vector<16x128xf32>
    %274 = math.exp %273 : vector<16x128xf32>
    %cst_65 = arith.constant 1.000000e+00 : f32
    %275 = vector.broadcast %cst_65 : f32 to vector<16x128xf32>
    %276 = arith.addf %275, %274 : vector<16x128xf32>
    %277 = arith.divf %275, %276 : vector<16x128xf32>
    %278 = vector.extract_strided_slice %271 {offsets = [0, 128], sizes = [16, 128], strides = [1, 1]} : vector<16x512xf32> to vector<16x128xf32>
    %279 = arith.negf %278 : vector<16x128xf32>
    %280 = math.exp %279 : vector<16x128xf32>
    %cst_66 = arith.constant 1.000000e+00 : f32
    %281 = vector.broadcast %cst_66 : f32 to vector<16x128xf32>
    %282 = arith.addf %281, %280 : vector<16x128xf32>
    %283 = arith.divf %281, %282 : vector<16x128xf32>
    %284 = vector.extract_strided_slice %271 {offsets = [0, 256], sizes = [16, 128], strides = [1, 1]} : vector<16x512xf32> to vector<16x128xf32>
    %285 = math.tanh %284 : vector<16x128xf32>
    %286 = vector.extract_strided_slice %271 {offsets = [0, 384], sizes = [16, 128], strides = [1, 1]} : vector<16x512xf32> to vector<16x128xf32>
    %287 = arith.negf %286 : vector<16x128xf32>
    %288 = math.exp %287 : vector<16x128xf32>
    %cst_67 = arith.constant 1.000000e+00 : f32
    %289 = vector.broadcast %cst_67 : f32 to vector<16x128xf32>
    %290 = arith.addf %289, %288 : vector<16x128xf32>
    %291 = arith.divf %289, %290 : vector<16x128xf32>
    %292 = arith.mulf %283, %257 : vector<16x128xf32>
    %293 = arith.mulf %277, %285 : vector<16x128xf32>
    %294 = arith.addf %292, %293 : vector<16x128xf32>
    %295 = math.tanh %294 : vector<16x128xf32>
    %296 = arith.mulf %291, %295 : vector<16x128xf32>
    %297 = arith.truncf %296 : vector<16x128xf32> to vector<16x128xbf16>
    %298 = arith.index_cast %c7_i32 : i32 to index
    %c0_68 = arith.constant 0 : index
    %c0_69 = arith.constant 0 : index
    %299 = vector.load %arg4[%298, %c0_68, %c0_69] : memref<8x16x128xbf16, #tpu.memory_space<vmem>>, vector<1x16x128xbf16>
    %300 = vector.shape_cast %299 : vector<1x16x128xbf16> to vector<16x128xbf16>
    %301 = vector.shape_cast %297 : vector<16x128xbf16> to vector<1x16x128xbf16>
    tpu.vector_store %arg4[%298, %c0_68, %c0_69], %301 {strides = array<i32>} : memref<8x16x128xbf16, #tpu.memory_space<vmem>>, vector<1x16x128xbf16>,
    %c8_i32 = arith.constant 8 : i32
    %c0_70 = arith.constant 0 : index
    %c0_71 = arith.constant 0 : index
    %302 = vector.load %arg5[%c0_70, %c0_71] : memref<16x128xf32, #tpu.memory_space<vmem>>, vector<16x128xf32>
    tpu.vector_store %arg5[%c0_70, %c0_71], %296 {strides = array<i32>} : memref<16x128xf32, #tpu.memory_space<vmem>>, vector<16x128xf32>,
    %c0_72 = arith.constant 0 : index
    %c0_73 = arith.constant 0 : index
    %303 = vector.load %arg6[%c0_72, %c0_73] : memref<16x128xf32, #tpu.memory_space<vmem>>, vector<16x128xf32>
    tpu.vector_store %arg6[%c0_72, %c0_73], %294 {strides = array<i32>} : memref<16x128xf32, #tpu.memory_space<vmem>>, vector<16x128xf32>,
    return
  }
  func.func @transform_0(%arg0: i32, %arg1: i32) -> (i32, i32, i32) {
    %c0_i32 = arith.constant 0 : i32
    %c0_i32_0 = arith.constant 0 : i32
    return %arg1, %arg0, %c0_i32 : i32, i32, i32
  }
  func.func @transform_1(%arg0: i32, %arg1: i32) -> (i32, i32) {
    %c0_i32 = arith.constant 0 : i32
    %c0_i32_0 = arith.constant 0 : i32
    %c0_i32_1 = arith.constant 0 : i32
    return %c0_i32, %c0_i32_0 : i32, i32
  }
  func.func @transform_2(%arg0: i32, %arg1: i32) -> (i32, i32, i32) {
    %c0_i32 = arith.constant 0 : i32
    %c0_i32_0 = arith.constant 0 : i32
    return %arg1, %arg0, %c0_i32 : i32, i32, i32
  }
}

module attributes {stable_mosaic.version = 11 : i64} {
  func.func @matmul_bias_kernel(%arg0: i32, %arg1: i32, %arg2: i32, %arg3: memref<16x128xbf16, #tpu.memory_space<vmem>>, %arg4: memref<128x128xbf16, #tpu.memory_space<vmem>>, %arg5: memref<1x128xf32, #tpu.memory_space<vmem>>, %arg6: memref<16x128xf32, #tpu.memory_space<vmem>>, %arg7: memref<16x128xf32, #tpu.memory_space<vmem>>) attributes {dimension_semantics = [#tpu.dimension_semantics<parallel>, #tpu.dimension_semantics<parallel>, #tpu.dimension_semantics<arbitrary>], iteration_bounds = array<i64: 1, 1, 1>, scalar_prefetch = 0 : i64, scratch_operands = 1 : i64, tpu.core_type = #tpu.core_type<tc>, window_params = [{transform_indices = @transform_0, window_bounds = array<i64: 16, 128>}, {transform_indices = @transform_1, window_bounds = array<i64: 128, 128>}, {transform_indices = @transform_2, window_bounds = array<i64: 1, 128>}, {transform_indices = @transform_3, window_bounds = array<i64: 16, 128>}]} {
    %c0_i32 = arith.constant 0 : i32
    %0 = arith.cmpi eq, %arg2, %c0_i32 : i32
    %1 = arith.extui %0 : i1 to i32
    %c0_i32_0 = arith.constant 0 : i32
    %2 = arith.cmpi ne, %1, %c0_i32_0 : i32
    scf.if %2 {
      %cst_10 = arith.constant 0.000000e+00 : f32
      %12 = vector.broadcast %cst_10 : f32 to vector<16x128xf32>
      %c0_11 = arith.constant 0 : index
      %c0_12 = arith.constant 0 : index
      %13 = vector.load %arg7[%c0_11, %c0_12] : memref<16x128xf32, #tpu.memory_space<vmem>>, vector<16x128xf32>
      tpu.vector_store %arg7[%c0_11, %c0_12], %12 {strides = array<i32>} : memref<16x128xf32, #tpu.memory_space<vmem>>, vector<16x128xf32>,
    } else {
    }
    %c0 = arith.constant 0 : index
    %c0_1 = arith.constant 0 : index
    %3 = vector.load %arg7[%c0, %c0_1] : memref<16x128xf32, #tpu.memory_space<vmem>>, vector<16x128xf32>
    %c0_2 = arith.constant 0 : index
    %c0_3 = arith.constant 0 : index
    %4 = vector.load %arg3[%c0_2, %c0_3] : memref<16x128xbf16, #tpu.memory_space<vmem>>, vector<16x128xbf16>
    %c0_4 = arith.constant 0 : index
    %c0_5 = arith.constant 0 : index
    %5 = vector.load %arg4[%c0_4, %c0_5] : memref<128x128xbf16, #tpu.memory_space<vmem>>, vector<128x128xbf16>
    %cst = arith.constant dense<0.000000e+00> : vector<16x128xf32>
    %6 = tpu.matmul %4, %5, %cst {dimension_numbers = #tpu.dot_dimension_numbers<[1], [0], [0], [1], [0, 0, 1, 1], [], []>} : vector<16x128xbf16>, vector<128x128xbf16>, vector<16x128xf32> -> vector<16x128xf32>
    %7 = arith.addf %3, %6 : vector<16x128xf32>
    %c0_6 = arith.constant 0 : index
    %c0_7 = arith.constant 0 : index
    %8 = vector.load %arg7[%c0_6, %c0_7] : memref<16x128xf32, #tpu.memory_space<vmem>>, vector<16x128xf32>
    tpu.vector_store %arg7[%c0_6, %c0_7], %7 {strides = array<i32>} : memref<16x128xf32, #tpu.memory_space<vmem>>, vector<16x128xf32>,
    %c0_i32_8 = arith.constant 0 : i32
    %9 = arith.cmpi eq, %arg2, %c0_i32_8 : i32
    %10 = arith.extui %9 : i1 to i32
    %c0_i32_9 = arith.constant 0 : i32
    %11 = arith.cmpi ne, %10, %c0_i32_9 : i32
    scf.if %11 {
      %c0_10 = arith.constant 0 : index
      %c0_11 = arith.constant 0 : index
      %12 = vector.load %arg7[%c0_10, %c0_11] : memref<16x128xf32, #tpu.memory_space<vmem>>, vector<16x128xf32>
      %c0_12 = arith.constant 0 : index
      %c0_13 = arith.constant 0 : index
      %13 = vector.load %arg5[%c0_12, %c0_13] : memref<1x128xf32, #tpu.memory_space<vmem>>, vector<1x128xf32>
      %14 = vector.broadcast %13 : vector<1x128xf32> to vector<16x128xf32>
      %15 = arith.addf %12, %14 : vector<16x128xf32>
      %c0_14 = arith.constant 0 : index
      %c0_15 = arith.constant 0 : index
      %16 = vector.load %arg6[%c0_14, %c0_15] : memref<16x128xf32, #tpu.memory_space<vmem>>, vector<16x128xf32>
      tpu.vector_store %arg6[%c0_14, %c0_15], %15 {strides = array<i32>} : memref<16x128xf32, #tpu.memory_space<vmem>>, vector<16x128xf32>,
    } else {
    }
    return
  }
  func.func @transform_0(%arg0: i32, %arg1: i32, %arg2: i32) -> (i32, i32) {
    %c0_i32 = arith.constant 0 : i32
    return %arg0, %arg2 : i32, i32
  }
  func.func @transform_1(%arg0: i32, %arg1: i32, %arg2: i32) -> (i32, i32) {
    %c0_i32 = arith.constant 0 : i32
    return %arg2, %arg1 : i32, i32
  }
  func.func @transform_2(%arg0: i32, %arg1: i32, %arg2: i32) -> (i32, i32) {
    %c0_i32 = arith.constant 0 : i32
    %c0_i32_0 = arith.constant 0 : i32
    return %c0_i32, %arg1 : i32, i32
  }
  func.func @transform_3(%arg0: i32, %arg1: i32, %arg2: i32) -> (i32, i32) {
    %c0_i32 = arith.constant 0 : i32
    return %arg0, %arg1 : i32, i32
  }
}

</mosaic_0001>

<bundles_post_ra>
// kernel: rnn_forward.5
= control target key start
LH: loop header
LB: loop body
LE: loop exit
PB: predicated region body
PF: predicated region fallthrough
CT: control target
= control target key end

     0   :  { %8 = vsyncpa [#allocation4], 0  ;;  %s967_s15 = smov [#allocation3]   ;;  %s968_s17 = smov 256   ;;  %s1220_s0 = inlined_call_operand.vmem [shape: bf16[128,32], index: 0, kind: input, shape index: {}]   ;;  %s1221_s1 = inlined_call_operand.hbm [shape: bf16[32,512], index: 1, kind: input, shape index: {}]   ;;  %s1222_s2 = inlined_call_operand.vmem [shape: f32[1,512], index: 2, kind: input, shape index: {}]   ;;  %s1223_s3 = inlined_call_operand.vmem [shape: bf16[128,512], index: 3, kind: output, shape index: {}]  }
   0x1   :  { %s15_s14 = sshll.u32 %s1221_s1, 4  ;;  %s17_s16 = sshll.u32 %s967_s15, 4  ;;  %s16_s14 = int_to_ptr.hbm [resolvable:$true] %s15_s14  ;;  %s18_s16 = int_to_ptr.vmem [resolvable:$true] %s17_s16 }
   0x2   :  { %s969_s18 = smov 16  }
   0x3   :  { %23 = dma.hbm_to_vmem [thread:$0]  %s16_s14, 1024, %s18_s16, [#allocation4], %s968_s17, %s968_s17, %s969_s18  }
   0x4   :  { %965 = dma.done.wait [#allocation4], 1024  }
   0x5   :  { %966 = vsyncadd [#allocation4], 4294966272  ;;  %v876_v0 = vld [vmem:[#allocation3 + $0x20] sm:$0xf]  ;;  %v936_v1 = vld [vmem:[#allocation3 + $0x2c] sm:$0xf0] }
   0x6   :  { %v934_v2 = vld [vmem:[#allocation3 + $0x24] sm:$0xf]  ;;  %v877_v3 = vor.u32 %v936_v1, %v876_v0  ;;  %v878_v4 = vld [vmem:[#allocation3 + $0x30] sm:$0xf0]  ;;  %v884_v5 = vld [vmem:[#allocation3 + $0x28] sm:$0xf] }
   0x7   :  { %v937_v6 = vld [vmem:[#allocation3 + $0x34] sm:$0xf0]  ;;  %v881_v7 = vor.u32 %v934_v2, %v878_v4  ;;  %v935_v9 = vld [vmem:[#allocation3 + $0x2c] sm:$0xf]  ;;  %v886_v10 = vld [vmem:[#allocation3 + $0x38] sm:$0xf0] }
   0x8   :  { %v885_v8 = vor.u32 %v937_v6, %v884_v5  ;;  %v860_v11 = vld [vmem:[#allocation3] sm:$0xf]  ;;  %298 = vmatpush.bf16.msra.mxu0 %v877_v3  ;;  %v889_v12 = vor.u32 %v935_v9, %v886_v10  ;;  %v932_v13 = vld [vmem:[#allocation3 + $0xc] sm:$0xf0]  ;;  %v930_v14 = vld [vmem:[#allocation3 + $0x4] sm:$0xf] }
   0x9   :  { %v862_v15 = vld [vmem:[#allocation3 + $0x10] sm:$0xf0]  ;;  %347 = vmatpush.bf16.msra.mxu1 %v881_v7  ;;  %v861_v16 = vor.u32 %v932_v13, %v860_v11  ;;  %v868_v18 = vld [vmem:[#allocation3 + $0x8] sm:$0xf]  ;;  %v933_v19 = vld [vmem:[#allocation3 + $0x14] sm:$0xf0] }
   0xa   :  { %396 = vmatpush.bf16.msra.mxu2 %v885_v8  ;;  %v865_v17 = vor.u32 %v930_v14, %v862_v15  ;;  %v931_v20 = vld [vmem:[#allocation3 + $0xc] sm:$0xf]  ;;  %445 = vmatpush.bf16.msra.mxu3 %v889_v12  ;;  %v869_v21 = vor.u32 %v933_v19, %v868_v18  ;;  %v870_v22 = vld [vmem:[#allocation3 + $0x18] sm:$0xf0]  ;;  %v922_v24 = vld [vmem:[%s1220_s0] sm:$0xff]  ;;  %vm267_vm0 = vcmask 261120  }
   0xb   :  { %v873_v23 = vor.u32 %v931_v20, %v870_v22  ;;  %v923_v25 = vld [vmem:[%s1220_s0 + $0x8] sm:$0xff]  ;;  %v924_v26 = vld [vmem:[%s1220_s0 + $0x10] sm:$0xff]  ;;  %v925_v27 = vld [vmem:[%s1220_s0 + $0x18] sm:$0xff] }
   0xc   :  { %299 = vmatpush.bf16.msra.mxu0 %v861_v16  ;;  %v926_v28 = vld [vmem:[%s1220_s0 + $0x20] sm:$0xff]  ;;  %v927_v29 = vld [vmem:[%s1220_s0 + $0x28] sm:$0xff]  ;;  %v928_v30 = vld [vmem:[%s1220_s0 + $0x30] sm:$0xff] }
   0xd   :  { %348 = vmatpush.bf16.msra.mxu1 %v865_v17  ;;  %v929_v31 = vld [vmem:[%s1220_s0 + $0x38] sm:$0xff]  ;;  %v683_v32 = vld [vmem:[%s1222_s2] sm:$0xf] }
   0xe   :  { %397 = vmatpush.bf16.msra.mxu2 %v869_v21  ;;  %446 = vmatpush.bf16.msra.mxu3 %v873_v23  ;;  %v1052_v33 = vperm.slane %v683_v32, 0  ;;  %v1054_v34 = vperm.slane %v683_v32, 1  ;;  %v1058_v40 = vperm.slane %v683_v32, 2  ;;  %v1060_v41 = vperm.slane %v683_v32, 3 }
   0xf   :  { %890 = vmatmul.msk.bf16.vlgmr.msra.gmra.mxu0 %vm267_vm0, %v922_v24 }
  0x10   :  { %898 = vmatmul.msk.bf16.vlgmr.msra.gmra.mxu1 %vm267_vm0, %v922_v24 }
  0x11   :  { %906 = vmatmul.msk.bf16.vlgmr.msra.gmra.mxu2 %vm267_vm0, %v922_v24  ;;  %914 = vmatmul.msk.bf16.vlgmr.msra.gmra.mxu3 %vm267_vm0, %v922_v24 }
  0x1f   :  { %891 = vmatmul.msk.bf16.gmra.mxu0 %vm267_vm0, %v923_v25 }
  0x20   :  { %899 = vmatmul.msk.bf16.gmra.mxu1 %vm267_vm0, %v923_v25 }
  0x21   :  { %907 = vmatmul.msk.bf16.gmra.mxu2 %vm267_vm0, %v923_v25  ;;  %915 = vmatmul.msk.bf16.gmra.mxu3 %vm267_vm0, %v923_v25 }
  0x2f   :  { %892 = vmatmul.msk.bf16.gmra.mxu0 %vm267_vm0, %v924_v26 }
  0x30   :  { %900 = vmatmul.msk.bf16.gmra.mxu1 %vm267_vm0, %v924_v26 }
  0x31   :  { %908 = vmatmul.msk.bf16.gmra.mxu2 %vm267_vm0, %v924_v26  ;;  %916 = vmatmul.msk.bf16.gmra.mxu3 %vm267_vm0, %v924_v26 }
  0x3f   :  { %893 = vmatmul.msk.bf16.gmra.mxu0 %vm267_vm0, %v925_v27 }
  0x40   :  { %901 = vmatmul.msk.bf16.gmra.mxu1 %vm267_vm0, %v925_v27 }
  0x41   :  { %909 = vmatmul.msk.bf16.gmra.mxu2 %vm267_vm0, %v925_v27  ;;  %917 = vmatmul.msk.bf16.gmra.mxu3 %vm267_vm0, %v925_v27 }
  0x4f   :  { %894 = vmatmul.msk.bf16.gmra.mxu0 %vm267_vm0, %v926_v28 }
  0x50   :  { %902 = vmatmul.msk.bf16.gmra.mxu1 %vm267_vm0, %v926_v28 }
  0x51   :  { %910 = vmatmul.msk.bf16.gmra.mxu2 %vm267_vm0, %v926_v28  ;;  %918 = vmatmul.msk.bf16.gmra.mxu3 %vm267_vm0, %v926_v28 }
  0x5f   :  { %895 = vmatmul.msk.bf16.gmra.mxu0 %vm267_vm0, %v927_v29 }
  0x60   :  { %903 = vmatmul.msk.bf16.gmra.mxu1 %vm267_vm0, %v927_v29 }
  0x61   :  { %911 = vmatmul.msk.bf16.gmra.mxu2 %vm267_vm0, %v927_v29  ;;  %919 = vmatmul.msk.bf16.gmra.mxu3 %vm267_vm0, %v927_v29 }
  0x6f   :  { %896 = vmatmul.msk.bf16.gmra.mxu0 %vm267_vm0, %v928_v30 }
  0x70   :  { %904 = vmatmul.msk.bf16.gmra.mxu1 %vm267_vm0, %v928_v30 }
  0x71   :  { %912 = vmatmul.msk.bf16.gmra.mxu2 %vm267_vm0, %v928_v30  ;;  %920 = vmatmul.msk.bf16.gmra.mxu3 %vm267_vm0, %v928_v30 }
  0x7f   :  { %897 = vmatmul.msk.bf16.gmra.mxu0 %vm267_vm0, %v929_v31 }
  0x80   :  { %905 = vmatmul.msk.bf16.gmra.mxu1 %vm267_vm0, %v929_v31 }
  0x81   :  { %913 = vmatmul.msk.bf16.gmra.mxu2 %vm267_vm0, %v929_v31  ;;  %921 = vmatmul.msk.bf16.gmra.mxu3 %vm267_vm0, %v929_v31 }
  0x8c   :  { %v301_v35 = vpop.f32.mrf.mxu0 }
  0x8d   :  { %v693_v36 = vadd.f32 %v1052_v33, %v301_v35  ;;  %v350_v37 = vpop.f32.mrf.mxu1 }
  0x8e   :  { %v694_v38 = vadd.f32 %v1054_v34, %v350_v37 }
  0x90   :  { %v757_v39 = vpack.c.bf16 %v694_v38, %v693_v36 }
  0x92   :  { %789 = vst [vmem:[%s1223_s3] sm:$0xff] %v757_v39 }
  0x94   :  { %v399_v42 = vpop.f32.mrf.mxu2  ;;  %v448_v44 = vpop.f32.mrf.mxu3 }
  0x95   :  { %v695_v43 = vadd.f32 %v1058_v40, %v399_v42  ;;  %v303_v45 = vpop.f32.mrf.mxu0  ;;  %v696_v46 = vadd.f32 %v1060_v41, %v448_v44  ;;  %v352_v48 = vpop.f32.mrf.mxu1 }
  0x96   :  { %v697_v47 = vadd.f32 %v1052_v33, %v303_v45  ;;  %v698_v49 = vadd.f32 %v1054_v34, %v352_v48 }
  0x97   :  { %v758_v50 = vpack.c.bf16 %v696_v46, %v695_v43 }
  0x98   :  { %v759_v51 = vpack.c.bf16 %v698_v49, %v697_v47 }
  0x99   :  { %790 = vst [vmem:[%s1223_s3 + $0x8] sm:$0xff] %v758_v50 }
  0x9a   :  { %791 = vst [vmem:[%s1223_s3 + $0x10] sm:$0xff] %v759_v51 }
  0x9c   :  { %v401_v52 = vpop.f32.mrf.mxu2  ;;  %v450_v54 = vpop.f32.mrf.mxu3 }
  0x9d   :  { %v699_v53 = vadd.f32 %v1058_v40, %v401_v52  ;;  %v306_v55 = vpop.f32.mrf.mxu0  ;;  %v700_v56 = vadd.f32 %v1060_v41, %v450_v54  ;;  %v355_v58 = vpop.f32.mrf.mxu1 }
  0x9e   :  { %v701_v57 = vadd.f32 %v1052_v33, %v306_v55  ;;  %v702_v59 = vadd.f32 %v1054_v34, %v355_v58 }
  0x9f   :  { %v760_v60 = vpack.c.bf16 %v700_v56, %v699_v53 }
  0xa0   :  { %v761_v61 = vpack.c.bf16 %v702_v59, %v701_v57 }
  0xa1   :  { %792 = vst [vmem:[%s1223_s3 + $0x18] sm:$0xff] %v760_v60 }
  0xa2   :  { %793 = vst [vmem:[%s1223_s3 + $0x20] sm:$0xff] %v761_v61 }
  0xa4   :  { %v404_v62 = vpop.f32.mrf.mxu2  ;;  %v453_v0 = vpop.f32.mrf.mxu3 }
  0xa5   :  { %v703_v63 = vadd.f32 %v1058_v40, %v404_v62  ;;  %v308_v1 = vpop.f32.mrf.mxu0  ;;  %v704_v2 = vadd.f32 %v1060_v41, %v453_v0  ;;  %v357_v4 = vpop.f32.mrf.mxu1 }
  0xa6   :  { %v705_v3 = vadd.f32 %v1052_v33, %v308_v1  ;;  %v706_v5 = vadd.f32 %v1054_v34, %v357_v4 }
  0xa7   :  { %v762_v6 = vpack.c.bf16 %v704_v2, %v703_v63 }
  0xa8   :  { %v763_v7 = vpack.c.bf16 %v706_v5, %v705_v3 }
  0xa9   :  { %794 = vst [vmem:[%s1223_s3 + $0x28] sm:$0xff] %v762_v6 }
  0xaa   :  { %795 = vst [vmem:[%s1223_s3 + $0x30] sm:$0xff] %v763_v7 }
  0xac   :  { %v406_v8 = vpop.f32.mrf.mxu2  ;;  %v455_v10 = vpop.f32.mrf.mxu3 }
  0xad   :  { %v707_v9 = vadd.f32 %v1058_v40, %v406_v8  ;;  %v311_v11 = vpop.f32.mrf.mxu0  ;;  %v708_v12 = vadd.f32 %v1060_v41, %v455_v10  ;;  %v360_v14 = vpop.f32.mrf.mxu1 }
  0xae   :  { %v709_v13 = vadd.f32 %v1052_v33, %v311_v11  ;;  %v710_v15 = vadd.f32 %v1054_v34, %v360_v14 }
  0xaf   :  { %v764_v16 = vpack.c.bf16 %v708_v12, %v707_v9 }
  0xb0   :  { %v765_v17 = vpack.c.bf16 %v710_v15, %v709_v13 }
  0xb1   :  { %796 = vst [vmem:[%s1223_s3 + $0x38] sm:$0xff] %v764_v16 }
  0xb2   :  { %797 = vst [vmem:[%s1223_s3 + $0x40] sm:$0xff] %v765_v17 }
  0xb4   :  { %v409_v18 = vpop.f32.mrf.mxu2  ;;  %v458_v20 = vpop.f32.mrf.mxu3 }
  0xb5   :  { %v711_v19 = vadd.f32 %v1058_v40, %v409_v18  ;;  %v313_v21 = vpop.f32.mrf.mxu0  ;;  %v712_v22 = vadd.f32 %v1060_v41, %v458_v20  ;;  %v362_v24 = vpop.f32.mrf.mxu1 }
  0xb6   :  { %v713_v23 = vadd.f32 %v1052_v33, %v313_v21  ;;  %v714_v25 = vadd.f32 %v1054_v34, %v362_v24 }
  0xb7   :  { %v766_v26 = vpack.c.bf16 %v712_v22, %v711_v19 }
  0xb8   :  { %v767_v27 = vpack.c.bf16 %v714_v25, %v713_v23 }
  0xb9   :  { %798 = vst [vmem:[%s1223_s3 + $0x48] sm:$0xff] %v766_v26 }
  0xba   :  { %799 = vst [vmem:[%s1223_s3 + $0x50] sm:$0xff] %v767_v27 }
  0xbc   :  { %v411_v28 = vpop.f32.mrf.mxu2  ;;  %v460_v30 = vpop.f32.mrf.mxu3 }
  0xbd   :  { %v715_v29 = vadd.f32 %v1058_v40, %v411_v28  ;;  %v316_v31 = vpop.f32.mrf.mxu0  ;;  %v716_v32 = vadd.f32 %v1060_v41, %v460_v30  ;;  %v365_v36 = vpop.f32.mrf.mxu1 }
  0xbe   :  { %v717_v35 = vadd.f32 %v1052_v33, %v316_v31  ;;  %v718_v37 = vadd.f32 %v1054_v34, %v365_v36 }
  0xbf   :  { %v768_v38 = vpack.c.bf16 %v716_v32, %v715_v29 }
  0xc0   :  { %v769_v39 = vpack.c.bf16 %v718_v37, %v717_v35 }
  0xc1   :  { %800 = vst [vmem:[%s1223_s3 + $0x58] sm:$0xff] %v768_v38 }
  0xc2   :  { %801 = vst [vmem:[%s1223_s3 + $0x60] sm:$0xff] %v769_v39 }
  0xc4   :  { %v414_v42 = vpop.f32.mrf.mxu2  ;;  %v463_v44 = vpop.f32.mrf.mxu3 }
  0xc5   :  { %v719_v43 = vadd.f32 %v1058_v40, %v414_v42  ;;  %v318_v45 = vpop.f32.mrf.mxu0  ;;  %v720_v46 = vadd.f32 %v1060_v41, %v463_v44  ;;  %v367_v48 = vpop.f32.mrf.mxu1 }
  0xc6   :  { %v721_v47 = vadd.f32 %v1052_v33, %v318_v45  ;;  %v722_v49 = vadd.f32 %v1054_v34, %v367_v48 }
  0xc7   :  { %v770_v50 = vpack.c.bf16 %v720_v46, %v719_v43 }
  0xc8   :  { %v771_v51 = vpack.c.bf16 %v722_v49, %v721_v47 }
  0xc9   :  { %802 = vst [vmem:[%s1223_s3 + $0x68] sm:$0xff] %v770_v50 }
  0xca   :  { %803 = vst [vmem:[%s1223_s3 + $0x70] sm:$0xff] %v771_v51 }
  0xcc   :  { %v416_v52 = vpop.f32.mrf.mxu2  ;;  %v465_v54 = vpop.f32.mrf.mxu3 }
  0xcd   :  { %v723_v53 = vadd.f32 %v1058_v40, %v416_v52  ;;  %v321_v55 = vpop.f32.mrf.mxu0  ;;  %v724_v56 = vadd.f32 %v1060_v41, %v465_v54  ;;  %v370_v58 = vpop.f32.mrf.mxu1 }
  0xce   :  { %v725_v57 = vadd.f32 %v1052_v33, %v321_v55  ;;  %v726_v59 = vadd.f32 %v1054_v34, %v370_v58 }
  0xcf   :  { %v772_v60 = vpack.c.bf16 %v724_v56, %v723_v53 }
  0xd0   :  { %v773_v61 = vpack.c.bf16 %v726_v59, %v725_v57 }
  0xd1   :  { %804 = vst [vmem:[%s1223_s3 + $0x78] sm:$0xff] %v772_v60 }
  0xd2   :  { %805 = vst [vmem:[%s1223_s3 + $0x80] sm:$0xff] %v773_v61 }
  0xd4   :  { %v419_v62 = vpop.f32.mrf.mxu2  ;;  %v468_v0 = vpop.f32.mrf.mxu3 }
  0xd5   :  { %v727_v63 = vadd.f32 %v1058_v40, %v419_v62  ;;  %v323_v1 = vpop.f32.mrf.mxu0  ;;  %v728_v2 = vadd.f32 %v1060_v41, %v468_v0  ;;  %v372_v4 = vpop.f32.mrf.mxu1 }
  0xd6   :  { %v729_v3 = vadd.f32 %v1052_v33, %v323_v1  ;;  %v730_v5 = vadd.f32 %v1054_v34, %v372_v4 }
  0xd7   :  { %v774_v6 = vpack.c.bf16 %v728_v2, %v727_v63 }
  0xd8   :  { %v775_v7 = vpack.c.bf16 %v730_v5, %v729_v3 }
  0xd9   :  { %806 = vst [vmem:[%s1223_s3 + $0x88] sm:$0xff] %v774_v6 }
  0xda   :  { %807 = vst [vmem:[%s1223_s3 + $0x90] sm:$0xff] %v775_v7 }
  0xdc   :  { %v421_v8 = vpop.f32.mrf.mxu2  ;;  %v470_v10 = vpop.f32.mrf.mxu3 }
  0xdd   :  { %v731_v9 = vadd.f32 %v1058_v40, %v421_v8  ;;  %v326_v11 = vpop.f32.mrf.mxu0  ;;  %v732_v12 = vadd.f32 %v1060_v41, %v470_v10  ;;  %v375_v14 = vpop.f32.mrf.mxu1 }
  0xde   :  { %v733_v13 = vadd.f32 %v1052_v33, %v326_v11  ;;  %v734_v15 = vadd.f32 %v1054_v34, %v375_v14 }
  0xdf   :  { %v776_v16 = vpack.c.bf16 %v732_v12, %v731_v9 }
  0xe0   :  { %v777_v17 = vpack.c.bf16 %v734_v15, %v733_v13 }
  0xe1   :  { %808 = vst [vmem:[%s1223_s3 + $0x98] sm:$0xff] %v776_v16 }
  0xe2   :  { %809 = vst [vmem:[%s1223_s3 + $0xa0] sm:$0xff] %v777_v17 }
  0xe4   :  { %v424_v18 = vpop.f32.mrf.mxu2  ;;  %v473_v20 = vpop.f32.mrf.mxu3 }
  0xe5   :  { %v735_v19 = vadd.f32 %v1058_v40, %v424_v18  ;;  %v328_v21 = vpop.f32.mrf.mxu0  ;;  %v736_v22 = vadd.f32 %v1060_v41, %v473_v20  ;;  %v377_v24 = vpop.f32.mrf.mxu1 }
  0xe6   :  { %v737_v23 = vadd.f32 %v1052_v33, %v328_v21  ;;  %v738_v25 = vadd.f32 %v1054_v34, %v377_v24 }
  0xe7   :  { %v778_v26 = vpack.c.bf16 %v736_v22, %v735_v19 }
  0xe8   :  { %v779_v27 = vpack.c.bf16 %v738_v25, %v737_v23 }
  0xe9   :  { %810 = vst [vmem:[%s1223_s3 + $0xa8] sm:$0xff] %v778_v26 }
  0xea   :  { %811 = vst [vmem:[%s1223_s3 + $0xb0] sm:$0xff] %v779_v27 }
  0xec   :  { %v426_v28 = vpop.f32.mrf.mxu2  ;;  %v475_v30 = vpop.f32.mrf.mxu3 }
  0xed   :  { %v739_v29 = vadd.f32 %v1058_v40, %v426_v28  ;;  %v331_v31 = vpop.f32.mrf.mxu0  ;;  %v740_v32 = vadd.f32 %v1060_v41, %v475_v30  ;;  %v380_v36 = vpop.f32.mrf.mxu1 }
  0xee   :  { %v741_v35 = vadd.f32 %v1052_v33, %v331_v31  ;;  %v742_v37 = vadd.f32 %v1054_v34, %v380_v36 }
  0xef   :  { %v780_v38 = vpack.c.bf16 %v740_v32, %v739_v29 }
  0xf0   :  { %v781_v39 = vpack.c.bf16 %v742_v37, %v741_v35 }
  0xf1   :  { %812 = vst [vmem:[%s1223_s3 + $0xb8] sm:$0xff] %v780_v38 }
  0xf2   :  { %813 = vst [vmem:[%s1223_s3 + $0xc0] sm:$0xff] %v781_v39 }
  0xf4   :  { %v429_v42 = vpop.f32.mrf.mxu2  ;;  %v478_v44 = vpop.f32.mrf.mxu3 }
  0xf5   :  { %v743_v43 = vadd.f32 %v1058_v40, %v429_v42  ;;  %v333_v45 = vpop.f32.mrf.mxu0  ;;  %v744_v46 = vadd.f32 %v1060_v41, %v478_v44  ;;  %v382_v48 = vpop.f32.mrf.mxu1 }
  0xf6   :  { %v745_v47 = vadd.f32 %v1052_v33, %v333_v45  ;;  %v746_v49 = vadd.f32 %v1054_v34, %v382_v48 }
  0xf7   :  { %v782_v50 = vpack.c.bf16 %v744_v46, %v743_v43 }
  0xf8   :  { %v783_v51 = vpack.c.bf16 %v746_v49, %v745_v47 }
  0xf9   :  { %814 = vst [vmem:[%s1223_s3 + $0xc8] sm:$0xff] %v782_v50 }
  0xfa   :  { %815 = vst [vmem:[%s1223_s3 + $0xd0] sm:$0xff] %v783_v51 }
  0xfc   :  { %v431_v52 = vpop.f32.mrf.mxu2  ;;  %v480_v54 = vpop.f32.mrf.mxu3 }
  0xfd   :  { %v747_v53 = vadd.f32 %v1058_v40, %v431_v52  ;;  %v336_v55 = vpop.f32.mrf.mxu0  ;;  %v748_v56 = vadd.f32 %v1060_v41, %v480_v54  ;;  %v385_v58 = vpop.f32.mrf.mxu1 }
  0xfe   :  { %v749_v57 = vadd.f32 %v1052_v33, %v336_v55  ;;  %v750_v59 = vadd.f32 %v1054_v34, %v385_v58 }
  0xff   :  { %v784_v60 = vpack.c.bf16 %v748_v56, %v747_v53 }
 0x100   :  { %v785_v61 = vpack.c.bf16 %v750_v59, %v749_v57 }
 0x101   :  { %816 = vst [vmem:[%s1223_s3 + $0xd8] sm:$0xff] %v784_v60 }
 0x102   :  { %817 = vst [vmem:[%s1223_s3 + $0xe0] sm:$0xff] %v785_v61 }
 0x104   :  { %v434_v62 = vpop.f32.mrf.mxu2  ;;  %v483_v0 = vpop.f32.mrf.mxu3 }
 0x105   :  { %v751_v63 = vadd.f32 %v1058_v40, %v434_v62  ;;  %v338_v1 = vpop.f32.mrf.mxu0  ;;  %v752_v2 = vadd.f32 %v1060_v41, %v483_v0  ;;  %v387_v4 = vpop.f32.mrf.mxu1 }
 0x106   :  { %v753_v3 = vadd.f32 %v1052_v33, %v338_v1  ;;  %v754_v5 = vadd.f32 %v1054_v34, %v387_v4 }
 0x107   :  { %v786_v6 = vpack.c.bf16 %v752_v2, %v751_v63 }
 0x108   :  { %v787_v7 = vpack.c.bf16 %v754_v5, %v753_v3 }
 0x109   :  { %818 = vst [vmem:[%s1223_s3 + $0xe8] sm:$0xff] %v786_v6 }
 0x10a   :  { %819 = vst [vmem:[%s1223_s3 + $0xf0] sm:$0xff] %v787_v7 }
 0x10c   :  { %v436_v8 = vpop.f32.mrf.mxu2  ;;  %v485_v10 = vpop.f32.mrf.mxu3 }
 0x10d   :  { %v755_v9 = vadd.f32 %v1058_v40, %v436_v8  ;;  %v756_v11 = vadd.f32 %v1060_v41, %v485_v10 }
 0x10f   :  { %v788_v33 = vpack.c.bf16 %v756_v11, %v755_v9 }
 0x111   :  { %820 = vst [vmem:[%s1223_s3 + $0xf8] sm:$0xff] %v788_v33 }
 0x112   :  { %825 = vsyncpa [#allocation4], 1 }

// kernel: rnn_forward.7
= control target key start
LH: loop header
LB: loop body
LE: loop exit
PB: predicated region body
PF: predicated region fallthrough
CT: control target
= control target key end

     0   :  { %8 = vsyncpa [#allocation4], 0  ;;  %s1181_s15 = smov [#allocation3]   ;;  %s1182_s17 = smov 256   ;;  %s1402_s0 = inlined_call_operand.vmem [shape: bf16[128,128], index: 0, kind: input, shape index: {}]   ;;  %s1403_s1 = inlined_call_operand.hbm [shape: bf16[128,512], index: 1, kind: input, shape index: {}]   ;;  %s1404_s2 = inlined_call_operand.vmem [shape: f32[1,512], index: 2, kind: input, shape index: {}]   ;;  %s1405_s3 = inlined_call_operand.vmem [shape: bf16[128,512], index: 3, kind: output, shape index: {}]  }
   0x1   :  { %s15_s14 = sshll.u32 %s1403_s1, 4  ;;  %s17_s16 = sshll.u32 %s1181_s15, 4  ;;  %s16_s14 = int_to_ptr.hbm [resolvable:$true] %s15_s14  ;;  %s18_s16 = int_to_ptr.vmem [resolvable:$true] %s17_s16 }
   0x2   :  { %s1183_s18 = smov 16  }
   0x3   :  { %23 = dma.hbm_to_vmem [thread:$0]  %s16_s14, 4096, %s18_s16, [#allocation4], %s1182_s17, %s1182_s17, %s1183_s18  }
   0x4   :  { %1179 = dma.done.wait [#allocation4], 4096  }
   0x5   :  { %1180 = vsyncadd [#allocation4], 4294963200  ;;  %v1098_v0 = vld [vmem:[#allocation3 + $0xe0] sm:$0xf]  ;;  %v1150_v1 = vld [vmem:[#allocation3 + $0xec] sm:$0xf0] }
   0x6   :  { %v1148_v2 = vld [vmem:[#allocation3 + $0xe4] sm:$0xf]  ;;  %v1099_v3 = vor.u32 %v1150_v1, %v1098_v0  ;;  %v1100_v4 = vld [vmem:[#allocation3 + $0xf0] sm:$0xf0]  ;;  %v1106_v5 = vld [vmem:[#allocation3 + $0xe8] sm:$0xf] }
   0x7   :  { %v1151_v6 = vld [vmem:[#allocation3 + $0xf4] sm:$0xf0]  ;;  %v1103_v7 = vor.u32 %v1148_v2, %v1100_v4  ;;  %v1149_v9 = vld [vmem:[#allocation3 + $0xec] sm:$0xf]  ;;  %v1108_v10 = vld [vmem:[#allocation3 + $0xf8] sm:$0xf0] }
   0x8   :  { %v1107_v8 = vor.u32 %v1151_v6, %v1106_v5  ;;  %v1082_v11 = vld [vmem:[#allocation3 + $0xc0] sm:$0xf]  ;;  %418 = vmatpush.bf16.msra.mxu0 %v1099_v3  ;;  %v1111_v12 = vor.u32 %v1149_v9, %v1108_v10  ;;  %v1146_v13 = vld [vmem:[#allocation3 + $0xcc] sm:$0xf0]  ;;  %v1144_v14 = vld [vmem:[#allocation3 + $0xc4] sm:$0xf] }
   0x9   :  { %v1084_v15 = vld [vmem:[#allocation3 + $0xd0] sm:$0xf0]  ;;  %467 = vmatpush.bf16.msra.mxu1 %v1103_v7  ;;  %v1083_v16 = vor.u32 %v1146_v13, %v1082_v11  ;;  %v1090_v18 = vld [vmem:[#allocation3 + $0xc8] sm:$0xf]  ;;  %v1147_v19 = vld [vmem:[#allocation3 + $0xd4] sm:$0xf0] }
   0xa   :  { %516 = vmatpush.bf16.msra.mxu2 %v1107_v8  ;;  %v1087_v17 = vor.u32 %v1144_v14, %v1084_v15  ;;  %v1145_v20 = vld [vmem:[#allocation3 + $0xcc] sm:$0xf]  ;;  %565 = vmatpush.bf16.msra.mxu3 %v1111_v12  ;;  %v1091_v21 = vor.u32 %v1147_v19, %v1090_v18  ;;  %v1092_v22 = vld [vmem:[#allocation3 + $0xd8] sm:$0xf0]  ;;  %v1066_v23 = vld [vmem:[#allocation3 + $0xa0] sm:$0xf] }
   0xb   :  { %v1142_v24 = vld [vmem:[#allocation3 + $0xac] sm:$0xf0]  ;;  %v1095_v25 = vor.u32 %v1145_v20, %v1092_v22  ;;  %v1140_v26 = vld [vmem:[#allocation3 + $0xa4] sm:$0xf]  ;;  %v1068_v27 = vld [vmem:[#allocation3 + $0xb0] sm:$0xf0] }
   0xc   :  { %v1074_v28 = vld [vmem:[#allocation3 + $0xa8] sm:$0xf]  ;;  %419 = vmatpush.bf16.msra.mxu0 %v1083_v16  ;;  %v1067_v29 = vor.u32 %v1142_v24, %v1066_v23  ;;  %v1143_v30 = vld [vmem:[#allocation3 + $0xb4] sm:$0xf0]  ;;  %v1141_v31 = vld [vmem:[#allocation3 + $0xac] sm:$0xf]  ;;  %v1071_v33 = vor.u32 %v1140_v26, %v1068_v27 }
   0xd   :  { %v1076_v32 = vld [vmem:[#allocation3 + $0xb8] sm:$0xf0]  ;;  %468 = vmatpush.bf16.msra.mxu1 %v1087_v17  ;;  %v1075_v34 = vor.u32 %v1143_v30, %v1074_v28  ;;  %v1050_v35 = vld [vmem:[#allocation3 + $0x80] sm:$0xf]  ;;  %v1138_v36 = vld [vmem:[#allocation3 + $0x8c] sm:$0xf0] }
   0xe   :  { %517 = vmatpush.bf16.msra.mxu2 %v1091_v21  ;;  %v1136_v37 = vld [vmem:[#allocation3 + $0x84] sm:$0xf]  ;;  %566 = vmatpush.bf16.msra.mxu3 %v1095_v25  ;;  %v1079_v38 = vor.u32 %v1141_v31, %v1076_v32  ;;  %v1052_v39 = vld [vmem:[#allocation3 + $0x90] sm:$0xf0]  ;;  %v1058_v40 = vld [vmem:[#allocation3 + $0x88] sm:$0xf]  ;;  %v1051_v44 = vor.u32 %v1138_v36, %v1050_v35 }
   0xf   :  { %v1139_v41 = vld [vmem:[#allocation3 + $0x94] sm:$0xf0]  ;;  %v1137_v42 = vld [vmem:[#allocation3 + $0x8c] sm:$0xf]  ;;  %v1060_v43 = vld [vmem:[#allocation3 + $0x98] sm:$0xf0]  ;;  %v1055_v45 = vor.u32 %v1136_v37, %v1052_v39 }
  0x10   :  { %420 = vmatpush.bf16.msra.mxu0 %v1067_v29  ;;  %v1059_v46 = vor.u32 %v1139_v41, %v1058_v40  ;;  %v1034_v47 = vld [vmem:[#allocation3 + $0x60] sm:$0xf]  ;;  %v1134_v48 = vld [vmem:[#allocation3 + $0x6c] sm:$0xf0]  ;;  %v1132_v49 = vld [vmem:[#allocation3 + $0x64] sm:$0xf]  ;;  %v1063_v50 = vor.u32 %v1137_v42, %v1060_v43 }
  0x11   :  { %469 = vmatpush.bf16.msra.mxu1 %v1071_v33  ;;  %v1036_v51 = vld [vmem:[#allocation3 + $0x70] sm:$0xf0]  ;;  %v1042_v52 = vld [vmem:[#allocation3 + $0x68] sm:$0xf]  ;;  %v1135_v53 = vld [vmem:[#allocation3 + $0x74] sm:$0xf0]  ;;  %v1035_v56 = vor.u32 %v1134_v48, %v1034_v47 }
  0x12   :  { %518 = vmatpush.bf16.msra.mxu2 %v1075_v34  ;;  %567 = vmatpush.bf16.msra.mxu3 %v1079_v38  ;;  %v1133_v54 = vld [vmem:[#allocation3 + $0x6c] sm:$0xf]  ;;  %v1044_v55 = vld [vmem:[#allocation3 + $0x78] sm:$0xf0]  ;;  %v1039_v57 = vor.u32 %v1132_v49, %v1036_v51  ;;  %v1043_v58 = vor.u32 %v1135_v53, %v1042_v52  ;;  %v1018_v59 = vld [vmem:[#allocation3 + $0x40] sm:$0xf] }
  0x13   :  { %v1130_v60 = vld [vmem:[#allocation3 + $0x4c] sm:$0xf0]  ;;  %v1128_v61 = vld [vmem:[#allocation3 + $0x44] sm:$0xf]  ;;  %v1047_v62 = vor.u32 %v1133_v54, %v1044_v55  ;;  %v1020_v63 = vld [vmem:[#allocation3 + $0x50] sm:$0xf0] }
  0x14   :  { %421 = vmatpush.bf16.msra.mxu0 %v1051_v44  ;;  %v1026_v0 = vld [vmem:[#allocation3 + $0x48] sm:$0xf]  ;;  %v1131_v1 = vld [vmem:[#allocation3 + $0x54] sm:$0xf0]  ;;  %v1129_v2 = vld [vmem:[#allocation3 + $0x4c] sm:$0xf]  ;;  %v1019_v4 = vor.u32 %v1130_v60, %v1018_v59  ;;  %v1023_v5 = vor.u32 %v1128_v61, %v1020_v63 }
  0x15   :  { %470 = vmatpush.bf16.msra.mxu1 %v1055_v45  ;;  %v1028_v3 = vld [vmem:[#allocation3 + $0x58] sm:$0xf0]  ;;  %v1027_v6 = vor.u32 %v1131_v1, %v1026_v0  ;;  %v1002_v7 = vld [vmem:[#allocation3 + $0x20] sm:$0xf]  ;;  %v1126_v8 = vld [vmem:[#allocation3 + $0x2c] sm:$0xf0] }
  0x16   :  { %519 = vmatpush.bf16.msra.mxu2 %v1059_v46  ;;  %568 = vmatpush.bf16.msra.mxu3 %v1063_v50  ;;  %v1124_v9 = vld [vmem:[#allocation3 + $0x24] sm:$0xf]  ;;  %v1031_v10 = vor.u32 %v1129_v2, %v1028_v3  ;;  %v1004_v11 = vld [vmem:[#allocation3 + $0x30] sm:$0xf0]  ;;  %v1010_v12 = vld [vmem:[#allocation3 + $0x28] sm:$0xf]  ;;  %v1003_v16 = vor.u32 %v1126_v8, %v1002_v7 }
  0x17   :  { %v1127_v13 = vld [vmem:[#allocation3 + $0x34] sm:$0xf0]  ;;  %v1125_v14 = vld [vmem:[#allocation3 + $0x2c] sm:$0xf]  ;;  %v1012_v15 = vld [vmem:[#allocation3 + $0x38] sm:$0xf0]  ;;  %v1007_v17 = vor.u32 %v1124_v9, %v1004_v11 }
  0x18   :  { %422 = vmatpush.bf16.msra.mxu0 %v1035_v56  ;;  %v1011_v18 = vor.u32 %v1127_v13, %v1010_v12  ;;  %v986_v19 = vld [vmem:[#allocation3] sm:$0xf]  ;;  %v1122_v20 = vld [vmem:[#allocation3 + $0xc] sm:$0xf0]  ;;  %v1120_v21 = vld [vmem:[#allocation3 + $0x4] sm:$0xf]  ;;  %v1015_v22 = vor.u32 %v1125_v14, %v1012_v15 }
  0x19   :  { %471 = vmatpush.bf16.msra.mxu1 %v1039_v57  ;;  %v988_v23 = vld [vmem:[#allocation3 + $0x10] sm:$0xf0]  ;;  %v994_v24 = vld [vmem:[#allocation3 + $0x8] sm:$0xf]  ;;  %v1123_v25 = vld [vmem:[#allocation3 + $0x14] sm:$0xf0]  ;;  %v987_v28 = vor.u32 %v1122_v20, %v986_v19 }
  0x1a   :  { %520 = vmatpush.bf16.msra.mxu2 %v1043_v58  ;;  %569 = vmatpush.bf16.msra.mxu3 %v1047_v62  ;;  %v1121_v26 = vld [vmem:[#allocation3 + $0xc] sm:$0xf]  ;;  %v996_v27 = vld [vmem:[#allocation3 + $0x18] sm:$0xf0]  ;;  %v991_v29 = vor.u32 %v1120_v21, %v988_v23  ;;  %v995_v30 = vor.u32 %v1123_v25, %v994_v24  ;;  %v1112_v32 = vld [vmem:[%s1402_s0] sm:$0xff] }
  0x1b   :  { %v999_v31 = vor.u32 %v1121_v26, %v996_v27  ;;  %v1113_v33 = vld [vmem:[%s1402_s0 + $0x8] sm:$0xff]  ;;  %v1114_v34 = vld [vmem:[%s1402_s0 + $0x10] sm:$0xff]  ;;  %v1115_v35 = vld [vmem:[%s1402_s0 + $0x18] sm:$0xff] }
  0x1c   :  { %423 = vmatpush.bf16.msra.mxu0 %v1019_v4  ;;  %v1116_v36 = vld [vmem:[%s1402_s0 + $0x20] sm:$0xff]  ;;  %v1117_v37 = vld [vmem:[%s1402_s0 + $0x28] sm:$0xff]  ;;  %v1118_v38 = vld [vmem:[%s1402_s0 + $0x30] sm:$0xff] }
  0x1d   :  { %472 = vmatpush.bf16.msra.mxu1 %v1023_v5  ;;  %v1119_v39 = vld [vmem:[%s1402_s0 + $0x38] sm:$0xff]  ;;  %v809_v40 = vld [vmem:[%s1404_s2] sm:$0xf] }
  0x1e   :  { %521 = vmatpush.bf16.msra.mxu2 %v1027_v6  ;;  %570 = vmatpush.bf16.msra.mxu3 %v1031_v10  ;;  %v1234_v41 = vperm.slane %v809_v40, 0  ;;  %v1236_v42 = vperm.slane %v809_v40, 1  ;;  %v1240_v48 = vperm.slane %v809_v40, 2  ;;  %v1242_v49 = vperm.slane %v809_v40, 3 }
  0x20   :  { %424 = vmatpush.bf16.msra.mxu0 %v1003_v16 }
  0x21   :  { %473 = vmatpush.bf16.msra.mxu1 %v1007_v17 }
  0x22   :  { %522 = vmatpush.bf16.msra.mxu2 %v1011_v18  ;;  %571 = vmatpush.bf16.msra.mxu3 %v1015_v22 }
  0x24   :  { %425 = vmatpush.bf16.msra.mxu0 %v987_v28 }
  0x25   :  { %474 = vmatpush.bf16.msra.mxu1 %v991_v29 }
  0x26   :  { %523 = vmatpush.bf16.msra.mxu2 %v995_v30  ;;  %572 = vmatpush.bf16.msra.mxu3 %v999_v31 }
  0x27   :  { %426 = vmatmul.bf16.vlgmr.msra.gmra.mxu0 %v1112_v32 }
  0x28   :  { %475 = vmatmul.bf16.vlgmr.msra.gmra.mxu1 %v1112_v32 }
  0x29   :  { %524 = vmatmul.bf16.vlgmr.msra.gmra.mxu2 %v1112_v32  ;;  %573 = vmatmul.bf16.vlgmr.msra.gmra.mxu3 %v1112_v32 }
  0x37   :  { %431 = vmatmul.bf16.gmra.mxu0 %v1113_v33 }
  0x38   :  { %480 = vmatmul.bf16.gmra.mxu1 %v1113_v33 }
  0x39   :  { %529 = vmatmul.bf16.gmra.mxu2 %v1113_v33  ;;  %578 = vmatmul.bf16.gmra.mxu3 %v1113_v33 }
  0x47   :  { %436 = vmatmul.bf16.gmra.mxu0 %v1114_v34 }
  0x48   :  { %485 = vmatmul.bf16.gmra.mxu1 %v1114_v34 }
  0x49   :  { %534 = vmatmul.bf16.gmra.mxu2 %v1114_v34  ;;  %583 = vmatmul.bf16.gmra.mxu3 %v1114_v34 }
  0x57   :  { %441 = vmatmul.bf16.gmra.mxu0 %v1115_v35 }
  0x58   :  { %490 = vmatmul.bf16.gmra.mxu1 %v1115_v35 }
  0x59   :  { %539 = vmatmul.bf16.gmra.mxu2 %v1115_v35  ;;  %588 = vmatmul.bf16.gmra.mxu3 %v1115_v35 }
  0x67   :  { %446 = vmatmul.bf16.gmra.mxu0 %v1116_v36 }
  0x68   :  { %495 = vmatmul.bf16.gmra.mxu1 %v1116_v36 }
  0x69   :  { %544 = vmatmul.bf16.gmra.mxu2 %v1116_v36  ;;  %593 = vmatmul.bf16.gmra.mxu3 %v1116_v36 }
  0x77   :  { %451 = vmatmul.bf16.gmra.mxu0 %v1117_v37 }
  0x78   :  { %500 = vmatmul.bf16.gmra.mxu1 %v1117_v37 }
  0x79   :  { %549 = vmatmul.bf16.gmra.mxu2 %v1117_v37  ;;  %598 = vmatmul.bf16.gmra.mxu3 %v1117_v37 }
  0x87   :  { %456 = vmatmul.bf16.gmra.mxu0 %v1118_v38 }
  0x88   :  { %505 = vmatmul.bf16.gmra.mxu1 %v1118_v38 }
  0x89   :  { %554 = vmatmul.bf16.gmra.mxu2 %v1118_v38  ;;  %603 = vmatmul.bf16.gmra.mxu3 %v1118_v38 }
  0x97   :  { %461 = vmatmul.bf16.gmra.mxu0 %v1119_v39 }
  0x98   :  { %510 = vmatmul.bf16.gmra.mxu1 %v1119_v39 }
  0x99   :  { %559 = vmatmul.bf16.gmra.mxu2 %v1119_v39  ;;  %608 = vmatmul.bf16.gmra.mxu3 %v1119_v39 }
  0xa4   :  { %v427_v43 = vpop.f32.mrf.mxu0 }
  0xa5   :  { %v819_v44 = vadd.f32 %v1234_v41, %v427_v43  ;;  %v476_v45 = vpop.f32.mrf.mxu1 }
  0xa6   :  { %v820_v46 = vadd.f32 %v1236_v42, %v476_v45 }
  0xa8   :  { %v883_v47 = vpack.c.bf16 %v820_v46, %v819_v44 }
  0xaa   :  { %915 = vst [vmem:[%s1405_s3] sm:$0xff] %v883_v47 }
  0xac   :  { %v525_v50 = vpop.f32.mrf.mxu2  ;;  %v574_v52 = vpop.f32.mrf.mxu3 }
  0xad   :  { %v821_v51 = vadd.f32 %v1240_v48, %v525_v50  ;;  %v429_v53 = vpop.f32.mrf.mxu0  ;;  %v822_v54 = vadd.f32 %v1242_v49, %v574_v52  ;;  %v478_v56 = vpop.f32.mrf.mxu1 }
  0xae   :  { %v823_v55 = vadd.f32 %v1234_v41, %v429_v53  ;;  %v824_v57 = vadd.f32 %v1236_v42, %v478_v56 }
  0xaf   :  { %v884_v58 = vpack.c.bf16 %v822_v54, %v821_v51 }
  0xb0   :  { %v885_v59 = vpack.c.bf16 %v824_v57, %v823_v55 }
  0xb1   :  { %916 = vst [vmem:[%s1405_s3 + $0x8] sm:$0xff] %v884_v58 }
  0xb2   :  { %917 = vst [vmem:[%s1405_s3 + $0x10] sm:$0xff] %v885_v59 }
  0xb4   :  { %v527_v60 = vpop.f32.mrf.mxu2  ;;  %v576_v62 = vpop.f32.mrf.mxu3 }
  0xb5   :  { %v825_v61 = vadd.f32 %v1240_v48, %v527_v60  ;;  %v432_v63 = vpop.f32.mrf.mxu0  ;;  %v826_v0 = vadd.f32 %v1242_v49, %v576_v62  ;;  %v481_v2 = vpop.f32.mrf.mxu1 }
  0xb6   :  { %v827_v1 = vadd.f32 %v1234_v41, %v432_v63  ;;  %v828_v3 = vadd.f32 %v1236_v42, %v481_v2 }
  0xb7   :  { %v886_v4 = vpack.c.bf16 %v826_v0, %v825_v61 }
  0xb8   :  { %v887_v5 = vpack.c.bf16 %v828_v3, %v827_v1 }
  0xb9   :  { %918 = vst [vmem:[%s1405_s3 + $0x18] sm:$0xff] %v886_v4 }
  0xba   :  { %919 = vst [vmem:[%s1405_s3 + $0x20] sm:$0xff] %v887_v5 }
  0xbc   :  { %v530_v6 = vpop.f32.mrf.mxu2  ;;  %v579_v8 = vpop.f32.mrf.mxu3 }
  0xbd   :  { %v829_v7 = vadd.f32 %v1240_v48, %v530_v6  ;;  %v434_v9 = vpop.f32.mrf.mxu0  ;;  %v830_v10 = vadd.f32 %v1242_v49, %v579_v8  ;;  %v483_v12 = vpop.f32.mrf.mxu1 }
  0xbe   :  { %v831_v11 = vadd.f32 %v1234_v41, %v434_v9  ;;  %v832_v13 = vadd.f32 %v1236_v42, %v483_v12 }
  0xbf   :  { %v888_v14 = vpack.c.bf16 %v830_v10, %v829_v7 }
  0xc0   :  { %v889_v15 = vpack.c.bf16 %v832_v13, %v831_v11 }
  0xc1   :  { %920 = vst [vmem:[%s1405_s3 + $0x28] sm:$0xff] %v888_v14 }
  0xc2   :  { %921 = vst [vmem:[%s1405_s3 + $0x30] sm:$0xff] %v889_v15 }
  0xc4   :  { %v532_v16 = vpop.f32.mrf.mxu2  ;;  %v581_v18 = vpop.f32.mrf.mxu3 }
  0xc5   :  { %v833_v17 = vadd.f32 %v1240_v48, %v532_v16  ;;  %v437_v19 = vpop.f32.mrf.mxu0  ;;  %v834_v20 = vadd.f32 %v1242_v49, %v581_v18  ;;  %v486_v22 = vpop.f32.mrf.mxu1 }
  0xc6   :  { %v835_v21 = vadd.f32 %v1234_v41, %v437_v19  ;;  %v836_v23 = vadd.f32 %v1236_v42, %v486_v22 }
  0xc7   :  { %v890_v24 = vpack.c.bf16 %v834_v20, %v833_v17 }
  0xc8   :  { %v891_v25 = vpack.c.bf16 %v836_v23, %v835_v21 }
  0xc9   :  { %922 = vst [vmem:[%s1405_s3 + $0x38] sm:$0xff] %v890_v24 }
  0xca   :  { %923 = vst [vmem:[%s1405_s3 + $0x40] sm:$0xff] %v891_v25 }
  0xcc   :  { %v535_v26 = vpop.f32.mrf.mxu2  ;;  %v584_v28 = vpop.f32.mrf.mxu3 }
  0xcd   :  { %v837_v27 = vadd.f32 %v1240_v48, %v535_v26  ;;  %v439_v29 = vpop.f32.mrf.mxu0  ;;  %v838_v30 = vadd.f32 %v1242_v49, %v584_v28  ;;  %v488_v32 = vpop.f32.mrf.mxu1 }
  0xce   :  { %v839_v31 = vadd.f32 %v1234_v41, %v439_v29  ;;  %v840_v33 = vadd.f32 %v1236_v42, %v488_v32 }
  0xcf   :  { %v892_v34 = vpack.c.bf16 %v838_v30, %v837_v27 }
  0xd0   :  { %v893_v35 = vpack.c.bf16 %v840_v33, %v839_v31 }
  0xd1   :  { %924 = vst [vmem:[%s1405_s3 + $0x48] sm:$0xff] %v892_v34 }
  0xd2   :  { %925 = vst [vmem:[%s1405_s3 + $0x50] sm:$0xff] %v893_v35 }
  0xd4   :  { %v537_v36 = vpop.f32.mrf.mxu2  ;;  %v586_v38 = vpop.f32.mrf.mxu3 }
  0xd5   :  { %v841_v37 = vadd.f32 %v1240_v48, %v537_v36  ;;  %v442_v39 = vpop.f32.mrf.mxu0  ;;  %v842_v40 = vadd.f32 %v1242_v49, %v586_v38  ;;  %v491_v44 = vpop.f32.mrf.mxu1 }
  0xd6   :  { %v843_v43 = vadd.f32 %v1234_v41, %v442_v39  ;;  %v844_v45 = vadd.f32 %v1236_v42, %v491_v44 }
  0xd7   :  { %v894_v46 = vpack.c.bf16 %v842_v40, %v841_v37 }
  0xd8   :  { %v895_v47 = vpack.c.bf16 %v844_v45, %v843_v43 }
  0xd9   :  { %926 = vst [vmem:[%s1405_s3 + $0x58] sm:$0xff] %v894_v46 }
  0xda   :  { %927 = vst [vmem:[%s1405_s3 + $0x60] sm:$0xff] %v895_v47 }
  0xdc   :  { %v540_v50 = vpop.f32.mrf.mxu2  ;;  %v589_v52 = vpop.f32.mrf.mxu3 }
  0xdd   :  { %v845_v51 = vadd.f32 %v1240_v48, %v540_v50  ;;  %v444_v53 = vpop.f32.mrf.mxu0  ;;  %v846_v54 = vadd.f32 %v1242_v49, %v589_v52  ;;  %v493_v56 = vpop.f32.mrf.mxu1 }
  0xde   :  { %v847_v55 = vadd.f32 %v1234_v41, %v444_v53  ;;  %v848_v57 = vadd.f32 %v1236_v42, %v493_v56 }
  0xdf   :  { %v896_v58 = vpack.c.bf16 %v846_v54, %v845_v51 }
  0xe0   :  { %v897_v59 = vpack.c.bf16 %v848_v57, %v847_v55 }
  0xe1   :  { %928 = vst [vmem:[%s1405_s3 + $0x68] sm:$0xff] %v896_v58 }
  0xe2   :  { %929 = vst [vmem:[%s1405_s3 + $0x70] sm:$0xff] %v897_v59 }
  0xe4   :  { %v542_v60 = vpop.f32.mrf.mxu2  ;;  %v591_v62 = vpop.f32.mrf.mxu3 }
  0xe5   :  { %v849_v61 = vadd.f32 %v1240_v48, %v542_v60  ;;  %v447_v63 = vpop.f32.mrf.mxu0  ;;  %v850_v0 = vadd.f32 %v1242_v49, %v591_v62  ;;  %v496_v2 = vpop.f32.mrf.mxu1 }
  0xe6   :  { %v851_v1 = vadd.f32 %v1234_v41, %v447_v63  ;;  %v852_v3 = vadd.f32 %v1236_v42, %v496_v2 }
  0xe7   :  { %v898_v4 = vpack.c.bf16 %v850_v0, %v849_v61 }
  0xe8   :  { %v899_v5 = vpack.c.bf16 %v852_v3, %v851_v1 }
  0xe9   :  { %930 = vst [vmem:[%s1405_s3 + $0x78] sm:$0xff] %v898_v4 }
  0xea   :  { %931 = vst [vmem:[%s1405_s3 + $0x80] sm:$0xff] %v899_v5 }
  0xec   :  { %v545_v6 = vpop.f32.mrf.mxu2  ;;  %v594_v8 = vpop.f32.mrf.mxu3 }
  0xed   :  { %v853_v7 = vadd.f32 %v1240_v48, %v545_v6  ;;  %v449_v9 = vpop.f32.mrf.mxu0  ;;  %v854_v10 = vadd.f32 %v1242_v49, %v594_v8  ;;  %v498_v12 = vpop.f32.mrf.mxu1 }
  0xee   :  { %v855_v11 = vadd.f32 %v1234_v41, %v449_v9  ;;  %v856_v13 = vadd.f32 %v1236_v42, %v498_v12 }
  0xef   :  { %v900_v14 = vpack.c.bf16 %v854_v10, %v853_v7 }
  0xf0   :  { %v901_v15 = vpack.c.bf16 %v856_v13, %v855_v11 }
  0xf1   :  { %932 = vst [vmem:[%s1405_s3 + $0x88] sm:$0xff] %v900_v14 }
  0xf2   :  { %933 = vst [vmem:[%s1405_s3 + $0x90] sm:$0xff] %v901_v15 }
  0xf4   :  { %v547_v16 = vpop.f32.mrf.mxu2  ;;  %v596_v18 = vpop.f32.mrf.mxu3 }
  0xf5   :  { %v857_v17 = vadd.f32 %v1240_v48, %v547_v16  ;;  %v452_v19 = vpop.f32.mrf.mxu0  ;;  %v858_v20 = vadd.f32 %v1242_v49, %v596_v18  ;;  %v501_v22 = vpop.f32.mrf.mxu1 }
  0xf6   :  { %v859_v21 = vadd.f32 %v1234_v41, %v452_v19  ;;  %v860_v23 = vadd.f32 %v1236_v42, %v501_v22 }
  0xf7   :  { %v902_v24 = vpack.c.bf16 %v858_v20, %v857_v17 }
  0xf8   :  { %v903_v25 = vpack.c.bf16 %v860_v23, %v859_v21 }
  0xf9   :  { %934 = vst [vmem:[%s1405_s3 + $0x98] sm:$0xff] %v902_v24 }
  0xfa   :  { %935 = vst [vmem:[%s1405_s3 + $0xa0] sm:$0xff] %v903_v25 }
  0xfc   :  { %v550_v26 = vpop.f32.mrf.mxu2  ;;  %v599_v28 = vpop.f32.mrf.mxu3 }
  0xfd   :  { %v861_v27 = vadd.f32 %v1240_v48, %v550_v26  ;;  %v454_v29 = vpop.f32.mrf.mxu0  ;;  %v862_v30 = vadd.f32 %v1242_v49, %v599_v28  ;;  %v503_v32 = vpop.f32.mrf.mxu1 }
  0xfe   :  { %v863_v31 = vadd.f32 %v1234_v41, %v454_v29  ;;  %v864_v33 = vadd.f32 %v1236_v42, %v503_v32 }
  0xff   :  { %v904_v34 = vpack.c.bf16 %v862_v30, %v861_v27 }
 0x100   :  { %v905_v35 = vpack.c.bf16 %v864_v33, %v863_v31 }
 0x101   :  { %936 = vst [vmem:[%s1405_s3 + $0xa8] sm:$0xff] %v904_v34 }
 0x102   :  { %937 = vst [vmem:[%s1405_s3 + $0xb0] sm:$0xff] %v905_v35 }
 0x104   :  { %v552_v36 = vpop.f32.mrf.mxu2  ;;  %v601_v38 = vpop.f32.mrf.mxu3 }
 0x105   :  { %v865_v37 = vadd.f32 %v1240_v48, %v552_v36  ;;  %v457_v39 = vpop.f32.mrf.mxu0  ;;  %v866_v40 = vadd.f32 %v1242_v49, %v601_v38  ;;  %v506_v44 = vpop.f32.mrf.mxu1 }
 0x106   :  { %v867_v43 = vadd.f32 %v1234_v41, %v457_v39  ;;  %v868_v45 = vadd.f32 %v1236_v42, %v506_v44 }
 0x107   :  { %v906_v46 = vpack.c.bf16 %v866_v40, %v865_v37 }
 0x108   :  { %v907_v47 = vpack.c.bf16 %v868_v45, %v867_v43 }
 0x109   :  { %938 = vst [vmem:[%s1405_s3 + $0xb8] sm:$0xff] %v906_v46 }
 0x10a   :  { %939 = vst [vmem:[%s1405_s3 + $0xc0] sm:$0xff] %v907_v47 }
 0x10c   :  { %v555_v50 = vpop.f32.mrf.mxu2  ;;  %v604_v52 = vpop.f32.mrf.mxu3 }
 0x10d   :  { %v869_v51 = vadd.f32 %v1240_v48, %v555_v50  ;;  %v459_v53 = vpop.f32.mrf.mxu0  ;;  %v870_v54 = vadd.f32 %v1242_v49, %v604_v52  ;;  %v508_v56 = vpop.f32.mrf.mxu1 }
 0x10e   :  { %v871_v55 = vadd.f32 %v1234_v41, %v459_v53  ;;  %v872_v57 = vadd.f32 %v1236_v42, %v508_v56 }
 0x10f   :  { %v908_v58 = vpack.c.bf16 %v870_v54, %v869_v51 }
 0x110   :  { %v909_v59 = vpack.c.bf16 %v872_v57, %v871_v55 }
 0x111   :  { %940 = vst [vmem:[%s1405_s3 + $0xc8] sm:$0xff] %v908_v58 }
 0x112   :  { %941 = vst [vmem:[%s1405_s3 + $0xd0] sm:$0xff] %v909_v59 }
 0x114   :  { %v557_v60 = vpop.f32.mrf.mxu2  ;;  %v606_v62 = vpop.f32.mrf.mxu3 }
 0x115   :  { %v873_v61 = vadd.f32 %v1240_v48, %v557_v60  ;;  %v462_v63 = vpop.f32.mrf.mxu0  ;;  %v874_v0 = vadd.f32 %v1242_v49, %v606_v62  ;;  %v511_v2 = vpop.f32.mrf.mxu1 }
 0x116   :  { %v875_v1 = vadd.f32 %v1234_v41, %v462_v63  ;;  %v876_v3 = vadd.f32 %v1236_v42, %v511_v2 }
 0x117   :  { %v910_v4 = vpack.c.bf16 %v874_v0, %v873_v61 }
 0x118   :  { %v911_v5 = vpack.c.bf16 %v876_v3, %v875_v1 }
 0x119   :  { %942 = vst [vmem:[%s1405_s3 + $0xd8] sm:$0xff] %v910_v4 }
 0x11a   :  { %943 = vst [vmem:[%s1405_s3 + $0xe0] sm:$0xff] %v911_v5 }
 0x11c   :  { %v560_v6 = vpop.f32.mrf.mxu2  ;;  %v609_v8 = vpop.f32.mrf.mxu3 }
 0x11d   :  { %v877_v7 = vadd.f32 %v1240_v48, %v560_v6  ;;  %v464_v9 = vpop.f32.mrf.mxu0  ;;  %v878_v10 = vadd.f32 %v1242_v49, %v609_v8  ;;  %v513_v12 = vpop.f32.mrf.mxu1 }
 0x11e   :  { %v879_v11 = vadd.f32 %v1234_v41, %v464_v9  ;;  %v880_v13 = vadd.f32 %v1236_v42, %v513_v12 }
 0x11f   :  { %v912_v14 = vpack.c.bf16 %v878_v10, %v877_v7 }
 0x120   :  { %v913_v15 = vpack.c.bf16 %v880_v13, %v879_v11 }
 0x121   :  { %944 = vst [vmem:[%s1405_s3 + $0xe8] sm:$0xff] %v912_v14 }
 0x122   :  { %945 = vst [vmem:[%s1405_s3 + $0xf0] sm:$0xff] %v913_v15 }
 0x124   :  { %v562_v16 = vpop.f32.mrf.mxu2  ;;  %v611_v18 = vpop.f32.mrf.mxu3 }
 0x125   :  { %v881_v17 = vadd.f32 %v1240_v48, %v562_v16  ;;  %v882_v19 = vadd.f32 %v1242_v49, %v611_v18 }
 0x127   :  { %v914_v41 = vpack.c.bf16 %v882_v19, %v881_v17 }
 0x129   :  { %946 = vst [vmem:[%s1405_s3 + $0xf8] sm:$0xff] %v914_v41 }
 0x12a   :  { %951 = vsyncpa [#allocation4], 1 }

// kernel: rnn_forward.8
= control target key start
LH: loop header
LB: loop body
LE: loop exit
PB: predicated region body
PF: predicated region fallthrough
CT: control target
= control target key end

     0   :  { %7 = vsyncpa [#allocation5], 0  ;;  %s2528_s12 = smov [#allocation4]   ;;  %s2529_s14 = smov 256   ;;  %s3292_s0 = inlined_call_operand.vmem [shape: bf16[8,16,512], index: 0, kind: input, shape index: {}]   ;;  %s3293_s1 = inlined_call_operand.hbm [shape: bf16[128,512], index: 1, kind: input, shape index: {}]   ;;  %s3294_s2 = inlined_call_operand.vmem [shape: bf16[8,16,128], index: 2, kind: output, shape index: {}]  }
   0x1   :  { %s14_s11 = sshll.u32 %s3293_s1, 4  ;;  %s16_s13 = sshll.u32 %s2528_s12, 4  ;;  %s15_s11 = int_to_ptr.hbm [resolvable:$true] %s14_s11  ;;  %s17_s13 = int_to_ptr.vmem [resolvable:$true] %s16_s13 }
   0x2   :  { %s2530_s15 = smov 16  }
   0x3   :  { %22 = dma.hbm_to_vmem [thread:$0]  %s15_s11, 4096, %s17_s13, [#allocation5], %s2529_s14, %s2529_s14, %s2530_s15  }
   0x4   :  { %2526 = dma.done.wait [#allocation5], 4096  }
   0x5   :  { %2527 = vsyncadd [#allocation5], 4294963200  ;;  %v2059_v0 = vld [vmem:[#allocation4 + $0xe0] sm:$0xf]  ;;  %v2193_v1 = vld [vmem:[#allocation4 + $0xec] sm:$0xf0] }
   0x6   :  { %v2191_v2 = vld [vmem:[#allocation4 + $0xe4] sm:$0xf]  ;;  %v2550_v3 = vor.u32 %v2193_v1, %v2059_v0  ;;  %v2061_v4 = vld [vmem:[#allocation4 + $0xf0] sm:$0xf0]  ;;  %v2192_v5 = vld [vmem:[#allocation4 + $0xec] sm:$0xf] }
   0x7   :  { %v2069_v6 = vld [vmem:[#allocation4 + $0xf8] sm:$0xf0]  ;;  %v2552_v7 = vor.u32 %v2191_v2, %v2061_v4  ;;  %v2043_v9 = vld [vmem:[#allocation4 + $0xc0] sm:$0xf]  ;;  %v2189_v10 = vld [vmem:[#allocation4 + $0xcc] sm:$0xf0] }
   0x8   :  { %v2554_v8 = vor.u32 %v2192_v5, %v2069_v6  ;;  %v2187_v11 = vld [vmem:[#allocation4 + $0xc4] sm:$0xf]  ;;  %236 = vmatpush.bf16.msra.mxu0 %v2550_v3  ;;  %v2557_v12 = vor.u32 %v2189_v10, %v2043_v9  ;;  %v2045_v13 = vld [vmem:[#allocation4 + $0xd0] sm:$0xf0]  ;;  %v2188_v14 = vld [vmem:[#allocation4 + $0xcc] sm:$0xf] }
   0x9   :  { %v2053_v15 = vld [vmem:[#allocation4 + $0xd8] sm:$0xf0]  ;;  %250 = vmatpush.bf16.msra.mxu1 %v2552_v7  ;;  %v2561_v16 = vor.u32 %v2187_v11, %v2045_v13  ;;  %v2067_v18 = vld [vmem:[#allocation4 + $0xe8] sm:$0xf]  ;;  %v2194_v19 = vld [vmem:[#allocation4 + $0xf4] sm:$0xf0] }
   0xa   :  { %278 = vmatpush.bf16.msra.mxu3 %v2554_v8  ;;  %v2563_v17 = vor.u32 %v2188_v14, %v2053_v15  ;;  %v2027_v20 = vld [vmem:[#allocation4 + $0xa0] sm:$0xf]  ;;  %v2565_v21 = vor.u32 %v2194_v19, %v2067_v18  ;;  %v2185_v22 = vld [vmem:[#allocation4 + $0xac] sm:$0xf0]  ;;  %v2183_v23 = vld [vmem:[#allocation4 + $0xa4] sm:$0xf] }
   0xb   :  { %v2029_v24 = vld [vmem:[#allocation4 + $0xb0] sm:$0xf0]  ;;  %v2184_v25 = vld [vmem:[#allocation4 + $0xac] sm:$0xf]  ;;  %v2037_v26 = vld [vmem:[#allocation4 + $0xb8] sm:$0xf0]  ;;  %v2569_v28 = vor.u32 %v2185_v22, %v2027_v20 }
   0xc   :  { %v2051_v27 = vld [vmem:[#allocation4 + $0xc8] sm:$0xf]  ;;  %237 = vmatpush.bf16.msra.mxu0 %v2557_v12  ;;  %264 = vmatpush.bf16.msra.mxu2 %v2565_v21  ;;  %v2190_v29 = vld [vmem:[#allocation4 + $0xd4] sm:$0xf0]  ;;  %v2011_v30 = vld [vmem:[#allocation4 + $0x80] sm:$0xf]  ;;  %v2573_v32 = vor.u32 %v2183_v23, %v2029_v24  ;;  %v2575_v33 = vor.u32 %v2184_v25, %v2037_v26 }
   0xd   :  { %v2181_v31 = vld [vmem:[#allocation4 + $0x8c] sm:$0xf0]  ;;  %251 = vmatpush.bf16.msra.mxu1 %v2561_v16  ;;  %v2577_v34 = vor.u32 %v2190_v29, %v2051_v27  ;;  %v2179_v35 = vld [vmem:[#allocation4 + $0x84] sm:$0xf]  ;;  %v2013_v36 = vld [vmem:[#allocation4 + $0x90] sm:$0xf0] }
   0xe   :  { %279 = vmatpush.bf16.msra.mxu3 %v2563_v17  ;;  %v2180_v37 = vld [vmem:[#allocation4 + $0x8c] sm:$0xf]  ;;  %v2021_v38 = vld [vmem:[#allocation4 + $0x98] sm:$0xf0]  ;;  %v2035_v39 = vld [vmem:[#allocation4 + $0xa8] sm:$0xf]  ;;  %v2581_v41 = vor.u32 %v2181_v31, %v2011_v30  ;;  %v2587_v45 = vor.u32 %v2179_v35, %v2013_v36 }
   0xf   :  { %v2186_v40 = vld [vmem:[#allocation4 + $0xb4] sm:$0xf0]  ;;  %v1995_v43 = vld [vmem:[#allocation4 + $0x60] sm:$0xf]  ;;  %v2177_v44 = vld [vmem:[#allocation4 + $0x6c] sm:$0xf0]  ;;  %v2589_v46 = vor.u32 %v2180_v37, %v2021_v38 }
  0x10   :  { %238 = vmatpush.bf16.msra.mxu0 %v2569_v28  ;;  %265 = vmatpush.bf16.msra.mxu2 %v2577_v34  ;;  %v2583_v42 = vor.u32 %v2186_v40, %v2035_v39  ;;  %v2175_v47 = vld [vmem:[#allocation4 + $0x64] sm:$0xf]  ;;  %v2019_v48 = vld [vmem:[#allocation4 + $0x88] sm:$0xf]  ;;  %v2182_v49 = vld [vmem:[#allocation4 + $0x94] sm:$0xf0]  ;;  %v2593_v53 = vor.u32 %v2177_v44, %v1995_v43 }
  0x11   :  { %252 = vmatpush.bf16.msra.mxu1 %v2573_v32  ;;  %v1997_v50 = vld [vmem:[#allocation4 + $0x70] sm:$0xf0]  ;;  %v2176_v51 = vld [vmem:[#allocation4 + $0x6c] sm:$0xf]  ;;  %v2005_v52 = vld [vmem:[#allocation4 + $0x78] sm:$0xf0]  ;;  %v2595_v54 = vor.u32 %v2182_v49, %v2019_v48 }
  0x12   :  { %280 = vmatpush.bf16.msra.mxu3 %v2575_v33  ;;  %v1979_v55 = vld [vmem:[#allocation4 + $0x40] sm:$0xf]  ;;  %v2173_v56 = vld [vmem:[#allocation4 + $0x4c] sm:$0xf0]  ;;  %v2599_v57 = vor.u32 %v2175_v47, %v1997_v50  ;;  %v2601_v58 = vor.u32 %v2176_v51, %v2005_v52  ;;  %v2171_v59 = vld [vmem:[#allocation4 + $0x44] sm:$0xf] }
  0x13   :  { %v2003_v60 = vld [vmem:[#allocation4 + $0x68] sm:$0xf]  ;;  %v2178_v61 = vld [vmem:[#allocation4 + $0x74] sm:$0xf0]  ;;  %v1981_v62 = vld [vmem:[#allocation4 + $0x50] sm:$0xf0]  ;;  %v2605_v1 = vor.u32 %v2173_v56, %v1979_v55 }
  0x14   :  { %239 = vmatpush.bf16.msra.mxu0 %v2581_v41  ;;  %266 = vmatpush.bf16.msra.mxu2 %v2583_v42  ;;  %v2172_v63 = vld [vmem:[#allocation4 + $0x4c] sm:$0xf]  ;;  %v1989_v0 = vld [vmem:[#allocation4 + $0x58] sm:$0xf0]  ;;  %v2607_v2 = vor.u32 %v2178_v61, %v2003_v60  ;;  %v1963_v4 = vld [vmem:[#allocation4 + $0x20] sm:$0xf]  ;;  %v2611_v6 = vor.u32 %v2171_v59, %v1981_v62 }
  0x15   :  { %253 = vmatpush.bf16.msra.mxu1 %v2587_v45  ;;  %v2169_v5 = vld [vmem:[#allocation4 + $0x2c] sm:$0xf0]  ;;  %v2613_v9 = vor.u32 %v2172_v63, %v1989_v0  ;;  %v2167_v10 = vld [vmem:[#allocation4 + $0x24] sm:$0xf]  ;;  %v1987_v11 = vld [vmem:[#allocation4 + $0x48] sm:$0xf] }
  0x16   :  { %281 = vmatpush.bf16.msra.mxu3 %v2589_v46  ;;  %v2174_v13 = vld [vmem:[#allocation4 + $0x54] sm:$0xf0]  ;;  %v1965_v14 = vld [vmem:[#allocation4 + $0x30] sm:$0xf0]  ;;  %v2168_v15 = vld [vmem:[#allocation4 + $0x2c] sm:$0xf]  ;;  %v2617_v19 = vor.u32 %v2169_v5, %v1963_v4 }
  0x17   :  { %v1973_v18 = vld [vmem:[#allocation4 + $0x38] sm:$0xf0]  ;;  %v2619_v20 = vor.u32 %v2174_v13, %v1987_v11  ;;  %v1947_v22 = vld [vmem:[#allocation4] sm:$0xf]  ;;  %v2165_v23 = vld [vmem:[#allocation4 + $0xc] sm:$0xf0]  ;;  %v2623_v24 = vor.u32 %v2167_v10, %v1965_v14 }
  0x18   :  { %240 = vmatpush.bf16.msra.mxu0 %v2593_v53  ;;  %267 = vmatpush.bf16.msra.mxu2 %v2595_v54  ;;  %v2625_v25 = vor.u32 %v2168_v15, %v1973_v18  ;;  %v2163_v26 = vld [vmem:[#allocation4 + $0x4] sm:$0xf]  ;;  %v1971_v27 = vld [vmem:[#allocation4 + $0x28] sm:$0xf]  ;;  %v2170_v29 = vld [vmem:[#allocation4 + $0x34] sm:$0xf0]  ;;  %v2629_v36 = vor.u32 %v2165_v23, %v1947_v22 }
  0x19   :  { %254 = vmatpush.bf16.msra.mxu1 %v2599_v57  ;;  %v1949_v30 = vld [vmem:[#allocation4 + $0x10] sm:$0xf0]  ;;  %v2164_v31 = vld [vmem:[#allocation4 + $0xc] sm:$0xf]  ;;  %v1957_v35 = vld [vmem:[#allocation4 + $0x18] sm:$0xf0]  ;;  %v2631_v37 = vor.u32 %v2170_v29, %v1971_v27 }
  0x1a   :  { %282 = vmatpush.bf16.msra.mxu3 %v2601_v58  ;;  %v2635_v38 = vor.u32 %v2163_v26, %v1949_v30  ;;  %v2637_v39 = vor.u32 %v2164_v31, %v1957_v35  ;;  %v1955_v40 = vld [vmem:[#allocation4 + $0x8] sm:$0xf]  ;;  %v2166_v43 = vld [vmem:[#allocation4 + $0x14] sm:$0xf0]  ;;  %v2531_v47 = vmov 0.0|0.0   ;;  %v71_v48 = vld [vmem:[%s3292_s0] sm:$0xff] }
  0x1b   :  { %v2643_v44 = vor.u32 %v2166_v43, %v1955_v40  ;;  %v292_v49 = vunpack.c.l.bf16 %v71_v48  ;;  %v293_v50 = vunpack.c.h.bf16 %v71_v48  ;;  %v72_v56 = vld [vmem:[%s3292_s0 + $0x8] sm:$0xff]  ;;  %v73_v60 = vld [vmem:[%s3292_s0 + $0x10] sm:$0xff]  ;;  %v74_v15 = vld [vmem:[%s3292_s0 + $0x18] sm:$0xff] }
  0x1c   :  { %241 = vmatpush.bf16.msra.mxu0 %v2605_v1  ;;  %268 = vmatpush.bf16.msra.mxu2 %v2607_v2  ;;  %v295_v63 = vunpack.c.h.bf16 %v72_v56  ;;  %v296_v0 = vunpack.c.l.bf16 %v73_v60  ;;  %v297_v4 = vunpack.c.h.bf16 %v73_v60  ;;  %v299_v31 = vunpack.c.h.bf16 %v74_v15 }
  0x1d   :  { %255 = vmatpush.bf16.msra.mxu1 %v2611_v6  ;;  %v294_v43 = vunpack.c.l.bf16 %v72_v56 }
  0x1e   :  { %283 = vmatpush.bf16.msra.mxu3 %v2613_v9 }
  0x20   :  { %242 = vmatpush.bf16.msra.mxu0 %v2617_v19  ;;  %269 = vmatpush.bf16.msra.mxu2 %v2619_v20 }
  0x21   :  { %256 = vmatpush.bf16.msra.mxu1 %v2623_v24 }
  0x22   :  { %284 = vmatpush.bf16.msra.mxu3 %v2625_v25 }
  0x24   :  { %243 = vmatpush.bf16.msra.mxu0 %v2629_v36  ;;  %270 = vmatpush.bf16.msra.mxu2 %v2631_v37 }
  0x25   :  { %257 = vmatpush.bf16.msra.mxu1 %v2635_v38 }
  0x26   :  { %285 = vmatpush.bf16.msra.mxu3 %v2637_v39 }
  0x27   :  { %244 = vmatmul.bf16.vlgmr.msra.gmra.mxu0 %v2531_v47 }
  0x28   :  { %449 = vmatpush.bf16.msrb.mxu0 %v2550_v3  ;;  %258 = vmatmul.bf16.vlgmr.msra.gmra.mxu1 %v2531_v47 }
  0x29   :  { %463 = vmatpush.bf16.msrb.mxu1 %v2552_v7  ;;  %286 = vmatmul.bf16.vlgmr.msra.gmra.mxu3 %v2531_v47 }
  0x2a   :  { %491 = vmatpush.bf16.msrb.mxu3 %v2554_v8  ;;  %271 = vmatpush.bf16.msra.mxu2 %v2643_v44 }
  0x2c   :  { %450 = vmatpush.bf16.msrb.mxu0 %v2557_v12 }
  0x2d   :  { %464 = vmatpush.bf16.msrb.mxu1 %v2561_v16  ;;  %272 = vmatmul.bf16.vlgmr.msra.gmra.mxu2 %v2531_v47 }
  0x2e   :  { %477 = vmatpush.bf16.msrb.mxu2 %v2565_v21  ;;  %492 = vmatpush.bf16.msrb.mxu3 %v2563_v17 }
  0x30   :  { %451 = vmatpush.bf16.msrb.mxu0 %v2569_v28 }
  0x31   :  { %465 = vmatpush.bf16.msrb.mxu1 %v2573_v32 }
  0x32   :  { %478 = vmatpush.bf16.msrb.mxu2 %v2577_v34  ;;  %493 = vmatpush.bf16.msrb.mxu3 %v2575_v33 }
  0x34   :  { %452 = vmatpush.bf16.msrb.mxu0 %v2581_v41 }
  0x35   :  { %466 = vmatpush.bf16.msrb.mxu1 %v2587_v45 }
  0x36   :  { %479 = vmatpush.bf16.msrb.mxu2 %v2583_v42  ;;  %494 = vmatpush.bf16.msrb.mxu3 %v2589_v46 }
  0x38   :  { %453 = vmatpush.bf16.msrb.mxu0 %v2593_v53 }
  0x39   :  { %467 = vmatpush.bf16.msrb.mxu1 %v2599_v57 }
  0x3a   :  { %480 = vmatpush.bf16.msrb.mxu2 %v2595_v54  ;;  %495 = vmatpush.bf16.msrb.mxu3 %v2601_v58 }
  0x3c   :  { %454 = vmatpush.bf16.msrb.mxu0 %v2605_v1 }
  0x3d   :  { %468 = vmatpush.bf16.msrb.mxu1 %v2611_v6 }
  0x3e   :  { %481 = vmatpush.bf16.msrb.mxu2 %v2607_v2  ;;  %496 = vmatpush.bf16.msrb.mxu3 %v2613_v9 }
  0x40   :  { %455 = vmatpush.bf16.msrb.mxu0 %v2617_v19 }
  0x41   :  { %469 = vmatpush.bf16.msrb.mxu1 %v2623_v24 }
  0x42   :  { %482 = vmatpush.bf16.msrb.mxu2 %v2619_v20  ;;  %497 = vmatpush.bf16.msrb.mxu3 %v2625_v25 }
  0x44   :  { %456 = vmatpush.bf16.msrb.mxu0 %v2629_v36 }
  0x45   :  { %470 = vmatpush.bf16.msrb.mxu1 %v2635_v38 }
  0x46   :  { %483 = vmatpush.bf16.msrb.mxu2 %v2631_v37  ;;  %498 = vmatpush.bf16.msrb.mxu3 %v2637_v39 }
  0x48   :  { %663 = vmatpush.bf16.msra.mxu0 %v2550_v3 }
  0x49   :  { %677 = vmatpush.bf16.msra.mxu1 %v2552_v7 }
  0x4a   :  { %705 = vmatpush.bf16.msra.mxu3 %v2554_v8  ;;  %484 = vmatpush.bf16.msrb.mxu2 %v2643_v44 }
  0x4c   :  { %664 = vmatpush.bf16.msra.mxu0 %v2557_v12 }
  0x4d   :  { %678 = vmatpush.bf16.msra.mxu1 %v2561_v16 }
  0x4e   :  { %691 = vmatpush.bf16.msra.mxu2 %v2565_v21  ;;  %706 = vmatpush.bf16.msra.mxu3 %v2563_v17 }
  0x50   :  { %665 = vmatpush.bf16.msra.mxu0 %v2569_v28 }
  0x51   :  { %679 = vmatpush.bf16.msra.mxu1 %v2573_v32 }
  0x52   :  { %692 = vmatpush.bf16.msra.mxu2 %v2577_v34  ;;  %707 = vmatpush.bf16.msra.mxu3 %v2575_v33 }
  0x54   :  { %666 = vmatpush.bf16.msra.mxu0 %v2581_v41 }
  0x55   :  { %680 = vmatpush.bf16.msra.mxu1 %v2587_v45 }
  0x56   :  { %693 = vmatpush.bf16.msra.mxu2 %v2583_v42  ;;  %708 = vmatpush.bf16.msra.mxu3 %v2589_v46 }
  0x58   :  { %667 = vmatpush.bf16.msra.mxu0 %v2593_v53 }
  0x59   :  { %681 = vmatpush.bf16.msra.mxu1 %v2599_v57 }
  0x5a   :  { %694 = vmatpush.bf16.msra.mxu2 %v2595_v54  ;;  %709 = vmatpush.bf16.msra.mxu3 %v2601_v58 }
  0x5c   :  { %668 = vmatpush.bf16.msra.mxu0 %v2605_v1 }
  0x5d   :  { %682 = vmatpush.bf16.msra.mxu1 %v2611_v6 }
  0x5e   :  { %695 = vmatpush.bf16.msra.mxu2 %v2607_v2  ;;  %710 = vmatpush.bf16.msra.mxu3 %v2613_v9 }
  0x60   :  { %669 = vmatpush.bf16.msra.mxu0 %v2617_v19 }
  0x61   :  { %683 = vmatpush.bf16.msra.mxu1 %v2623_v24 }
  0x62   :  { %696 = vmatpush.bf16.msra.mxu2 %v2619_v20  ;;  %711 = vmatpush.bf16.msra.mxu3 %v2625_v25 }
  0x64   :  { %670 = vmatpush.bf16.msra.mxu0 %v2629_v36 }
  0x65   :  { %684 = vmatpush.bf16.msra.mxu1 %v2635_v38 }
  0x66   :  { %697 = vmatpush.bf16.msra.mxu2 %v2631_v37  ;;  %712 = vmatpush.bf16.msra.mxu3 %v2637_v39 }
  0x6a   :  { %698 = vmatpush.bf16.msra.mxu2 %v2643_v44 }
  0xa4   :  { %v245_v51 = vpop.f32.mrf.mxu0 }
  0xa5   :  { %v300_v52 = vadd.f32 %v292_v49, %v245_v51  ;;  %v259_v55 = vpop.f32.mrf.mxu1 }
  0xa6   :  { %v301_v59 = vadd.f32 %v293_v50, %v259_v55 }
  0xa7   :  { %v2073_v61 = vmul.f32 -1.442695, %v300_v52 }
  0xa8   :  { %v2075_v62 = vmul.f32 -1.442695, %v301_v59 }
  0xa9   :  { %2246 = vpow2.f32 %v2073_v61 }
  0xaa   :  { %2248 = vpow2.f32 %v2075_v62 }
  0xac   :  { %v287_v5 = vpop.f32.mrf.mxu3  ;;  %v247_v11 = vpop.f32.mrf.mxu0 }
  0xad   :  { %v303_v10 = vadd.f32 %v295_v63, %v287_v5  ;;  %v304_v13 = vadd.f32 %v296_v0, %v247_v11  ;;  %v261_v14 = vpop.f32.mrf.mxu1 }
  0xae   :  { %v305_v22 = vadd.f32 %v297_v4, %v261_v14  ;;  %v298_v14 = vunpack.c.l.bf16 %v74_v15 }
  0xaf   :  { %v2077_v18 = vmul.f32 -1.442695, %v303_v10  ;;  %v2247_v23 = vpop.eup %2246  ;;  %v2074_v26 = vmul.f32 -1.442695, %v304_v13 }
  0xb0   :  { %v2249_v27 = vpop.eup %2248  ;;  %v314_v29 = vadd.f32 1.0, %v2247_v23  ;;  %v2076_v30 = vmul.f32 -1.442695, %v305_v22  ;;  %v273_v40 = vpop.f32.mrf.mxu2 }
  0xb1   :  { %2250 = vpow2.f32 %v2077_v18  ;;  %v352_v35 = vadd.f32 1.0, %v2249_v27  ;;  %v302_v55 = vadd.f32 %v294_v43, %v273_v40 }
  0xb2   :  { %2252 = vpow2.f32 %v2074_v26  ;;  %v325_v5 = vand.u32 2147483647, %v314_v29  ;;  %v327_v13 = vand.u32 2147483648, %v314_v29  ;;  %vm321_vm1 = vweird.f32 %v314_v29 }
  0xb3   :  { %2254 = vrcp.f32 %v314_v29  ;;  %v365_v11 = vand.u32 2147483648, %v352_v35  ;;  %v363_v27 = vand.u32 2147483647, %v352_v35  ;;  %vm359_vm3 = vweird.f32 %v352_v35 }
  0xb4   :  { %2256 = vrcp.f32 %v352_v35  ;;  %v289_v47 = vpop.f32.mrf.mxu3  ;;  %vm326_vm4 = vcmp.eq.f32.partialorder %v325_v5, 8.507059e+37  ;;  %v328_v15 = vor.u32 1.1754944e-38, %v327_v13 }
  0xb5   :  { %2258 = vpow2.f32 %v2076_v30  ;;  %v307_v48 = vadd.f32 %v299_v31, %v289_v47  ;;  %v366_v47 = vor.u32 1.1754944e-38, %v365_v11  ;;  %vm364_vm7 = vcmp.eq.f32.partialorder %v363_v27, 8.507059e+37 }
  0xb7   :  { %v2251_v49 = vpop.eup %2250  ;;  %v2078_v50 = vmul.f32 -1.442695, %v307_v48 }
  0xb8   :  { %v2253_v51 = vpop.eup %2252  ;;  %v2722_v52 = vadd.f32 1.0, %v2251_v49  ;;  %v275_v22 = vpop.f32.mrf.mxu2 }
  0xb9   :  { %v2255_v59 = vpop.eup %2254  ;;  %v2724_v60 = vadd.f32 1.0, %v2253_v51  ;;  %2260 = vpow2.f32 %v2078_v50  ;;  %v306_v49 = vadd.f32 %v298_v14, %v275_v22 }
  0xba   :  { %v2257_v61 = vpop.eup %2256  ;;  %v317_v62 = vmul.f32 %v2255_v59, %v314_v29  ;;  %2262 = vrcp.f32 %v2722_v52  ;;  %vm322_vm0 = vweird.f32 %v2255_v59 }
  0xbb   :  { %v2259_v63 = vpop.eup %2258  ;;  %v355_v0 = vmul.f32 %v2257_v61, %v352_v35  ;;  %2264 = vrcp.f32 %v2724_v60  ;;  %vm360_vm2 = vweird.f32 %v2257_v61  ;;  %vm323_vm5 = vmor %vm321_vm1, %vm322_vm0  ;;  %v342_v5 = vand.u32 2147483648, %v2724_v60 }
  0xbc   :  { %v318_v56 = vsub.f32 1.0, %v317_v62  ;;  %v2728_v4 = vadd.f32 1.0, %v2259_v63  ;;  %2266 = vtanh.f32 %v302_v55  ;;  %vm361_vm6 = vmor %vm359_vm3, %vm360_vm2  ;;  %v340_v14 = vand.u32 2147483647, %v2724_v60 }
  0xbd   :  { %v356_v10 = vsub.f32 1.0, %v355_v0  ;;  %vm336_vm9 = vweird.f32 %v2724_v60  ;;  %v343_v27 = vor.u32 1.1754944e-38, %v342_v5  ;;  %vm399_vm1 = vweird.f32 %v2722_v52 }
  0xbe   :  { %2268 = vrcp.f32 %v2728_v4  ;;  %v319_v18 = vmul.f32 %v2255_v59, %v318_v56  ;;  %vm341_vm12 = vcmp.eq.f32.partialorder %v340_v14, 8.507059e+37  ;;  %vm374_vm13 = vweird.f32 %v2728_v4 }
  0xbf   :  { %v2261_v23 = vpop.eup %2260  ;;  %v357_v26 = vmul.f32 %v2257_v61, %v356_v10 }
  0xc0   :  { %v2731_v30 = vpop.eup %2262  ;;  %v320_v31 = vadd.f32 %v2255_v59, %v319_v18  ;;  %v2733_v40 = vadd.f32 1.0, %v2261_v23  ;;  %v380_v23 = vand.u32 2147483648, %v2728_v4 }
  0xc1   :  { %v2265_v43 = vpop.eup %2264  ;;  %v358_v48 = vadd.f32 %v2257_v61, %v357_v26  ;;  %v395_v51 = vmul.f32 %v2731_v30, %v2722_v52  ;;  %vm400_vm0 = vweird.f32 %v2731_v30 }
  0xc2   :  { %v2267_v50 = vpop.eup %2266  ;;  %v332_v29 = vmul.f32 %v2265_v43, %v2724_v60  ;;  %v324_v55 = vsel %vm323_vm5, %v2255_v59, %v320_v31  ;;  %2270 = vrcp.f32 %v2733_v40  ;;  %vm337_vm8 = vweird.f32 %v2265_v43  ;;  %vm401_vm2 = vmor %vm399_vm1, %vm400_vm0 }
  0xc3   :  { %v329_v35 = vsel %vm326_vm4, %v328_v15, %v324_v55  ;;  %v362_v62 = vsel %vm361_vm6, %v2257_v61, %v358_v48  ;;  %v396_v18 = vsub.f32 1.0, %v395_v51  ;;  %2272 = vtanh.f32 %v306_v49  ;;  %vm338_vm10 = vmor %vm336_vm9, %vm337_vm8 }
  0xc4   :  { %v2269_v63 = vpop.eup %2268  ;;  %v333_v0 = vsub.f32 1.0, %v332_v29  ;;  %v367_v56 = vsel %vm364_vm7, %v366_v47, %v362_v62  ;;  %v426_v13 = vmul.f32 %v2267_v50, %v329_v35  ;;  %v378_v31 = vand.u32 2147483647, %v2728_v4 }
  0xc5   :  { %v370_v10 = vmul.f32 %v2269_v63, %v2728_v4  ;;  %v424_v11 = vmul.f32 0.0, %v367_v56  ;;  %vm375_vm11 = vweird.f32 %v2269_v63  ;;  %v397_v50 = vmul.f32 %v2731_v30, %v396_v18 }
  0xc6   :  { %v334_v59 = vmul.f32 %v2265_v43, %v333_v0  ;;  %v381_v35 = vor.u32 1.1754944e-38, %v380_v23  ;;  %vm376_vm14 = vmor %vm374_vm13, %vm375_vm11  ;;  %vm379_vm15 = vcmp.eq.f32.partialorder %v378_v31, 8.507059e+37  ;;  %vm414_vm4 = vweird.f32 %v2733_v40 }
  0xc7   :  { %v371_v22 = vsub.f32 1.0, %v370_v10  ;;  %v2746_v15 = vadd.f32 %v426_v13, %v424_v11  ;;  %v405_v10 = vand.u32 2147483648, %v2722_v52  ;;  %v403_v11 = vand.u32 2147483647, %v2722_v52 }
  0xc8   :  { %v2271_v61 = vpop.eup %2270  ;;  %v335_v26 = vadd.f32 %v2265_v43, %v334_v59  ;;  %v418_v23 = vand.u32 2147483647, %v2733_v40 }
  0xc9   :  { %v372_v47 = vmul.f32 %v2269_v63, %v371_v22  ;;  %v410_v48 = vmul.f32 %v2271_v61, %v2733_v40  ;;  %v2273_v55 = vpop.eup %2272  ;;  %2274 = vtanh.f32 %v2746_v15  ;;  %vm415_vm3 = vweird.f32 %v2271_v61 }
  0xca   :  { %v339_v49 = vsel %vm338_vm10, %v2265_v43, %v335_v26  ;;  %v398_v43 = vadd.f32 %v2731_v30, %v397_v50  ;;  %v406_v59 = vor.u32 1.1754944e-38, %v405_v10  ;;  %v420_v22 = vand.u32 2147483648, %v2733_v40  ;;  %vm416_vm6 = vmor %vm414_vm4, %vm415_vm3  ;;  %v2079_v40 = vld [vmem:[%s3292_s0 + $0x20] sm:$0xff]  ;;  %v2081_v10 = vld [vmem:[%s3292_s0 + $0x30] sm:$0xff] }
  0xcb   :  { %v411_v60 = vsub.f32 1.0, %v410_v48  ;;  %v344_v51 = vsel %vm341_vm12, %v343_v27, %v339_v49  ;;  %v373_v29 = vadd.f32 %v2269_v63, %v372_v47  ;;  %vm404_vm5 = vcmp.eq.f32.partialorder %v403_v11, 8.507059e+37 }
  0xcc   :  { %v427_v0 = vmul.f32 %v2273_v55, %v344_v51  ;;  %v421_v31 = vor.u32 1.1754944e-38, %v420_v22  ;;  %vm419_vm7 = vcmp.eq.f32.partialorder %v418_v23, 8.507059e+37 }
  0xcd   :  { %v377_v62 = vsel %vm376_vm14, %v2269_v63, %v373_v29  ;;  %v412_v56 = vmul.f32 %v2271_v61, %v411_v60  ;;  %v402_v63 = vsel %vm401_vm2, %v2731_v30, %v398_v43  ;;  %v2080_v43 = vld [vmem:[%s3292_s0 + $0x28] sm:$0xff] }
  0xce   :  { %v382_v5 = vsel %vm379_vm15, %v381_v35, %v377_v62  ;;  %v407_v52 = vsel %vm404_vm5, %v406_v59, %v402_v63  ;;  %v506_v35 = vunpack.c.h.bf16 %v2079_v40  ;;  %v508_v63 = vunpack.c.h.bf16 %v2080_v43 }
  0xcf   :  { %v425_v4 = vmul.f32 0.0, %v382_v5  ;;  %v413_v14 = vadd.f32 %v2271_v61, %v412_v56  ;;  %v2275_v18 = vpop.eup %2274 }
  0xd0   :  { %v432_v27 = vmul.f32 %v2275_v18, %v407_v52  ;;  %v510_v18 = vunpack.c.h.bf16 %v2081_v10 }
  0xd1   :  { %v2757_v13 = vadd.f32 %v427_v0, %v425_v4  ;;  %v417_v26 = vsel %vm416_vm6, %v2271_v61, %v413_v14  ;;  %v505_v61 = vunpack.c.l.bf16 %v2079_v40  ;;  %v509_v14 = vunpack.c.l.bf16 %v2081_v10 }
  0xd2   :  { %v422_v30 = vsel %vm419_vm7, %v421_v31, %v417_v26  ;;  %v434_v50 = vpack.c.bf16 %v432_v27, %v432_v27  ;;  %v507_v40 = vunpack.c.l.bf16 %v2080_v43 }
  0xd3   :  { %2276 = vtanh.f32 %v2757_v13 }
  0xd4   :  { %v445_v51 = vunpack.c.l.b16 %v434_v50 }
  0xd9   :  { %v2277_v47 = vpop.eup %2276 }
  0xda   :  { %v433_v48 = vmul.f32 %v2277_v47, %v422_v30  ;;  %v2082_v47 = vld [vmem:[%s3292_s0 + $0x38] sm:$0xff] }
  0xdb   :  { %v511_v43 = vunpack.c.l.bf16 %v2082_v47 }
  0xdc   :  { %v435_v49 = vpack.c.bf16 %v433_v48, %v433_v48  ;;  %v2198_v60 = vpack.c.bf16 %v433_v48, %v432_v27 }
  0xde   :  { %2199 = vst [vmem:[%s3294_s2] sm:$0xff] %v2198_v60   ;;  %v446_v29 = vunpack.c.l.b16 %v435_v49 }
  0xe0   :  { %v447_v55 = vpack.c.b16 %v446_v29, %v445_v51 }
  0xe2   :  { %457 = vmatmul.bf16.vlgmr.msrb.gmra.mxu0 %v447_v55  ;;  %471 = vmatmul.bf16.vlgmr.msrb.gmra.mxu1 %v447_v55 }
  0xe3   :  { %485 = vmatmul.bf16.vlgmr.msrb.gmra.mxu2 %v447_v55  ;;  %499 = vmatmul.bf16.vlgmr.msrb.gmra.mxu3 %v447_v55  ;;  %v512_v55 = vunpack.c.h.bf16 %v2082_v47 }
  0xe4   :  { %877 = vmatpush.bf16.msrb.mxu0 %v2550_v3  ;;  %891 = vmatpush.bf16.msrb.mxu1 %v2552_v7 }
  0xe5   :  { %905 = vmatpush.bf16.msrb.mxu2 %v2565_v21  ;;  %919 = vmatpush.bf16.msrb.mxu3 %v2554_v8 }
  0xe8   :  { %878 = vmatpush.bf16.msrb.mxu0 %v2557_v12  ;;  %892 = vmatpush.bf16.msrb.mxu1 %v2561_v16 }
  0xe9   :  { %906 = vmatpush.bf16.msrb.mxu2 %v2577_v34  ;;  %920 = vmatpush.bf16.msrb.mxu3 %v2563_v17 }
  0xec   :  { %879 = vmatpush.bf16.msrb.mxu0 %v2569_v28  ;;  %893 = vmatpush.bf16.msrb.mxu1 %v2573_v32 }
  0xed   :  { %907 = vmatpush.bf16.msrb.mxu2 %v2583_v42  ;;  %921 = vmatpush.bf16.msrb.mxu3 %v2575_v33 }
  0xf0   :  { %880 = vmatpush.bf16.msrb.mxu0 %v2581_v41  ;;  %894 = vmatpush.bf16.msrb.mxu1 %v2587_v45 }
  0xf1   :  { %908 = vmatpush.bf16.msrb.mxu2 %v2595_v54  ;;  %922 = vmatpush.bf16.msrb.mxu3 %v2589_v46 }
  0xf4   :  { %881 = vmatpush.bf16.msrb.mxu0 %v2593_v53  ;;  %895 = vmatpush.bf16.msrb.mxu1 %v2599_v57 }
  0xf5   :  { %909 = vmatpush.bf16.msrb.mxu2 %v2607_v2  ;;  %923 = vmatpush.bf16.msrb.mxu3 %v2601_v58 }
  0xf8   :  { %882 = vmatpush.bf16.msrb.mxu0 %v2605_v1  ;;  %896 = vmatpush.bf16.msrb.mxu1 %v2611_v6 }
  0xf9   :  { %910 = vmatpush.bf16.msrb.mxu2 %v2619_v20  ;;  %924 = vmatpush.bf16.msrb.mxu3 %v2613_v9 }
  0xfc   :  { %883 = vmatpush.bf16.msrb.mxu0 %v2617_v19  ;;  %897 = vmatpush.bf16.msrb.mxu1 %v2623_v24 }
  0xfd   :  { %911 = vmatpush.bf16.msrb.mxu2 %v2631_v37  ;;  %925 = vmatpush.bf16.msrb.mxu3 %v2625_v25 }
 0x100   :  { %884 = vmatpush.bf16.msrb.mxu0 %v2629_v36  ;;  %898 = vmatpush.bf16.msrb.mxu1 %v2635_v38 }
 0x101   :  { %912 = vmatpush.bf16.msrb.mxu2 %v2643_v44  ;;  %926 = vmatpush.bf16.msrb.mxu3 %v2637_v39 }
 0x15f   :  { %v458_v62 = vpop.f32.mrf.mxu0  ;;  %v472_v0 = vpop.f32.mrf.mxu1 }
 0x160   :  { %v513_v56 = vadd.f32 %v505_v61, %v458_v62  ;;  %v514_v5 = vadd.f32 %v506_v35, %v472_v0 }
 0x162   :  { %v2083_v4 = vmul.f32 -1.442695, %v513_v56  ;;  %v2085_v11 = vmul.f32 -1.442695, %v514_v5 }
 0x164   :  { %2278 = vpow2.f32 %v2083_v4 }
 0x165   :  { %2280 = vpow2.f32 %v2085_v11 }
 0x166   :  { %v500_v59 = vpop.f32.mrf.mxu3  ;;  %v486_v29 = vpop.f32.mrf.mxu2 }
 0x167   :  { %v516_v22 = vadd.f32 %v508_v63, %v500_v59  ;;  %v460_v23 = vpop.f32.mrf.mxu0  ;;  %v474_v52 = vpop.f32.mrf.mxu1  ;;  %v515_v56 = vadd.f32 %v507_v40, %v486_v29 }
 0x168   :  { %v517_v26 = vadd.f32 %v509_v14, %v460_v23  ;;  %v518_v27 = vadd.f32 %v510_v18, %v474_v52 }
 0x169   :  { %v2087_v31 = vmul.f32 -1.442695, %v516_v22 }
 0x16a   :  { %v2279_v30 = vpop.eup %2278  ;;  %v2084_v48 = vmul.f32 -1.442695, %v517_v26  ;;  %v2086_v60 = vmul.f32 -1.442695, %v518_v27 }
 0x16b   :  { %v2281_v50 = vpop.eup %2280  ;;  %v527_v49 = vadd.f32 1.0, %v2279_v30  ;;  %2282 = vpow2.f32 %v2087_v31 }
 0x16c   :  { %v565_v51 = vadd.f32 1.0, %v2281_v50  ;;  %2284 = vpow2.f32 %v2084_v48 }
 0x16d   :  { %2286 = vrcp.f32 %v527_v49  ;;  %v538_v27 = vand.u32 2147483647, %v527_v49  ;;  %v540_v31 = vand.u32 2147483648, %v527_v49  ;;  %vm534_vm10 = vweird.f32 %v527_v49 }
 0x16e   :  { %2288 = vrcp.f32 %v565_v51  ;;  %v502_v61 = vpop.f32.mrf.mxu3  ;;  %v488_v52 = vpop.f32.mrf.mxu2  ;;  %v578_v30 = vand.u32 2147483648, %v565_v51  ;;  %vm572_vm11 = vweird.f32 %v565_v51 }
 0x16f   :  { %2290 = vpow2.f32 %v2086_v60  ;;  %v520_v35 = vadd.f32 %v512_v55, %v502_v61  ;;  %v576_v60 = vand.u32 2147483647, %v565_v51  ;;  %v519_v29 = vadd.f32 %v511_v43, %v488_v52 }
 0x170   :  { %vm539_vm13 = vcmp.eq.f32.partialorder %v538_v27, 8.507059e+37  ;;  %v541_v61 = vor.u32 1.1754944e-38, %v540_v31 }
 0x171   :  { %v2283_v62 = vpop.eup %2282  ;;  %v2088_v11 = vmul.f32 -1.442695, %v520_v35  ;;  %vm577_vm15 = vcmp.eq.f32.partialorder %v576_v60, 8.507059e+37 }
 0x172   :  { %v2285_v0 = vpop.eup %2284  ;;  %v2811_v5 = vadd.f32 1.0, %v2283_v62 }
 0x173   :  { %v2287_v10 = vpop.eup %2286  ;;  %v2813_v4 = vadd.f32 1.0, %v2285_v0  ;;  %v579_v0 = vor.u32 1.1754944e-38, %v578_v30 }
 0x174   :  { %v2289_v63 = vpop.eup %2288  ;;  %v530_v14 = vmul.f32 %v2287_v10, %v527_v49  ;;  %2292 = vrcp.f32 %v2811_v5  ;;  %vm535_vm8 = vweird.f32 %v2287_v10 }
 0x175   :  { %v2291_v18 = vpop.eup %2290  ;;  %v568_v59 = vmul.f32 %v2289_v63, %v565_v51  ;;  %2294 = vrcp.f32 %v2813_v4  ;;  %vm573_vm9 = vweird.f32 %v2289_v63  ;;  %vm536_vm12 = vmor %vm534_vm10, %vm535_vm8  ;;  %v553_v52 = vand.u32 2147483647, %v2813_v4 }
 0x176   :  { %v531_v22 = vsub.f32 1.0, %v530_v14  ;;  %2296 = vtanh.f32 %v515_v56  ;;  %v2817_v23 = vadd.f32 1.0, %v2291_v18  ;;  %vm574_vm14 = vmor %vm572_vm11, %vm573_vm9  ;;  %v555_v30 = vand.u32 2147483648, %v2813_v4 }
 0x177   :  { %v569_v26 = vsub.f32 1.0, %v568_v59  ;;  %2298 = vpow2.f32 %v2088_v11  ;;  %vm549_vm1 = vweird.f32 %v2813_v4  ;;  %vm554_vm4 = vcmp.eq.f32.partialorder %v553_v52, 8.507059e+37 }
 0x178   :  { %v532_v48 = vmul.f32 %v2287_v10, %v531_v22  ;;  %2300 = vrcp.f32 %v2817_v23  ;;  %v593_v60 = vand.u32 2147483648, %v2817_v23  ;;  %vm587_vm5 = vweird.f32 %v2817_v23 }
 0x179   :  { %v570_v50 = vmul.f32 %v2289_v63, %v569_v26  ;;  %2302 = vtanh.f32 %v519_v29  ;;  %vm612_vm9 = vweird.f32 %v2811_v5 }
 0x17a   :  { %v2820_v55 = vpop.eup %2292  ;;  %v533_v47 = vadd.f32 %v2287_v10, %v532_v48 }
 0x17b   :  { %v2295_v40 = vpop.eup %2294  ;;  %v571_v35 = vadd.f32 %v2289_v63, %v570_v50  ;;  %v608_v11 = vmul.f32 %v2820_v55, %v2811_v5  ;;  %vm613_vm8 = vweird.f32 %v2820_v55 }
 0x17c   :  { %v2297_v62 = vpop.eup %2296  ;;  %v537_v56 = vsel %vm536_vm12, %v2287_v10, %v533_v47  ;;  %v545_v14 = vmul.f32 %v2295_v40, %v2813_v4  ;;  %vm550_vm0 = vweird.f32 %v2295_v40  ;;  %v591_v47 = vand.u32 2147483647, %v2817_v23  ;;  %vm614_vm10 = vmor %vm612_vm9, %vm613_vm8 }
 0x17d   :  { %v2299_v18 = vpop.eup %2298  ;;  %v542_v59 = vsel %vm539_vm13, %v541_v61, %v537_v56  ;;  %v575_v43 = vsel %vm574_vm14, %v2289_v63, %v571_v35  ;;  %v609_v48 = vsub.f32 1.0, %v608_v11  ;;  %vm551_vm3 = vmor %vm549_vm1, %vm550_vm0  ;;  %v594_v4 = vor.u32 1.1754944e-38, %v593_v60 }
 0x17e   :  { %v2301_v49 = vpop.eup %2300  ;;  %v580_v51 = vsel %vm577_vm15, %v579_v0, %v575_v43  ;;  %v546_v22 = vsub.f32 1.0, %v545_v14  ;;  %v606_v26 = vadd.f32 1.0, %v2299_v18  ;;  %v639_v31 = vmul.f32 %v2297_v62, %v542_v59 }
 0x17f   :  { %v637_v27 = vmul.f32 %v580_v51, %v2746_v15  ;;  %v583_v10 = vmul.f32 %v2301_v49, %v2817_v23  ;;  %v2303_v61 = vpop.eup %2302  ;;  %vm588_vm2 = vweird.f32 %v2301_v49  ;;  %v556_v62 = vor.u32 1.1754944e-38, %v555_v30 }
 0x180   :  { %v547_v50 = vmul.f32 %v2295_v40, %v546_v22  ;;  %2304 = vrcp.f32 %v606_v26  ;;  %v610_v0 = vmul.f32 %v2820_v55, %v609_v48  ;;  %vm589_vm6 = vmor %vm587_vm5, %vm588_vm2  ;;  %vm592_vm7 = vcmp.eq.f32.partialorder %v591_v47, 8.507059e+37 }
 0x181   :  { %v584_v63 = vsub.f32 1.0, %v583_v10  ;;  %v2832_v35 = vadd.f32 %v639_v31, %v637_v27  ;;  %v616_v31 = vand.u32 2147483647, %v2811_v5  ;;  %vm627_vm12 = vweird.f32 %v606_v26 }
 0x182   :  { %v548_v29 = vadd.f32 %v2295_v40, %v547_v50  ;;  %v611_v27 = vadd.f32 %v2820_v55, %v610_v0 }
 0x183   :  { %v585_v15 = vmul.f32 %v2301_v49, %v584_v63  ;;  %2306 = vtanh.f32 %v2832_v35  ;;  %v633_v63 = vand.u32 2147483648, %v606_v26  ;;  %vm617_vm13 = vcmp.eq.f32.partialorder %v616_v31, 8.507059e+37 }
 0x184   :  { %v552_v56 = vsel %vm551_vm3, %v2295_v40, %v548_v29  ;;  %v618_v40 = vand.u32 2147483648, %v2811_v5  ;;  %v615_v30 = vsel %vm614_vm10, %v2820_v55, %v611_v27 }
 0x185   :  { %v557_v11 = vsel %vm554_vm4, %v556_v62, %v552_v56  ;;  %v586_v14 = vadd.f32 %v2301_v49, %v585_v15 }
 0x186   :  { %v2305_v18 = vpop.eup %2304  ;;  %v640_v43 = vmul.f32 %v2303_v61, %v557_v11  ;;  %v619_v50 = vor.u32 1.1754944e-38, %v618_v40  ;;  %v634_v61 = vor.u32 1.1754944e-38, %v633_v63 }
 0x187   :  { %v590_v59 = vsel %vm589_vm6, %v2301_v49, %v586_v14  ;;  %v623_v51 = vmul.f32 %v2305_v18, %v606_v26  ;;  %vm628_vm11 = vweird.f32 %v2305_v18 }
 0x188   :  { %v595_v22 = vsel %vm592_vm7, %v594_v4, %v590_v59  ;;  %vm629_vm14 = vmor %vm627_vm12, %vm628_vm11  ;;  %v620_v29 = vsel %vm617_vm13, %v619_v50, %v615_v30 }
 0x189   :  { %v638_v23 = vmul.f32 %v595_v22, %v2757_v13  ;;  %v624_v52 = vsub.f32 1.0, %v623_v51  ;;  %v2307_v48 = vpop.eup %2306  ;;  %v631_v13 = vand.u32 2147483647, %v606_v26  ;;  %v2091_v26 = vld [vmem:[%s3292_s0 + $0x40] sm:$0xff] }
 0x18a   :  { %v645_v5 = vmul.f32 %v2307_v48, %v620_v29 }
 0x18b   :  { %v2843_v10 = vadd.f32 %v640_v43, %v638_v23  ;;  %v625_v49 = vmul.f32 %v2305_v18, %v624_v52  ;;  %vm632_vm15 = vcmp.eq.f32.partialorder %v631_v13, 8.507059e+37  ;;  %v720_v43 = vunpack.c.h.bf16 %v2091_v26  ;;  %v2092_v23 = vld [vmem:[%s3292_s0 + $0x48] sm:$0xff]  ;;  %v2093_v52 = vld [vmem:[%s3292_s0 + $0x50] sm:$0xff] }
 0x18c   :  { %v647_v56 = vpack.c.bf16 %v645_v5, %v645_v5  ;;  %v722_v30 = vunpack.c.h.bf16 %v2092_v23  ;;  %v723_v48 = vunpack.c.l.bf16 %v2093_v52  ;;  %v724_v50 = vunpack.c.h.bf16 %v2093_v52 }
 0x18d   :  { %2308 = vtanh.f32 %v2843_v10  ;;  %v626_v60 = vadd.f32 %v2305_v18, %v625_v49 }
 0x18e   :  { %v659_v14 = vunpack.c.l.b16 %v647_v56 }
 0x18f   :  { %v630_v47 = vsel %vm629_vm14, %v2305_v18, %v626_v60  ;;  %v719_v18 = vunpack.c.l.bf16 %v2091_v26  ;;  %v721_v26 = vunpack.c.l.bf16 %v2092_v23 }
 0x190   :  { %v635_v62 = vsel %vm632_vm15, %v634_v61, %v630_v47 }
 0x193   :  { %v2309_v15 = vpop.eup %2308 }
 0x194   :  { %v646_v0 = vmul.f32 %v2309_v15, %v635_v62  ;;  %v2094_v15 = vld [vmem:[%s3292_s0 + $0x58] sm:$0xff] }
 0x195   :  { %v725_v23 = vunpack.c.l.bf16 %v2094_v15 }
 0x196   :  { %v648_v55 = vpack.c.bf16 %v646_v0, %v646_v0  ;;  %v2203_v11 = vpack.c.bf16 %v646_v0, %v645_v5 }
 0x198   :  { %2235 = vst [vmem:[%s3294_s2 + $0x8] sm:$0xff] %v2203_v11   ;;  %v660_v4 = vunpack.c.l.b16 %v648_v55 }
 0x19a   :  { %v661_v59 = vpack.c.b16 %v660_v4, %v659_v14 }
 0x19c   :  { %671 = vmatmul.bf16.vlgmr.msra.gmra.mxu0 %v661_v59  ;;  %685 = vmatmul.bf16.vlgmr.msra.gmra.mxu1 %v661_v59 }
 0x19d   :  { %699 = vmatmul.bf16.vlgmr.msra.gmra.mxu2 %v661_v59  ;;  %713 = vmatmul.bf16.vlgmr.msra.gmra.mxu3 %v661_v59  ;;  %v726_v59 = vunpack.c.h.bf16 %v2094_v15 }
 0x19e   :  { %1091 = vmatpush.bf16.msra.mxu0 %v2550_v3  ;;  %1105 = vmatpush.bf16.msra.mxu1 %v2552_v7 }
 0x19f   :  { %1119 = vmatpush.bf16.msra.mxu2 %v2565_v21  ;;  %1133 = vmatpush.bf16.msra.mxu3 %v2554_v8 }
 0x1a2   :  { %1092 = vmatpush.bf16.msra.mxu0 %v2557_v12  ;;  %1106 = vmatpush.bf16.msra.mxu1 %v2561_v16 }
 0x1a3   :  { %1120 = vmatpush.bf16.msra.mxu2 %v2577_v34  ;;  %1134 = vmatpush.bf16.msra.mxu3 %v2563_v17 }
 0x1a6   :  { %1093 = vmatpush.bf16.msra.mxu0 %v2569_v28  ;;  %1107 = vmatpush.bf16.msra.mxu1 %v2573_v32 }
 0x1a7   :  { %1121 = vmatpush.bf16.msra.mxu2 %v2583_v42  ;;  %1135 = vmatpush.bf16.msra.mxu3 %v2575_v33 }
 0x1aa   :  { %1094 = vmatpush.bf16.msra.mxu0 %v2581_v41  ;;  %1108 = vmatpush.bf16.msra.mxu1 %v2587_v45 }
 0x1ab   :  { %1122 = vmatpush.bf16.msra.mxu2 %v2595_v54  ;;  %1136 = vmatpush.bf16.msra.mxu3 %v2589_v46 }
 0x1ae   :  { %1095 = vmatpush.bf16.msra.mxu0 %v2593_v53  ;;  %1109 = vmatpush.bf16.msra.mxu1 %v2599_v57 }
 0x1af   :  { %1123 = vmatpush.bf16.msra.mxu2 %v2607_v2  ;;  %1137 = vmatpush.bf16.msra.mxu3 %v2601_v58 }
 0x1b2   :  { %1096 = vmatpush.bf16.msra.mxu0 %v2605_v1  ;;  %1110 = vmatpush.bf16.msra.mxu1 %v2611_v6 }
 0x1b3   :  { %1124 = vmatpush.bf16.msra.mxu2 %v2619_v20  ;;  %1138 = vmatpush.bf16.msra.mxu3 %v2613_v9 }
 0x1b6   :  { %1097 = vmatpush.bf16.msra.mxu0 %v2617_v19  ;;  %1111 = vmatpush.bf16.msra.mxu1 %v2623_v24 }
 0x1b7   :  { %1125 = vmatpush.bf16.msra.mxu2 %v2631_v37  ;;  %1139 = vmatpush.bf16.msra.mxu3 %v2625_v25 }
 0x1ba   :  { %1098 = vmatpush.bf16.msra.mxu0 %v2629_v36  ;;  %1112 = vmatpush.bf16.msra.mxu1 %v2635_v38 }
 0x1bb   :  { %1126 = vmatpush.bf16.msra.mxu2 %v2643_v44  ;;  %1140 = vmatpush.bf16.msra.mxu3 %v2637_v39 }
 0x219   :  { %v672_v51 = vpop.f32.mrf.mxu0  ;;  %v686_v22 = vpop.f32.mrf.mxu1 }
 0x21a   :  { %v727_v27 = vadd.f32 %v719_v18, %v672_v51  ;;  %v728_v40 = vadd.f32 %v720_v43, %v686_v22 }
 0x21c   :  { %v2095_v31 = vmul.f32 -1.442695, %v727_v27  ;;  %v2097_v49 = vmul.f32 -1.442695, %v728_v40 }
 0x21e   :  { %2310 = vpow2.f32 %v2095_v31 }
 0x21f   :  { %2312 = vpow2.f32 %v2097_v49 }
 0x220   :  { %v714_v63 = vpop.f32.mrf.mxu3  ;;  %v700_v4 = vpop.f32.mrf.mxu2 }
 0x221   :  { %v730_v60 = vadd.f32 %v722_v30, %v714_v63  ;;  %v674_v13 = vpop.f32.mrf.mxu0  ;;  %v688_v29 = vpop.f32.mrf.mxu1  ;;  %v729_v27 = vadd.f32 %v721_v26, %v700_v4 }
 0x222   :  { %v731_v47 = vadd.f32 %v723_v48, %v674_v13  ;;  %v732_v5 = vadd.f32 %v724_v50, %v688_v29 }
 0x223   :  { %v2099_v61 = vmul.f32 -1.442695, %v730_v60 }
 0x224   :  { %v2311_v62 = vpop.eup %2310  ;;  %v2096_v0 = vmul.f32 -1.442695, %v731_v47  ;;  %v2098_v11 = vmul.f32 -1.442695, %v732_v5 }
 0x225   :  { %v2313_v56 = vpop.eup %2312  ;;  %v741_v55 = vadd.f32 1.0, %v2311_v62  ;;  %2314 = vpow2.f32 %v2099_v61 }
 0x226   :  { %v779_v14 = vadd.f32 1.0, %v2313_v56  ;;  %2316 = vpow2.f32 %v2096_v0 }
 0x227   :  { %2318 = vrcp.f32 %v741_v55  ;;  %v752_v5 = vand.u32 2147483647, %v741_v55  ;;  %v754_v61 = vand.u32 2147483648, %v741_v55  ;;  %vm748_vm2 = vweird.f32 %v741_v55 }
 0x228   :  { %2320 = vrcp.f32 %v779_v14  ;;  %v716_v18 = vpop.f32.mrf.mxu3  ;;  %v702_v29 = vpop.f32.mrf.mxu2  ;;  %v792_v62 = vand.u32 2147483648, %v779_v14  ;;  %vm786_vm3 = vweird.f32 %v779_v14 }
 0x229   :  { %2322 = vpow2.f32 %v2098_v11  ;;  %v734_v43 = vadd.f32 %v726_v59, %v716_v18  ;;  %v790_v11 = vand.u32 2147483647, %v779_v14  ;;  %v733_v4 = vadd.f32 %v725_v23, %v702_v29 }
 0x22a   :  { %vm753_vm5 = vcmp.eq.f32.partialorder %v752_v5, 8.507059e+37  ;;  %v755_v18 = vor.u32 1.1754944e-38, %v754_v61 }
 0x22b   :  { %v2315_v51 = vpop.eup %2314  ;;  %v2100_v49 = vmul.f32 -1.442695, %v734_v43  ;;  %vm791_vm7 = vcmp.eq.f32.partialorder %v790_v11, 8.507059e+37 }
 0x22c   :  { %v2317_v22 = vpop.eup %2316  ;;  %v2894_v40 = vadd.f32 1.0, %v2315_v51 }
 0x22d   :  { %v2319_v52 = vpop.eup %2318  ;;  %v2896_v31 = vadd.f32 1.0, %v2317_v22  ;;  %v793_v22 = vor.u32 1.1754944e-38, %v792_v62 }
 0x22e   :  { %v2321_v30 = vpop.eup %2320  ;;  %v744_v48 = vmul.f32 %v2319_v52, %v741_v55  ;;  %2324 = vrcp.f32 %v2894_v40  ;;  %vm749_vm0 = vweird.f32 %v2319_v52 }
 0x22f   :  { %v2323_v50 = vpop.eup %2322  ;;  %v782_v63 = vmul.f32 %v2321_v30, %v779_v14  ;;  %2326 = vrcp.f32 %v2896_v31  ;;  %vm787_vm1 = vweird.f32 %v2321_v30  ;;  %vm750_vm4 = vmor %vm748_vm2, %vm749_vm0  ;;  %v767_v29 = vand.u32 2147483647, %v2896_v31 }
 0x230   :  { %v745_v60 = vsub.f32 1.0, %v744_v48  ;;  %2328 = vtanh.f32 %v729_v27  ;;  %v2900_v13 = vadd.f32 1.0, %v2323_v50  ;;  %vm788_vm6 = vmor %vm786_vm3, %vm787_vm1  ;;  %v769_v62 = vand.u32 2147483648, %v2896_v31 }
 0x231   :  { %v783_v47 = vsub.f32 1.0, %v782_v63  ;;  %2330 = vpow2.f32 %v2100_v49  ;;  %vm763_vm9 = vweird.f32 %v2896_v31  ;;  %vm768_vm12 = vcmp.eq.f32.partialorder %v767_v29, 8.507059e+37 }
 0x232   :  { %v746_v0 = vmul.f32 %v2319_v52, %v745_v60  ;;  %2332 = vrcp.f32 %v2900_v13  ;;  %v807_v11 = vand.u32 2147483648, %v2900_v13  ;;  %vm801_vm13 = vweird.f32 %v2900_v13 }
 0x233   :  { %v784_v56 = vmul.f32 %v2321_v30, %v783_v47  ;;  %2334 = vtanh.f32 %v733_v4  ;;  %vm826_vm1 = vweird.f32 %v2894_v40 }
 0x234   :  { %v2903_v59 = vpop.eup %2324  ;;  %v747_v15 = vadd.f32 %v2319_v52, %v746_v0 }
 0x235   :  { %v2327_v26 = vpop.eup %2326  ;;  %v785_v43 = vadd.f32 %v2321_v30, %v784_v56  ;;  %v822_v49 = vmul.f32 %v2903_v59, %v2894_v40  ;;  %vm827_vm0 = vweird.f32 %v2903_v59 }
 0x236   :  { %v2329_v51 = vpop.eup %2328  ;;  %v751_v27 = vsel %vm750_vm4, %v2319_v52, %v747_v15  ;;  %v759_v48 = vmul.f32 %v2327_v26, %v2896_v31  ;;  %vm764_vm8 = vweird.f32 %v2327_v26  ;;  %v805_v15 = vand.u32 2147483647, %v2900_v13  ;;  %vm828_vm2 = vmor %vm826_vm1, %vm827_vm0 }
 0x237   :  { %v2331_v50 = vpop.eup %2330  ;;  %v756_v63 = vsel %vm753_vm5, %v755_v18, %v751_v27  ;;  %v789_v23 = vsel %vm788_vm6, %v2321_v30, %v785_v43  ;;  %v823_v0 = vsub.f32 1.0, %v822_v49  ;;  %vm765_vm11 = vmor %vm763_vm9, %vm764_vm8  ;;  %v808_v31 = vor.u32 1.1754944e-38, %v807_v11 }
 0x238   :  { %v2333_v55 = vpop.eup %2332  ;;  %v794_v14 = vsel %vm791_vm7, %v793_v22, %v789_v23  ;;  %v760_v60 = vsub.f32 1.0, %v759_v48  ;;  %v820_v47 = vadd.f32 1.0, %v2331_v50  ;;  %v853_v61 = vmul.f32 %v2329_v51, %v756_v63 }
 0x239   :  { %v851_v5 = vmul.f32 %v794_v14, %v2832_v35  ;;  %v797_v52 = vmul.f32 %v2333_v55, %v2900_v13  ;;  %v2335_v18 = vpop.eup %2334  ;;  %vm802_vm10 = vweird.f32 %v2333_v55  ;;  %v770_v51 = vor.u32 1.1754944e-38, %v769_v62 }
 0x23a   :  { %v761_v56 = vmul.f32 %v2327_v26, %v760_v60  ;;  %2336 = vrcp.f32 %v820_v47  ;;  %v824_v22 = vmul.f32 %v2903_v59, %v823_v0  ;;  %vm803_vm14 = vmor %vm801_vm13, %vm802_vm10  ;;  %vm806_vm15 = vcmp.eq.f32.partialorder %v805_v15, 8.507059e+37 }
 0x23b   :  { %v798_v30 = vsub.f32 1.0, %v797_v52  ;;  %v2915_v43 = vadd.f32 %v853_v61, %v851_v5  ;;  %v830_v61 = vand.u32 2147483647, %v2894_v40  ;;  %vm841_vm4 = vweird.f32 %v820_v47 }
 0x23c   :  { %v762_v4 = vadd.f32 %v2327_v26, %v761_v56  ;;  %v825_v5 = vadd.f32 %v2903_v59, %v824_v22 }
 0x23d   :  { %v799_v35 = vmul.f32 %v2333_v55, %v798_v30  ;;  %2338 = vtanh.f32 %v2915_v43  ;;  %v847_v30 = vand.u32 2147483648, %v820_v47  ;;  %vm831_vm5 = vcmp.eq.f32.partialorder %v830_v61, 8.507059e+37 }
 0x23e   :  { %v766_v27 = vsel %vm765_vm11, %v2327_v26, %v762_v4  ;;  %v832_v26 = vand.u32 2147483648, %v2894_v40  ;;  %v829_v62 = vsel %vm828_vm2, %v2903_v59, %v825_v5 }
 0x23f   :  { %v771_v49 = vsel %vm768_vm12, %v770_v51, %v766_v27  ;;  %v800_v48 = vadd.f32 %v2333_v55, %v799_v35 }
 0x240   :  { %v2337_v50 = vpop.eup %2336  ;;  %v854_v23 = vmul.f32 %v2335_v18, %v771_v49  ;;  %v833_v56 = vor.u32 1.1754944e-38, %v832_v26  ;;  %v848_v18 = vor.u32 1.1754944e-38, %v847_v30 }
 0x241   :  { %v804_v63 = vsel %vm803_vm14, %v2333_v55, %v800_v48  ;;  %v837_v14 = vmul.f32 %v2337_v50, %v820_v47  ;;  %vm842_vm3 = vweird.f32 %v2337_v50 }
 0x242   :  { %v809_v60 = vsel %vm806_vm15, %v808_v31, %v804_v63  ;;  %vm843_vm6 = vmor %vm841_vm4, %vm842_vm3  ;;  %v834_v4 = vsel %vm831_vm5, %v833_v56, %v829_v62 }
 0x243   :  { %v852_v13 = vmul.f32 %v809_v60, %v2843_v10  ;;  %v838_v29 = vsub.f32 1.0, %v837_v14  ;;  %v2339_v0 = vpop.eup %2338  ;;  %v845_v10 = vand.u32 2147483647, %v820_v47  ;;  %v2103_v47 = vld [vmem:[%s3292_s0 + $0x60] sm:$0xff] }
 0x244   :  { %v859_v40 = vmul.f32 %v2339_v0, %v834_v4 }
 0x245   :  { %v2926_v52 = vadd.f32 %v854_v23, %v852_v13  ;;  %v839_v55 = vmul.f32 %v2337_v50, %v838_v29  ;;  %vm846_vm7 = vcmp.eq.f32.partialorder %v845_v10, 8.507059e+37  ;;  %v934_v23 = vunpack.c.h.bf16 %v2103_v47  ;;  %v2104_v13 = vld [vmem:[%s3292_s0 + $0x68] sm:$0xff]  ;;  %v2105_v29 = vld [vmem:[%s3292_s0 + $0x70] sm:$0xff] }
 0x246   :  { %v861_v27 = vpack.c.bf16 %v859_v40, %v859_v40  ;;  %v936_v62 = vunpack.c.h.bf16 %v2104_v13  ;;  %v937_v0 = vunpack.c.l.bf16 %v2105_v29  ;;  %v938_v56 = vunpack.c.h.bf16 %v2105_v29 }
 0x247   :  { %2340 = vtanh.f32 %v2926_v52  ;;  %v840_v11 = vadd.f32 %v2337_v50, %v839_v55 }
 0x248   :  { %v873_v48 = vunpack.c.l.b16 %v861_v27 }
 0x249   :  { %v844_v15 = vsel %vm843_vm6, %v2337_v50, %v840_v11  ;;  %v933_v50 = vunpack.c.l.bf16 %v2103_v47  ;;  %v935_v47 = vunpack.c.l.bf16 %v2104_v13 }
 0x24a   :  { %v849_v51 = vsel %vm846_vm7, %v848_v18, %v844_v15 }
 0x24d   :  { %v2341_v35 = vpop.eup %2340 }
 0x24e   :  { %v860_v22 = vmul.f32 %v2341_v35, %v849_v51  ;;  %v2106_v35 = vld [vmem:[%s3292_s0 + $0x78] sm:$0xff] }
 0x24f   :  { %v939_v13 = vunpack.c.l.bf16 %v2106_v35 }
 0x250   :  { %v862_v59 = vpack.c.bf16 %v860_v22, %v860_v22  ;;  %v2208_v49 = vpack.c.bf16 %v860_v22, %v859_v40 }
 0x252   :  { %2236 = vst [vmem:[%s3294_s2 + $0x10] sm:$0xff] %v2208_v49   ;;  %v874_v31 = vunpack.c.l.b16 %v862_v59 }
 0x254   :  { %v875_v63 = vpack.c.b16 %v874_v31, %v873_v48 }
 0x256   :  { %885 = vmatmul.bf16.vlgmr.msrb.gmra.mxu0 %v875_v63  ;;  %899 = vmatmul.bf16.vlgmr.msrb.gmra.mxu1 %v875_v63 }
 0x257   :  { %913 = vmatmul.bf16.vlgmr.msrb.gmra.mxu2 %v875_v63  ;;  %927 = vmatmul.bf16.vlgmr.msrb.gmra.mxu3 %v875_v63  ;;  %v940_v63 = vunpack.c.h.bf16 %v2106_v35 }
 0x258   :  { %1305 = vmatpush.bf16.msrb.mxu0 %v2550_v3  ;;  %1319 = vmatpush.bf16.msrb.mxu1 %v2552_v7 }
 0x259   :  { %1333 = vmatpush.bf16.msrb.mxu2 %v2565_v21  ;;  %1347 = vmatpush.bf16.msrb.mxu3 %v2554_v8 }
 0x25c   :  { %1306 = vmatpush.bf16.msrb.mxu0 %v2557_v12  ;;  %1320 = vmatpush.bf16.msrb.mxu1 %v2561_v16 }
 0x25d   :  { %1334 = vmatpush.bf16.msrb.mxu2 %v2577_v34  ;;  %1348 = vmatpush.bf16.msrb.mxu3 %v2563_v17 }
 0x260   :  { %1307 = vmatpush.bf16.msrb.mxu0 %v2569_v28  ;;  %1321 = vmatpush.bf16.msrb.mxu1 %v2573_v32 }
 0x261   :  { %1335 = vmatpush.bf16.msrb.mxu2 %v2583_v42  ;;  %1349 = vmatpush.bf16.msrb.mxu3 %v2575_v33 }
 0x264   :  { %1308 = vmatpush.bf16.msrb.mxu0 %v2581_v41  ;;  %1322 = vmatpush.bf16.msrb.mxu1 %v2587_v45 }
 0x265   :  { %1336 = vmatpush.bf16.msrb.mxu2 %v2595_v54  ;;  %1350 = vmatpush.bf16.msrb.mxu3 %v2589_v46 }
 0x268   :  { %1309 = vmatpush.bf16.msrb.mxu0 %v2593_v53  ;;  %1323 = vmatpush.bf16.msrb.mxu1 %v2599_v57 }
 0x269   :  { %1337 = vmatpush.bf16.msrb.mxu2 %v2607_v2  ;;  %1351 = vmatpush.bf16.msrb.mxu3 %v2601_v58 }
 0x26c   :  { %1310 = vmatpush.bf16.msrb.mxu0 %v2605_v1  ;;  %1324 = vmatpush.bf16.msrb.mxu1 %v2611_v6 }
 0x26d   :  { %1338 = vmatpush.bf16.msrb.mxu2 %v2619_v20  ;;  %1352 = vmatpush.bf16.msrb.mxu3 %v2613_v9 }
 0x270   :  { %1311 = vmatpush.bf16.msrb.mxu0 %v2617_v19  ;;  %1325 = vmatpush.bf16.msrb.mxu1 %v2623_v24 }
 0x271   :  { %1339 = vmatpush.bf16.msrb.mxu2 %v2631_v37  ;;  %1353 = vmatpush.bf16.msrb.mxu3 %v2625_v25 }
 0x274   :  { %1312 = vmatpush.bf16.msrb.mxu0 %v2629_v36  ;;  %1326 = vmatpush.bf16.msrb.mxu1 %v2635_v38 }
 0x275   :  { %1340 = vmatpush.bf16.msrb.mxu2 %v2643_v44  ;;  %1354 = vmatpush.bf16.msrb.mxu3 %v2637_v39 }
 0x2d3   :  { %v886_v14 = vpop.f32.mrf.mxu0  ;;  %v900_v60 = vpop.f32.mrf.mxu1 }
 0x2d4   :  { %v941_v5 = vadd.f32 %v933_v50, %v886_v14  ;;  %v942_v26 = vadd.f32 %v934_v23, %v900_v60 }
 0x2d6   :  { %v2107_v61 = vmul.f32 -1.442695, %v941_v5  ;;  %v2109_v55 = vmul.f32 -1.442695, %v942_v26 }
 0x2d8   :  { %2342 = vpow2.f32 %v2107_v61 }
 0x2d9   :  { %2344 = vpow2.f32 %v2109_v55 }
 0x2da   :  { %v928_v30 = vpop.f32.mrf.mxu3  ;;  %v914_v31 = vpop.f32.mrf.mxu2 }
 0x2db   :  { %v944_v11 = vadd.f32 %v936_v62, %v928_v30  ;;  %v888_v10 = vpop.f32.mrf.mxu0  ;;  %v902_v4 = vpop.f32.mrf.mxu1  ;;  %v943_v5 = vadd.f32 %v935_v47, %v914_v31 }
 0x2dc   :  { %v945_v15 = vadd.f32 %v937_v0, %v888_v10  ;;  %v946_v40 = vadd.f32 %v938_v56, %v902_v4 }
 0x2dd   :  { %v2111_v18 = vmul.f32 -1.442695, %v944_v11 }
 0x2de   :  { %v2343_v51 = vpop.eup %2342  ;;  %v2108_v22 = vmul.f32 -1.442695, %v945_v15  ;;  %v2110_v49 = vmul.f32 -1.442695, %v946_v40 }
 0x2df   :  { %v2345_v27 = vpop.eup %2344  ;;  %v955_v59 = vadd.f32 1.0, %v2343_v51  ;;  %2346 = vpow2.f32 %v2111_v18 }
 0x2e0   :  { %v993_v48 = vadd.f32 1.0, %v2345_v27  ;;  %2348 = vpow2.f32 %v2108_v22 }
 0x2e1   :  { %2350 = vrcp.f32 %v955_v59  ;;  %v966_v40 = vand.u32 2147483647, %v955_v59  ;;  %v968_v18 = vand.u32 2147483648, %v955_v59  ;;  %vm962_vm10 = vweird.f32 %v955_v59 }
 0x2e2   :  { %2352 = vrcp.f32 %v993_v48  ;;  %v930_v50 = vpop.f32.mrf.mxu3  ;;  %v916_v4 = vpop.f32.mrf.mxu2  ;;  %v1006_v51 = vand.u32 2147483648, %v993_v48  ;;  %vm1000_vm11 = vweird.f32 %v993_v48 }
 0x2e3   :  { %2354 = vpow2.f32 %v2110_v49  ;;  %v948_v23 = vadd.f32 %v940_v63, %v930_v50  ;;  %v1004_v49 = vand.u32 2147483647, %v993_v48  ;;  %v947_v31 = vadd.f32 %v939_v13, %v916_v4 }
 0x2e4   :  { %vm967_vm13 = vcmp.eq.f32.partialorder %v966_v40, 8.507059e+37  ;;  %v969_v50 = vor.u32 1.1754944e-38, %v968_v18 }
 0x2e5   :  { %v2347_v14 = vpop.eup %2346  ;;  %v2112_v55 = vmul.f32 -1.442695, %v948_v23  ;;  %vm1005_vm15 = vcmp.eq.f32.partialorder %v1004_v49, 8.507059e+37 }
 0x2e6   :  { %v2349_v60 = vpop.eup %2348  ;;  %v2977_v26 = vadd.f32 1.0, %v2347_v14 }
 0x2e7   :  { %v2351_v29 = vpop.eup %2350  ;;  %v2979_v61 = vadd.f32 1.0, %v2349_v60  ;;  %v1007_v60 = vor.u32 1.1754944e-38, %v1006_v51 }
 0x2e8   :  { %v2353_v62 = vpop.eup %2352  ;;  %v958_v0 = vmul.f32 %v2351_v29, %v955_v59  ;;  %2356 = vrcp.f32 %v2977_v26  ;;  %vm963_vm8 = vweird.f32 %v2351_v29 }
 0x2e9   :  { %v2355_v56 = vpop.eup %2354  ;;  %v996_v30 = vmul.f32 %v2353_v62, %v993_v48  ;;  %2358 = vrcp.f32 %v2979_v61  ;;  %vm1001_vm9 = vweird.f32 %v2353_v62  ;;  %vm964_vm12 = vmor %vm962_vm10, %vm963_vm8  ;;  %v981_v4 = vand.u32 2147483647, %v2979_v61 }
 0x2ea   :  { %v959_v11 = vsub.f32 1.0, %v958_v0  ;;  %2360 = vtanh.f32 %v943_v5  ;;  %v2983_v10 = vadd.f32 1.0, %v2355_v56  ;;  %vm1002_vm14 = vmor %vm1000_vm11, %vm1001_vm9  ;;  %v983_v51 = vand.u32 2147483648, %v2979_v61 }
 0x2eb   :  { %v997_v15 = vsub.f32 1.0, %v996_v30  ;;  %2362 = vpow2.f32 %v2112_v55  ;;  %vm977_vm1 = vweird.f32 %v2979_v61  ;;  %vm982_vm4 = vcmp.eq.f32.partialorder %v981_v4, 8.507059e+37 }
 0x2ec   :  { %v960_v22 = vmul.f32 %v2351_v29, %v959_v11  ;;  %2364 = vrcp.f32 %v2983_v10  ;;  %v1021_v49 = vand.u32 2147483648, %v2983_v10  ;;  %vm1015_vm5 = vweird.f32 %v2983_v10 }
 0x2ed   :  { %v998_v27 = vmul.f32 %v2353_v62, %v997_v15  ;;  %2366 = vtanh.f32 %v947_v31  ;;  %vm1040_vm9 = vweird.f32 %v2977_v26 }
 0x2ee   :  { %v2986_v63 = vpop.eup %2356  ;;  %v961_v35 = vadd.f32 %v2351_v29, %v960_v22 }
 0x2ef   :  { %v2359_v47 = vpop.eup %2358  ;;  %v999_v23 = vadd.f32 %v2353_v62, %v998_v27  ;;  %v1036_v55 = vmul.f32 %v2986_v63, %v2977_v26  ;;  %vm1041_vm8 = vweird.f32 %v2986_v63 }
 0x2f0   :  { %v2361_v14 = vpop.eup %2360  ;;  %v965_v5 = vsel %vm964_vm12, %v2351_v29, %v961_v35  ;;  %v973_v0 = vmul.f32 %v2359_v47, %v2979_v61  ;;  %vm978_vm0 = vweird.f32 %v2359_v47  ;;  %v1019_v35 = vand.u32 2147483647, %v2983_v10  ;;  %vm1042_vm10 = vmor %vm1040_vm9, %vm1041_vm8 }
 0x2f1   :  { %v2363_v56 = vpop.eup %2362  ;;  %v970_v30 = vsel %vm967_vm13, %v969_v50, %v965_v5  ;;  %v1003_v13 = vsel %vm1002_vm14, %v2353_v62, %v999_v23  ;;  %v1037_v22 = vsub.f32 1.0, %v1036_v55  ;;  %vm979_vm3 = vmor %vm977_vm1, %vm978_vm0  ;;  %v1022_v61 = vor.u32 1.1754944e-38, %v1021_v49 }
 0x2f2   :  { %v2365_v59 = vpop.eup %2364  ;;  %v1008_v48 = vsel %vm1005_vm15, %v1007_v60, %v1003_v13  ;;  %v974_v11 = vsub.f32 1.0, %v973_v0  ;;  %v1034_v15 = vadd.f32 1.0, %v2363_v56  ;;  %v1067_v18 = vmul.f32 %v2361_v14, %v970_v30 }
 0x2f3   :  { %v1065_v40 = vmul.f32 %v1008_v48, %v2915_v43  ;;  %v1011_v29 = vmul.f32 %v2365_v59, %v2983_v10  ;;  %v2367_v50 = vpop.eup %2366  ;;  %vm1016_vm2 = vweird.f32 %v2365_v59  ;;  %v984_v14 = vor.u32 1.1754944e-38, %v983_v51 }
 0x2f4   :  { %v975_v27 = vmul.f32 %v2359_v47, %v974_v11  ;;  %2368 = vrcp.f32 %v1034_v15  ;;  %v1038_v60 = vmul.f32 %v2986_v63, %v1037_v22  ;;  %vm1017_vm6 = vmor %vm1015_vm5, %vm1016_vm2  ;;  %vm1020_vm7 = vcmp.eq.f32.partialorder %v1019_v35, 8.507059e+37 }
 0x2f5   :  { %v1012_v62 = vsub.f32 1.0, %v1011_v29  ;;  %v2998_v23 = vadd.f32 %v1067_v18, %v1065_v40  ;;  %v1044_v18 = vand.u32 2147483647, %v2977_v26  ;;  %vm1055_vm12 = vweird.f32 %v1034_v15 }
 0x2f6   :  { %v976_v31 = vadd.f32 %v2359_v47, %v975_v27  ;;  %v1039_v40 = vadd.f32 %v2986_v63, %v1038_v60 }
 0x2f7   :  { %v1013_v43 = vmul.f32 %v2365_v59, %v1012_v62  ;;  %2370 = vtanh.f32 %v2998_v23  ;;  %v1061_v62 = vand.u32 2147483648, %v1034_v15  ;;  %vm1045_vm13 = vcmp.eq.f32.partialorder %v1044_v18, 8.507059e+37 }
 0x2f8   :  { %v980_v5 = vsel %vm979_vm3, %v2359_v47, %v976_v31  ;;  %v1046_v47 = vand.u32 2147483648, %v2977_v26  ;;  %v1043_v51 = vsel %vm1042_vm10, %v2986_v63, %v1039_v40 }
 0x2f9   :  { %v985_v55 = vsel %vm982_vm4, %v984_v14, %v980_v5  ;;  %v1014_v0 = vadd.f32 %v2365_v59, %v1013_v43 }
 0x2fa   :  { %v2369_v56 = vpop.eup %2368  ;;  %v1068_v13 = vmul.f32 %v2367_v50, %v985_v55  ;;  %v1047_v27 = vor.u32 1.1754944e-38, %v1046_v47  ;;  %v1062_v50 = vor.u32 1.1754944e-38, %v1061_v62 }
 0x2fb   :  { %v1018_v30 = vsel %vm1017_vm6, %v2365_v59, %v1014_v0  ;;  %v1051_v48 = vmul.f32 %v2369_v56, %v1034_v15  ;;  %vm1056_vm11 = vweird.f32 %v2369_v56 }
 0x2fc   :  { %v1023_v11 = vsel %vm1020_vm7, %v1022_v61, %v1018_v30  ;;  %vm1057_vm14 = vmor %vm1055_vm12, %vm1056_vm11  ;;  %v1048_v31 = vsel %vm1045_vm13, %v1047_v27, %v1043_v51 }
 0x2fd   :  { %v1066_v10 = vmul.f32 %v1023_v11, %v2926_v52  ;;  %v1052_v4 = vsub.f32 1.0, %v1051_v48  ;;  %v2371_v22 = vpop.eup %2370  ;;  %v1059_v52 = vand.u32 2147483647, %v1034_v15  ;;  %v2115_v15 = vld [vmem:[%s3292_s0 + $0x80] sm:$0xff] }
 0x2fe   :  { %v1073_v26 = vmul.f32 %v2371_v22, %v1048_v31 }
 0x2ff   :  { %v3009_v29 = vadd.f32 %v1068_v13, %v1066_v10  ;;  %v1053_v59 = vmul.f32 %v2369_v56, %v1052_v4  ;;  %vm1060_vm15 = vcmp.eq.f32.partialorder %v1059_v52, 8.507059e+37  ;;  %v1148_v13 = vunpack.c.h.bf16 %v2115_v15  ;;  %v2116_v10 = vld [vmem:[%s3292_s0 + $0x88] sm:$0xff]  ;;  %v2117_v4 = vld [vmem:[%s3292_s0 + $0x90] sm:$0xff] }
 0x300   :  { %v1075_v5 = vpack.c.bf16 %v1073_v26, %v1073_v26  ;;  %v1150_v51 = vunpack.c.h.bf16 %v2116_v10  ;;  %v1151_v22 = vunpack.c.l.bf16 %v2117_v4  ;;  %v1152_v27 = vunpack.c.h.bf16 %v2117_v4 }
 0x301   :  { %2372 = vtanh.f32 %v3009_v29  ;;  %v1054_v49 = vadd.f32 %v2369_v56, %v1053_v59 }
 0x302   :  { %v1087_v0 = vunpack.c.l.b16 %v1075_v5 }
 0x303   :  { %v1058_v35 = vsel %vm1057_vm14, %v2369_v56, %v1054_v49  ;;  %v1147_v56 = vunpack.c.l.bf16 %v2115_v15  ;;  %v1149_v15 = vunpack.c.l.bf16 %v2116_v10 }
 0x304   :  { %v1063_v14 = vsel %vm1060_vm15, %v1062_v50, %v1058_v35 }
 0x307   :  { %v2373_v43 = vpop.eup %2372 }
 0x308   :  { %v1074_v60 = vmul.f32 %v2373_v43, %v1063_v14  ;;  %v2118_v43 = vld [vmem:[%s3292_s0 + $0x98] sm:$0xff] }
 0x309   :  { %v1153_v10 = vunpack.c.l.bf16 %v2118_v43 }
 0x30a   :  { %v1076_v63 = vpack.c.bf16 %v1074_v60, %v1074_v60  ;;  %v2213_v55 = vpack.c.bf16 %v1074_v60, %v1073_v26 }
 0x30c   :  { %2237 = vst [vmem:[%s3294_s2 + $0x18] sm:$0xff] %v2213_v55   ;;  %v1088_v61 = vunpack.c.l.b16 %v1076_v63 }
 0x30e   :  { %v1089_v30 = vpack.c.b16 %v1088_v61, %v1087_v0 }
 0x310   :  { %1099 = vmatmul.bf16.vlgmr.msra.gmra.mxu0 %v1089_v30  ;;  %1113 = vmatmul.bf16.vlgmr.msra.gmra.mxu1 %v1089_v30 }
 0x311   :  { %1127 = vmatmul.bf16.vlgmr.msra.gmra.mxu2 %v1089_v30  ;;  %1141 = vmatmul.bf16.vlgmr.msra.gmra.mxu3 %v1089_v30  ;;  %v1154_v30 = vunpack.c.h.bf16 %v2118_v43 }
 0x312   :  { %1519 = vmatpush.bf16.msra.mxu0 %v2550_v3  ;;  %1533 = vmatpush.bf16.msra.mxu1 %v2552_v7 }
 0x313   :  { %1547 = vmatpush.bf16.msra.mxu2 %v2565_v21  ;;  %1561 = vmatpush.bf16.msra.mxu3 %v2554_v8 }
 0x316   :  { %1520 = vmatpush.bf16.msra.mxu0 %v2557_v12  ;;  %1534 = vmatpush.bf16.msra.mxu1 %v2561_v16 }
 0x317   :  { %1548 = vmatpush.bf16.msra.mxu2 %v2577_v34  ;;  %1562 = vmatpush.bf16.msra.mxu3 %v2563_v17 }
 0x31a   :  { %1521 = vmatpush.bf16.msra.mxu0 %v2569_v28  ;;  %1535 = vmatpush.bf16.msra.mxu1 %v2573_v32 }
 0x31b   :  { %1549 = vmatpush.bf16.msra.mxu2 %v2583_v42  ;;  %1563 = vmatpush.bf16.msra.mxu3 %v2575_v33 }
 0x31e   :  { %1522 = vmatpush.bf16.msra.mxu0 %v2581_v41  ;;  %1536 = vmatpush.bf16.msra.mxu1 %v2587_v45 }
 0x31f   :  { %1550 = vmatpush.bf16.msra.mxu2 %v2595_v54  ;;  %1564 = vmatpush.bf16.msra.mxu3 %v2589_v46 }
 0x322   :  { %1523 = vmatpush.bf16.msra.mxu0 %v2593_v53  ;;  %1537 = vmatpush.bf16.msra.mxu1 %v2599_v57 }
 0x323   :  { %1551 = vmatpush.bf16.msra.mxu2 %v2607_v2  ;;  %1565 = vmatpush.bf16.msra.mxu3 %v2601_v58 }
 0x326   :  { %1524 = vmatpush.bf16.msra.mxu0 %v2605_v1  ;;  %1538 = vmatpush.bf16.msra.mxu1 %v2611_v6 }
 0x327   :  { %1552 = vmatpush.bf16.msra.mxu2 %v2619_v20  ;;  %1566 = vmatpush.bf16.msra.mxu3 %v2613_v9 }
 0x32a   :  { %1525 = vmatpush.bf16.msra.mxu0 %v2617_v19  ;;  %1539 = vmatpush.bf16.msra.mxu1 %v2623_v24 }
 0x32b   :  { %1553 = vmatpush.bf16.msra.mxu2 %v2631_v37  ;;  %1567 = vmatpush.bf16.msra.mxu3 %v2625_v25 }
 0x32e   :  { %1526 = vmatpush.bf16.msra.mxu0 %v2629_v36  ;;  %1540 = vmatpush.bf16.msra.mxu1 %v2635_v38 }
 0x32f   :  { %1554 = vmatpush.bf16.msra.mxu2 %v2643_v44  ;;  %1568 = vmatpush.bf16.msra.mxu3 %v2637_v39 }
 0x38d   :  { %v1100_v48 = vpop.f32.mrf.mxu0  ;;  %v1114_v11 = vpop.f32.mrf.mxu1 }
 0x38e   :  { %v1155_v40 = vadd.f32 %v1147_v56, %v1100_v48  ;;  %v1156_v47 = vadd.f32 %v1148_v13, %v1114_v11 }
 0x390   :  { %v2119_v18 = vmul.f32 -1.442695, %v1155_v40  ;;  %v2121_v59 = vmul.f32 -1.442695, %v1156_v47 }
 0x392   :  { %2374 = vpow2.f32 %v2119_v18 }
 0x393   :  { %2376 = vpow2.f32 %v2121_v59 }
 0x394   :  { %v1142_v62 = vpop.f32.mrf.mxu3  ;;  %v1128_v61 = vpop.f32.mrf.mxu2 }
 0x395   :  { %v1158_v49 = vadd.f32 %v1150_v51, %v1142_v62  ;;  %v1102_v52 = vpop.f32.mrf.mxu0  ;;  %v1116_v31 = vpop.f32.mrf.mxu1  ;;  %v1157_v40 = vadd.f32 %v1149_v15, %v1128_v61 }
 0x396   :  { %v1159_v35 = vadd.f32 %v1151_v22, %v1102_v52  ;;  %v1160_v26 = vadd.f32 %v1152_v27, %v1116_v31 }
 0x397   :  { %v2123_v50 = vmul.f32 -1.442695, %v1158_v49 }
 0x398   :  { %v2375_v14 = vpop.eup %2374  ;;  %v2120_v60 = vmul.f32 -1.442695, %v1159_v35  ;;  %v2122_v55 = vmul.f32 -1.442695, %v1160_v26 }
 0x399   :  { %v2377_v5 = vpop.eup %2376  ;;  %v1169_v63 = vadd.f32 1.0, %v2375_v14  ;;  %2378 = vpow2.f32 %v2123_v50 }
 0x39a   :  { %v1207_v0 = vadd.f32 1.0, %v2377_v5  ;;  %2380 = vpow2.f32 %v2120_v60 }
 0x39b   :  { %2382 = vrcp.f32 %v1169_v63  ;;  %v1180_v26 = vand.u32 2147483647, %v1169_v63  ;;  %v1182_v50 = vand.u32 2147483648, %v1169_v63  ;;  %vm1176_vm2 = vweird.f32 %v1169_v63 }
 0x39c   :  { %2384 = vrcp.f32 %v1207_v0  ;;  %v1144_v56 = vpop.f32.mrf.mxu3  ;;  %v1130_v31 = vpop.f32.mrf.mxu2  ;;  %v1220_v14 = vand.u32 2147483648, %v1207_v0  ;;  %vm1214_vm3 = vweird.f32 %v1207_v0 }
 0x39d   :  { %2386 = vpow2.f32 %v2122_v55  ;;  %v1162_v13 = vadd.f32 %v1154_v30, %v1144_v56  ;;  %v1218_v55 = vand.u32 2147483647, %v1207_v0  ;;  %v1161_v61 = vadd.f32 %v1153_v10, %v1130_v31 }
 0x39e   :  { %vm1181_vm5 = vcmp.eq.f32.partialorder %v1180_v26, 8.507059e+37  ;;  %v1183_v56 = vor.u32 1.1754944e-38, %v1182_v50 }
 0x39f   :  { %v2379_v48 = vpop.eup %2378  ;;  %v2124_v59 = vmul.f32 -1.442695, %v1162_v13  ;;  %vm1219_vm7 = vcmp.eq.f32.partialorder %v1218_v55, 8.507059e+37 }
 0x3a0   :  { %v2381_v11 = vpop.eup %2380  ;;  %v3060_v47 = vadd.f32 1.0, %v2379_v48 }
 0x3a1   :  { %v2383_v4 = vpop.eup %2382  ;;  %v3062_v18 = vadd.f32 1.0, %v2381_v11  ;;  %v1221_v11 = vor.u32 1.1754944e-38, %v1220_v14 }
 0x3a2   :  { %v2385_v51 = vpop.eup %2384  ;;  %v1172_v22 = vmul.f32 %v2383_v4, %v1169_v63  ;;  %2388 = vrcp.f32 %v3060_v47  ;;  %vm1177_vm0 = vweird.f32 %v2383_v4 }
 0x3a3   :  { %v2387_v27 = vpop.eup %2386  ;;  %v1210_v62 = vmul.f32 %v2385_v51, %v1207_v0  ;;  %2390 = vrcp.f32 %v3062_v18  ;;  %vm1215_vm1 = vweird.f32 %v2385_v51  ;;  %vm1178_vm4 = vmor %vm1176_vm2, %vm1177_vm0  ;;  %v1195_v31 = vand.u32 2147483647, %v3062_v18 }
 0x3a4   :  { %v1173_v49 = vsub.f32 1.0, %v1172_v22  ;;  %2392 = vtanh.f32 %v1157_v40  ;;  %v3066_v52 = vadd.f32 1.0, %v2387_v27  ;;  %vm1216_vm6 = vmor %vm1214_vm3, %vm1215_vm1  ;;  %v1197_v14 = vand.u32 2147483648, %v3062_v18 }
 0x3a5   :  { %v1211_v35 = vsub.f32 1.0, %v1210_v62  ;;  %2394 = vpow2.f32 %v2124_v59  ;;  %vm1191_vm9 = vweird.f32 %v3062_v18  ;;  %vm1196_vm12 = vcmp.eq.f32.partialorder %v1195_v31, 8.507059e+37 }
 0x3a6   :  { %v1174_v60 = vmul.f32 %v2383_v4, %v1173_v49  ;;  %2396 = vrcp.f32 %v3066_v52  ;;  %v1235_v55 = vand.u32 2147483648, %v3066_v52  ;;  %vm1229_vm13 = vweird.f32 %v3066_v52 }
 0x3a7   :  { %v1212_v5 = vmul.f32 %v2385_v51, %v1211_v35  ;;  %2398 = vtanh.f32 %v1161_v61  ;;  %vm1254_vm1 = vweird.f32 %v3060_v47 }
 0x3a8   :  { %v3069_v30 = vpop.eup %2388  ;;  %v1175_v43 = vadd.f32 %v2383_v4, %v1174_v60 }
 0x3a9   :  { %v2391_v15 = vpop.eup %2390  ;;  %v1213_v13 = vadd.f32 %v2385_v51, %v1212_v5  ;;  %v1250_v59 = vmul.f32 %v3069_v30, %v3060_v47  ;;  %vm1255_vm0 = vweird.f32 %v3069_v30 }
 0x3aa   :  { %v2393_v48 = vpop.eup %2392  ;;  %v1179_v40 = vsel %vm1178_vm4, %v2383_v4, %v1175_v43  ;;  %v1187_v22 = vmul.f32 %v2391_v15, %v3062_v18  ;;  %vm1192_vm8 = vweird.f32 %v2391_v15  ;;  %v1233_v43 = vand.u32 2147483647, %v3066_v52  ;;  %vm1256_vm2 = vmor %vm1254_vm1, %vm1255_vm0 }
 0x3ab   :  { %v2395_v27 = vpop.eup %2394  ;;  %v1184_v62 = vsel %vm1181_vm5, %v1183_v56, %v1179_v40  ;;  %v1217_v10 = vsel %vm1216_vm6, %v2385_v51, %v1213_v13  ;;  %v1251_v60 = vsub.f32 1.0, %v1250_v59  ;;  %vm1193_vm11 = vmor %vm1191_vm9, %vm1192_vm8  ;;  %v1236_v18 = vor.u32 1.1754944e-38, %v1235_v55 }
 0x3ac   :  { %v2397_v63 = vpop.eup %2396  ;;  %v1222_v0 = vsel %vm1219_vm7, %v1221_v11, %v1217_v10  ;;  %v1188_v49 = vsub.f32 1.0, %v1187_v22  ;;  %v1248_v35 = vadd.f32 1.0, %v2395_v27  ;;  %v1281_v50 = vmul.f32 %v2393_v48, %v1184_v62 }
 0x3ad   :  { %v1279_v26 = vmul.f32 %v1222_v0, %v2998_v23  ;;  %v1225_v4 = vmul.f32 %v2397_v63, %v3066_v52  ;;  %v2399_v56 = vpop.eup %2398  ;;  %vm1230_vm10 = vweird.f32 %v2397_v63  ;;  %v1198_v48 = vor.u32 1.1754944e-38, %v1197_v14 }
 0x3ae   :  { %v1189_v5 = vmul.f32 %v2391_v15, %v1188_v49  ;;  %2400 = vrcp.f32 %v1248_v35  ;;  %v1252_v11 = vmul.f32 %v3069_v30, %v1251_v60  ;;  %vm1231_vm14 = vmor %vm1229_vm13, %vm1230_vm10  ;;  %vm1234_vm15 = vcmp.eq.f32.partialorder %v1233_v43, 8.507059e+37 }
 0x3af   :  { %v1226_v51 = vsub.f32 1.0, %v1225_v4  ;;  %v3081_v13 = vadd.f32 %v1281_v50, %v1279_v26  ;;  %v1258_v50 = vand.u32 2147483647, %v3060_v47  ;;  %vm1269_vm4 = vweird.f32 %v1248_v35 }
 0x3b0   :  { %v1190_v61 = vadd.f32 %v2391_v15, %v1189_v5  ;;  %v1253_v26 = vadd.f32 %v3069_v30, %v1252_v11 }
 0x3b1   :  { %v1227_v23 = vmul.f32 %v2397_v63, %v1226_v51  ;;  %2402 = vtanh.f32 %v3081_v13  ;;  %v1275_v51 = vand.u32 2147483648, %v1248_v35  ;;  %vm1259_vm5 = vcmp.eq.f32.partialorder %v1258_v50, 8.507059e+37 }
 0x3b2   :  { %v1194_v40 = vsel %vm1193_vm11, %v2391_v15, %v1190_v61  ;;  %v1260_v15 = vand.u32 2147483648, %v3060_v47  ;;  %v1257_v14 = vsel %vm1256_vm2, %v3069_v30, %v1253_v26 }
 0x3b3   :  { %v1199_v59 = vsel %vm1196_vm12, %v1198_v48, %v1194_v40  ;;  %v1228_v22 = vadd.f32 %v2397_v63, %v1227_v23 }
 0x3b4   :  { %v2401_v27 = vpop.eup %2400  ;;  %v1282_v10 = vmul.f32 %v2399_v56, %v1199_v59  ;;  %v1261_v5 = vor.u32 1.1754944e-38, %v1260_v15  ;;  %v1276_v56 = vor.u32 1.1754944e-38, %v1275_v51 }
 0x3b5   :  { %v1232_v62 = vsel %vm1231_vm14, %v2397_v63, %v1228_v22  ;;  %v1265_v0 = vmul.f32 %v2401_v27, %v1248_v35  ;;  %vm1270_vm3 = vweird.f32 %v2401_v27 }
 0x3b6   :  { %v1237_v49 = vsel %vm1234_vm15, %v1236_v18, %v1232_v62  ;;  %vm1271_vm6 = vmor %vm1269_vm4, %vm1270_vm3  ;;  %v1262_v61 = vsel %vm1259_vm5, %v1261_v5, %v1257_v14 }
 0x3b7   :  { %v1280_v52 = vmul.f32 %v1237_v49, %v3009_v29  ;;  %v1266_v31 = vsub.f32 1.0, %v1265_v0  ;;  %v2403_v60 = vpop.eup %2402  ;;  %v1273_v29 = vand.u32 2147483647, %v1248_v35 }
 0x3b8   :  { %v1287_v47 = vmul.f32 %v2403_v60, %v1262_v61 }
 0x3b9   :  { %v3092_v4 = vadd.f32 %v1282_v10, %v1280_v52  ;;  %v1267_v63 = vmul.f32 %v2401_v27, %v1266_v31  ;;  %vm1274_vm7 = vcmp.eq.f32.partialorder %v1273_v29, 8.507059e+37 }
 0x3ba   :  { %v1289_v40 = vpack.c.bf16 %v1287_v47, %v1287_v47 }
 0x3bb   :  { %2404 = vtanh.f32 %v3092_v4  ;;  %v1268_v55 = vadd.f32 %v2401_v27, %v1267_v63 }
 0x3bc   :  { %v1301_v22 = vunpack.c.l.b16 %v1289_v40 }
 0x3bd   :  { %v1272_v43 = vsel %vm1271_vm6, %v2401_v27, %v1268_v55 }
 0x3be   :  { %v1277_v48 = vsel %vm1274_vm7, %v1276_v56, %v1272_v43 }
 0x3c1   :  { %v2405_v23 = vpop.eup %2404 }
 0x3c2   :  { %v1288_v11 = vmul.f32 %v2405_v23, %v1277_v48 }
 0x3c4   :  { %v1290_v30 = vpack.c.bf16 %v1288_v11, %v1288_v11  ;;  %v2218_v59 = vpack.c.bf16 %v1288_v11, %v1287_v47 }
 0x3c6   :  { %2238 = vst [vmem:[%s3294_s2 + $0x20] sm:$0xff] %v2218_v59   ;;  %v1302_v18 = vunpack.c.l.b16 %v1290_v30 }
 0x3c8   :  { %v1303_v62 = vpack.c.b16 %v1302_v18, %v1301_v22 }
 0x3ca   :  { %1313 = vmatmul.bf16.vlgmr.msrb.gmra.mxu0 %v1303_v62  ;;  %1327 = vmatmul.bf16.vlgmr.msrb.gmra.mxu1 %v1303_v62 }
 0x3cb   :  { %1341 = vmatmul.bf16.vlgmr.msrb.gmra.mxu2 %v1303_v62  ;;  %1355 = vmatmul.bf16.vlgmr.msrb.gmra.mxu3 %v1303_v62 }
 0x3cc   :  { %1733 = vmatpush.bf16.msrb.mxu0 %v2550_v3  ;;  %1747 = vmatpush.bf16.msrb.mxu1 %v2552_v7  ;;  %v2127_v3 = vld [vmem:[%s3292_s0 + $0xa0] sm:$0xff] }
 0x3cd   :  { %1761 = vmatpush.bf16.msrb.mxu2 %v2565_v21  ;;  %1775 = vmatpush.bf16.msrb.mxu3 %v2554_v8  ;;  %v1361_v7 = vunpack.c.l.bf16 %v2127_v3  ;;  %v1362_v8 = vunpack.c.h.bf16 %v2127_v3 }
 0x3d0   :  { %1734 = vmatpush.bf16.msrb.mxu0 %v2557_v12  ;;  %1748 = vmatpush.bf16.msrb.mxu1 %v2561_v16 }
 0x3d1   :  { %1762 = vmatpush.bf16.msrb.mxu2 %v2577_v34  ;;  %1776 = vmatpush.bf16.msrb.mxu3 %v2563_v17 }
 0x3d4   :  { %1735 = vmatpush.bf16.msrb.mxu0 %v2569_v28  ;;  %1749 = vmatpush.bf16.msrb.mxu1 %v2573_v32  ;;  %v2128_v28 = vld [vmem:[%s3292_s0 + $0xa8] sm:$0xff]  ;;  %v2129_v32 = vld [vmem:[%s3292_s0 + $0xb0] sm:$0xff] }
 0x3d5   :  { %1763 = vmatpush.bf16.msrb.mxu2 %v2583_v42  ;;  %1777 = vmatpush.bf16.msrb.mxu3 %v2575_v33  ;;  %v1365_v42 = vunpack.c.l.bf16 %v2129_v32 }
 0x3d8   :  { %1736 = vmatpush.bf16.msrb.mxu0 %v2581_v41  ;;  %1750 = vmatpush.bf16.msrb.mxu1 %v2587_v45  ;;  %v1364_v41 = vunpack.c.h.bf16 %v2128_v28  ;;  %v1366_v45 = vunpack.c.h.bf16 %v2129_v32 }
 0x3d9   :  { %1764 = vmatpush.bf16.msrb.mxu2 %v2595_v54  ;;  %1778 = vmatpush.bf16.msrb.mxu3 %v2589_v46 }
 0x3dc   :  { %1737 = vmatpush.bf16.msrb.mxu0 %v2593_v53  ;;  %1751 = vmatpush.bf16.msrb.mxu1 %v2599_v57 }
 0x3dd   :  { %1765 = vmatpush.bf16.msrb.mxu2 %v2607_v2  ;;  %1779 = vmatpush.bf16.msrb.mxu3 %v2601_v58 }
 0x3e0   :  { %1738 = vmatpush.bf16.msrb.mxu0 %v2605_v1  ;;  %1752 = vmatpush.bf16.msrb.mxu1 %v2611_v6  ;;  %v2130_v6 = vld [vmem:[%s3292_s0 + $0xb8] sm:$0xff] }
 0x3e1   :  { %1766 = vmatpush.bf16.msrb.mxu2 %v2619_v20  ;;  %1780 = vmatpush.bf16.msrb.mxu3 %v2613_v9  ;;  %v1367_v60 = vunpack.c.l.bf16 %v2130_v6 }
 0x3e4   :  { %1739 = vmatpush.bf16.msrb.mxu0 %v2617_v19  ;;  %1753 = vmatpush.bf16.msrb.mxu1 %v2623_v24 }
 0x3e5   :  { %1767 = vmatpush.bf16.msrb.mxu2 %v2631_v37  ;;  %1781 = vmatpush.bf16.msrb.mxu3 %v2625_v25 }
 0x3e8   :  { %1740 = vmatpush.bf16.msrb.mxu0 %v2629_v36  ;;  %1754 = vmatpush.bf16.msrb.mxu1 %v2635_v38  ;;  %v1368_v38 = vunpack.c.h.bf16 %v2130_v6 }
 0x3e9   :  { %1768 = vmatpush.bf16.msrb.mxu2 %v2643_v44  ;;  %1782 = vmatpush.bf16.msrb.mxu3 %v2637_v39  ;;  %v1363_v39 = vunpack.c.l.bf16 %v2128_v28 }
 0x447   :  { %v1314_v12 = vpop.f32.mrf.mxu0  ;;  %v1328_v16 = vpop.f32.mrf.mxu1 }
 0x448   :  { %v1369_v17 = vadd.f32 %v1361_v7, %v1314_v12  ;;  %v1370_v21 = vadd.f32 %v1362_v8, %v1328_v16 }
 0x44a   :  { %v2131_v33 = vmul.f32 -1.442695, %v1369_v17  ;;  %v2133_v34 = vmul.f32 -1.442695, %v1370_v21 }
 0x44c   :  { %2406 = vpow2.f32 %v2131_v33 }
 0x44d   :  { %2408 = vpow2.f32 %v2133_v34 }
 0x44e   :  { %v1356_v46 = vpop.f32.mrf.mxu3  ;;  %v1342_v37 = vpop.f32.mrf.mxu2 }
 0x44f   :  { %v1372_v53 = vadd.f32 %v1364_v41, %v1356_v46  ;;  %v1316_v54 = vpop.f32.mrf.mxu0  ;;  %v1330_v57 = vpop.f32.mrf.mxu1  ;;  %v1371_v0 = vadd.f32 %v1363_v39, %v1342_v37 }
 0x450   :  { %v1373_v58 = vadd.f32 %v1365_v42, %v1316_v54  ;;  %v1374_v1 = vadd.f32 %v1366_v45, %v1330_v57 }
 0x451   :  { %v2135_v2 = vmul.f32 -1.442695, %v1372_v53 }
 0x452   :  { %v2407_v9 = vpop.eup %2406  ;;  %v2132_v19 = vmul.f32 -1.442695, %v1373_v58  ;;  %v2134_v25 = vmul.f32 -1.442695, %v1374_v1 }
 0x453   :  { %v2409_v20 = vpop.eup %2408  ;;  %v1383_v24 = vadd.f32 1.0, %v2407_v9  ;;  %2410 = vpow2.f32 %v2135_v2 }
 0x454   :  { %v1421_v36 = vadd.f32 1.0, %v2409_v20  ;;  %2412 = vpow2.f32 %v2132_v19 }
 0x455   :  { %2414 = vrcp.f32 %v1383_v24  ;;  %v1394_v61 = vand.u32 2147483647, %v1383_v24  ;;  %v1396_v43 = vand.u32 2147483648, %v1383_v24  ;;  %vm1390_vm10 = vweird.f32 %v1383_v24 }
 0x456   :  { %2416 = vrcp.f32 %v1421_v36  ;;  %v1358_v44 = vpop.f32.mrf.mxu3  ;;  %v1344_v55 = vpop.f32.mrf.mxu2  ;;  %v1434_v47 = vand.u32 2147483648, %v1421_v36  ;;  %v1432_v48 = vand.u32 2147483647, %v1421_v36  ;;  %vm1428_vm11 = vweird.f32 %v1421_v36 }
 0x457   :  { %2418 = vpow2.f32 %v2134_v25  ;;  %v1376_v35 = vadd.f32 %v1368_v38, %v1358_v44  ;;  %v1375_v11 = vadd.f32 %v1367_v60, %v1344_v55  ;;  %vm1395_vm13 = vcmp.eq.f32.partialorder %v1394_v61, 8.507059e+37 }
 0x458   :  { %v1397_v22 = vor.u32 1.1754944e-38, %v1396_v43  ;;  %v1435_v3 = vor.u32 1.1754944e-38, %v1434_v47  ;;  %vm1433_vm15 = vcmp.eq.f32.partialorder %v1432_v48, 8.507059e+37 }
 0x459   :  { %v2411_v27 = vpop.eup %2410  ;;  %v2136_v52 = vmul.f32 -1.442695, %v1376_v35 }
 0x45a   :  { %v2413_v10 = vpop.eup %2412  ;;  %v3143_v49 = vadd.f32 1.0, %v2411_v27 }
 0x45b   :  { %v2415_v26 = vpop.eup %2414  ;;  %v3145_v15 = vadd.f32 1.0, %v2413_v10 }
 0x45c   :  { %v2417_v31 = vpop.eup %2416  ;;  %v1386_v50 = vmul.f32 %v2415_v26, %v1383_v24  ;;  %2420 = vrcp.f32 %v3143_v49  ;;  %vm1391_vm8 = vweird.f32 %v2415_v26 }
 0x45d   :  { %v2419_v63 = vpop.eup %2418  ;;  %v1424_v14 = vmul.f32 %v2417_v31, %v1421_v36  ;;  %2422 = vrcp.f32 %v3145_v15  ;;  %vm1429_vm9 = vweird.f32 %v2417_v31  ;;  %vm1392_vm12 = vmor %vm1390_vm10, %vm1391_vm8  ;;  %v1409_v34 = vand.u32 2147483647, %v3145_v15 }
 0x45e   :  { %v1387_v5 = vsub.f32 1.0, %v1386_v50  ;;  %2424 = vtanh.f32 %v1371_v0  ;;  %v3149_v51 = vadd.f32 1.0, %v2419_v63  ;;  %vm1430_vm14 = vmor %vm1428_vm11, %vm1429_vm9  ;;  %v1411_v53 = vand.u32 2147483648, %v3145_v15 }
 0x45f   :  { %v1425_v29 = vsub.f32 1.0, %v1424_v14  ;;  %2426 = vpow2.f32 %v2136_v52  ;;  %vm1405_vm1 = vweird.f32 %v3145_v15  ;;  %vm1410_vm4 = vcmp.eq.f32.partialorder %v1409_v34, 8.507059e+37 }
 0x460   :  { %v1388_v56 = vmul.f32 %v2415_v26, %v1387_v5  ;;  %2428 = vrcp.f32 %v3149_v51  ;;  %v1449_v1 = vand.u32 2147483648, %v3149_v51  ;;  %v1447_v6 = vand.u32 2147483647, %v3149_v51 }
 0x461   :  { %v1426_v23 = vmul.f32 %v2417_v31, %v1425_v29  ;;  %2430 = vtanh.f32 %v1375_v11  ;;  %v1412_v20 = vor.u32 1.1754944e-38, %v1411_v53  ;;  %vm1443_vm5 = vweird.f32 %v3149_v51 }
 0x462   :  { %v3152_v40 = vpop.eup %2420  ;;  %v1389_v30 = vadd.f32 %v2415_v26, %v1388_v56  ;;  %v1450_v39 = vor.u32 1.1754944e-38, %v1449_v1  ;;  %vm1448_vm7 = vcmp.eq.f32.partialorder %v1447_v6, 8.507059e+37  ;;  %vm1468_vm9 = vweird.f32 %v3143_v49  ;;  %v2142_v1 = vld [vmem:[%s3292_s0 + $0xd8] sm:$0xff] }
 0x463   :  { %v2423_v59 = vpop.eup %2422  ;;  %v1427_v18 = vadd.f32 %v2417_v31, %v1426_v23  ;;  %v1464_v8 = vmul.f32 %v3152_v40, %v3143_v49  ;;  %vm1469_vm8 = vweird.f32 %v3152_v40 }
 0x464   :  { %v2425_v62 = vpop.eup %2424  ;;  %v1393_v7 = vsel %vm1392_vm12, %v2415_v26, %v1389_v30  ;;  %v1401_v12 = vmul.f32 %v2423_v59, %v3145_v15  ;;  %vm1406_vm0 = vweird.f32 %v2423_v59  ;;  %v1474_v26 = vand.u32 2147483648, %v3143_v49  ;;  %vm1470_vm10 = vmor %vm1468_vm9, %vm1469_vm8 }
 0x465   :  { %v2427_v16 = vpop.eup %2426  ;;  %v1398_v17 = vsel %vm1395_vm13, %v1397_v22, %v1393_v7  ;;  %v1431_v21 = vsel %vm1430_vm14, %v2417_v31, %v1427_v18  ;;  %v1465_v54 = vsub.f32 1.0, %v1464_v8  ;;  %vm1407_vm3 = vmor %vm1405_vm1, %vm1406_vm0  ;;  %v1472_v31 = vand.u32 2147483647, %v3143_v49  ;;  %v2139_v18 = vld [vmem:[%s3292_s0 + $0xc0] sm:$0xff] }
 0x466   :  { %v2429_v28 = vpop.eup %2428  ;;  %v1436_v32 = vsel %vm1433_vm15, %v1435_v3, %v1431_v21  ;;  %v1402_v33 = vsub.f32 1.0, %v1401_v12  ;;  %v1462_v41 = vadd.f32 1.0, %v2427_v16  ;;  %v1495_v45 = vmul.f32 %v2425_v62, %v1398_v17  ;;  %v2140_v17 = vld [vmem:[%s3292_s0 + $0xc8] sm:$0xff]  ;;  %v2141_v21 = vld [vmem:[%s3292_s0 + $0xd0] sm:$0xff] }
 0x467   :  { %v1493_v42 = vmul.f32 %v1436_v32, %v3081_v13  ;;  %v1439_v46 = vmul.f32 %v2429_v28, %v3149_v51  ;;  %v2431_v9 = vpop.eup %2430  ;;  %vm1444_vm2 = vweird.f32 %v2429_v28  ;;  %v1466_v24 = vmul.f32 %v3152_v40, %v1465_v54 }
 0x468   :  { %v1403_v57 = vmul.f32 %v2423_v59, %v1402_v33  ;;  %2432 = vrcp.f32 %v1462_v41  ;;  %vm1445_vm6 = vmor %vm1443_vm5, %vm1444_vm2  ;;  %v1475_v5 = vor.u32 1.1754944e-38, %v1474_v26  ;;  %v1489_v51 = vand.u32 2147483648, %v1462_v41 }
 0x469   :  { %v1440_v58 = vsub.f32 1.0, %v1439_v46  ;;  %v3164_v19 = vadd.f32 %v1495_v45, %v1493_v42  ;;  %v1467_v0 = vadd.f32 %v3152_v40, %v1466_v24  ;;  %vm1483_vm12 = vweird.f32 %v1462_v41 }
 0x46a   :  { %v1404_v2 = vadd.f32 %v2423_v59, %v1403_v57  ;;  %vm1473_vm13 = vcmp.eq.f32.partialorder %v1472_v31, 8.507059e+37  ;;  %v1490_v43 = vor.u32 1.1754944e-38, %v1489_v51  ;;  %v1575_v62 = vunpack.c.l.bf16 %v2139_v18 }
 0x46b   :  { %v1441_v13 = vmul.f32 %v2429_v28, %v1440_v58  ;;  %2434 = vtanh.f32 %v3164_v19  ;;  %v1471_v14 = vsel %vm1470_vm10, %v3152_v40, %v1467_v0  ;;  %v1576_v3 = vunpack.c.h.bf16 %v2139_v18 }
 0x46c   :  { %v1408_v25 = vsel %vm1407_vm3, %v2423_v59, %v1404_v2  ;;  %v1476_v29 = vsel %vm1473_vm13, %v1475_v5, %v1471_v14  ;;  %v1578_v33 = vunpack.c.h.bf16 %v2140_v17  ;;  %v1579_v34 = vunpack.c.l.bf16 %v2141_v21 }
 0x46d   :  { %v1413_v36 = vsel %vm1410_vm4, %v1412_v20, %v1408_v25  ;;  %v1442_v37 = vadd.f32 %v2429_v28, %v1441_v13 }
 0x46e   :  { %v2433_v38 = vpop.eup %2432  ;;  %v1496_v35 = vmul.f32 %v2431_v9, %v1413_v36  ;;  %v1582_v36 = vunpack.c.h.bf16 %v2142_v1 }
 0x46f   :  { %v1446_v44 = vsel %vm1445_vm6, %v2429_v28, %v1442_v37  ;;  %v1479_v27 = vmul.f32 %v2433_v38, %v1462_v41  ;;  %vm1484_vm11 = vweird.f32 %v2433_v38  ;;  %v1577_v37 = vunpack.c.l.bf16 %v2140_v17 }
 0x470   :  { %v1451_v10 = vsel %vm1448_vm7, %v1450_v39, %v1446_v44  ;;  %vm1485_vm14 = vmor %vm1483_vm12, %vm1484_vm11 }
 0x471   :  { %v1494_v15 = vmul.f32 %v1451_v10, %v3092_v4  ;;  %v1480_v52 = vsub.f32 1.0, %v1479_v27  ;;  %v2435_v60 = vpop.eup %2434  ;;  %v1487_v4 = vand.u32 2147483647, %v1462_v41  ;;  %v1580_v41 = vunpack.c.h.bf16 %v2141_v21 }
 0x472   :  { %v1501_v49 = vmul.f32 %v2435_v60, %v1476_v29  ;;  %v1581_v60 = vunpack.c.l.bf16 %v2142_v1 }
 0x473   :  { %v3175_v50 = vadd.f32 %v1496_v35, %v1494_v15  ;;  %v1481_v63 = vmul.f32 %v2433_v38, %v1480_v52  ;;  %vm1488_vm15 = vcmp.eq.f32.partialorder %v1487_v4, 8.507059e+37 }
 0x474   :  { %v1503_v48 = vpack.c.bf16 %v1501_v49, %v1501_v49 }
 0x475   :  { %2436 = vtanh.f32 %v3175_v50  ;;  %v1482_v55 = vadd.f32 %v2433_v38, %v1481_v63 }
 0x476   :  { %v1515_v30 = vunpack.c.l.b16 %v1503_v48 }
 0x477   :  { %v1486_v61 = vsel %vm1485_vm14, %v2433_v38, %v1482_v55 }
 0x478   :  { %v1491_v56 = vsel %vm1488_vm15, %v1490_v43, %v1486_v61 }
 0x47b   :  { %v2437_v47 = vpop.eup %2436 }
 0x47c   :  { %v1502_v23 = vmul.f32 %v2437_v47, %v1491_v56 }
 0x47e   :  { %v1504_v11 = vpack.c.bf16 %v1502_v23, %v1502_v23  ;;  %v2223_v40 = vpack.c.bf16 %v1502_v23, %v1501_v49 }
 0x480   :  { %2239 = vst [vmem:[%s3294_s2 + $0x28] sm:$0xff] %v2223_v40   ;;  %v1516_v59 = vunpack.c.l.b16 %v1504_v11 }
 0x482   :  { %v1517_v22 = vpack.c.b16 %v1516_v59, %v1515_v30 }
 0x484   :  { %1527 = vmatmul.bf16.vlgmr.msra.gmra.mxu0 %v1517_v22  ;;  %1541 = vmatmul.bf16.vlgmr.msra.gmra.mxu1 %v1517_v22 }
 0x485   :  { %1555 = vmatmul.bf16.vlgmr.msra.gmra.mxu2 %v1517_v22  ;;  %1569 = vmatmul.bf16.vlgmr.msra.gmra.mxu3 %v1517_v22 }
 0x501   :  { %v1528_v7 = vpop.f32.mrf.mxu0  ;;  %v1542_v8 = vpop.f32.mrf.mxu1 }
 0x502   :  { %v1583_v12 = vadd.f32 %v1575_v62, %v1528_v7  ;;  %v1584_v16 = vadd.f32 %v1576_v3, %v1542_v8 }
 0x504   :  { %v2143_v28 = vmul.f32 -1.442695, %v1583_v12  ;;  %v2145_v32 = vmul.f32 -1.442695, %v1584_v16 }
 0x506   :  { %2438 = vpow2.f32 %v2143_v28 }
 0x507   :  { %2440 = vpow2.f32 %v2145_v32 }
 0x508   :  { %v1570_v42 = vpop.f32.mrf.mxu3  ;;  %v1556_v25 = vpop.f32.mrf.mxu2 }
 0x509   :  { %v1586_v45 = vadd.f32 %v1578_v33, %v1570_v42  ;;  %v1530_v46 = vpop.f32.mrf.mxu0  ;;  %v1544_v53 = vpop.f32.mrf.mxu1  ;;  %v1585_v27 = vadd.f32 %v1577_v37, %v1556_v25 }
 0x50a   :  { %v1587_v54 = vadd.f32 %v1579_v34, %v1530_v46  ;;  %v1588_v57 = vadd.f32 %v1580_v41, %v1544_v53 }
 0x50b   :  { %v2147_v58 = vmul.f32 -1.442695, %v1586_v45 }
 0x50c   :  { %v2439_v2 = vpop.eup %2438  ;;  %v2144_v6 = vmul.f32 -1.442695, %v1587_v54  ;;  %v2146_v20 = vmul.f32 -1.442695, %v1588_v57 }
 0x50d   :  { %v2441_v9 = vpop.eup %2440  ;;  %v1597_v13 = vadd.f32 1.0, %v2439_v2  ;;  %2442 = vpow2.f32 %v2147_v58 }
 0x50e   :  { %v1635_v24 = vadd.f32 1.0, %v2441_v9  ;;  %2444 = vpow2.f32 %v2144_v6 }
 0x50f   :  { %2446 = vrcp.f32 %v1597_v13  ;;  %v1608_v29 = vand.u32 2147483647, %v1597_v13  ;;  %v1610_v61 = vand.u32 2147483648, %v1597_v13  ;;  %vm1604_vm2 = vweird.f32 %v1597_v13 }
 0x510   :  { %2448 = vrcp.f32 %v1635_v24  ;;  %v1572_v38 = vpop.f32.mrf.mxu3  ;;  %v1558_v55 = vpop.f32.mrf.mxu2  ;;  %v1648_v49 = vand.u32 2147483648, %v1635_v24  ;;  %v1646_v56 = vand.u32 2147483647, %v1635_v24  ;;  %vm1642_vm3 = vweird.f32 %v1635_v24 }
 0x511   :  { %2450 = vpow2.f32 %v2146_v20  ;;  %v1590_v39 = vadd.f32 %v1582_v36, %v1572_v38  ;;  %v1589_v23 = vadd.f32 %v1581_v60, %v1558_v55  ;;  %vm1609_vm5 = vcmp.eq.f32.partialorder %v1608_v29, 8.507059e+37 }
 0x512   :  { %v1611_v30 = vor.u32 1.1754944e-38, %v1610_v61  ;;  %v1649_v18 = vor.u32 1.1754944e-38, %v1648_v49  ;;  %vm1647_vm7 = vcmp.eq.f32.partialorder %v1646_v56, 8.507059e+37 }
 0x513   :  { %v2443_v44 = vpop.eup %2442  ;;  %v2148_v15 = vmul.f32 -1.442695, %v1590_v39 }
 0x514   :  { %v2445_v35 = vpop.eup %2444  ;;  %v3194_v10 = vadd.f32 1.0, %v2443_v44 }
 0x515   :  { %v2447_v0 = vpop.eup %2446  ;;  %v3196_v26 = vadd.f32 1.0, %v2445_v35 }
 0x516   :  { %v2449_v52 = vpop.eup %2448  ;;  %v1600_v31 = vmul.f32 %v2447_v0, %v1597_v13  ;;  %2452 = vrcp.f32 %v3194_v10  ;;  %vm1605_vm0 = vweird.f32 %v2447_v0 }
 0x517   :  { %v2451_v63 = vpop.eup %2450  ;;  %v1638_v14 = vmul.f32 %v2449_v52, %v1635_v24  ;;  %2454 = vrcp.f32 %v3196_v26  ;;  %vm1643_vm1 = vweird.f32 %v2449_v52  ;;  %vm1606_vm4 = vmor %vm1604_vm2, %vm1605_vm0  ;;  %v1623_v32 = vand.u32 2147483647, %v3196_v26 }
 0x518   :  { %v1601_v5 = vsub.f32 1.0, %v1600_v31  ;;  %2456 = vtanh.f32 %v1585_v27  ;;  %v3200_v51 = vadd.f32 1.0, %v2451_v63  ;;  %vm1644_vm6 = vmor %vm1642_vm3, %vm1643_vm1  ;;  %v1625_v45 = vand.u32 2147483648, %v3196_v26 }
 0x519   :  { %v1639_v4 = vsub.f32 1.0, %v1638_v14  ;;  %2458 = vpow2.f32 %v2148_v15  ;;  %vm1619_vm9 = vweird.f32 %v3196_v26  ;;  %vm1624_vm12 = vcmp.eq.f32.partialorder %v1623_v32, 8.507059e+37 }
 0x51a   :  { %v1602_v43 = vmul.f32 %v2447_v0, %v1601_v5  ;;  %2460 = vrcp.f32 %v3200_v51  ;;  %v1663_v57 = vand.u32 2147483648, %v3200_v51  ;;  %v1661_v1 = vand.u32 2147483647, %v3200_v51 }
 0x51b   :  { %v1640_v47 = vmul.f32 %v2449_v52, %v1639_v4  ;;  %2462 = vtanh.f32 %v1589_v23  ;;  %v1626_v9 = vor.u32 1.1754944e-38, %v1625_v45  ;;  %vm1657_vm13 = vweird.f32 %v3200_v51 }
 0x51c   :  { %v3203_v48 = vpop.eup %2452  ;;  %v1603_v11 = vadd.f32 %v2447_v0, %v1602_v43  ;;  %v1664_v37 = vor.u32 1.1754944e-38, %v1663_v57  ;;  %vm1662_vm15 = vcmp.eq.f32.partialorder %v1661_v1, 8.507059e+37  ;;  %vm1682_vm1 = vweird.f32 %v3194_v10 }
 0x51d   :  { %v2455_v40 = vpop.eup %2454  ;;  %v1641_v59 = vadd.f32 %v2449_v52, %v1640_v47  ;;  %v1678_v3 = vmul.f32 %v3203_v48, %v3194_v10  ;;  %vm1683_vm0 = vweird.f32 %v3203_v48 }
 0x51e   :  { %v2457_v22 = vpop.eup %2456  ;;  %v1607_v62 = vsel %vm1606_vm4, %v2447_v0, %v1603_v11  ;;  %v1615_v7 = vmul.f32 %v2455_v40, %v3196_v26  ;;  %vm1620_vm8 = vweird.f32 %v2455_v40  ;;  %v1688_v0 = vand.u32 2147483648, %v3194_v10  ;;  %vm1684_vm2 = vmor %vm1682_vm1, %vm1683_vm0 }
 0x51f   :  { %v2459_v8 = vpop.eup %2458  ;;  %v1612_v12 = vsel %vm1609_vm5, %v1611_v30, %v1607_v62  ;;  %v1645_v16 = vsel %vm1644_vm6, %v2449_v52, %v1641_v59  ;;  %v1679_v46 = vsub.f32 1.0, %v1678_v3  ;;  %vm1621_vm11 = vmor %vm1619_vm9, %vm1620_vm8  ;;  %v1686_v52 = vand.u32 2147483647, %v3194_v10  ;;  %v2151_v59 = vld [vmem:[%s3292_s0 + $0xe0] sm:$0xff] }
 0x520   :  { %v2461_v17 = vpop.eup %2460  ;;  %v1650_v21 = vsel %vm1647_vm7, %v1649_v18, %v1645_v16  ;;  %v1616_v28 = vsub.f32 1.0, %v1615_v7  ;;  %v1676_v33 = vadd.f32 1.0, %v2459_v8  ;;  %v1709_v41 = vmul.f32 %v2457_v22, %v1612_v12  ;;  %v2152_v12 = vld [vmem:[%s3292_s0 + $0xe8] sm:$0xff]  ;;  %v2153_v16 = vld [vmem:[%s3292_s0 + $0xf0] sm:$0xff] }
 0x521   :  { %v1707_v34 = vmul.f32 %v1650_v21, %v3164_v19  ;;  %v1653_v42 = vmul.f32 %v2461_v17, %v3200_v51  ;;  %v2463_v2 = vpop.eup %2462  ;;  %vm1658_vm10 = vweird.f32 %v2461_v17  ;;  %v1680_v13 = vmul.f32 %v3203_v48, %v1679_v46 }
 0x522   :  { %v1617_v53 = vmul.f32 %v2455_v40, %v1616_v28  ;;  %2464 = vrcp.f32 %v1676_v33  ;;  %vm1659_vm14 = vmor %vm1657_vm13, %vm1658_vm10  ;;  %v1689_v5 = vor.u32 1.1754944e-38, %v1688_v0  ;;  %v1703_v51 = vand.u32 2147483648, %v1676_v33 }
 0x523   :  { %v1654_v54 = vsub.f32 1.0, %v1653_v42  ;;  %v3215_v6 = vadd.f32 %v1709_v41, %v1707_v34  ;;  %v1681_v27 = vadd.f32 %v3203_v48, %v1680_v13  ;;  %vm1697_vm4 = vweird.f32 %v1676_v33 }
 0x524   :  { %v1618_v58 = vadd.f32 %v2455_v40, %v1617_v53  ;;  %vm1687_vm5 = vcmp.eq.f32.partialorder %v1686_v52, 8.507059e+37  ;;  %v1704_v61 = vor.u32 1.1754944e-38, %v1703_v51  ;;  %v1789_v22 = vunpack.c.l.bf16 %v2151_v59 }
 0x525   :  { %v1655_v19 = vmul.f32 %v2461_v17, %v1654_v54  ;;  %2466 = vtanh.f32 %v3215_v6  ;;  %v1685_v14 = vsel %vm1684_vm2, %v3203_v48, %v1681_v27  ;;  %v1790_v18 = vunpack.c.h.bf16 %v2151_v59 }
 0x526   :  { %v1622_v20 = vsel %vm1621_vm11, %v2455_v40, %v1618_v58  ;;  %v1690_v4 = vsel %vm1687_vm5, %v1689_v5, %v1685_v14  ;;  %v1792_v28 = vunpack.c.h.bf16 %v2152_v12  ;;  %v1793_v32 = vunpack.c.l.bf16 %v2153_v16 }
 0x527   :  { %v1627_v24 = vsel %vm1624_vm12, %v1626_v9, %v1622_v20  ;;  %v1656_v25 = vadd.f32 %v2461_v17, %v1655_v19  ;;  %v2154_v9 = vld [vmem:[%s3292_s0 + $0xf8] sm:$0xff] }
 0x528   :  { %v2465_v36 = vpop.eup %2464  ;;  %v1710_v39 = vmul.f32 %v2463_v2, %v1627_v24  ;;  %v1796_v24 = vunpack.c.h.bf16 %v2154_v9  ;;  %v1795_v51 = vunpack.c.l.bf16 %v2154_v9 }
 0x529   :  { %v1660_v38 = vsel %vm1659_vm14, %v2461_v17, %v1656_v25  ;;  %v1693_v44 = vmul.f32 %v2465_v36, %v1676_v33  ;;  %vm1698_vm3 = vweird.f32 %v2465_v36 }
 0x52a   :  { %v1665_v35 = vsel %vm1662_vm15, %v1664_v37, %v1660_v38  ;;  %vm1699_vm6 = vmor %vm1697_vm4, %vm1698_vm3 }
 0x52b   :  { %v1708_v26 = vmul.f32 %v1665_v35, %v3175_v50  ;;  %v1694_v15 = vsub.f32 1.0, %v1693_v44  ;;  %v2467_v60 = vpop.eup %2466  ;;  %v1701_v50 = vand.u32 2147483647, %v1676_v33  ;;  %v1794_v33 = vunpack.c.h.bf16 %v2153_v16 }
 0x52c   :  { %v1715_v10 = vmul.f32 %v2467_v60, %v1690_v4 }
 0x52d   :  { %v3226_v31 = vadd.f32 %v1710_v39, %v1708_v26  ;;  %v1695_v63 = vmul.f32 %v2465_v36, %v1694_v15  ;;  %vm1702_vm7 = vcmp.eq.f32.partialorder %v1701_v50, 8.507059e+37  ;;  %v1791_v26 = vunpack.c.l.bf16 %v2152_v12 }
 0x52e   :  { %v1717_v56 = vpack.c.bf16 %v1715_v10, %v1715_v10 }
 0x52f   :  { %2468 = vtanh.f32 %v3226_v31  ;;  %v1696_v55 = vadd.f32 %v2465_v36, %v1695_v63 }
 0x530   :  { %v1729_v11 = vunpack.c.l.b16 %v1717_v56 }
 0x531   :  { %v1700_v29 = vsel %vm1699_vm6, %v2465_v36, %v1696_v55 }
 0x532   :  { %v1705_v43 = vsel %vm1702_vm7, %v1704_v61, %v1700_v29 }
 0x535   :  { %v2469_v49 = vpop.eup %2468 }
 0x536   :  { %v1716_v47 = vmul.f32 %v2469_v49, %v1705_v43 }
 0x538   :  { %v1718_v23 = vpack.c.bf16 %v1716_v47, %v1716_v47  ;;  %v2228_v48 = vpack.c.bf16 %v1716_v47, %v1715_v10 }
 0x53a   :  { %2240 = vst [vmem:[%s3294_s2 + $0x30] sm:$0xff] %v2228_v48   ;;  %v1730_v40 = vunpack.c.l.b16 %v1718_v23 }
 0x53c   :  { %v1731_v30 = vpack.c.b16 %v1730_v40, %v1729_v11 }
 0x53e   :  { %1741 = vmatmul.bf16.vlgmr.msrb.gmra.mxu0 %v1731_v30  ;;  %1755 = vmatmul.bf16.vlgmr.msrb.gmra.mxu1 %v1731_v30 }
 0x53f   :  { %1769 = vmatmul.bf16.vlgmr.msrb.gmra.mxu2 %v1731_v30  ;;  %1783 = vmatmul.bf16.vlgmr.msrb.gmra.mxu3 %v1731_v30 }
 0x5bb   :  { %v1742_v62 = vpop.f32.mrf.mxu0  ;;  %v1756_v3 = vpop.f32.mrf.mxu1 }
 0x5bc   :  { %v1797_v7 = vadd.f32 %v1789_v22, %v1742_v62  ;;  %v1798_v8 = vadd.f32 %v1790_v18, %v1756_v3 }
 0x5be   :  { %v2155_v17 = vmul.f32 -1.442695, %v1797_v7  ;;  %v2157_v21 = vmul.f32 -1.442695, %v1798_v8 }
 0x5c0   :  { %2470 = vpow2.f32 %v2155_v17 }
 0x5c1   :  { %2472 = vpow2.f32 %v2157_v21 }
 0x5c2   :  { %v1784_v34 = vpop.f32.mrf.mxu3  ;;  %v1770_v20 = vpop.f32.mrf.mxu2 }
 0x5c3   :  { %v1800_v41 = vadd.f32 %v1792_v28, %v1784_v34  ;;  %v1744_v42 = vpop.f32.mrf.mxu0  ;;  %v1758_v45 = vpop.f32.mrf.mxu1  ;;  %v1799_v55 = vadd.f32 %v1791_v26, %v1770_v20 }
 0x5c4   :  { %v1801_v46 = vadd.f32 %v1793_v32, %v1744_v42  ;;  %v1802_v53 = vadd.f32 %v1794_v33, %v1758_v45 }
 0x5c5   :  { %v2159_v54 = vmul.f32 -1.442695, %v1800_v41 }
 0x5c6   :  { %v2471_v57 = vpop.eup %2470  ;;  %v2156_v58 = vmul.f32 -1.442695, %v1801_v46  ;;  %v2158_v19 = vmul.f32 -1.442695, %v1802_v53 }
 0x5c7   :  { %v2473_v1 = vpop.eup %2472  ;;  %v1811_v2 = vadd.f32 1.0, %v2471_v57  ;;  %2474 = vpow2.f32 %v2159_v54 }
 0x5c8   :  { %v1849_v13 = vadd.f32 1.0, %v2473_v1  ;;  %2476 = vpow2.f32 %v2156_v58 }
 0x5c9   :  { %2478 = vrcp.f32 %v1811_v2  ;;  %v1822_v10 = vand.u32 2147483647, %v1811_v2  ;;  %v1824_v61 = vand.u32 2147483648, %v1811_v2  ;;  %vm1818_vm10 = vweird.f32 %v1811_v2 }
 0x5ca   :  { %2480 = vrcp.f32 %v1849_v13  ;;  %v1786_v25 = vpop.f32.mrf.mxu3  ;;  %v1772_v4 = vpop.f32.mrf.mxu2  ;;  %v1862_v49 = vand.u32 2147483648, %v1849_v13  ;;  %v1860_v56 = vand.u32 2147483647, %v1849_v13  ;;  %vm1856_vm11 = vweird.f32 %v1849_v13 }
 0x5cb   :  { %2482 = vpow2.f32 %v2158_v19  ;;  %v1804_v38 = vadd.f32 %v1796_v24, %v1786_v25  ;;  %v1803_v23 = vadd.f32 %v1795_v51, %v1772_v4  ;;  %vm1823_vm14 = vcmp.eq.f32.partialorder %v1822_v10, 8.507059e+37 }
 0x5cc   :  { %v1863_v62 = vor.u32 1.1754944e-38, %v1862_v49  ;;  %v1825_v3 = vor.u32 1.1754944e-38, %v1824_v61  ;;  %vm1861_vm15 = vcmp.eq.f32.partialorder %v1860_v56, 8.507059e+37 }
 0x5cd   :  { %v2475_v36 = vpop.eup %2474  ;;  %v2160_v60 = vmul.f32 -1.442695, %v1804_v38 }
 0x5ce   :  { %v2477_v37 = vpop.eup %2476  ;;  %v3245_v44 = vadd.f32 1.0, %v2475_v36 }
 0x5cf   :  { %v2479_v39 = vpop.eup %2478  ;;  %v3247_v35 = vadd.f32 1.0, %v2477_v37 }
 0x5d0   :  { %v2481_v27 = vpop.eup %2480  ;;  %v1814_v0 = vmul.f32 %v2479_v39, %v1811_v2  ;;  %vm1819_vm8 = vweird.f32 %v2479_v39 }
 0x5d1   :  { %v2483_v15 = vpop.eup %2482  ;;  %v1852_v52 = vmul.f32 %v2481_v27, %v1849_v13  ;;  %2484 = vrcp.f32 %v3247_v35  ;;  %vm1857_vm9 = vweird.f32 %v2481_v27  ;;  %vm3254_vm12 = vmor %vm1818_vm10, %vm1819_vm8  ;;  %v1837_v28 = vand.u32 2147483647, %v3247_v35 }
 0x5d2   :  { %v1815_v63 = vsub.f32 1.0, %v1814_v0  ;;  %v3250_v14 = vadd.f32 1.0, %v2483_v15  ;;  %2486 = vrcp.f32 %v3245_v44  ;;  %vm3260_vm13 = vmor %vm1856_vm11, %vm1857_vm9  ;;  %v1839_v32 = vand.u32 2147483648, %v3247_v35 }
 0x5d3   :  { %v1853_v5 = vsub.f32 1.0, %v1852_v52  ;;  %vm1833_vm2 = vweird.f32 %v3247_v35  ;;  %vm1838_vm5 = vcmp.eq.f32.partialorder %v1837_v28, 8.507059e+37  ;;  %vm1896_vm9 = vweird.f32 %v3245_v44 }
 0x5d4   :  { %v1816_v50 = vmul.f32 %v2479_v39, %v1815_v63  ;;  %2488 = vrcp.f32 %v3250_v14  ;;  %vm1871_vm1 = vweird.f32 %v3250_v14  ;;  %v1877_v42 = vand.u32 2147483648, %v3250_v14 }
 0x5d5   :  { %v1854_v29 = vmul.f32 %v2481_v27, %v1853_v5  ;;  %2490 = vpow2.f32 %v2160_v60  ;;  %v1875_v57 = vand.u32 2147483647, %v3250_v14  ;;  %v1840_v2 = vor.u32 1.1754944e-38, %v1839_v32 }
 0x5d6   :  { %v1817_v43 = vadd.f32 %v2479_v39, %v1816_v50  ;;  %2492 = vtanh.f32 %v1799_v55  ;;  %v1878_v24 = vor.u32 1.1754944e-38, %v1877_v42  ;;  %v1902_v63 = vand.u32 2147483648, %v3245_v44 }
 0x5d7   :  { %v1855_v47 = vadd.f32 %v2481_v27, %v1854_v29  ;;  %v2485_v48 = vpop.eup %2484  ;;  %2494 = vtanh.f32 %v1803_v23  ;;  %vm1876_vm7 = vcmp.eq.f32.partialorder %v1875_v57, 8.507059e+37  ;;  %v1900_v60 = vand.u32 2147483647, %v3245_v44 }
 0x5d8   :  { %v3258_v40 = vpop.eup %2486  ;;  %v1821_v59 = vsel %vm3254_vm12, %v2479_v39, %v1817_v43  ;;  %v1829_v22 = vmul.f32 %v2485_v48, %v3247_v35  ;;  %vm1834_vm0 = vweird.f32 %v2485_v48  ;;  %v1903_v4 = vor.u32 1.1754944e-38, %v1902_v63 }
 0x5d9   :  { %v1859_v7 = vsel %vm3260_vm13, %v2481_v27, %v1855_v47  ;;  %v1826_v17 = vsel %vm1823_vm14, %v1825_v3, %v1821_v59  ;;  %v1892_v21 = vmul.f32 %v3258_v40, %v3245_v44  ;;  %vm1835_vm4 = vmor %vm1833_vm2, %vm1834_vm0  ;;  %vm1897_vm8 = vweird.f32 %v3258_v40 }
 0x5da   :  { %v2489_v18 = vpop.eup %2488  ;;  %v1830_v8 = vsub.f32 1.0, %v1829_v22  ;;  %v1864_v33 = vsel %vm1861_vm15, %v1863_v62, %v1859_v7  ;;  %vm1898_vm11 = vmor %vm1896_vm9, %vm1897_vm8  ;;  %vm1901_vm14 = vcmp.eq.f32.partialorder %v1900_v60, 8.507059e+37 }
 0x5db   :  { %v1867_v12 = vmul.f32 %v2489_v18, %v3250_v14  ;;  %v2491_v16 = vpop.eup %2490  ;;  %vm1872_vm3 = vweird.f32 %v2489_v18  ;;  %v1921_v58 = vmul.f32 %v1864_v33, %v3215_v6  ;;  %v1893_v9 = vsub.f32 1.0, %v1892_v21 }
 0x5dc   :  { %v1831_v41 = vmul.f32 %v2485_v48, %v1830_v8  ;;  %v1890_v45 = vadd.f32 1.0, %v2491_v16  ;;  %v2493_v46 = vpop.eup %2492  ;;  %vm1873_vm6 = vmor %vm1871_vm1, %vm1872_vm3 }
 0x5dd   :  { %v1868_v34 = vsub.f32 1.0, %v1867_v12  ;;  %v1923_v1 = vmul.f32 %v2493_v46, %v1826_v17  ;;  %v2495_v19 = vpop.eup %2494  ;;  %v1894_v6 = vmul.f32 %v3258_v40, %v1893_v9 }
 0x5de   :  { %v1832_v54 = vadd.f32 %v2485_v48, %v1831_v41  ;;  %2496 = vrcp.f32 %v1890_v45  ;;  %v1917_v14 = vand.u32 2147483648, %v1890_v45  ;;  %vm1911_vm12 = vweird.f32 %v1890_v45 }
 0x5df   :  { %v1869_v53 = vmul.f32 %v2489_v18, %v1868_v34  ;;  %v1925_v38 = vadd.f32 %v1923_v1, %v1921_v58  ;;  %v1895_v15 = vadd.f32 %v3258_v40, %v1894_v6 }
 0x5e0   :  { %v1836_v13 = vsel %vm1835_vm4, %v2485_v48, %v1832_v54  ;;  %v1918_v29 = vor.u32 1.1754944e-38, %v1917_v14 }
 0x5e1   :  { %v1870_v20 = vadd.f32 %v2489_v18, %v1869_v53  ;;  %v1841_v25 = vsel %vm1838_vm5, %v1840_v2, %v1836_v13  ;;  %2498 = vtanh.f32 %v1925_v38  ;;  %v1899_v51 = vsel %vm1898_vm11, %v3258_v40, %v1895_v15 }
 0x5e2   :  { %v1924_v37 = vmul.f32 %v2495_v19, %v1841_v25  ;;  %v1904_v49 = vsel %vm1901_vm14, %v1903_v4, %v1899_v51 }
 0x5e3   :  { %v1874_v36 = vsel %vm1873_vm6, %v2489_v18, %v1870_v20 }
 0x5e4   :  { %v1879_v39 = vsel %vm1876_vm7, %v1878_v24, %v1874_v36  ;;  %v2497_v27 = vpop.eup %2496 }
 0x5e5   :  { %v1922_v35 = vmul.f32 %v1879_v39, %v3226_v31  ;;  %v1907_v26 = vmul.f32 %v2497_v27, %v1890_v45  ;;  %vm1912_vm10 = vweird.f32 %v2497_v27  ;;  %v1915_v31 = vand.u32 2147483647, %v1890_v45 }
 0x5e6   :  { %vm1913_vm13 = vmor %vm1911_vm12, %vm1912_vm10 }
 0x5e7   :  { %v1926_v0 = vadd.f32 %v1924_v37, %v1922_v35  ;;  %v1908_v52 = vsub.f32 1.0, %v1907_v26  ;;  %v2499_v50 = vpop.eup %2498  ;;  %vm1916_vm15 = vcmp.eq.f32.partialorder %v1915_v31, 8.507059e+37 }
 0x5e8   :  { %v1929_v47 = vmul.f32 %v2499_v50, %v1904_v49 }
 0x5e9   :  { %2500 = vtanh.f32 %v1926_v0  ;;  %v1909_v5 = vmul.f32 %v2497_v27, %v1908_v52 }
 0x5eb   :  { %v1910_v55 = vadd.f32 %v2497_v27, %v1909_v5 }
 0x5ed   :  { %v1914_v61 = vsel %vm1913_vm13, %v2497_v27, %v1910_v55 }
 0x5ee   :  { %v1919_v43 = vsel %vm1916_vm15, %v1918_v29, %v1914_v61 }
 0x5ef   :  { %v2501_v10 = vpop.eup %2500 }
 0x5f0   :  { %v1930_v44 = vmul.f32 %v2501_v10, %v1919_v43 }
 0x5f2   :  { %v2233_v56 = vpack.c.bf16 %v1930_v44, %v1929_v47 }
 0x5f4   :  { %2241 = vst [vmem:[%s3294_s2 + $0x38] sm:$0xff] %v2233_v56  }
 0x5f5   :  { %1944 = vsyncpa [#allocation5], 1 }

// kernel: rnn_forward.6
= control target key start
LH: loop header
LB: loop body
LE: loop exit
PB: predicated region body
PF: predicated region fallthrough
CT: control target
= control target key end

     0   :  { %s3432_s1 = inlined_call_operand.vmem [shape: bf16[128,512], index: 1, kind: input, shape index: {}]   ;;  %s3433_s0 = inlined_call_operand.vmem [shape: bf16[8,16,512], index: 0, kind: input, shape index: {}]   ;;  %s3434_s2 = inlined_call_operand.vmem [shape: bf16[8,16,128], index: 2, kind: output, shape index: {}]  }
   0x1   :  { %v2042_v0 = vld [vmem:[%s3432_s1 + $0xe0] sm:$0xf]  ;;  %v2176_v1 = vld [vmem:[%s3432_s1 + $0xec] sm:$0xf0]  ;;  %v2174_v2 = vld [vmem:[%s3432_s1 + $0xe4] sm:$0xf] }
   0x2   :  { %v2507_v3 = vor.u32 %v2176_v1, %v2042_v0  ;;  %v2044_v4 = vld [vmem:[%s3432_s1 + $0xf0] sm:$0xf0]  ;;  %v2175_v5 = vld [vmem:[%s3432_s1 + $0xec] sm:$0xf]  ;;  %v2052_v6 = vld [vmem:[%s3432_s1 + $0xf8] sm:$0xf0] }
   0x3   :  { %v2518_v7 = vor.u32 %v2174_v2, %v2044_v4  ;;  %v2520_v8 = vor.u32 %v2175_v5, %v2052_v6  ;;  %v2026_v9 = vld [vmem:[%s3432_s1 + $0xc0] sm:$0xf]  ;;  %v2172_v10 = vld [vmem:[%s3432_s1 + $0xcc] sm:$0xf0]  ;;  %v2170_v11 = vld [vmem:[%s3432_s1 + $0xc4] sm:$0xf] }
   0x4   :  { %220 = vmatpush.bf16.msra.mxu0 %v2507_v3  ;;  %v2532_v12 = vor.u32 %v2172_v10, %v2026_v9  ;;  %v2028_v13 = vld [vmem:[%s3432_s1 + $0xd0] sm:$0xf0]  ;;  %v2171_v14 = vld [vmem:[%s3432_s1 + $0xcc] sm:$0xf]  ;;  %v2036_v15 = vld [vmem:[%s3432_s1 + $0xd8] sm:$0xf0] }
   0x5   :  { %234 = vmatpush.bf16.msra.mxu1 %v2518_v7  ;;  %262 = vmatpush.bf16.msra.mxu3 %v2520_v8  ;;  %v2545_v16 = vor.u32 %v2170_v11, %v2028_v13  ;;  %v2547_v17 = vor.u32 %v2171_v14, %v2036_v15  ;;  %v2050_v18 = vld [vmem:[%s3432_s1 + $0xe8] sm:$0xf]  ;;  %v2177_v19 = vld [vmem:[%s3432_s1 + $0xf4] sm:$0xf0]  ;;  %v2010_v20 = vld [vmem:[%s3432_s1 + $0xa0] sm:$0xf] }
   0x6   :  { %v2558_v21 = vor.u32 %v2177_v19, %v2050_v18  ;;  %v2168_v22 = vld [vmem:[%s3432_s1 + $0xac] sm:$0xf0]  ;;  %v2166_v23 = vld [vmem:[%s3432_s1 + $0xa4] sm:$0xf]  ;;  %v2012_v24 = vld [vmem:[%s3432_s1 + $0xb0] sm:$0xf0] }
   0x7   :  { %v2167_v25 = vld [vmem:[%s3432_s1 + $0xac] sm:$0xf]  ;;  %v2020_v26 = vld [vmem:[%s3432_s1 + $0xb8] sm:$0xf0]  ;;  %v2034_v27 = vld [vmem:[%s3432_s1 + $0xc8] sm:$0xf]  ;;  %v2580_v28 = vor.u32 %v2168_v22, %v2010_v20  ;;  %v2593_v32 = vor.u32 %v2166_v23, %v2012_v24 }
   0x8   :  { %221 = vmatpush.bf16.msra.mxu0 %v2532_v12  ;;  %248 = vmatpush.bf16.msra.mxu2 %v2558_v21  ;;  %v2173_v29 = vld [vmem:[%s3432_s1 + $0xd4] sm:$0xf0]  ;;  %v1994_v30 = vld [vmem:[%s3432_s1 + $0x80] sm:$0xf]  ;;  %v2164_v31 = vld [vmem:[%s3432_s1 + $0x8c] sm:$0xf0]  ;;  %v2595_v33 = vor.u32 %v2167_v25, %v2020_v26 }
   0x9   :  { %235 = vmatpush.bf16.msra.mxu1 %v2545_v16  ;;  %263 = vmatpush.bf16.msra.mxu3 %v2547_v17  ;;  %v2597_v34 = vor.u32 %v2173_v29, %v2034_v27  ;;  %v2162_v35 = vld [vmem:[%s3432_s1 + $0x84] sm:$0xf]  ;;  %v1996_v36 = vld [vmem:[%s3432_s1 + $0x90] sm:$0xf0]  ;;  %v2163_v37 = vld [vmem:[%s3432_s1 + $0x8c] sm:$0xf]  ;;  %v2619_v41 = vor.u32 %v2164_v31, %v1994_v30 }
   0xa   :  { %v2004_v38 = vld [vmem:[%s3432_s1 + $0x98] sm:$0xf0]  ;;  %v2018_v39 = vld [vmem:[%s3432_s1 + $0xa8] sm:$0xf]  ;;  %v2169_v40 = vld [vmem:[%s3432_s1 + $0xb4] sm:$0xf0]  ;;  %v2631_v45 = vor.u32 %v2162_v35, %v1996_v36 }
   0xb   :  { %v2621_v42 = vor.u32 %v2169_v40, %v2018_v39  ;;  %v1978_v43 = vld [vmem:[%s3432_s1 + $0x60] sm:$0xf]  ;;  %v2160_v44 = vld [vmem:[%s3432_s1 + $0x6c] sm:$0xf0]  ;;  %v2633_v46 = vor.u32 %v2163_v37, %v2004_v38  ;;  %v2158_v47 = vld [vmem:[%s3432_s1 + $0x64] sm:$0xf] }
   0xc   :  { %222 = vmatpush.bf16.msra.mxu0 %v2580_v28  ;;  %249 = vmatpush.bf16.msra.mxu2 %v2597_v34  ;;  %v2002_v48 = vld [vmem:[%s3432_s1 + $0x88] sm:$0xf]  ;;  %v2165_v49 = vld [vmem:[%s3432_s1 + $0x94] sm:$0xf0]  ;;  %v1980_v50 = vld [vmem:[%s3432_s1 + $0x70] sm:$0xf0]  ;;  %v2655_v53 = vor.u32 %v2160_v44, %v1978_v43 }
   0xd   :  { %236 = vmatpush.bf16.msra.mxu1 %v2593_v32  ;;  %264 = vmatpush.bf16.msra.mxu3 %v2595_v33  ;;  %v2159_v51 = vld [vmem:[%s3432_s1 + $0x6c] sm:$0xf]  ;;  %v1988_v52 = vld [vmem:[%s3432_s1 + $0x78] sm:$0xf0]  ;;  %v2657_v54 = vor.u32 %v2165_v49, %v2002_v48  ;;  %v1962_v55 = vld [vmem:[%s3432_s1 + $0x40] sm:$0xf]  ;;  %v2667_v57 = vor.u32 %v2158_v47, %v1980_v50 }
   0xe   :  { %v2156_v56 = vld [vmem:[%s3432_s1 + $0x4c] sm:$0xf0]  ;;  %v2669_v58 = vor.u32 %v2159_v51, %v1988_v52  ;;  %v2154_v59 = vld [vmem:[%s3432_s1 + $0x44] sm:$0xf]  ;;  %v1986_v60 = vld [vmem:[%s3432_s1 + $0x68] sm:$0xf] }
   0xf   :  { %v2161_v61 = vld [vmem:[%s3432_s1 + $0x74] sm:$0xf0]  ;;  %v1964_v62 = vld [vmem:[%s3432_s1 + $0x50] sm:$0xf0]  ;;  %v2155_v63 = vld [vmem:[%s3432_s1 + $0x4c] sm:$0xf]  ;;  %v2691_v1 = vor.u32 %v2156_v56, %v1962_v55 }
  0x10   :  { %223 = vmatpush.bf16.msra.mxu0 %v2619_v41  ;;  %250 = vmatpush.bf16.msra.mxu2 %v2621_v42  ;;  %v1972_v0 = vld [vmem:[%s3432_s1 + $0x58] sm:$0xf0]  ;;  %v2693_v2 = vor.u32 %v2161_v61, %v1986_v60  ;;  %v1946_v4 = vld [vmem:[%s3432_s1 + $0x20] sm:$0xf]  ;;  %v2152_v5 = vld [vmem:[%s3432_s1 + $0x2c] sm:$0xf0]  ;;  %v2703_v6 = vor.u32 %v2154_v59, %v1964_v62 }
  0x11   :  { %237 = vmatpush.bf16.msra.mxu1 %v2631_v45  ;;  %265 = vmatpush.bf16.msra.mxu3 %v2633_v46  ;;  %v2705_v9 = vor.u32 %v2155_v63, %v1972_v0  ;;  %v2150_v10 = vld [vmem:[%s3432_s1 + $0x24] sm:$0xf]  ;;  %v1970_v11 = vld [vmem:[%s3432_s1 + $0x48] sm:$0xf]  ;;  %v2157_v13 = vld [vmem:[%s3432_s1 + $0x54] sm:$0xf0]  ;;  %v2727_v19 = vor.u32 %v2152_v5, %v1946_v4 }
  0x12   :  { %v1948_v14 = vld [vmem:[%s3432_s1 + $0x30] sm:$0xf0]  ;;  %v2151_v15 = vld [vmem:[%s3432_s1 + $0x2c] sm:$0xf]  ;;  %v1956_v18 = vld [vmem:[%s3432_s1 + $0x38] sm:$0xf0]  ;;  %v2729_v20 = vor.u32 %v2157_v13, %v1970_v11 }
  0x13   :  { %v1930_v22 = vld [vmem:[%s3432_s1] sm:$0xf]  ;;  %v2148_v23 = vld [vmem:[%s3432_s1 + $0xc] sm:$0xf0]  ;;  %v2739_v24 = vor.u32 %v2150_v10, %v1948_v14  ;;  %v2741_v25 = vor.u32 %v2151_v15, %v1956_v18  ;;  %v2146_v26 = vld [vmem:[%s3432_s1 + $0x4] sm:$0xf] }
  0x14   :  { %224 = vmatpush.bf16.msra.mxu0 %v2655_v53  ;;  %251 = vmatpush.bf16.msra.mxu2 %v2657_v54  ;;  %v1954_v27 = vld [vmem:[%s3432_s1 + $0x28] sm:$0xf]  ;;  %v2153_v29 = vld [vmem:[%s3432_s1 + $0x34] sm:$0xf0]  ;;  %v1932_v30 = vld [vmem:[%s3432_s1 + $0x10] sm:$0xf0]  ;;  %v2763_v36 = vor.u32 %v2148_v23, %v1930_v22 }
  0x15   :  { %238 = vmatpush.bf16.msra.mxu1 %v2667_v57  ;;  %266 = vmatpush.bf16.msra.mxu3 %v2669_v58  ;;  %v2147_v31 = vld [vmem:[%s3432_s1 + $0xc] sm:$0xf]  ;;  %v1940_v35 = vld [vmem:[%s3432_s1 + $0x18] sm:$0xf0]  ;;  %v2765_v37 = vor.u32 %v2153_v29, %v1954_v27  ;;  %v2769_v38 = vor.u32 %v2146_v26, %v1932_v30  ;;  %v1938_v40 = vld [vmem:[%s3432_s1 + $0x8] sm:$0xf] }
  0x16   :  { %v2771_v39 = vor.u32 %v2147_v31, %v1940_v35  ;;  %v2149_v43 = vld [vmem:[%s3432_s1 + $0x14] sm:$0xf0]  ;;  %v2482_v47 = vmov 0.0|0.0   ;;  %v55_v48 = vld [vmem:[%s3433_s0] sm:$0xff]  ;;  %v56_v56 = vld [vmem:[%s3433_s0 + $0x8] sm:$0xff] }
  0x17   :  { %v2783_v44 = vor.u32 %v2149_v43, %v1938_v40  ;;  %v276_v49 = vunpack.c.l.bf16 %v55_v48  ;;  %v277_v50 = vunpack.c.h.bf16 %v55_v48  ;;  %v57_v60 = vld [vmem:[%s3433_s0 + $0x10] sm:$0xff]  ;;  %v279_v63 = vunpack.c.h.bf16 %v56_v56  ;;  %v58_v15 = vld [vmem:[%s3433_s0 + $0x18] sm:$0xff] }
  0x18   :  { %225 = vmatpush.bf16.msra.mxu0 %v2691_v1  ;;  %252 = vmatpush.bf16.msra.mxu2 %v2693_v2  ;;  %v280_v0 = vunpack.c.l.bf16 %v57_v60  ;;  %v281_v4 = vunpack.c.h.bf16 %v57_v60  ;;  %v283_v31 = vunpack.c.h.bf16 %v58_v15  ;;  %v278_v43 = vunpack.c.l.bf16 %v56_v56 }
  0x19   :  { %239 = vmatpush.bf16.msra.mxu1 %v2703_v6  ;;  %267 = vmatpush.bf16.msra.mxu3 %v2705_v9 }
  0x1c   :  { %226 = vmatpush.bf16.msra.mxu0 %v2727_v19  ;;  %253 = vmatpush.bf16.msra.mxu2 %v2729_v20 }
  0x1d   :  { %240 = vmatpush.bf16.msra.mxu1 %v2739_v24  ;;  %268 = vmatpush.bf16.msra.mxu3 %v2741_v25 }
  0x20   :  { %227 = vmatpush.bf16.msra.mxu0 %v2763_v36  ;;  %254 = vmatpush.bf16.msra.mxu2 %v2765_v37 }
  0x21   :  { %241 = vmatpush.bf16.msra.mxu1 %v2769_v38  ;;  %269 = vmatpush.bf16.msra.mxu3 %v2771_v39 }
  0x23   :  { %228 = vmatmul.bf16.vlgmr.msra.gmra.mxu0 %v2482_v47 }
  0x24   :  { %433 = vmatpush.bf16.msrb.mxu0 %v2507_v3  ;;  %242 = vmatmul.bf16.vlgmr.msra.gmra.mxu1 %v2482_v47 }
  0x25   :  { %447 = vmatpush.bf16.msrb.mxu1 %v2518_v7  ;;  %475 = vmatpush.bf16.msrb.mxu3 %v2520_v8 }
  0x26   :  { %270 = vmatmul.bf16.vlgmr.msra.gmra.mxu3 %v2482_v47  ;;  %255 = vmatpush.bf16.msra.mxu2 %v2783_v44 }
  0x28   :  { %434 = vmatpush.bf16.msrb.mxu0 %v2532_v12 }
  0x29   :  { %448 = vmatpush.bf16.msrb.mxu1 %v2545_v16  ;;  %476 = vmatpush.bf16.msrb.mxu3 %v2547_v17 }
  0x2a   :  { %461 = vmatpush.bf16.msrb.mxu2 %v2558_v21 }
  0x2b   :  { %256 = vmatmul.bf16.vlgmr.msra.gmra.mxu2 %v2482_v47 }
  0x2c   :  { %435 = vmatpush.bf16.msrb.mxu0 %v2580_v28 }
  0x2d   :  { %449 = vmatpush.bf16.msrb.mxu1 %v2593_v32  ;;  %477 = vmatpush.bf16.msrb.mxu3 %v2595_v33 }
  0x2e   :  { %462 = vmatpush.bf16.msrb.mxu2 %v2597_v34 }
  0x30   :  { %436 = vmatpush.bf16.msrb.mxu0 %v2619_v41 }
  0x31   :  { %450 = vmatpush.bf16.msrb.mxu1 %v2631_v45  ;;  %478 = vmatpush.bf16.msrb.mxu3 %v2633_v46 }
  0x32   :  { %463 = vmatpush.bf16.msrb.mxu2 %v2621_v42 }
  0x34   :  { %437 = vmatpush.bf16.msrb.mxu0 %v2655_v53 }
  0x35   :  { %451 = vmatpush.bf16.msrb.mxu1 %v2667_v57  ;;  %479 = vmatpush.bf16.msrb.mxu3 %v2669_v58 }
  0x36   :  { %464 = vmatpush.bf16.msrb.mxu2 %v2657_v54 }
  0x38   :  { %438 = vmatpush.bf16.msrb.mxu0 %v2691_v1 }
  0x39   :  { %452 = vmatpush.bf16.msrb.mxu1 %v2703_v6  ;;  %480 = vmatpush.bf16.msrb.mxu3 %v2705_v9 }
  0x3a   :  { %465 = vmatpush.bf16.msrb.mxu2 %v2693_v2 }
  0x3c   :  { %439 = vmatpush.bf16.msrb.mxu0 %v2727_v19 }
  0x3d   :  { %453 = vmatpush.bf16.msrb.mxu1 %v2739_v24  ;;  %481 = vmatpush.bf16.msrb.mxu3 %v2741_v25 }
  0x3e   :  { %466 = vmatpush.bf16.msrb.mxu2 %v2729_v20 }
  0x40   :  { %440 = vmatpush.bf16.msrb.mxu0 %v2763_v36 }
  0x41   :  { %454 = vmatpush.bf16.msrb.mxu1 %v2769_v38  ;;  %482 = vmatpush.bf16.msrb.mxu3 %v2771_v39 }
  0x42   :  { %467 = vmatpush.bf16.msrb.mxu2 %v2765_v37 }
  0x44   :  { %647 = vmatpush.bf16.msra.mxu0 %v2507_v3 }
  0x45   :  { %661 = vmatpush.bf16.msra.mxu1 %v2518_v7  ;;  %689 = vmatpush.bf16.msra.mxu3 %v2520_v8 }
  0x46   :  { %468 = vmatpush.bf16.msrb.mxu2 %v2783_v44 }
  0x48   :  { %648 = vmatpush.bf16.msra.mxu0 %v2532_v12 }
  0x49   :  { %662 = vmatpush.bf16.msra.mxu1 %v2545_v16  ;;  %690 = vmatpush.bf16.msra.mxu3 %v2547_v17 }
  0x4a   :  { %675 = vmatpush.bf16.msra.mxu2 %v2558_v21 }
  0x4c   :  { %649 = vmatpush.bf16.msra.mxu0 %v2580_v28 }
  0x4d   :  { %663 = vmatpush.bf16.msra.mxu1 %v2593_v32  ;;  %691 = vmatpush.bf16.msra.mxu3 %v2595_v33 }
  0x4e   :  { %676 = vmatpush.bf16.msra.mxu2 %v2597_v34 }
  0x50   :  { %650 = vmatpush.bf16.msra.mxu0 %v2619_v41 }
  0x51   :  { %664 = vmatpush.bf16.msra.mxu1 %v2631_v45  ;;  %692 = vmatpush.bf16.msra.mxu3 %v2633_v46 }
  0x52   :  { %677 = vmatpush.bf16.msra.mxu2 %v2621_v42 }
  0x54   :  { %651 = vmatpush.bf16.msra.mxu0 %v2655_v53 }
  0x55   :  { %665 = vmatpush.bf16.msra.mxu1 %v2667_v57  ;;  %693 = vmatpush.bf16.msra.mxu3 %v2669_v58 }
  0x56   :  { %678 = vmatpush.bf16.msra.mxu2 %v2657_v54 }
  0x58   :  { %652 = vmatpush.bf16.msra.mxu0 %v2691_v1 }
  0x59   :  { %666 = vmatpush.bf16.msra.mxu1 %v2703_v6  ;;  %694 = vmatpush.bf16.msra.mxu3 %v2705_v9 }
  0x5a   :  { %679 = vmatpush.bf16.msra.mxu2 %v2693_v2 }
  0x5c   :  { %653 = vmatpush.bf16.msra.mxu0 %v2727_v19 }
  0x5d   :  { %667 = vmatpush.bf16.msra.mxu1 %v2739_v24  ;;  %695 = vmatpush.bf16.msra.mxu3 %v2741_v25 }
  0x5e   :  { %680 = vmatpush.bf16.msra.mxu2 %v2729_v20 }
  0x60   :  { %654 = vmatpush.bf16.msra.mxu0 %v2763_v36 }
  0x61   :  { %668 = vmatpush.bf16.msra.mxu1 %v2769_v38  ;;  %696 = vmatpush.bf16.msra.mxu3 %v2771_v39 }
  0x62   :  { %681 = vmatpush.bf16.msra.mxu2 %v2765_v37 }
  0x66   :  { %682 = vmatpush.bf16.msra.mxu2 %v2783_v44 }
  0xa0   :  { %v229_v51 = vpop.f32.mrf.mxu0 }
  0xa1   :  { %v284_v52 = vadd.f32 %v276_v49, %v229_v51  ;;  %v243_v55 = vpop.f32.mrf.mxu1 }
  0xa2   :  { %v285_v59 = vadd.f32 %v277_v50, %v243_v55 }
  0xa3   :  { %v2056_v61 = vmul.f32 -1.442695, %v284_v52 }
  0xa4   :  { %v2058_v62 = vmul.f32 -1.442695, %v285_v59 }
  0xa5   :  { %2226 = vpow2.f32 %v2056_v61 }
  0xa6   :  { %2228 = vpow2.f32 %v2058_v62 }
  0xa8   :  { %v231_v11 = vpop.f32.mrf.mxu0 }
  0xa9   :  { %v271_v5 = vpop.f32.mrf.mxu3  ;;  %v288_v13 = vadd.f32 %v280_v0, %v231_v11  ;;  %v245_v14 = vpop.f32.mrf.mxu1 }
  0xaa   :  { %v287_v10 = vadd.f32 %v279_v63, %v271_v5  ;;  %v289_v22 = vadd.f32 %v281_v4, %v245_v14  ;;  %v282_v14 = vunpack.c.l.bf16 %v58_v15 }
  0xab   :  { %v2227_v23 = vpop.eup %2226  ;;  %v2057_v26 = vmul.f32 -1.442695, %v288_v13 }
  0xac   :  { %v2060_v18 = vmul.f32 -1.442695, %v287_v10  ;;  %v2229_v27 = vpop.eup %2228  ;;  %v298_v29 = vadd.f32 1.0, %v2227_v23  ;;  %v2059_v30 = vmul.f32 -1.442695, %v289_v22 }
  0xad   :  { %v336_v35 = vadd.f32 1.0, %v2229_v27 }
  0xae   :  { %2230 = vpow2.f32 %v2060_v18  ;;  %v257_v40 = vpop.f32.mrf.mxu2  ;;  %v309_v5 = vand.u32 2147483647, %v298_v29  ;;  %v311_v13 = vand.u32 2147483648, %v298_v29  ;;  %vm305_vm1 = vweird.f32 %v298_v29 }
  0xaf   :  { %2232 = vpow2.f32 %v2057_v26  ;;  %v286_v55 = vadd.f32 %v278_v43, %v257_v40  ;;  %v349_v11 = vand.u32 2147483648, %v336_v35  ;;  %v347_v27 = vand.u32 2147483647, %v336_v35 }
  0xb0   :  { %2234 = vrcp.f32 %v298_v29  ;;  %vm343_vm3 = vweird.f32 %v336_v35  ;;  %vm310_vm4 = vcmp.eq.f32.partialorder %v309_v5, 8.507059e+37  ;;  %v312_v15 = vor.u32 1.1754944e-38, %v311_v13 }
  0xb1   :  { %2236 = vrcp.f32 %v336_v35  ;;  %v273_v47 = vpop.f32.mrf.mxu3  ;;  %vm348_vm7 = vcmp.eq.f32.partialorder %v347_v27, 8.507059e+37 }
  0xb2   :  { %2238 = vpow2.f32 %v2059_v30  ;;  %v291_v48 = vadd.f32 %v283_v31, %v273_v47  ;;  %v350_v47 = vor.u32 1.1754944e-38, %v349_v11 }
  0xb4   :  { %v2231_v49 = vpop.eup %2230  ;;  %v2061_v50 = vmul.f32 -1.442695, %v291_v48 }
  0xb5   :  { %v2233_v51 = vpop.eup %2232  ;;  %v2862_v52 = vadd.f32 1.0, %v2231_v49 }
  0xb6   :  { %v2235_v59 = vpop.eup %2234  ;;  %v2864_v60 = vadd.f32 1.0, %v2233_v51  ;;  %2240 = vpow2.f32 %v2061_v50  ;;  %v259_v22 = vpop.f32.mrf.mxu2 }
  0xb7   :  { %v2237_v61 = vpop.eup %2236  ;;  %v301_v62 = vmul.f32 %v2235_v59, %v298_v29  ;;  %2242 = vrcp.f32 %v2862_v52  ;;  %vm306_vm0 = vweird.f32 %v2235_v59  ;;  %v290_v49 = vadd.f32 %v282_v14, %v259_v22 }
  0xb8   :  { %v2239_v63 = vpop.eup %2238  ;;  %v339_v0 = vmul.f32 %v2237_v61, %v336_v35  ;;  %2244 = vrcp.f32 %v2864_v60  ;;  %vm344_vm2 = vweird.f32 %v2237_v61  ;;  %vm307_vm5 = vmor %vm305_vm1, %vm306_vm0  ;;  %v326_v5 = vand.u32 2147483648, %v2864_v60 }
  0xb9   :  { %v302_v56 = vsub.f32 1.0, %v301_v62  ;;  %v2868_v4 = vadd.f32 1.0, %v2239_v63  ;;  %2246 = vtanh.f32 %v286_v55  ;;  %vm345_vm6 = vmor %vm343_vm3, %vm344_vm2  ;;  %v324_v14 = vand.u32 2147483647, %v2864_v60 }
  0xba   :  { %v340_v10 = vsub.f32 1.0, %v339_v0  ;;  %vm320_vm9 = vweird.f32 %v2864_v60  ;;  %v327_v27 = vor.u32 1.1754944e-38, %v326_v5  ;;  %vm383_vm1 = vweird.f32 %v2862_v52 }
  0xbb   :  { %2248 = vrcp.f32 %v2868_v4  ;;  %v303_v18 = vmul.f32 %v2235_v59, %v302_v56  ;;  %vm325_vm12 = vcmp.eq.f32.partialorder %v324_v14, 8.507059e+37  ;;  %vm358_vm13 = vweird.f32 %v2868_v4 }
  0xbc   :  { %v2241_v23 = vpop.eup %2240  ;;  %v341_v26 = vmul.f32 %v2237_v61, %v340_v10 }
  0xbd   :  { %v2871_v30 = vpop.eup %2242  ;;  %v304_v31 = vadd.f32 %v2235_v59, %v303_v18  ;;  %v2873_v40 = vadd.f32 1.0, %v2241_v23  ;;  %v364_v23 = vand.u32 2147483648, %v2868_v4 }
  0xbe   :  { %v2245_v43 = vpop.eup %2244  ;;  %v342_v48 = vadd.f32 %v2237_v61, %v341_v26  ;;  %v379_v51 = vmul.f32 %v2871_v30, %v2862_v52  ;;  %vm384_vm0 = vweird.f32 %v2871_v30 }
  0xbf   :  { %v2247_v50 = vpop.eup %2246  ;;  %v316_v29 = vmul.f32 %v2245_v43, %v2864_v60  ;;  %v308_v55 = vsel %vm307_vm5, %v2235_v59, %v304_v31  ;;  %2250 = vrcp.f32 %v2873_v40  ;;  %vm321_vm8 = vweird.f32 %v2245_v43  ;;  %vm385_vm2 = vmor %vm383_vm1, %vm384_vm0 }
  0xc0   :  { %v313_v35 = vsel %vm310_vm4, %v312_v15, %v308_v55  ;;  %v346_v62 = vsel %vm345_vm6, %v2237_v61, %v342_v48  ;;  %v380_v18 = vsub.f32 1.0, %v379_v51  ;;  %2252 = vtanh.f32 %v290_v49  ;;  %vm322_vm10 = vmor %vm320_vm9, %vm321_vm8 }
  0xc1   :  { %v2249_v63 = vpop.eup %2248  ;;  %v317_v0 = vsub.f32 1.0, %v316_v29  ;;  %v351_v56 = vsel %vm348_vm7, %v350_v47, %v346_v62  ;;  %v410_v13 = vmul.f32 %v2247_v50, %v313_v35  ;;  %v362_v31 = vand.u32 2147483647, %v2868_v4 }
  0xc2   :  { %v354_v10 = vmul.f32 %v2249_v63, %v2868_v4  ;;  %v408_v11 = vmul.f32 0.0, %v351_v56  ;;  %vm359_vm11 = vweird.f32 %v2249_v63  ;;  %v381_v50 = vmul.f32 %v2871_v30, %v380_v18 }
  0xc3   :  { %v318_v59 = vmul.f32 %v2245_v43, %v317_v0  ;;  %v365_v35 = vor.u32 1.1754944e-38, %v364_v23  ;;  %vm360_vm14 = vmor %vm358_vm13, %vm359_vm11  ;;  %vm363_vm15 = vcmp.eq.f32.partialorder %v362_v31, 8.507059e+37  ;;  %vm398_vm4 = vweird.f32 %v2873_v40 }
  0xc4   :  { %v355_v22 = vsub.f32 1.0, %v354_v10  ;;  %v2886_v15 = vadd.f32 %v410_v13, %v408_v11  ;;  %v389_v10 = vand.u32 2147483648, %v2862_v52  ;;  %v387_v11 = vand.u32 2147483647, %v2862_v52 }
  0xc5   :  { %v2251_v61 = vpop.eup %2250  ;;  %v319_v26 = vadd.f32 %v2245_v43, %v318_v59  ;;  %v402_v23 = vand.u32 2147483647, %v2873_v40 }
  0xc6   :  { %v356_v47 = vmul.f32 %v2249_v63, %v355_v22  ;;  %v394_v48 = vmul.f32 %v2251_v61, %v2873_v40  ;;  %v2253_v55 = vpop.eup %2252  ;;  %2254 = vtanh.f32 %v2886_v15  ;;  %vm399_vm3 = vweird.f32 %v2251_v61 }
  0xc7   :  { %v323_v49 = vsel %vm322_vm10, %v2245_v43, %v319_v26  ;;  %v382_v43 = vadd.f32 %v2871_v30, %v381_v50  ;;  %v390_v59 = vor.u32 1.1754944e-38, %v389_v10  ;;  %v404_v22 = vand.u32 2147483648, %v2873_v40  ;;  %vm400_vm6 = vmor %vm398_vm4, %vm399_vm3  ;;  %v2062_v40 = vld [vmem:[%s3433_s0 + $0x20] sm:$0xff]  ;;  %v2064_v10 = vld [vmem:[%s3433_s0 + $0x30] sm:$0xff] }
  0xc8   :  { %v395_v60 = vsub.f32 1.0, %v394_v48  ;;  %v328_v51 = vsel %vm325_vm12, %v327_v27, %v323_v49  ;;  %v357_v29 = vadd.f32 %v2249_v63, %v356_v47  ;;  %vm388_vm5 = vcmp.eq.f32.partialorder %v387_v11, 8.507059e+37 }
  0xc9   :  { %v411_v0 = vmul.f32 %v2253_v55, %v328_v51  ;;  %v405_v31 = vor.u32 1.1754944e-38, %v404_v22  ;;  %vm403_vm7 = vcmp.eq.f32.partialorder %v402_v23, 8.507059e+37 }
  0xca   :  { %v361_v62 = vsel %vm360_vm14, %v2249_v63, %v357_v29  ;;  %v396_v56 = vmul.f32 %v2251_v61, %v395_v60  ;;  %v386_v63 = vsel %vm385_vm2, %v2871_v30, %v382_v43  ;;  %v2063_v43 = vld [vmem:[%s3433_s0 + $0x28] sm:$0xff] }
  0xcb   :  { %v366_v5 = vsel %vm363_vm15, %v365_v35, %v361_v62  ;;  %v391_v52 = vsel %vm388_vm5, %v390_v59, %v386_v63  ;;  %v490_v35 = vunpack.c.h.bf16 %v2062_v40  ;;  %v492_v63 = vunpack.c.h.bf16 %v2063_v43 }
  0xcc   :  { %v409_v4 = vmul.f32 0.0, %v366_v5  ;;  %v397_v14 = vadd.f32 %v2251_v61, %v396_v56  ;;  %v2255_v18 = vpop.eup %2254 }
  0xcd   :  { %v416_v27 = vmul.f32 %v2255_v18, %v391_v52  ;;  %v494_v18 = vunpack.c.h.bf16 %v2064_v10 }
  0xce   :  { %v2897_v13 = vadd.f32 %v411_v0, %v409_v4  ;;  %v401_v26 = vsel %vm400_vm6, %v2251_v61, %v397_v14  ;;  %v489_v61 = vunpack.c.l.bf16 %v2062_v40  ;;  %v493_v14 = vunpack.c.l.bf16 %v2064_v10 }
  0xcf   :  { %v406_v30 = vsel %vm403_vm7, %v405_v31, %v401_v26  ;;  %v418_v50 = vpack.c.bf16 %v416_v27, %v416_v27  ;;  %v491_v40 = vunpack.c.l.bf16 %v2063_v43 }
  0xd0   :  { %2256 = vtanh.f32 %v2897_v13 }
  0xd1   :  { %v429_v51 = vunpack.c.l.b16 %v418_v50 }
  0xd6   :  { %v2257_v47 = vpop.eup %2256 }
  0xd7   :  { %v417_v48 = vmul.f32 %v2257_v47, %v406_v30  ;;  %v2065_v47 = vld [vmem:[%s3433_s0 + $0x38] sm:$0xff] }
  0xd8   :  { %v495_v43 = vunpack.c.l.bf16 %v2065_v47 }
  0xd9   :  { %v419_v49 = vpack.c.bf16 %v417_v48, %v417_v48  ;;  %v2181_v60 = vpack.c.bf16 %v417_v48, %v416_v27 }
  0xdb   :  { %2182 = vst [vmem:[%s3434_s2] sm:$0xff] %v2181_v60   ;;  %v430_v29 = vunpack.c.l.b16 %v419_v49 }
  0xdd   :  { %v431_v55 = vpack.c.b16 %v430_v29, %v429_v51 }
  0xdf   :  { %441 = vmatmul.bf16.vlgmr.msrb.gmra.mxu0 %v431_v55  ;;  %455 = vmatmul.bf16.vlgmr.msrb.gmra.mxu1 %v431_v55 }
  0xe0   :  { %469 = vmatmul.bf16.vlgmr.msrb.gmra.mxu2 %v431_v55  ;;  %483 = vmatmul.bf16.vlgmr.msrb.gmra.mxu3 %v431_v55  ;;  %v496_v55 = vunpack.c.h.bf16 %v2065_v47 }
  0xe1   :  { %861 = vmatpush.bf16.msrb.mxu0 %v2507_v3  ;;  %875 = vmatpush.bf16.msrb.mxu1 %v2518_v7 }
  0xe2   :  { %889 = vmatpush.bf16.msrb.mxu2 %v2558_v21  ;;  %903 = vmatpush.bf16.msrb.mxu3 %v2520_v8 }
  0xe5   :  { %862 = vmatpush.bf16.msrb.mxu0 %v2532_v12  ;;  %876 = vmatpush.bf16.msrb.mxu1 %v2545_v16 }
  0xe6   :  { %890 = vmatpush.bf16.msrb.mxu2 %v2597_v34  ;;  %904 = vmatpush.bf16.msrb.mxu3 %v2547_v17 }
  0xe9   :  { %863 = vmatpush.bf16.msrb.mxu0 %v2580_v28  ;;  %877 = vmatpush.bf16.msrb.mxu1 %v2593_v32 }
  0xea   :  { %891 = vmatpush.bf16.msrb.mxu2 %v2621_v42  ;;  %905 = vmatpush.bf16.msrb.mxu3 %v2595_v33 }
  0xed   :  { %864 = vmatpush.bf16.msrb.mxu0 %v2619_v41  ;;  %878 = vmatpush.bf16.msrb.mxu1 %v2631_v45 }
  0xee   :  { %892 = vmatpush.bf16.msrb.mxu2 %v2657_v54  ;;  %906 = vmatpush.bf16.msrb.mxu3 %v2633_v46 }
  0xf1   :  { %865 = vmatpush.bf16.msrb.mxu0 %v2655_v53  ;;  %879 = vmatpush.bf16.msrb.mxu1 %v2667_v57 }
  0xf2   :  { %893 = vmatpush.bf16.msrb.mxu2 %v2693_v2  ;;  %907 = vmatpush.bf16.msrb.mxu3 %v2669_v58 }
  0xf5   :  { %866 = vmatpush.bf16.msrb.mxu0 %v2691_v1  ;;  %880 = vmatpush.bf16.msrb.mxu1 %v2703_v6 }
  0xf6   :  { %894 = vmatpush.bf16.msrb.mxu2 %v2729_v20  ;;  %908 = vmatpush.bf16.msrb.mxu3 %v2705_v9 }
  0xf9   :  { %867 = vmatpush.bf16.msrb.mxu0 %v2727_v19  ;;  %881 = vmatpush.bf16.msrb.mxu1 %v2739_v24 }
  0xfa   :  { %895 = vmatpush.bf16.msrb.mxu2 %v2765_v37  ;;  %909 = vmatpush.bf16.msrb.mxu3 %v2741_v25 }
  0xfd   :  { %868 = vmatpush.bf16.msrb.mxu0 %v2763_v36  ;;  %882 = vmatpush.bf16.msrb.mxu1 %v2769_v38 }
  0xfe   :  { %896 = vmatpush.bf16.msrb.mxu2 %v2783_v44  ;;  %910 = vmatpush.bf16.msrb.mxu3 %v2771_v39 }
 0x15c   :  { %v442_v62 = vpop.f32.mrf.mxu0  ;;  %v456_v0 = vpop.f32.mrf.mxu1 }
 0x15d   :  { %v497_v56 = vadd.f32 %v489_v61, %v442_v62  ;;  %v498_v5 = vadd.f32 %v490_v35, %v456_v0 }
 0x15f   :  { %v2066_v4 = vmul.f32 -1.442695, %v497_v56  ;;  %v2068_v11 = vmul.f32 -1.442695, %v498_v5 }
 0x161   :  { %2258 = vpow2.f32 %v2066_v4 }
 0x162   :  { %2260 = vpow2.f32 %v2068_v11 }
 0x163   :  { %v484_v59 = vpop.f32.mrf.mxu3  ;;  %v470_v29 = vpop.f32.mrf.mxu2 }
 0x164   :  { %v500_v22 = vadd.f32 %v492_v63, %v484_v59  ;;  %v444_v23 = vpop.f32.mrf.mxu0  ;;  %v458_v52 = vpop.f32.mrf.mxu1  ;;  %v499_v56 = vadd.f32 %v491_v40, %v470_v29 }
 0x165   :  { %v501_v26 = vadd.f32 %v493_v14, %v444_v23  ;;  %v502_v27 = vadd.f32 %v494_v18, %v458_v52 }
 0x166   :  { %v2070_v31 = vmul.f32 -1.442695, %v500_v22 }
 0x167   :  { %v2259_v30 = vpop.eup %2258  ;;  %v2067_v48 = vmul.f32 -1.442695, %v501_v26  ;;  %v2069_v60 = vmul.f32 -1.442695, %v502_v27 }
 0x168   :  { %v2261_v50 = vpop.eup %2260  ;;  %v511_v49 = vadd.f32 1.0, %v2259_v30  ;;  %2262 = vpow2.f32 %v2070_v31 }
 0x169   :  { %v549_v51 = vadd.f32 1.0, %v2261_v50  ;;  %2264 = vpow2.f32 %v2067_v48 }
 0x16a   :  { %2266 = vrcp.f32 %v511_v49  ;;  %v522_v27 = vand.u32 2147483647, %v511_v49  ;;  %v524_v31 = vand.u32 2147483648, %v511_v49  ;;  %vm518_vm10 = vweird.f32 %v511_v49 }
 0x16b   :  { %2268 = vrcp.f32 %v549_v51  ;;  %v486_v61 = vpop.f32.mrf.mxu3  ;;  %v472_v52 = vpop.f32.mrf.mxu2  ;;  %v562_v30 = vand.u32 2147483648, %v549_v51  ;;  %vm556_vm11 = vweird.f32 %v549_v51 }
 0x16c   :  { %2270 = vpow2.f32 %v2069_v60  ;;  %v504_v35 = vadd.f32 %v496_v55, %v486_v61  ;;  %v560_v60 = vand.u32 2147483647, %v549_v51  ;;  %v503_v29 = vadd.f32 %v495_v43, %v472_v52 }
 0x16d   :  { %vm523_vm13 = vcmp.eq.f32.partialorder %v522_v27, 8.507059e+37  ;;  %v525_v61 = vor.u32 1.1754944e-38, %v524_v31 }
 0x16e   :  { %v2263_v62 = vpop.eup %2262  ;;  %v2071_v11 = vmul.f32 -1.442695, %v504_v35  ;;  %vm561_vm15 = vcmp.eq.f32.partialorder %v560_v60, 8.507059e+37 }
 0x16f   :  { %v2265_v0 = vpop.eup %2264  ;;  %v2951_v5 = vadd.f32 1.0, %v2263_v62 }
 0x170   :  { %v2267_v10 = vpop.eup %2266  ;;  %v2953_v4 = vadd.f32 1.0, %v2265_v0  ;;  %v563_v0 = vor.u32 1.1754944e-38, %v562_v30 }
 0x171   :  { %v2269_v63 = vpop.eup %2268  ;;  %v514_v14 = vmul.f32 %v2267_v10, %v511_v49  ;;  %2272 = vrcp.f32 %v2951_v5  ;;  %vm519_vm8 = vweird.f32 %v2267_v10 }
 0x172   :  { %v2271_v18 = vpop.eup %2270  ;;  %v552_v59 = vmul.f32 %v2269_v63, %v549_v51  ;;  %2274 = vrcp.f32 %v2953_v4  ;;  %vm557_vm9 = vweird.f32 %v2269_v63  ;;  %vm520_vm12 = vmor %vm518_vm10, %vm519_vm8  ;;  %v537_v52 = vand.u32 2147483647, %v2953_v4 }
 0x173   :  { %v515_v22 = vsub.f32 1.0, %v514_v14  ;;  %2276 = vtanh.f32 %v499_v56  ;;  %v2957_v23 = vadd.f32 1.0, %v2271_v18  ;;  %vm558_vm14 = vmor %vm556_vm11, %vm557_vm9  ;;  %v539_v30 = vand.u32 2147483648, %v2953_v4 }
 0x174   :  { %v553_v26 = vsub.f32 1.0, %v552_v59  ;;  %2278 = vpow2.f32 %v2071_v11  ;;  %vm533_vm1 = vweird.f32 %v2953_v4  ;;  %vm538_vm4 = vcmp.eq.f32.partialorder %v537_v52, 8.507059e+37 }
 0x175   :  { %v516_v48 = vmul.f32 %v2267_v10, %v515_v22  ;;  %2280 = vrcp.f32 %v2957_v23  ;;  %v577_v60 = vand.u32 2147483648, %v2957_v23  ;;  %vm571_vm5 = vweird.f32 %v2957_v23 }
 0x176   :  { %v554_v50 = vmul.f32 %v2269_v63, %v553_v26  ;;  %2282 = vtanh.f32 %v503_v29  ;;  %vm596_vm9 = vweird.f32 %v2951_v5 }
 0x177   :  { %v2960_v55 = vpop.eup %2272  ;;  %v517_v47 = vadd.f32 %v2267_v10, %v516_v48 }
 0x178   :  { %v2275_v40 = vpop.eup %2274  ;;  %v555_v35 = vadd.f32 %v2269_v63, %v554_v50  ;;  %v592_v11 = vmul.f32 %v2960_v55, %v2951_v5  ;;  %vm597_vm8 = vweird.f32 %v2960_v55 }
 0x179   :  { %v2277_v62 = vpop.eup %2276  ;;  %v521_v56 = vsel %vm520_vm12, %v2267_v10, %v517_v47  ;;  %v529_v14 = vmul.f32 %v2275_v40, %v2953_v4  ;;  %vm534_vm0 = vweird.f32 %v2275_v40  ;;  %v575_v47 = vand.u32 2147483647, %v2957_v23  ;;  %vm598_vm10 = vmor %vm596_vm9, %vm597_vm8 }
 0x17a   :  { %v2279_v18 = vpop.eup %2278  ;;  %v526_v59 = vsel %vm523_vm13, %v525_v61, %v521_v56  ;;  %v559_v43 = vsel %vm558_vm14, %v2269_v63, %v555_v35  ;;  %v593_v48 = vsub.f32 1.0, %v592_v11  ;;  %vm535_vm3 = vmor %vm533_vm1, %vm534_vm0  ;;  %v578_v4 = vor.u32 1.1754944e-38, %v577_v60 }
 0x17b   :  { %v2281_v49 = vpop.eup %2280  ;;  %v564_v51 = vsel %vm561_vm15, %v563_v0, %v559_v43  ;;  %v530_v22 = vsub.f32 1.0, %v529_v14  ;;  %v590_v26 = vadd.f32 1.0, %v2279_v18  ;;  %v623_v31 = vmul.f32 %v2277_v62, %v526_v59 }
 0x17c   :  { %v621_v27 = vmul.f32 %v564_v51, %v2886_v15  ;;  %v567_v10 = vmul.f32 %v2281_v49, %v2957_v23  ;;  %v2283_v61 = vpop.eup %2282  ;;  %vm572_vm2 = vweird.f32 %v2281_v49  ;;  %v540_v62 = vor.u32 1.1754944e-38, %v539_v30 }
 0x17d   :  { %v531_v50 = vmul.f32 %v2275_v40, %v530_v22  ;;  %2284 = vrcp.f32 %v590_v26  ;;  %v594_v0 = vmul.f32 %v2960_v55, %v593_v48  ;;  %vm573_vm6 = vmor %vm571_vm5, %vm572_vm2  ;;  %vm576_vm7 = vcmp.eq.f32.partialorder %v575_v47, 8.507059e+37 }
 0x17e   :  { %v568_v63 = vsub.f32 1.0, %v567_v10  ;;  %v2972_v35 = vadd.f32 %v623_v31, %v621_v27  ;;  %v600_v31 = vand.u32 2147483647, %v2951_v5  ;;  %vm611_vm12 = vweird.f32 %v590_v26 }
 0x17f   :  { %v532_v29 = vadd.f32 %v2275_v40, %v531_v50  ;;  %v595_v27 = vadd.f32 %v2960_v55, %v594_v0 }
 0x180   :  { %v569_v15 = vmul.f32 %v2281_v49, %v568_v63  ;;  %2286 = vtanh.f32 %v2972_v35  ;;  %v617_v63 = vand.u32 2147483648, %v590_v26  ;;  %vm601_vm13 = vcmp.eq.f32.partialorder %v600_v31, 8.507059e+37 }
 0x181   :  { %v536_v56 = vsel %vm535_vm3, %v2275_v40, %v532_v29  ;;  %v602_v40 = vand.u32 2147483648, %v2951_v5  ;;  %v599_v30 = vsel %vm598_vm10, %v2960_v55, %v595_v27 }
 0x182   :  { %v541_v11 = vsel %vm538_vm4, %v540_v62, %v536_v56  ;;  %v570_v14 = vadd.f32 %v2281_v49, %v569_v15 }
 0x183   :  { %v2285_v18 = vpop.eup %2284  ;;  %v624_v43 = vmul.f32 %v2283_v61, %v541_v11  ;;  %v603_v50 = vor.u32 1.1754944e-38, %v602_v40  ;;  %v618_v61 = vor.u32 1.1754944e-38, %v617_v63 }
 0x184   :  { %v574_v59 = vsel %vm573_vm6, %v2281_v49, %v570_v14  ;;  %v607_v51 = vmul.f32 %v2285_v18, %v590_v26  ;;  %vm612_vm11 = vweird.f32 %v2285_v18 }
 0x185   :  { %v579_v22 = vsel %vm576_vm7, %v578_v4, %v574_v59  ;;  %vm613_vm14 = vmor %vm611_vm12, %vm612_vm11  ;;  %v604_v29 = vsel %vm601_vm13, %v603_v50, %v599_v30 }
 0x186   :  { %v622_v23 = vmul.f32 %v579_v22, %v2897_v13  ;;  %v608_v52 = vsub.f32 1.0, %v607_v51  ;;  %v2287_v48 = vpop.eup %2286  ;;  %v615_v13 = vand.u32 2147483647, %v590_v26  ;;  %v2074_v26 = vld [vmem:[%s3433_s0 + $0x40] sm:$0xff] }
 0x187   :  { %v629_v5 = vmul.f32 %v2287_v48, %v604_v29 }
 0x188   :  { %v2983_v10 = vadd.f32 %v624_v43, %v622_v23  ;;  %v609_v49 = vmul.f32 %v2285_v18, %v608_v52  ;;  %vm616_vm15 = vcmp.eq.f32.partialorder %v615_v13, 8.507059e+37  ;;  %v704_v43 = vunpack.c.h.bf16 %v2074_v26  ;;  %v2075_v23 = vld [vmem:[%s3433_s0 + $0x48] sm:$0xff]  ;;  %v2076_v52 = vld [vmem:[%s3433_s0 + $0x50] sm:$0xff] }
 0x189   :  { %v631_v56 = vpack.c.bf16 %v629_v5, %v629_v5  ;;  %v706_v30 = vunpack.c.h.bf16 %v2075_v23  ;;  %v707_v48 = vunpack.c.l.bf16 %v2076_v52  ;;  %v708_v50 = vunpack.c.h.bf16 %v2076_v52 }
 0x18a   :  { %2288 = vtanh.f32 %v2983_v10  ;;  %v610_v60 = vadd.f32 %v2285_v18, %v609_v49 }
 0x18b   :  { %v643_v14 = vunpack.c.l.b16 %v631_v56 }
 0x18c   :  { %v614_v47 = vsel %vm613_vm14, %v2285_v18, %v610_v60  ;;  %v703_v18 = vunpack.c.l.bf16 %v2074_v26  ;;  %v705_v26 = vunpack.c.l.bf16 %v2075_v23 }
 0x18d   :  { %v619_v62 = vsel %vm616_vm15, %v618_v61, %v614_v47 }
 0x190   :  { %v2289_v15 = vpop.eup %2288 }
 0x191   :  { %v630_v0 = vmul.f32 %v2289_v15, %v619_v62  ;;  %v2077_v15 = vld [vmem:[%s3433_s0 + $0x58] sm:$0xff] }
 0x192   :  { %v709_v23 = vunpack.c.l.bf16 %v2077_v15 }
 0x193   :  { %v632_v55 = vpack.c.bf16 %v630_v0, %v630_v0  ;;  %v2186_v11 = vpack.c.bf16 %v630_v0, %v629_v5 }
 0x195   :  { %2218 = vst [vmem:[%s3434_s2 + $0x8] sm:$0xff] %v2186_v11   ;;  %v644_v4 = vunpack.c.l.b16 %v632_v55 }
 0x197   :  { %v645_v59 = vpack.c.b16 %v644_v4, %v643_v14 }
 0x199   :  { %655 = vmatmul.bf16.vlgmr.msra.gmra.mxu0 %v645_v59  ;;  %669 = vmatmul.bf16.vlgmr.msra.gmra.mxu1 %v645_v59 }
 0x19a   :  { %683 = vmatmul.bf16.vlgmr.msra.gmra.mxu2 %v645_v59  ;;  %697 = vmatmul.bf16.vlgmr.msra.gmra.mxu3 %v645_v59  ;;  %v710_v59 = vunpack.c.h.bf16 %v2077_v15 }
 0x19b   :  { %1075 = vmatpush.bf16.msra.mxu0 %v2507_v3  ;;  %1089 = vmatpush.bf16.msra.mxu1 %v2518_v7 }
 0x19c   :  { %1103 = vmatpush.bf16.msra.mxu2 %v2558_v21  ;;  %1117 = vmatpush.bf16.msra.mxu3 %v2520_v8 }
 0x19f   :  { %1076 = vmatpush.bf16.msra.mxu0 %v2532_v12  ;;  %1090 = vmatpush.bf16.msra.mxu1 %v2545_v16 }
 0x1a0   :  { %1104 = vmatpush.bf16.msra.mxu2 %v2597_v34  ;;  %1118 = vmatpush.bf16.msra.mxu3 %v2547_v17 }
 0x1a3   :  { %1077 = vmatpush.bf16.msra.mxu0 %v2580_v28  ;;  %1091 = vmatpush.bf16.msra.mxu1 %v2593_v32 }
 0x1a4   :  { %1105 = vmatpush.bf16.msra.mxu2 %v2621_v42  ;;  %1119 = vmatpush.bf16.msra.mxu3 %v2595_v33 }
 0x1a7   :  { %1078 = vmatpush.bf16.msra.mxu0 %v2619_v41  ;;  %1092 = vmatpush.bf16.msra.mxu1 %v2631_v45 }
 0x1a8   :  { %1106 = vmatpush.bf16.msra.mxu2 %v2657_v54  ;;  %1120 = vmatpush.bf16.msra.mxu3 %v2633_v46 }
 0x1ab   :  { %1079 = vmatpush.bf16.msra.mxu0 %v2655_v53  ;;  %1093 = vmatpush.bf16.msra.mxu1 %v2667_v57 }
 0x1ac   :  { %1107 = vmatpush.bf16.msra.mxu2 %v2693_v2  ;;  %1121 = vmatpush.bf16.msra.mxu3 %v2669_v58 }
 0x1af   :  { %1080 = vmatpush.bf16.msra.mxu0 %v2691_v1  ;;  %1094 = vmatpush.bf16.msra.mxu1 %v2703_v6 }
 0x1b0   :  { %1108 = vmatpush.bf16.msra.mxu2 %v2729_v20  ;;  %1122 = vmatpush.bf16.msra.mxu3 %v2705_v9 }
 0x1b3   :  { %1081 = vmatpush.bf16.msra.mxu0 %v2727_v19  ;;  %1095 = vmatpush.bf16.msra.mxu1 %v2739_v24 }
 0x1b4   :  { %1109 = vmatpush.bf16.msra.mxu2 %v2765_v37  ;;  %1123 = vmatpush.bf16.msra.mxu3 %v2741_v25 }
 0x1b7   :  { %1082 = vmatpush.bf16.msra.mxu0 %v2763_v36  ;;  %1096 = vmatpush.bf16.msra.mxu1 %v2769_v38 }
 0x1b8   :  { %1110 = vmatpush.bf16.msra.mxu2 %v2783_v44  ;;  %1124 = vmatpush.bf16.msra.mxu3 %v2771_v39 }
 0x216   :  { %v656_v51 = vpop.f32.mrf.mxu0  ;;  %v670_v22 = vpop.f32.mrf.mxu1 }
 0x217   :  { %v711_v27 = vadd.f32 %v703_v18, %v656_v51  ;;  %v712_v40 = vadd.f32 %v704_v43, %v670_v22 }
 0x219   :  { %v2078_v31 = vmul.f32 -1.442695, %v711_v27  ;;  %v2080_v49 = vmul.f32 -1.442695, %v712_v40 }
 0x21b   :  { %2290 = vpow2.f32 %v2078_v31 }
 0x21c   :  { %2292 = vpow2.f32 %v2080_v49 }
 0x21d   :  { %v698_v63 = vpop.f32.mrf.mxu3  ;;  %v684_v4 = vpop.f32.mrf.mxu2 }
 0x21e   :  { %v714_v60 = vadd.f32 %v706_v30, %v698_v63  ;;  %v658_v13 = vpop.f32.mrf.mxu0  ;;  %v672_v29 = vpop.f32.mrf.mxu1  ;;  %v713_v27 = vadd.f32 %v705_v26, %v684_v4 }
 0x21f   :  { %v715_v47 = vadd.f32 %v707_v48, %v658_v13  ;;  %v716_v5 = vadd.f32 %v708_v50, %v672_v29 }
 0x220   :  { %v2082_v61 = vmul.f32 -1.442695, %v714_v60 }
 0x221   :  { %v2291_v62 = vpop.eup %2290  ;;  %v2079_v0 = vmul.f32 -1.442695, %v715_v47  ;;  %v2081_v11 = vmul.f32 -1.442695, %v716_v5 }
 0x222   :  { %v2293_v56 = vpop.eup %2292  ;;  %v725_v55 = vadd.f32 1.0, %v2291_v62  ;;  %2294 = vpow2.f32 %v2082_v61 }
 0x223   :  { %v763_v14 = vadd.f32 1.0, %v2293_v56  ;;  %2296 = vpow2.f32 %v2079_v0 }
 0x224   :  { %2298 = vrcp.f32 %v725_v55  ;;  %v736_v5 = vand.u32 2147483647, %v725_v55  ;;  %v738_v61 = vand.u32 2147483648, %v725_v55  ;;  %vm732_vm2 = vweird.f32 %v725_v55 }
 0x225   :  { %2300 = vrcp.f32 %v763_v14  ;;  %v700_v18 = vpop.f32.mrf.mxu3  ;;  %v686_v29 = vpop.f32.mrf.mxu2  ;;  %v776_v62 = vand.u32 2147483648, %v763_v14  ;;  %vm770_vm3 = vweird.f32 %v763_v14 }
 0x226   :  { %2302 = vpow2.f32 %v2081_v11  ;;  %v718_v43 = vadd.f32 %v710_v59, %v700_v18  ;;  %v774_v11 = vand.u32 2147483647, %v763_v14  ;;  %v717_v4 = vadd.f32 %v709_v23, %v686_v29 }
 0x227   :  { %vm737_vm5 = vcmp.eq.f32.partialorder %v736_v5, 8.507059e+37  ;;  %v739_v18 = vor.u32 1.1754944e-38, %v738_v61 }
 0x228   :  { %v2295_v51 = vpop.eup %2294  ;;  %v2083_v49 = vmul.f32 -1.442695, %v718_v43  ;;  %vm775_vm7 = vcmp.eq.f32.partialorder %v774_v11, 8.507059e+37 }
 0x229   :  { %v2297_v22 = vpop.eup %2296  ;;  %v3034_v40 = vadd.f32 1.0, %v2295_v51 }
 0x22a   :  { %v2299_v52 = vpop.eup %2298  ;;  %v3036_v31 = vadd.f32 1.0, %v2297_v22  ;;  %v777_v22 = vor.u32 1.1754944e-38, %v776_v62 }
 0x22b   :  { %v2301_v30 = vpop.eup %2300  ;;  %v728_v48 = vmul.f32 %v2299_v52, %v725_v55  ;;  %2304 = vrcp.f32 %v3034_v40  ;;  %vm733_vm0 = vweird.f32 %v2299_v52 }
 0x22c   :  { %v2303_v50 = vpop.eup %2302  ;;  %v766_v63 = vmul.f32 %v2301_v30, %v763_v14  ;;  %2306 = vrcp.f32 %v3036_v31  ;;  %vm771_vm1 = vweird.f32 %v2301_v30  ;;  %vm734_vm4 = vmor %vm732_vm2, %vm733_vm0  ;;  %v751_v29 = vand.u32 2147483647, %v3036_v31 }
 0x22d   :  { %v729_v60 = vsub.f32 1.0, %v728_v48  ;;  %2308 = vtanh.f32 %v713_v27  ;;  %v3040_v13 = vadd.f32 1.0, %v2303_v50  ;;  %vm772_vm6 = vmor %vm770_vm3, %vm771_vm1  ;;  %v753_v62 = vand.u32 2147483648, %v3036_v31 }
 0x22e   :  { %v767_v47 = vsub.f32 1.0, %v766_v63  ;;  %2310 = vpow2.f32 %v2083_v49  ;;  %vm747_vm9 = vweird.f32 %v3036_v31  ;;  %vm752_vm12 = vcmp.eq.f32.partialorder %v751_v29, 8.507059e+37 }
 0x22f   :  { %v730_v0 = vmul.f32 %v2299_v52, %v729_v60  ;;  %2312 = vrcp.f32 %v3040_v13  ;;  %v791_v11 = vand.u32 2147483648, %v3040_v13  ;;  %vm785_vm13 = vweird.f32 %v3040_v13 }
 0x230   :  { %v768_v56 = vmul.f32 %v2301_v30, %v767_v47  ;;  %2314 = vtanh.f32 %v717_v4  ;;  %vm810_vm1 = vweird.f32 %v3034_v40 }
 0x231   :  { %v3043_v59 = vpop.eup %2304  ;;  %v731_v15 = vadd.f32 %v2299_v52, %v730_v0 }
 0x232   :  { %v2307_v26 = vpop.eup %2306  ;;  %v769_v43 = vadd.f32 %v2301_v30, %v768_v56  ;;  %v806_v49 = vmul.f32 %v3043_v59, %v3034_v40  ;;  %vm811_vm0 = vweird.f32 %v3043_v59 }
 0x233   :  { %v2309_v51 = vpop.eup %2308  ;;  %v735_v27 = vsel %vm734_vm4, %v2299_v52, %v731_v15  ;;  %v743_v48 = vmul.f32 %v2307_v26, %v3036_v31  ;;  %vm748_vm8 = vweird.f32 %v2307_v26  ;;  %v789_v15 = vand.u32 2147483647, %v3040_v13  ;;  %vm812_vm2 = vmor %vm810_vm1, %vm811_vm0 }
 0x234   :  { %v2311_v50 = vpop.eup %2310  ;;  %v740_v63 = vsel %vm737_vm5, %v739_v18, %v735_v27  ;;  %v773_v23 = vsel %vm772_vm6, %v2301_v30, %v769_v43  ;;  %v807_v0 = vsub.f32 1.0, %v806_v49  ;;  %vm749_vm11 = vmor %vm747_vm9, %vm748_vm8  ;;  %v792_v31 = vor.u32 1.1754944e-38, %v791_v11 }
 0x235   :  { %v2313_v55 = vpop.eup %2312  ;;  %v778_v14 = vsel %vm775_vm7, %v777_v22, %v773_v23  ;;  %v744_v60 = vsub.f32 1.0, %v743_v48  ;;  %v804_v47 = vadd.f32 1.0, %v2311_v50  ;;  %v837_v61 = vmul.f32 %v2309_v51, %v740_v63 }
 0x236   :  { %v835_v5 = vmul.f32 %v778_v14, %v2972_v35  ;;  %v781_v52 = vmul.f32 %v2313_v55, %v3040_v13  ;;  %v2315_v18 = vpop.eup %2314  ;;  %vm786_vm10 = vweird.f32 %v2313_v55  ;;  %v754_v51 = vor.u32 1.1754944e-38, %v753_v62 }
 0x237   :  { %v745_v56 = vmul.f32 %v2307_v26, %v744_v60  ;;  %2316 = vrcp.f32 %v804_v47  ;;  %v808_v22 = vmul.f32 %v3043_v59, %v807_v0  ;;  %vm787_vm14 = vmor %vm785_vm13, %vm786_vm10  ;;  %vm790_vm15 = vcmp.eq.f32.partialorder %v789_v15, 8.507059e+37 }
 0x238   :  { %v782_v30 = vsub.f32 1.0, %v781_v52  ;;  %v3055_v43 = vadd.f32 %v837_v61, %v835_v5  ;;  %v814_v61 = vand.u32 2147483647, %v3034_v40  ;;  %vm825_vm4 = vweird.f32 %v804_v47 }
 0x239   :  { %v746_v4 = vadd.f32 %v2307_v26, %v745_v56  ;;  %v809_v5 = vadd.f32 %v3043_v59, %v808_v22 }
 0x23a   :  { %v783_v35 = vmul.f32 %v2313_v55, %v782_v30  ;;  %2318 = vtanh.f32 %v3055_v43  ;;  %v831_v30 = vand.u32 2147483648, %v804_v47  ;;  %vm815_vm5 = vcmp.eq.f32.partialorder %v814_v61, 8.507059e+37 }
 0x23b   :  { %v750_v27 = vsel %vm749_vm11, %v2307_v26, %v746_v4  ;;  %v816_v26 = vand.u32 2147483648, %v3034_v40  ;;  %v813_v62 = vsel %vm812_vm2, %v3043_v59, %v809_v5 }
 0x23c   :  { %v755_v49 = vsel %vm752_vm12, %v754_v51, %v750_v27  ;;  %v784_v48 = vadd.f32 %v2313_v55, %v783_v35 }
 0x23d   :  { %v2317_v50 = vpop.eup %2316  ;;  %v838_v23 = vmul.f32 %v2315_v18, %v755_v49  ;;  %v817_v56 = vor.u32 1.1754944e-38, %v816_v26  ;;  %v832_v18 = vor.u32 1.1754944e-38, %v831_v30 }
 0x23e   :  { %v788_v63 = vsel %vm787_vm14, %v2313_v55, %v784_v48  ;;  %v821_v14 = vmul.f32 %v2317_v50, %v804_v47  ;;  %vm826_vm3 = vweird.f32 %v2317_v50 }
 0x23f   :  { %v793_v60 = vsel %vm790_vm15, %v792_v31, %v788_v63  ;;  %vm827_vm6 = vmor %vm825_vm4, %vm826_vm3  ;;  %v818_v4 = vsel %vm815_vm5, %v817_v56, %v813_v62 }
 0x240   :  { %v836_v13 = vmul.f32 %v793_v60, %v2983_v10  ;;  %v822_v29 = vsub.f32 1.0, %v821_v14  ;;  %v2319_v0 = vpop.eup %2318  ;;  %v829_v10 = vand.u32 2147483647, %v804_v47  ;;  %v2086_v47 = vld [vmem:[%s3433_s0 + $0x60] sm:$0xff] }
 0x241   :  { %v843_v40 = vmul.f32 %v2319_v0, %v818_v4 }
 0x242   :  { %v3066_v52 = vadd.f32 %v838_v23, %v836_v13  ;;  %v823_v55 = vmul.f32 %v2317_v50, %v822_v29  ;;  %vm830_vm7 = vcmp.eq.f32.partialorder %v829_v10, 8.507059e+37  ;;  %v918_v23 = vunpack.c.h.bf16 %v2086_v47  ;;  %v2087_v13 = vld [vmem:[%s3433_s0 + $0x68] sm:$0xff]  ;;  %v2088_v29 = vld [vmem:[%s3433_s0 + $0x70] sm:$0xff] }
 0x243   :  { %v845_v27 = vpack.c.bf16 %v843_v40, %v843_v40  ;;  %v920_v62 = vunpack.c.h.bf16 %v2087_v13  ;;  %v921_v0 = vunpack.c.l.bf16 %v2088_v29  ;;  %v922_v56 = vunpack.c.h.bf16 %v2088_v29 }
 0x244   :  { %2320 = vtanh.f32 %v3066_v52  ;;  %v824_v11 = vadd.f32 %v2317_v50, %v823_v55 }
 0x245   :  { %v857_v48 = vunpack.c.l.b16 %v845_v27 }
 0x246   :  { %v828_v15 = vsel %vm827_vm6, %v2317_v50, %v824_v11  ;;  %v917_v50 = vunpack.c.l.bf16 %v2086_v47  ;;  %v919_v47 = vunpack.c.l.bf16 %v2087_v13 }
 0x247   :  { %v833_v51 = vsel %vm830_vm7, %v832_v18, %v828_v15 }
 0x24a   :  { %v2321_v35 = vpop.eup %2320 }
 0x24b   :  { %v844_v22 = vmul.f32 %v2321_v35, %v833_v51  ;;  %v2089_v35 = vld [vmem:[%s3433_s0 + $0x78] sm:$0xff] }
 0x24c   :  { %v923_v13 = vunpack.c.l.bf16 %v2089_v35 }
 0x24d   :  { %v846_v59 = vpack.c.bf16 %v844_v22, %v844_v22  ;;  %v2191_v49 = vpack.c.bf16 %v844_v22, %v843_v40 }
 0x24f   :  { %2219 = vst [vmem:[%s3434_s2 + $0x10] sm:$0xff] %v2191_v49   ;;  %v858_v31 = vunpack.c.l.b16 %v846_v59 }
 0x251   :  { %v859_v63 = vpack.c.b16 %v858_v31, %v857_v48 }
 0x253   :  { %869 = vmatmul.bf16.vlgmr.msrb.gmra.mxu0 %v859_v63  ;;  %883 = vmatmul.bf16.vlgmr.msrb.gmra.mxu1 %v859_v63 }
 0x254   :  { %897 = vmatmul.bf16.vlgmr.msrb.gmra.mxu2 %v859_v63  ;;  %911 = vmatmul.bf16.vlgmr.msrb.gmra.mxu3 %v859_v63  ;;  %v924_v63 = vunpack.c.h.bf16 %v2089_v35 }
 0x255   :  { %1289 = vmatpush.bf16.msrb.mxu0 %v2507_v3  ;;  %1303 = vmatpush.bf16.msrb.mxu1 %v2518_v7 }
 0x256   :  { %1317 = vmatpush.bf16.msrb.mxu2 %v2558_v21  ;;  %1331 = vmatpush.bf16.msrb.mxu3 %v2520_v8 }
 0x259   :  { %1290 = vmatpush.bf16.msrb.mxu0 %v2532_v12  ;;  %1304 = vmatpush.bf16.msrb.mxu1 %v2545_v16 }
 0x25a   :  { %1318 = vmatpush.bf16.msrb.mxu2 %v2597_v34  ;;  %1332 = vmatpush.bf16.msrb.mxu3 %v2547_v17 }
 0x25d   :  { %1291 = vmatpush.bf16.msrb.mxu0 %v2580_v28  ;;  %1305 = vmatpush.bf16.msrb.mxu1 %v2593_v32 }
 0x25e   :  { %1319 = vmatpush.bf16.msrb.mxu2 %v2621_v42  ;;  %1333 = vmatpush.bf16.msrb.mxu3 %v2595_v33 }
 0x261   :  { %1292 = vmatpush.bf16.msrb.mxu0 %v2619_v41  ;;  %1306 = vmatpush.bf16.msrb.mxu1 %v2631_v45 }
 0x262   :  { %1320 = vmatpush.bf16.msrb.mxu2 %v2657_v54  ;;  %1334 = vmatpush.bf16.msrb.mxu3 %v2633_v46 }
 0x265   :  { %1293 = vmatpush.bf16.msrb.mxu0 %v2655_v53  ;;  %1307 = vmatpush.bf16.msrb.mxu1 %v2667_v57 }
 0x266   :  { %1321 = vmatpush.bf16.msrb.mxu2 %v2693_v2  ;;  %1335 = vmatpush.bf16.msrb.mxu3 %v2669_v58 }
 0x269   :  { %1294 = vmatpush.bf16.msrb.mxu0 %v2691_v1  ;;  %1308 = vmatpush.bf16.msrb.mxu1 %v2703_v6 }
 0x26a   :  { %1322 = vmatpush.bf16.msrb.mxu2 %v2729_v20  ;;  %1336 = vmatpush.bf16.msrb.mxu3 %v2705_v9 }
 0x26d   :  { %1295 = vmatpush.bf16.msrb.mxu0 %v2727_v19  ;;  %1309 = vmatpush.bf16.msrb.mxu1 %v2739_v24 }
 0x26e   :  { %1323 = vmatpush.bf16.msrb.mxu2 %v2765_v37  ;;  %1337 = vmatpush.bf16.msrb.mxu3 %v2741_v25 }
 0x271   :  { %1296 = vmatpush.bf16.msrb.mxu0 %v2763_v36  ;;  %1310 = vmatpush.bf16.msrb.mxu1 %v2769_v38 }
 0x272   :  { %1324 = vmatpush.bf16.msrb.mxu2 %v2783_v44  ;;  %1338 = vmatpush.bf16.msrb.mxu3 %v2771_v39 }
 0x2d0   :  { %v870_v14 = vpop.f32.mrf.mxu0  ;;  %v884_v60 = vpop.f32.mrf.mxu1 }
 0x2d1   :  { %v925_v5 = vadd.f32 %v917_v50, %v870_v14  ;;  %v926_v26 = vadd.f32 %v918_v23, %v884_v60 }
 0x2d3   :  { %v2090_v61 = vmul.f32 -1.442695, %v925_v5  ;;  %v2092_v55 = vmul.f32 -1.442695, %v926_v26 }
 0x2d5   :  { %2322 = vpow2.f32 %v2090_v61 }
 0x2d6   :  { %2324 = vpow2.f32 %v2092_v55 }
 0x2d7   :  { %v912_v30 = vpop.f32.mrf.mxu3  ;;  %v898_v31 = vpop.f32.mrf.mxu2 }
 0x2d8   :  { %v928_v11 = vadd.f32 %v920_v62, %v912_v30  ;;  %v872_v10 = vpop.f32.mrf.mxu0  ;;  %v886_v4 = vpop.f32.mrf.mxu1  ;;  %v927_v5 = vadd.f32 %v919_v47, %v898_v31 }
 0x2d9   :  { %v929_v15 = vadd.f32 %v921_v0, %v872_v10  ;;  %v930_v40 = vadd.f32 %v922_v56, %v886_v4 }
 0x2da   :  { %v2094_v18 = vmul.f32 -1.442695, %v928_v11 }
 0x2db   :  { %v2323_v51 = vpop.eup %2322  ;;  %v2091_v22 = vmul.f32 -1.442695, %v929_v15  ;;  %v2093_v49 = vmul.f32 -1.442695, %v930_v40 }
 0x2dc   :  { %v2325_v27 = vpop.eup %2324  ;;  %v939_v59 = vadd.f32 1.0, %v2323_v51  ;;  %2326 = vpow2.f32 %v2094_v18 }
 0x2dd   :  { %v977_v48 = vadd.f32 1.0, %v2325_v27  ;;  %2328 = vpow2.f32 %v2091_v22 }
 0x2de   :  { %2330 = vrcp.f32 %v939_v59  ;;  %v950_v40 = vand.u32 2147483647, %v939_v59  ;;  %v952_v18 = vand.u32 2147483648, %v939_v59  ;;  %vm946_vm10 = vweird.f32 %v939_v59 }
 0x2df   :  { %2332 = vrcp.f32 %v977_v48  ;;  %v914_v50 = vpop.f32.mrf.mxu3  ;;  %v900_v4 = vpop.f32.mrf.mxu2  ;;  %v990_v51 = vand.u32 2147483648, %v977_v48  ;;  %vm984_vm11 = vweird.f32 %v977_v48 }
 0x2e0   :  { %2334 = vpow2.f32 %v2093_v49  ;;  %v932_v23 = vadd.f32 %v924_v63, %v914_v50  ;;  %v988_v49 = vand.u32 2147483647, %v977_v48  ;;  %v931_v31 = vadd.f32 %v923_v13, %v900_v4 }
 0x2e1   :  { %vm951_vm13 = vcmp.eq.f32.partialorder %v950_v40, 8.507059e+37  ;;  %v953_v50 = vor.u32 1.1754944e-38, %v952_v18 }
 0x2e2   :  { %v2327_v14 = vpop.eup %2326  ;;  %v2095_v55 = vmul.f32 -1.442695, %v932_v23  ;;  %vm989_vm15 = vcmp.eq.f32.partialorder %v988_v49, 8.507059e+37 }
 0x2e3   :  { %v2329_v60 = vpop.eup %2328  ;;  %v3117_v26 = vadd.f32 1.0, %v2327_v14 }
 0x2e4   :  { %v2331_v29 = vpop.eup %2330  ;;  %v3119_v61 = vadd.f32 1.0, %v2329_v60  ;;  %v991_v60 = vor.u32 1.1754944e-38, %v990_v51 }
 0x2e5   :  { %v2333_v62 = vpop.eup %2332  ;;  %v942_v0 = vmul.f32 %v2331_v29, %v939_v59  ;;  %2336 = vrcp.f32 %v3117_v26  ;;  %vm947_vm8 = vweird.f32 %v2331_v29 }
 0x2e6   :  { %v2335_v56 = vpop.eup %2334  ;;  %v980_v30 = vmul.f32 %v2333_v62, %v977_v48  ;;  %2338 = vrcp.f32 %v3119_v61  ;;  %vm985_vm9 = vweird.f32 %v2333_v62  ;;  %vm948_vm12 = vmor %vm946_vm10, %vm947_vm8  ;;  %v965_v4 = vand.u32 2147483647, %v3119_v61 }
 0x2e7   :  { %v943_v11 = vsub.f32 1.0, %v942_v0  ;;  %2340 = vtanh.f32 %v927_v5  ;;  %v3123_v10 = vadd.f32 1.0, %v2335_v56  ;;  %vm986_vm14 = vmor %vm984_vm11, %vm985_vm9  ;;  %v967_v51 = vand.u32 2147483648, %v3119_v61 }
 0x2e8   :  { %v981_v15 = vsub.f32 1.0, %v980_v30  ;;  %2342 = vpow2.f32 %v2095_v55  ;;  %vm961_vm1 = vweird.f32 %v3119_v61  ;;  %vm966_vm4 = vcmp.eq.f32.partialorder %v965_v4, 8.507059e+37 }
 0x2e9   :  { %v944_v22 = vmul.f32 %v2331_v29, %v943_v11  ;;  %2344 = vrcp.f32 %v3123_v10  ;;  %v1005_v49 = vand.u32 2147483648, %v3123_v10  ;;  %vm999_vm5 = vweird.f32 %v3123_v10 }
 0x2ea   :  { %v982_v27 = vmul.f32 %v2333_v62, %v981_v15  ;;  %2346 = vtanh.f32 %v931_v31  ;;  %vm1024_vm9 = vweird.f32 %v3117_v26 }
 0x2eb   :  { %v3126_v63 = vpop.eup %2336  ;;  %v945_v35 = vadd.f32 %v2331_v29, %v944_v22 }
 0x2ec   :  { %v2339_v47 = vpop.eup %2338  ;;  %v983_v23 = vadd.f32 %v2333_v62, %v982_v27  ;;  %v1020_v55 = vmul.f32 %v3126_v63, %v3117_v26  ;;  %vm1025_vm8 = vweird.f32 %v3126_v63 }
 0x2ed   :  { %v2341_v14 = vpop.eup %2340  ;;  %v949_v5 = vsel %vm948_vm12, %v2331_v29, %v945_v35  ;;  %v957_v0 = vmul.f32 %v2339_v47, %v3119_v61  ;;  %vm962_vm0 = vweird.f32 %v2339_v47  ;;  %v1003_v35 = vand.u32 2147483647, %v3123_v10  ;;  %vm1026_vm10 = vmor %vm1024_vm9, %vm1025_vm8 }
 0x2ee   :  { %v2343_v56 = vpop.eup %2342  ;;  %v954_v30 = vsel %vm951_vm13, %v953_v50, %v949_v5  ;;  %v987_v13 = vsel %vm986_vm14, %v2333_v62, %v983_v23  ;;  %v1021_v22 = vsub.f32 1.0, %v1020_v55  ;;  %vm963_vm3 = vmor %vm961_vm1, %vm962_vm0  ;;  %v1006_v61 = vor.u32 1.1754944e-38, %v1005_v49 }
 0x2ef   :  { %v2345_v59 = vpop.eup %2344  ;;  %v992_v48 = vsel %vm989_vm15, %v991_v60, %v987_v13  ;;  %v958_v11 = vsub.f32 1.0, %v957_v0  ;;  %v1018_v15 = vadd.f32 1.0, %v2343_v56  ;;  %v1051_v18 = vmul.f32 %v2341_v14, %v954_v30 }
 0x2f0   :  { %v1049_v40 = vmul.f32 %v992_v48, %v3055_v43  ;;  %v995_v29 = vmul.f32 %v2345_v59, %v3123_v10  ;;  %v2347_v50 = vpop.eup %2346  ;;  %vm1000_vm2 = vweird.f32 %v2345_v59  ;;  %v968_v14 = vor.u32 1.1754944e-38, %v967_v51 }
 0x2f1   :  { %v959_v27 = vmul.f32 %v2339_v47, %v958_v11  ;;  %2348 = vrcp.f32 %v1018_v15  ;;  %v1022_v60 = vmul.f32 %v3126_v63, %v1021_v22  ;;  %vm1001_vm6 = vmor %vm999_vm5, %vm1000_vm2  ;;  %vm1004_vm7 = vcmp.eq.f32.partialorder %v1003_v35, 8.507059e+37 }
 0x2f2   :  { %v996_v62 = vsub.f32 1.0, %v995_v29  ;;  %v3138_v23 = vadd.f32 %v1051_v18, %v1049_v40  ;;  %v1028_v18 = vand.u32 2147483647, %v3117_v26  ;;  %vm1039_vm12 = vweird.f32 %v1018_v15 }
 0x2f3   :  { %v960_v31 = vadd.f32 %v2339_v47, %v959_v27  ;;  %v1023_v40 = vadd.f32 %v3126_v63, %v1022_v60 }
 0x2f4   :  { %v997_v43 = vmul.f32 %v2345_v59, %v996_v62  ;;  %2350 = vtanh.f32 %v3138_v23  ;;  %v1045_v62 = vand.u32 2147483648, %v1018_v15  ;;  %vm1029_vm13 = vcmp.eq.f32.partialorder %v1028_v18, 8.507059e+37 }
 0x2f5   :  { %v964_v5 = vsel %vm963_vm3, %v2339_v47, %v960_v31  ;;  %v1030_v47 = vand.u32 2147483648, %v3117_v26  ;;  %v1027_v51 = vsel %vm1026_vm10, %v3126_v63, %v1023_v40 }
 0x2f6   :  { %v969_v55 = vsel %vm966_vm4, %v968_v14, %v964_v5  ;;  %v998_v0 = vadd.f32 %v2345_v59, %v997_v43 }
 0x2f7   :  { %v2349_v56 = vpop.eup %2348  ;;  %v1052_v13 = vmul.f32 %v2347_v50, %v969_v55  ;;  %v1031_v27 = vor.u32 1.1754944e-38, %v1030_v47  ;;  %v1046_v50 = vor.u32 1.1754944e-38, %v1045_v62 }
 0x2f8   :  { %v1002_v30 = vsel %vm1001_vm6, %v2345_v59, %v998_v0  ;;  %v1035_v48 = vmul.f32 %v2349_v56, %v1018_v15  ;;  %vm1040_vm11 = vweird.f32 %v2349_v56 }
 0x2f9   :  { %v1007_v11 = vsel %vm1004_vm7, %v1006_v61, %v1002_v30  ;;  %vm1041_vm14 = vmor %vm1039_vm12, %vm1040_vm11  ;;  %v1032_v31 = vsel %vm1029_vm13, %v1031_v27, %v1027_v51 }
 0x2fa   :  { %v1050_v10 = vmul.f32 %v1007_v11, %v3066_v52  ;;  %v1036_v4 = vsub.f32 1.0, %v1035_v48  ;;  %v2351_v22 = vpop.eup %2350  ;;  %v1043_v52 = vand.u32 2147483647, %v1018_v15  ;;  %v2098_v15 = vld [vmem:[%s3433_s0 + $0x80] sm:$0xff] }
 0x2fb   :  { %v1057_v26 = vmul.f32 %v2351_v22, %v1032_v31 }
 0x2fc   :  { %v3149_v29 = vadd.f32 %v1052_v13, %v1050_v10  ;;  %v1037_v59 = vmul.f32 %v2349_v56, %v1036_v4  ;;  %vm1044_vm15 = vcmp.eq.f32.partialorder %v1043_v52, 8.507059e+37  ;;  %v1132_v13 = vunpack.c.h.bf16 %v2098_v15  ;;  %v2099_v10 = vld [vmem:[%s3433_s0 + $0x88] sm:$0xff]  ;;  %v2100_v4 = vld [vmem:[%s3433_s0 + $0x90] sm:$0xff] }
 0x2fd   :  { %v1059_v5 = vpack.c.bf16 %v1057_v26, %v1057_v26  ;;  %v1134_v51 = vunpack.c.h.bf16 %v2099_v10  ;;  %v1135_v22 = vunpack.c.l.bf16 %v2100_v4  ;;  %v1136_v27 = vunpack.c.h.bf16 %v2100_v4 }
 0x2fe   :  { %2352 = vtanh.f32 %v3149_v29  ;;  %v1038_v49 = vadd.f32 %v2349_v56, %v1037_v59 }
 0x2ff   :  { %v1071_v0 = vunpack.c.l.b16 %v1059_v5 }
 0x300   :  { %v1042_v35 = vsel %vm1041_vm14, %v2349_v56, %v1038_v49  ;;  %v1131_v56 = vunpack.c.l.bf16 %v2098_v15  ;;  %v1133_v15 = vunpack.c.l.bf16 %v2099_v10 }
 0x301   :  { %v1047_v14 = vsel %vm1044_vm15, %v1046_v50, %v1042_v35 }
 0x304   :  { %v2353_v43 = vpop.eup %2352 }
 0x305   :  { %v1058_v60 = vmul.f32 %v2353_v43, %v1047_v14  ;;  %v2101_v43 = vld [vmem:[%s3433_s0 + $0x98] sm:$0xff] }
 0x306   :  { %v1137_v10 = vunpack.c.l.bf16 %v2101_v43 }
 0x307   :  { %v1060_v63 = vpack.c.bf16 %v1058_v60, %v1058_v60  ;;  %v2196_v55 = vpack.c.bf16 %v1058_v60, %v1057_v26 }
 0x309   :  { %2220 = vst [vmem:[%s3434_s2 + $0x18] sm:$0xff] %v2196_v55   ;;  %v1072_v61 = vunpack.c.l.b16 %v1060_v63 }
 0x30b   :  { %v1073_v30 = vpack.c.b16 %v1072_v61, %v1071_v0 }
 0x30d   :  { %1083 = vmatmul.bf16.vlgmr.msra.gmra.mxu0 %v1073_v30  ;;  %1097 = vmatmul.bf16.vlgmr.msra.gmra.mxu1 %v1073_v30 }
 0x30e   :  { %1111 = vmatmul.bf16.vlgmr.msra.gmra.mxu2 %v1073_v30  ;;  %1125 = vmatmul.bf16.vlgmr.msra.gmra.mxu3 %v1073_v30  ;;  %v1138_v30 = vunpack.c.h.bf16 %v2101_v43 }
 0x30f   :  { %1503 = vmatpush.bf16.msra.mxu0 %v2507_v3  ;;  %1517 = vmatpush.bf16.msra.mxu1 %v2518_v7 }
 0x310   :  { %1531 = vmatpush.bf16.msra.mxu2 %v2558_v21  ;;  %1545 = vmatpush.bf16.msra.mxu3 %v2520_v8 }
 0x313   :  { %1504 = vmatpush.bf16.msra.mxu0 %v2532_v12  ;;  %1518 = vmatpush.bf16.msra.mxu1 %v2545_v16 }
 0x314   :  { %1532 = vmatpush.bf16.msra.mxu2 %v2597_v34  ;;  %1546 = vmatpush.bf16.msra.mxu3 %v2547_v17 }
 0x317   :  { %1505 = vmatpush.bf16.msra.mxu0 %v2580_v28  ;;  %1519 = vmatpush.bf16.msra.mxu1 %v2593_v32 }
 0x318   :  { %1533 = vmatpush.bf16.msra.mxu2 %v2621_v42  ;;  %1547 = vmatpush.bf16.msra.mxu3 %v2595_v33 }
 0x31b   :  { %1506 = vmatpush.bf16.msra.mxu0 %v2619_v41  ;;  %1520 = vmatpush.bf16.msra.mxu1 %v2631_v45 }
 0x31c   :  { %1534 = vmatpush.bf16.msra.mxu2 %v2657_v54  ;;  %1548 = vmatpush.bf16.msra.mxu3 %v2633_v46 }
 0x31f   :  { %1507 = vmatpush.bf16.msra.mxu0 %v2655_v53  ;;  %1521 = vmatpush.bf16.msra.mxu1 %v2667_v57 }
 0x320   :  { %1535 = vmatpush.bf16.msra.mxu2 %v2693_v2  ;;  %1549 = vmatpush.bf16.msra.mxu3 %v2669_v58 }
 0x323   :  { %1508 = vmatpush.bf16.msra.mxu0 %v2691_v1  ;;  %1522 = vmatpush.bf16.msra.mxu1 %v2703_v6 }
 0x324   :  { %1536 = vmatpush.bf16.msra.mxu2 %v2729_v20  ;;  %1550 = vmatpush.bf16.msra.mxu3 %v2705_v9 }
 0x327   :  { %1509 = vmatpush.bf16.msra.mxu0 %v2727_v19  ;;  %1523 = vmatpush.bf16.msra.mxu1 %v2739_v24 }
 0x328   :  { %1537 = vmatpush.bf16.msra.mxu2 %v2765_v37  ;;  %1551 = vmatpush.bf16.msra.mxu3 %v2741_v25 }
 0x32b   :  { %1510 = vmatpush.bf16.msra.mxu0 %v2763_v36  ;;  %1524 = vmatpush.bf16.msra.mxu1 %v2769_v38 }
 0x32c   :  { %1538 = vmatpush.bf16.msra.mxu2 %v2783_v44  ;;  %1552 = vmatpush.bf16.msra.mxu3 %v2771_v39 }
 0x38a   :  { %v1084_v48 = vpop.f32.mrf.mxu0  ;;  %v1098_v11 = vpop.f32.mrf.mxu1 }
 0x38b   :  { %v1139_v40 = vadd.f32 %v1131_v56, %v1084_v48  ;;  %v1140_v47 = vadd.f32 %v1132_v13, %v1098_v11 }
 0x38d   :  { %v2102_v18 = vmul.f32 -1.442695, %v1139_v40  ;;  %v2104_v59 = vmul.f32 -1.442695, %v1140_v47 }
 0x38f   :  { %2354 = vpow2.f32 %v2102_v18 }
 0x390   :  { %2356 = vpow2.f32 %v2104_v59 }
 0x391   :  { %v1126_v62 = vpop.f32.mrf.mxu3  ;;  %v1112_v61 = vpop.f32.mrf.mxu2 }
 0x392   :  { %v1142_v49 = vadd.f32 %v1134_v51, %v1126_v62  ;;  %v1086_v52 = vpop.f32.mrf.mxu0  ;;  %v1100_v31 = vpop.f32.mrf.mxu1  ;;  %v1141_v40 = vadd.f32 %v1133_v15, %v1112_v61 }
 0x393   :  { %v1143_v35 = vadd.f32 %v1135_v22, %v1086_v52  ;;  %v1144_v26 = vadd.f32 %v1136_v27, %v1100_v31 }
 0x394   :  { %v2106_v50 = vmul.f32 -1.442695, %v1142_v49 }
 0x395   :  { %v2355_v14 = vpop.eup %2354  ;;  %v2103_v60 = vmul.f32 -1.442695, %v1143_v35  ;;  %v2105_v55 = vmul.f32 -1.442695, %v1144_v26 }
 0x396   :  { %v2357_v5 = vpop.eup %2356  ;;  %v1153_v63 = vadd.f32 1.0, %v2355_v14  ;;  %2358 = vpow2.f32 %v2106_v50 }
 0x397   :  { %v1191_v0 = vadd.f32 1.0, %v2357_v5  ;;  %2360 = vpow2.f32 %v2103_v60 }
 0x398   :  { %2362 = vrcp.f32 %v1153_v63  ;;  %v1164_v26 = vand.u32 2147483647, %v1153_v63  ;;  %v1166_v50 = vand.u32 2147483648, %v1153_v63  ;;  %vm1160_vm2 = vweird.f32 %v1153_v63 }
 0x399   :  { %2364 = vrcp.f32 %v1191_v0  ;;  %v1128_v56 = vpop.f32.mrf.mxu3  ;;  %v1114_v31 = vpop.f32.mrf.mxu2  ;;  %v1204_v14 = vand.u32 2147483648, %v1191_v0  ;;  %vm1198_vm3 = vweird.f32 %v1191_v0 }
 0x39a   :  { %2366 = vpow2.f32 %v2105_v55  ;;  %v1146_v13 = vadd.f32 %v1138_v30, %v1128_v56  ;;  %v1202_v55 = vand.u32 2147483647, %v1191_v0  ;;  %v1145_v61 = vadd.f32 %v1137_v10, %v1114_v31 }
 0x39b   :  { %vm1165_vm5 = vcmp.eq.f32.partialorder %v1164_v26, 8.507059e+37  ;;  %v1167_v56 = vor.u32 1.1754944e-38, %v1166_v50 }
 0x39c   :  { %v2359_v48 = vpop.eup %2358  ;;  %v2107_v59 = vmul.f32 -1.442695, %v1146_v13  ;;  %vm1203_vm7 = vcmp.eq.f32.partialorder %v1202_v55, 8.507059e+37 }
 0x39d   :  { %v2361_v11 = vpop.eup %2360  ;;  %v3200_v47 = vadd.f32 1.0, %v2359_v48 }
 0x39e   :  { %v2363_v4 = vpop.eup %2362  ;;  %v3202_v18 = vadd.f32 1.0, %v2361_v11  ;;  %v1205_v11 = vor.u32 1.1754944e-38, %v1204_v14 }
 0x39f   :  { %v2365_v51 = vpop.eup %2364  ;;  %v1156_v22 = vmul.f32 %v2363_v4, %v1153_v63  ;;  %2368 = vrcp.f32 %v3200_v47  ;;  %vm1161_vm0 = vweird.f32 %v2363_v4 }
 0x3a0   :  { %v2367_v27 = vpop.eup %2366  ;;  %v1194_v62 = vmul.f32 %v2365_v51, %v1191_v0  ;;  %2370 = vrcp.f32 %v3202_v18  ;;  %vm1199_vm1 = vweird.f32 %v2365_v51  ;;  %vm1162_vm4 = vmor %vm1160_vm2, %vm1161_vm0  ;;  %v1179_v31 = vand.u32 2147483647, %v3202_v18 }
 0x3a1   :  { %v1157_v49 = vsub.f32 1.0, %v1156_v22  ;;  %2372 = vtanh.f32 %v1141_v40  ;;  %v3206_v52 = vadd.f32 1.0, %v2367_v27  ;;  %vm1200_vm6 = vmor %vm1198_vm3, %vm1199_vm1  ;;  %v1181_v14 = vand.u32 2147483648, %v3202_v18 }
 0x3a2   :  { %v1195_v35 = vsub.f32 1.0, %v1194_v62  ;;  %2374 = vpow2.f32 %v2107_v59  ;;  %vm1175_vm9 = vweird.f32 %v3202_v18  ;;  %vm1180_vm12 = vcmp.eq.f32.partialorder %v1179_v31, 8.507059e+37 }
 0x3a3   :  { %v1158_v60 = vmul.f32 %v2363_v4, %v1157_v49  ;;  %2376 = vrcp.f32 %v3206_v52  ;;  %v1219_v55 = vand.u32 2147483648, %v3206_v52  ;;  %vm1213_vm13 = vweird.f32 %v3206_v52 }
 0x3a4   :  { %v1196_v5 = vmul.f32 %v2365_v51, %v1195_v35  ;;  %2378 = vtanh.f32 %v1145_v61  ;;  %vm1238_vm1 = vweird.f32 %v3200_v47 }
 0x3a5   :  { %v3209_v30 = vpop.eup %2368  ;;  %v1159_v43 = vadd.f32 %v2363_v4, %v1158_v60 }
 0x3a6   :  { %v2371_v15 = vpop.eup %2370  ;;  %v1197_v13 = vadd.f32 %v2365_v51, %v1196_v5  ;;  %v1234_v59 = vmul.f32 %v3209_v30, %v3200_v47  ;;  %vm1239_vm0 = vweird.f32 %v3209_v30 }
 0x3a7   :  { %v2373_v48 = vpop.eup %2372  ;;  %v1163_v40 = vsel %vm1162_vm4, %v2363_v4, %v1159_v43  ;;  %v1171_v22 = vmul.f32 %v2371_v15, %v3202_v18  ;;  %vm1176_vm8 = vweird.f32 %v2371_v15  ;;  %v1217_v43 = vand.u32 2147483647, %v3206_v52  ;;  %vm1240_vm2 = vmor %vm1238_vm1, %vm1239_vm0 }
 0x3a8   :  { %v2375_v27 = vpop.eup %2374  ;;  %v1168_v62 = vsel %vm1165_vm5, %v1167_v56, %v1163_v40  ;;  %v1201_v10 = vsel %vm1200_vm6, %v2365_v51, %v1197_v13  ;;  %v1235_v60 = vsub.f32 1.0, %v1234_v59  ;;  %vm1177_vm11 = vmor %vm1175_vm9, %vm1176_vm8  ;;  %v1220_v18 = vor.u32 1.1754944e-38, %v1219_v55 }
 0x3a9   :  { %v2377_v63 = vpop.eup %2376  ;;  %v1206_v0 = vsel %vm1203_vm7, %v1205_v11, %v1201_v10  ;;  %v1172_v49 = vsub.f32 1.0, %v1171_v22  ;;  %v1232_v35 = vadd.f32 1.0, %v2375_v27  ;;  %v1265_v50 = vmul.f32 %v2373_v48, %v1168_v62 }
 0x3aa   :  { %v1263_v26 = vmul.f32 %v1206_v0, %v3138_v23  ;;  %v1209_v4 = vmul.f32 %v2377_v63, %v3206_v52  ;;  %v2379_v56 = vpop.eup %2378  ;;  %vm1214_vm10 = vweird.f32 %v2377_v63  ;;  %v1182_v48 = vor.u32 1.1754944e-38, %v1181_v14 }
 0x3ab   :  { %v1173_v5 = vmul.f32 %v2371_v15, %v1172_v49  ;;  %2380 = vrcp.f32 %v1232_v35  ;;  %v1236_v11 = vmul.f32 %v3209_v30, %v1235_v60  ;;  %vm1215_vm14 = vmor %vm1213_vm13, %vm1214_vm10  ;;  %vm1218_vm15 = vcmp.eq.f32.partialorder %v1217_v43, 8.507059e+37 }
 0x3ac   :  { %v1210_v51 = vsub.f32 1.0, %v1209_v4  ;;  %v3221_v13 = vadd.f32 %v1265_v50, %v1263_v26  ;;  %v1242_v50 = vand.u32 2147483647, %v3200_v47  ;;  %vm1253_vm4 = vweird.f32 %v1232_v35 }
 0x3ad   :  { %v1174_v61 = vadd.f32 %v2371_v15, %v1173_v5  ;;  %v1237_v26 = vadd.f32 %v3209_v30, %v1236_v11 }
 0x3ae   :  { %v1211_v23 = vmul.f32 %v2377_v63, %v1210_v51  ;;  %2382 = vtanh.f32 %v3221_v13  ;;  %v1259_v51 = vand.u32 2147483648, %v1232_v35  ;;  %vm1243_vm5 = vcmp.eq.f32.partialorder %v1242_v50, 8.507059e+37 }
 0x3af   :  { %v1178_v40 = vsel %vm1177_vm11, %v2371_v15, %v1174_v61  ;;  %v1244_v15 = vand.u32 2147483648, %v3200_v47  ;;  %v1241_v14 = vsel %vm1240_vm2, %v3209_v30, %v1237_v26 }
 0x3b0   :  { %v1183_v59 = vsel %vm1180_vm12, %v1182_v48, %v1178_v40  ;;  %v1212_v22 = vadd.f32 %v2377_v63, %v1211_v23 }
 0x3b1   :  { %v2381_v27 = vpop.eup %2380  ;;  %v1266_v10 = vmul.f32 %v2379_v56, %v1183_v59  ;;  %v1245_v5 = vor.u32 1.1754944e-38, %v1244_v15  ;;  %v1260_v56 = vor.u32 1.1754944e-38, %v1259_v51 }
 0x3b2   :  { %v1216_v62 = vsel %vm1215_vm14, %v2377_v63, %v1212_v22  ;;  %v1249_v0 = vmul.f32 %v2381_v27, %v1232_v35  ;;  %vm1254_vm3 = vweird.f32 %v2381_v27 }
 0x3b3   :  { %v1221_v49 = vsel %vm1218_vm15, %v1220_v18, %v1216_v62  ;;  %vm1255_vm6 = vmor %vm1253_vm4, %vm1254_vm3  ;;  %v1246_v61 = vsel %vm1243_vm5, %v1245_v5, %v1241_v14 }
 0x3b4   :  { %v1264_v52 = vmul.f32 %v1221_v49, %v3149_v29  ;;  %v1250_v31 = vsub.f32 1.0, %v1249_v0  ;;  %v2383_v60 = vpop.eup %2382  ;;  %v1257_v29 = vand.u32 2147483647, %v1232_v35 }
 0x3b5   :  { %v1271_v47 = vmul.f32 %v2383_v60, %v1246_v61 }
 0x3b6   :  { %v3232_v4 = vadd.f32 %v1266_v10, %v1264_v52  ;;  %v1251_v63 = vmul.f32 %v2381_v27, %v1250_v31  ;;  %vm1258_vm7 = vcmp.eq.f32.partialorder %v1257_v29, 8.507059e+37 }
 0x3b7   :  { %v1273_v40 = vpack.c.bf16 %v1271_v47, %v1271_v47 }
 0x3b8   :  { %2384 = vtanh.f32 %v3232_v4  ;;  %v1252_v55 = vadd.f32 %v2381_v27, %v1251_v63 }
 0x3b9   :  { %v1285_v22 = vunpack.c.l.b16 %v1273_v40 }
 0x3ba   :  { %v1256_v43 = vsel %vm1255_vm6, %v2381_v27, %v1252_v55 }
 0x3bb   :  { %v1261_v48 = vsel %vm1258_vm7, %v1260_v56, %v1256_v43 }
 0x3be   :  { %v2385_v23 = vpop.eup %2384 }
 0x3bf   :  { %v1272_v11 = vmul.f32 %v2385_v23, %v1261_v48 }
 0x3c1   :  { %v1274_v30 = vpack.c.bf16 %v1272_v11, %v1272_v11  ;;  %v2201_v59 = vpack.c.bf16 %v1272_v11, %v1271_v47 }
 0x3c3   :  { %2221 = vst [vmem:[%s3434_s2 + $0x20] sm:$0xff] %v2201_v59   ;;  %v1286_v18 = vunpack.c.l.b16 %v1274_v30 }
 0x3c5   :  { %v1287_v62 = vpack.c.b16 %v1286_v18, %v1285_v22 }
 0x3c7   :  { %1297 = vmatmul.bf16.vlgmr.msrb.gmra.mxu0 %v1287_v62  ;;  %1311 = vmatmul.bf16.vlgmr.msrb.gmra.mxu1 %v1287_v62 }
 0x3c8   :  { %1325 = vmatmul.bf16.vlgmr.msrb.gmra.mxu2 %v1287_v62  ;;  %1339 = vmatmul.bf16.vlgmr.msrb.gmra.mxu3 %v1287_v62 }
 0x3c9   :  { %1717 = vmatpush.bf16.msrb.mxu0 %v2507_v3  ;;  %1731 = vmatpush.bf16.msrb.mxu1 %v2518_v7  ;;  %v2110_v3 = vld [vmem:[%s3433_s0 + $0xa0] sm:$0xff] }
 0x3ca   :  { %1745 = vmatpush.bf16.msrb.mxu2 %v2558_v21  ;;  %1759 = vmatpush.bf16.msrb.mxu3 %v2520_v8  ;;  %v1345_v7 = vunpack.c.l.bf16 %v2110_v3  ;;  %v1346_v8 = vunpack.c.h.bf16 %v2110_v3 }
 0x3cd   :  { %1718 = vmatpush.bf16.msrb.mxu0 %v2532_v12  ;;  %1732 = vmatpush.bf16.msrb.mxu1 %v2545_v16 }
 0x3ce   :  { %1746 = vmatpush.bf16.msrb.mxu2 %v2597_v34  ;;  %1760 = vmatpush.bf16.msrb.mxu3 %v2547_v17 }
 0x3d1   :  { %1719 = vmatpush.bf16.msrb.mxu0 %v2580_v28  ;;  %1733 = vmatpush.bf16.msrb.mxu1 %v2593_v32  ;;  %v2111_v28 = vld [vmem:[%s3433_s0 + $0xa8] sm:$0xff]  ;;  %v2112_v32 = vld [vmem:[%s3433_s0 + $0xb0] sm:$0xff] }
 0x3d2   :  { %1747 = vmatpush.bf16.msrb.mxu2 %v2621_v42  ;;  %1761 = vmatpush.bf16.msrb.mxu3 %v2595_v33  ;;  %v1349_v42 = vunpack.c.l.bf16 %v2112_v32 }
 0x3d5   :  { %1720 = vmatpush.bf16.msrb.mxu0 %v2619_v41  ;;  %1734 = vmatpush.bf16.msrb.mxu1 %v2631_v45  ;;  %v1348_v41 = vunpack.c.h.bf16 %v2111_v28  ;;  %v1350_v45 = vunpack.c.h.bf16 %v2112_v32 }
 0x3d6   :  { %1748 = vmatpush.bf16.msrb.mxu2 %v2657_v54  ;;  %1762 = vmatpush.bf16.msrb.mxu3 %v2633_v46 }
 0x3d9   :  { %1721 = vmatpush.bf16.msrb.mxu0 %v2655_v53  ;;  %1735 = vmatpush.bf16.msrb.mxu1 %v2667_v57 }
 0x3da   :  { %1749 = vmatpush.bf16.msrb.mxu2 %v2693_v2  ;;  %1763 = vmatpush.bf16.msrb.mxu3 %v2669_v58 }
 0x3dd   :  { %1722 = vmatpush.bf16.msrb.mxu0 %v2691_v1  ;;  %1736 = vmatpush.bf16.msrb.mxu1 %v2703_v6  ;;  %v2113_v6 = vld [vmem:[%s3433_s0 + $0xb8] sm:$0xff] }
 0x3de   :  { %1750 = vmatpush.bf16.msrb.mxu2 %v2729_v20  ;;  %1764 = vmatpush.bf16.msrb.mxu3 %v2705_v9  ;;  %v1351_v60 = vunpack.c.l.bf16 %v2113_v6 }
 0x3e1   :  { %1723 = vmatpush.bf16.msrb.mxu0 %v2727_v19  ;;  %1737 = vmatpush.bf16.msrb.mxu1 %v2739_v24 }
 0x3e2   :  { %1751 = vmatpush.bf16.msrb.mxu2 %v2765_v37  ;;  %1765 = vmatpush.bf16.msrb.mxu3 %v2741_v25 }
 0x3e5   :  { %1724 = vmatpush.bf16.msrb.mxu0 %v2763_v36  ;;  %1738 = vmatpush.bf16.msrb.mxu1 %v2769_v38  ;;  %v1352_v38 = vunpack.c.h.bf16 %v2113_v6 }
 0x3e6   :  { %1752 = vmatpush.bf16.msrb.mxu2 %v2783_v44  ;;  %1766 = vmatpush.bf16.msrb.mxu3 %v2771_v39  ;;  %v1347_v39 = vunpack.c.l.bf16 %v2111_v28 }
 0x444   :  { %v1298_v12 = vpop.f32.mrf.mxu0  ;;  %v1312_v16 = vpop.f32.mrf.mxu1 }
 0x445   :  { %v1353_v17 = vadd.f32 %v1345_v7, %v1298_v12  ;;  %v1354_v21 = vadd.f32 %v1346_v8, %v1312_v16 }
 0x447   :  { %v2114_v33 = vmul.f32 -1.442695, %v1353_v17  ;;  %v2116_v34 = vmul.f32 -1.442695, %v1354_v21 }
 0x449   :  { %2386 = vpow2.f32 %v2114_v33 }
 0x44a   :  { %2388 = vpow2.f32 %v2116_v34 }
 0x44b   :  { %v1340_v46 = vpop.f32.mrf.mxu3  ;;  %v1326_v37 = vpop.f32.mrf.mxu2 }
 0x44c   :  { %v1356_v53 = vadd.f32 %v1348_v41, %v1340_v46  ;;  %v1300_v54 = vpop.f32.mrf.mxu0  ;;  %v1314_v57 = vpop.f32.mrf.mxu1  ;;  %v1355_v0 = vadd.f32 %v1347_v39, %v1326_v37 }
 0x44d   :  { %v1357_v58 = vadd.f32 %v1349_v42, %v1300_v54  ;;  %v1358_v1 = vadd.f32 %v1350_v45, %v1314_v57 }
 0x44e   :  { %v2118_v2 = vmul.f32 -1.442695, %v1356_v53 }
 0x44f   :  { %v2387_v9 = vpop.eup %2386  ;;  %v2115_v19 = vmul.f32 -1.442695, %v1357_v58  ;;  %v2117_v25 = vmul.f32 -1.442695, %v1358_v1 }
 0x450   :  { %v2389_v20 = vpop.eup %2388  ;;  %v1367_v24 = vadd.f32 1.0, %v2387_v9  ;;  %2390 = vpow2.f32 %v2118_v2 }
 0x451   :  { %v1405_v36 = vadd.f32 1.0, %v2389_v20  ;;  %2392 = vpow2.f32 %v2115_v19 }
 0x452   :  { %2394 = vrcp.f32 %v1367_v24  ;;  %v1378_v61 = vand.u32 2147483647, %v1367_v24  ;;  %v1380_v43 = vand.u32 2147483648, %v1367_v24  ;;  %vm1374_vm10 = vweird.f32 %v1367_v24 }
 0x453   :  { %2396 = vrcp.f32 %v1405_v36  ;;  %v1342_v44 = vpop.f32.mrf.mxu3  ;;  %v1328_v55 = vpop.f32.mrf.mxu2  ;;  %v1418_v47 = vand.u32 2147483648, %v1405_v36  ;;  %v1416_v48 = vand.u32 2147483647, %v1405_v36  ;;  %vm1412_vm11 = vweird.f32 %v1405_v36 }
 0x454   :  { %2398 = vpow2.f32 %v2117_v25  ;;  %v1360_v35 = vadd.f32 %v1352_v38, %v1342_v44  ;;  %v1359_v11 = vadd.f32 %v1351_v60, %v1328_v55  ;;  %vm1379_vm13 = vcmp.eq.f32.partialorder %v1378_v61, 8.507059e+37 }
 0x455   :  { %v1381_v22 = vor.u32 1.1754944e-38, %v1380_v43  ;;  %v1419_v3 = vor.u32 1.1754944e-38, %v1418_v47  ;;  %vm1417_vm15 = vcmp.eq.f32.partialorder %v1416_v48, 8.507059e+37 }
 0x456   :  { %v2391_v27 = vpop.eup %2390  ;;  %v2119_v52 = vmul.f32 -1.442695, %v1360_v35 }
 0x457   :  { %v2393_v10 = vpop.eup %2392  ;;  %v3283_v49 = vadd.f32 1.0, %v2391_v27 }
 0x458   :  { %v2395_v26 = vpop.eup %2394  ;;  %v3285_v15 = vadd.f32 1.0, %v2393_v10 }
 0x459   :  { %v2397_v31 = vpop.eup %2396  ;;  %v1370_v50 = vmul.f32 %v2395_v26, %v1367_v24  ;;  %2400 = vrcp.f32 %v3283_v49  ;;  %vm1375_vm8 = vweird.f32 %v2395_v26 }
 0x45a   :  { %v2399_v63 = vpop.eup %2398  ;;  %v1408_v14 = vmul.f32 %v2397_v31, %v1405_v36  ;;  %2402 = vrcp.f32 %v3285_v15  ;;  %vm1413_vm9 = vweird.f32 %v2397_v31  ;;  %vm1376_vm12 = vmor %vm1374_vm10, %vm1375_vm8  ;;  %v1393_v34 = vand.u32 2147483647, %v3285_v15 }
 0x45b   :  { %v1371_v5 = vsub.f32 1.0, %v1370_v50  ;;  %2404 = vtanh.f32 %v1355_v0  ;;  %v3289_v51 = vadd.f32 1.0, %v2399_v63  ;;  %vm1414_vm14 = vmor %vm1412_vm11, %vm1413_vm9  ;;  %v1395_v53 = vand.u32 2147483648, %v3285_v15 }
 0x45c   :  { %v1409_v29 = vsub.f32 1.0, %v1408_v14  ;;  %2406 = vpow2.f32 %v2119_v52  ;;  %vm1389_vm1 = vweird.f32 %v3285_v15  ;;  %vm1394_vm4 = vcmp.eq.f32.partialorder %v1393_v34, 8.507059e+37 }
 0x45d   :  { %v1372_v56 = vmul.f32 %v2395_v26, %v1371_v5  ;;  %2408 = vrcp.f32 %v3289_v51  ;;  %v1433_v1 = vand.u32 2147483648, %v3289_v51  ;;  %v1431_v6 = vand.u32 2147483647, %v3289_v51 }
 0x45e   :  { %v1410_v23 = vmul.f32 %v2397_v31, %v1409_v29  ;;  %2410 = vtanh.f32 %v1359_v11  ;;  %v1396_v20 = vor.u32 1.1754944e-38, %v1395_v53  ;;  %vm1427_vm5 = vweird.f32 %v3289_v51 }
 0x45f   :  { %v3292_v40 = vpop.eup %2400  ;;  %v1373_v30 = vadd.f32 %v2395_v26, %v1372_v56  ;;  %v1434_v39 = vor.u32 1.1754944e-38, %v1433_v1  ;;  %vm1432_vm7 = vcmp.eq.f32.partialorder %v1431_v6, 8.507059e+37  ;;  %vm1452_vm9 = vweird.f32 %v3283_v49  ;;  %v2125_v1 = vld [vmem:[%s3433_s0 + $0xd8] sm:$0xff] }
 0x460   :  { %v2403_v59 = vpop.eup %2402  ;;  %v1411_v18 = vadd.f32 %v2397_v31, %v1410_v23  ;;  %v1448_v8 = vmul.f32 %v3292_v40, %v3283_v49  ;;  %vm1453_vm8 = vweird.f32 %v3292_v40 }
 0x461   :  { %v2405_v62 = vpop.eup %2404  ;;  %v1377_v7 = vsel %vm1376_vm12, %v2395_v26, %v1373_v30  ;;  %v1385_v12 = vmul.f32 %v2403_v59, %v3285_v15  ;;  %vm1390_vm0 = vweird.f32 %v2403_v59  ;;  %v1458_v26 = vand.u32 2147483648, %v3283_v49  ;;  %vm1454_vm10 = vmor %vm1452_vm9, %vm1453_vm8 }
 0x462   :  { %v2407_v16 = vpop.eup %2406  ;;  %v1382_v17 = vsel %vm1379_vm13, %v1381_v22, %v1377_v7  ;;  %v1415_v21 = vsel %vm1414_vm14, %v2397_v31, %v1411_v18  ;;  %v1449_v54 = vsub.f32 1.0, %v1448_v8  ;;  %vm1391_vm3 = vmor %vm1389_vm1, %vm1390_vm0  ;;  %v1456_v31 = vand.u32 2147483647, %v3283_v49  ;;  %v2122_v18 = vld [vmem:[%s3433_s0 + $0xc0] sm:$0xff] }
 0x463   :  { %v2409_v28 = vpop.eup %2408  ;;  %v1420_v32 = vsel %vm1417_vm15, %v1419_v3, %v1415_v21  ;;  %v1386_v33 = vsub.f32 1.0, %v1385_v12  ;;  %v1446_v41 = vadd.f32 1.0, %v2407_v16  ;;  %v1479_v45 = vmul.f32 %v2405_v62, %v1382_v17  ;;  %v2123_v17 = vld [vmem:[%s3433_s0 + $0xc8] sm:$0xff]  ;;  %v2124_v21 = vld [vmem:[%s3433_s0 + $0xd0] sm:$0xff] }
 0x464   :  { %v1477_v42 = vmul.f32 %v1420_v32, %v3221_v13  ;;  %v1423_v46 = vmul.f32 %v2409_v28, %v3289_v51  ;;  %v2411_v9 = vpop.eup %2410  ;;  %vm1428_vm2 = vweird.f32 %v2409_v28  ;;  %v1450_v24 = vmul.f32 %v3292_v40, %v1449_v54 }
 0x465   :  { %v1387_v57 = vmul.f32 %v2403_v59, %v1386_v33  ;;  %2412 = vrcp.f32 %v1446_v41  ;;  %vm1429_vm6 = vmor %vm1427_vm5, %vm1428_vm2  ;;  %v1459_v5 = vor.u32 1.1754944e-38, %v1458_v26  ;;  %v1473_v51 = vand.u32 2147483648, %v1446_v41 }
 0x466   :  { %v1424_v58 = vsub.f32 1.0, %v1423_v46  ;;  %v3304_v19 = vadd.f32 %v1479_v45, %v1477_v42  ;;  %v1451_v0 = vadd.f32 %v3292_v40, %v1450_v24  ;;  %vm1467_vm12 = vweird.f32 %v1446_v41 }
 0x467   :  { %v1388_v2 = vadd.f32 %v2403_v59, %v1387_v57  ;;  %vm1457_vm13 = vcmp.eq.f32.partialorder %v1456_v31, 8.507059e+37  ;;  %v1474_v43 = vor.u32 1.1754944e-38, %v1473_v51  ;;  %v1559_v62 = vunpack.c.l.bf16 %v2122_v18 }
 0x468   :  { %v1425_v13 = vmul.f32 %v2409_v28, %v1424_v58  ;;  %2414 = vtanh.f32 %v3304_v19  ;;  %v1455_v14 = vsel %vm1454_vm10, %v3292_v40, %v1451_v0  ;;  %v1560_v3 = vunpack.c.h.bf16 %v2122_v18 }
 0x469   :  { %v1392_v25 = vsel %vm1391_vm3, %v2403_v59, %v1388_v2  ;;  %v1460_v29 = vsel %vm1457_vm13, %v1459_v5, %v1455_v14  ;;  %v1562_v33 = vunpack.c.h.bf16 %v2123_v17  ;;  %v1563_v34 = vunpack.c.l.bf16 %v2124_v21 }
 0x46a   :  { %v1397_v36 = vsel %vm1394_vm4, %v1396_v20, %v1392_v25  ;;  %v1426_v37 = vadd.f32 %v2409_v28, %v1425_v13 }
 0x46b   :  { %v2413_v38 = vpop.eup %2412  ;;  %v1480_v35 = vmul.f32 %v2411_v9, %v1397_v36  ;;  %v1566_v36 = vunpack.c.h.bf16 %v2125_v1 }
 0x46c   :  { %v1430_v44 = vsel %vm1429_vm6, %v2409_v28, %v1426_v37  ;;  %v1463_v27 = vmul.f32 %v2413_v38, %v1446_v41  ;;  %vm1468_vm11 = vweird.f32 %v2413_v38  ;;  %v1561_v37 = vunpack.c.l.bf16 %v2123_v17 }
 0x46d   :  { %v1435_v10 = vsel %vm1432_vm7, %v1434_v39, %v1430_v44  ;;  %vm1469_vm14 = vmor %vm1467_vm12, %vm1468_vm11 }
 0x46e   :  { %v1478_v15 = vmul.f32 %v1435_v10, %v3232_v4  ;;  %v1464_v52 = vsub.f32 1.0, %v1463_v27  ;;  %v2415_v60 = vpop.eup %2414  ;;  %v1471_v4 = vand.u32 2147483647, %v1446_v41  ;;  %v1564_v41 = vunpack.c.h.bf16 %v2124_v21 }
 0x46f   :  { %v1485_v49 = vmul.f32 %v2415_v60, %v1460_v29  ;;  %v1565_v60 = vunpack.c.l.bf16 %v2125_v1 }
 0x470   :  { %v3315_v50 = vadd.f32 %v1480_v35, %v1478_v15  ;;  %v1465_v63 = vmul.f32 %v2413_v38, %v1464_v52  ;;  %vm1472_vm15 = vcmp.eq.f32.partialorder %v1471_v4, 8.507059e+37 }
 0x471   :  { %v1487_v48 = vpack.c.bf16 %v1485_v49, %v1485_v49 }
 0x472   :  { %2416 = vtanh.f32 %v3315_v50  ;;  %v1466_v55 = vadd.f32 %v2413_v38, %v1465_v63 }
 0x473   :  { %v1499_v30 = vunpack.c.l.b16 %v1487_v48 }
 0x474   :  { %v1470_v61 = vsel %vm1469_vm14, %v2413_v38, %v1466_v55 }
 0x475   :  { %v1475_v56 = vsel %vm1472_vm15, %v1474_v43, %v1470_v61 }
 0x478   :  { %v2417_v47 = vpop.eup %2416 }
 0x479   :  { %v1486_v23 = vmul.f32 %v2417_v47, %v1475_v56 }
 0x47b   :  { %v1488_v11 = vpack.c.bf16 %v1486_v23, %v1486_v23  ;;  %v2206_v40 = vpack.c.bf16 %v1486_v23, %v1485_v49 }
 0x47d   :  { %2222 = vst [vmem:[%s3434_s2 + $0x28] sm:$0xff] %v2206_v40   ;;  %v1500_v59 = vunpack.c.l.b16 %v1488_v11 }
 0x47f   :  { %v1501_v22 = vpack.c.b16 %v1500_v59, %v1499_v30 }
 0x481   :  { %1511 = vmatmul.bf16.vlgmr.msra.gmra.mxu0 %v1501_v22  ;;  %1525 = vmatmul.bf16.vlgmr.msra.gmra.mxu1 %v1501_v22 }
 0x482   :  { %1539 = vmatmul.bf16.vlgmr.msra.gmra.mxu2 %v1501_v22  ;;  %1553 = vmatmul.bf16.vlgmr.msra.gmra.mxu3 %v1501_v22 }
 0x4fe   :  { %v1512_v7 = vpop.f32.mrf.mxu0  ;;  %v1526_v8 = vpop.f32.mrf.mxu1 }
 0x4ff   :  { %v1567_v12 = vadd.f32 %v1559_v62, %v1512_v7  ;;  %v1568_v16 = vadd.f32 %v1560_v3, %v1526_v8 }
 0x501   :  { %v2126_v28 = vmul.f32 -1.442695, %v1567_v12  ;;  %v2128_v32 = vmul.f32 -1.442695, %v1568_v16 }
 0x503   :  { %2418 = vpow2.f32 %v2126_v28 }
 0x504   :  { %2420 = vpow2.f32 %v2128_v32 }
 0x505   :  { %v1554_v42 = vpop.f32.mrf.mxu3  ;;  %v1540_v25 = vpop.f32.mrf.mxu2 }
 0x506   :  { %v1570_v45 = vadd.f32 %v1562_v33, %v1554_v42  ;;  %v1514_v46 = vpop.f32.mrf.mxu0  ;;  %v1528_v53 = vpop.f32.mrf.mxu1  ;;  %v1569_v27 = vadd.f32 %v1561_v37, %v1540_v25 }
 0x507   :  { %v1571_v54 = vadd.f32 %v1563_v34, %v1514_v46  ;;  %v1572_v57 = vadd.f32 %v1564_v41, %v1528_v53 }
 0x508   :  { %v2130_v58 = vmul.f32 -1.442695, %v1570_v45 }
 0x509   :  { %v2419_v2 = vpop.eup %2418  ;;  %v2127_v6 = vmul.f32 -1.442695, %v1571_v54  ;;  %v2129_v20 = vmul.f32 -1.442695, %v1572_v57 }
 0x50a   :  { %v2421_v9 = vpop.eup %2420  ;;  %v1581_v13 = vadd.f32 1.0, %v2419_v2  ;;  %2422 = vpow2.f32 %v2130_v58 }
 0x50b   :  { %v1619_v24 = vadd.f32 1.0, %v2421_v9  ;;  %2424 = vpow2.f32 %v2127_v6 }
 0x50c   :  { %2426 = vrcp.f32 %v1581_v13  ;;  %v1592_v29 = vand.u32 2147483647, %v1581_v13  ;;  %v1594_v61 = vand.u32 2147483648, %v1581_v13  ;;  %vm1588_vm2 = vweird.f32 %v1581_v13 }
 0x50d   :  { %2428 = vrcp.f32 %v1619_v24  ;;  %v1556_v38 = vpop.f32.mrf.mxu3  ;;  %v1542_v55 = vpop.f32.mrf.mxu2  ;;  %v1632_v49 = vand.u32 2147483648, %v1619_v24  ;;  %v1630_v56 = vand.u32 2147483647, %v1619_v24  ;;  %vm1626_vm3 = vweird.f32 %v1619_v24 }
 0x50e   :  { %2430 = vpow2.f32 %v2129_v20  ;;  %v1574_v39 = vadd.f32 %v1566_v36, %v1556_v38  ;;  %v1573_v23 = vadd.f32 %v1565_v60, %v1542_v55  ;;  %vm1593_vm5 = vcmp.eq.f32.partialorder %v1592_v29, 8.507059e+37 }
 0x50f   :  { %v1595_v30 = vor.u32 1.1754944e-38, %v1594_v61  ;;  %v1633_v18 = vor.u32 1.1754944e-38, %v1632_v49  ;;  %vm1631_vm7 = vcmp.eq.f32.partialorder %v1630_v56, 8.507059e+37 }
 0x510   :  { %v2423_v44 = vpop.eup %2422  ;;  %v2131_v15 = vmul.f32 -1.442695, %v1574_v39 }
 0x511   :  { %v2425_v35 = vpop.eup %2424  ;;  %v3334_v10 = vadd.f32 1.0, %v2423_v44 }
 0x512   :  { %v2427_v0 = vpop.eup %2426  ;;  %v3336_v26 = vadd.f32 1.0, %v2425_v35 }
 0x513   :  { %v2429_v52 = vpop.eup %2428  ;;  %v1584_v31 = vmul.f32 %v2427_v0, %v1581_v13  ;;  %2432 = vrcp.f32 %v3334_v10  ;;  %vm1589_vm0 = vweird.f32 %v2427_v0 }
 0x514   :  { %v2431_v63 = vpop.eup %2430  ;;  %v1622_v14 = vmul.f32 %v2429_v52, %v1619_v24  ;;  %2434 = vrcp.f32 %v3336_v26  ;;  %vm1627_vm1 = vweird.f32 %v2429_v52  ;;  %vm1590_vm4 = vmor %vm1588_vm2, %vm1589_vm0  ;;  %v1607_v32 = vand.u32 2147483647, %v3336_v26 }
 0x515   :  { %v1585_v5 = vsub.f32 1.0, %v1584_v31  ;;  %2436 = vtanh.f32 %v1569_v27  ;;  %v3340_v51 = vadd.f32 1.0, %v2431_v63  ;;  %vm1628_vm6 = vmor %vm1626_vm3, %vm1627_vm1  ;;  %v1609_v45 = vand.u32 2147483648, %v3336_v26 }
 0x516   :  { %v1623_v4 = vsub.f32 1.0, %v1622_v14  ;;  %2438 = vpow2.f32 %v2131_v15  ;;  %vm1603_vm9 = vweird.f32 %v3336_v26  ;;  %vm1608_vm12 = vcmp.eq.f32.partialorder %v1607_v32, 8.507059e+37 }
 0x517   :  { %v1586_v43 = vmul.f32 %v2427_v0, %v1585_v5  ;;  %2440 = vrcp.f32 %v3340_v51  ;;  %v1647_v57 = vand.u32 2147483648, %v3340_v51  ;;  %v1645_v1 = vand.u32 2147483647, %v3340_v51 }
 0x518   :  { %v1624_v47 = vmul.f32 %v2429_v52, %v1623_v4  ;;  %2442 = vtanh.f32 %v1573_v23  ;;  %v1610_v9 = vor.u32 1.1754944e-38, %v1609_v45  ;;  %vm1641_vm13 = vweird.f32 %v3340_v51 }
 0x519   :  { %v3343_v48 = vpop.eup %2432  ;;  %v1587_v11 = vadd.f32 %v2427_v0, %v1586_v43  ;;  %v1648_v37 = vor.u32 1.1754944e-38, %v1647_v57  ;;  %vm1646_vm15 = vcmp.eq.f32.partialorder %v1645_v1, 8.507059e+37  ;;  %vm1666_vm1 = vweird.f32 %v3334_v10 }
 0x51a   :  { %v2435_v40 = vpop.eup %2434  ;;  %v1625_v59 = vadd.f32 %v2429_v52, %v1624_v47  ;;  %v1662_v3 = vmul.f32 %v3343_v48, %v3334_v10  ;;  %vm1667_vm0 = vweird.f32 %v3343_v48 }
 0x51b   :  { %v2437_v22 = vpop.eup %2436  ;;  %v1591_v62 = vsel %vm1590_vm4, %v2427_v0, %v1587_v11  ;;  %v1599_v7 = vmul.f32 %v2435_v40, %v3336_v26  ;;  %vm1604_vm8 = vweird.f32 %v2435_v40  ;;  %v1672_v0 = vand.u32 2147483648, %v3334_v10  ;;  %vm1668_vm2 = vmor %vm1666_vm1, %vm1667_vm0 }
 0x51c   :  { %v2439_v8 = vpop.eup %2438  ;;  %v1596_v12 = vsel %vm1593_vm5, %v1595_v30, %v1591_v62  ;;  %v1629_v16 = vsel %vm1628_vm6, %v2429_v52, %v1625_v59  ;;  %v1663_v46 = vsub.f32 1.0, %v1662_v3  ;;  %vm1605_vm11 = vmor %vm1603_vm9, %vm1604_vm8  ;;  %v1670_v52 = vand.u32 2147483647, %v3334_v10  ;;  %v2134_v59 = vld [vmem:[%s3433_s0 + $0xe0] sm:$0xff] }
 0x51d   :  { %v2441_v17 = vpop.eup %2440  ;;  %v1634_v21 = vsel %vm1631_vm7, %v1633_v18, %v1629_v16  ;;  %v1600_v28 = vsub.f32 1.0, %v1599_v7  ;;  %v1660_v33 = vadd.f32 1.0, %v2439_v8  ;;  %v1693_v41 = vmul.f32 %v2437_v22, %v1596_v12  ;;  %v2135_v12 = vld [vmem:[%s3433_s0 + $0xe8] sm:$0xff]  ;;  %v2136_v16 = vld [vmem:[%s3433_s0 + $0xf0] sm:$0xff] }
 0x51e   :  { %v1691_v34 = vmul.f32 %v1634_v21, %v3304_v19  ;;  %v1637_v42 = vmul.f32 %v2441_v17, %v3340_v51  ;;  %v2443_v2 = vpop.eup %2442  ;;  %vm1642_vm10 = vweird.f32 %v2441_v17  ;;  %v1664_v13 = vmul.f32 %v3343_v48, %v1663_v46 }
 0x51f   :  { %v1601_v53 = vmul.f32 %v2435_v40, %v1600_v28  ;;  %2444 = vrcp.f32 %v1660_v33  ;;  %vm1643_vm14 = vmor %vm1641_vm13, %vm1642_vm10  ;;  %v1673_v5 = vor.u32 1.1754944e-38, %v1672_v0  ;;  %v1687_v51 = vand.u32 2147483648, %v1660_v33 }
 0x520   :  { %v1638_v54 = vsub.f32 1.0, %v1637_v42  ;;  %v3355_v6 = vadd.f32 %v1693_v41, %v1691_v34  ;;  %v1665_v27 = vadd.f32 %v3343_v48, %v1664_v13  ;;  %vm1681_vm4 = vweird.f32 %v1660_v33 }
 0x521   :  { %v1602_v58 = vadd.f32 %v2435_v40, %v1601_v53  ;;  %vm1671_vm5 = vcmp.eq.f32.partialorder %v1670_v52, 8.507059e+37  ;;  %v1688_v61 = vor.u32 1.1754944e-38, %v1687_v51  ;;  %v1773_v22 = vunpack.c.l.bf16 %v2134_v59 }
 0x522   :  { %v1639_v19 = vmul.f32 %v2441_v17, %v1638_v54  ;;  %2446 = vtanh.f32 %v3355_v6  ;;  %v1669_v14 = vsel %vm1668_vm2, %v3343_v48, %v1665_v27  ;;  %v1774_v18 = vunpack.c.h.bf16 %v2134_v59 }
 0x523   :  { %v1606_v20 = vsel %vm1605_vm11, %v2435_v40, %v1602_v58  ;;  %v1674_v4 = vsel %vm1671_vm5, %v1673_v5, %v1669_v14  ;;  %v1776_v28 = vunpack.c.h.bf16 %v2135_v12  ;;  %v1777_v32 = vunpack.c.l.bf16 %v2136_v16 }
 0x524   :  { %v1611_v24 = vsel %vm1608_vm12, %v1610_v9, %v1606_v20  ;;  %v1640_v25 = vadd.f32 %v2441_v17, %v1639_v19  ;;  %v2137_v9 = vld [vmem:[%s3433_s0 + $0xf8] sm:$0xff] }
 0x525   :  { %v2445_v36 = vpop.eup %2444  ;;  %v1694_v39 = vmul.f32 %v2443_v2, %v1611_v24  ;;  %v1780_v24 = vunpack.c.h.bf16 %v2137_v9  ;;  %v1779_v51 = vunpack.c.l.bf16 %v2137_v9 }
 0x526   :  { %v1644_v38 = vsel %vm1643_vm14, %v2441_v17, %v1640_v25  ;;  %v1677_v44 = vmul.f32 %v2445_v36, %v1660_v33  ;;  %vm1682_vm3 = vweird.f32 %v2445_v36 }
 0x527   :  { %v1649_v35 = vsel %vm1646_vm15, %v1648_v37, %v1644_v38  ;;  %vm1683_vm6 = vmor %vm1681_vm4, %vm1682_vm3 }
 0x528   :  { %v1692_v26 = vmul.f32 %v1649_v35, %v3315_v50  ;;  %v1678_v15 = vsub.f32 1.0, %v1677_v44  ;;  %v2447_v60 = vpop.eup %2446  ;;  %v1685_v50 = vand.u32 2147483647, %v1660_v33  ;;  %v1778_v33 = vunpack.c.h.bf16 %v2136_v16 }
 0x529   :  { %v1699_v10 = vmul.f32 %v2447_v60, %v1674_v4 }
 0x52a   :  { %v3366_v31 = vadd.f32 %v1694_v39, %v1692_v26  ;;  %v1679_v63 = vmul.f32 %v2445_v36, %v1678_v15  ;;  %vm1686_vm7 = vcmp.eq.f32.partialorder %v1685_v50, 8.507059e+37  ;;  %v1775_v26 = vunpack.c.l.bf16 %v2135_v12 }
 0x52b   :  { %v1701_v56 = vpack.c.bf16 %v1699_v10, %v1699_v10 }
 0x52c   :  { %2448 = vtanh.f32 %v3366_v31  ;;  %v1680_v55 = vadd.f32 %v2445_v36, %v1679_v63 }
 0x52d   :  { %v1713_v11 = vunpack.c.l.b16 %v1701_v56 }
 0x52e   :  { %v1684_v29 = vsel %vm1683_vm6, %v2445_v36, %v1680_v55 }
 0x52f   :  { %v1689_v43 = vsel %vm1686_vm7, %v1688_v61, %v1684_v29 }
 0x532   :  { %v2449_v49 = vpop.eup %2448 }
 0x533   :  { %v1700_v47 = vmul.f32 %v2449_v49, %v1689_v43 }
 0x535   :  { %v1702_v23 = vpack.c.bf16 %v1700_v47, %v1700_v47  ;;  %v2211_v48 = vpack.c.bf16 %v1700_v47, %v1699_v10 }
 0x537   :  { %2223 = vst [vmem:[%s3434_s2 + $0x30] sm:$0xff] %v2211_v48   ;;  %v1714_v40 = vunpack.c.l.b16 %v1702_v23 }
 0x539   :  { %v1715_v30 = vpack.c.b16 %v1714_v40, %v1713_v11 }
 0x53b   :  { %1725 = vmatmul.bf16.vlgmr.msrb.gmra.mxu0 %v1715_v30  ;;  %1739 = vmatmul.bf16.vlgmr.msrb.gmra.mxu1 %v1715_v30 }
 0x53c   :  { %1753 = vmatmul.bf16.vlgmr.msrb.gmra.mxu2 %v1715_v30  ;;  %1767 = vmatmul.bf16.vlgmr.msrb.gmra.mxu3 %v1715_v30 }
 0x5b8   :  { %v1726_v62 = vpop.f32.mrf.mxu0  ;;  %v1740_v3 = vpop.f32.mrf.mxu1 }
 0x5b9   :  { %v1781_v7 = vadd.f32 %v1773_v22, %v1726_v62  ;;  %v1782_v8 = vadd.f32 %v1774_v18, %v1740_v3 }
 0x5bb   :  { %v2138_v17 = vmul.f32 -1.442695, %v1781_v7  ;;  %v2140_v21 = vmul.f32 -1.442695, %v1782_v8 }
 0x5bd   :  { %2450 = vpow2.f32 %v2138_v17 }
 0x5be   :  { %2452 = vpow2.f32 %v2140_v21 }
 0x5bf   :  { %v1768_v34 = vpop.f32.mrf.mxu3  ;;  %v1754_v20 = vpop.f32.mrf.mxu2 }
 0x5c0   :  { %v1784_v41 = vadd.f32 %v1776_v28, %v1768_v34  ;;  %v1728_v42 = vpop.f32.mrf.mxu0  ;;  %v1742_v45 = vpop.f32.mrf.mxu1  ;;  %v1783_v55 = vadd.f32 %v1775_v26, %v1754_v20 }
 0x5c1   :  { %v1785_v46 = vadd.f32 %v1777_v32, %v1728_v42  ;;  %v1786_v53 = vadd.f32 %v1778_v33, %v1742_v45 }
 0x5c2   :  { %v2142_v54 = vmul.f32 -1.442695, %v1784_v41 }
 0x5c3   :  { %v2451_v57 = vpop.eup %2450  ;;  %v2139_v58 = vmul.f32 -1.442695, %v1785_v46  ;;  %v2141_v19 = vmul.f32 -1.442695, %v1786_v53 }
 0x5c4   :  { %v2453_v1 = vpop.eup %2452  ;;  %v1795_v2 = vadd.f32 1.0, %v2451_v57  ;;  %2454 = vpow2.f32 %v2142_v54 }
 0x5c5   :  { %v1833_v13 = vadd.f32 1.0, %v2453_v1  ;;  %2456 = vpow2.f32 %v2139_v58 }
 0x5c6   :  { %2458 = vrcp.f32 %v1795_v2  ;;  %v1806_v10 = vand.u32 2147483647, %v1795_v2  ;;  %v1808_v61 = vand.u32 2147483648, %v1795_v2  ;;  %vm1802_vm10 = vweird.f32 %v1795_v2 }
 0x5c7   :  { %2460 = vrcp.f32 %v1833_v13  ;;  %v1770_v25 = vpop.f32.mrf.mxu3  ;;  %v1756_v4 = vpop.f32.mrf.mxu2  ;;  %v1846_v49 = vand.u32 2147483648, %v1833_v13  ;;  %v1844_v56 = vand.u32 2147483647, %v1833_v13  ;;  %vm1840_vm11 = vweird.f32 %v1833_v13 }
 0x5c8   :  { %2462 = vpow2.f32 %v2141_v19  ;;  %v1788_v38 = vadd.f32 %v1780_v24, %v1770_v25  ;;  %v1787_v23 = vadd.f32 %v1779_v51, %v1756_v4  ;;  %vm1807_vm14 = vcmp.eq.f32.partialorder %v1806_v10, 8.507059e+37 }
 0x5c9   :  { %v1847_v62 = vor.u32 1.1754944e-38, %v1846_v49  ;;  %v1809_v3 = vor.u32 1.1754944e-38, %v1808_v61  ;;  %vm1845_vm15 = vcmp.eq.f32.partialorder %v1844_v56, 8.507059e+37 }
 0x5ca   :  { %v2455_v36 = vpop.eup %2454  ;;  %v2143_v60 = vmul.f32 -1.442695, %v1788_v38 }
 0x5cb   :  { %v2457_v37 = vpop.eup %2456  ;;  %v3385_v44 = vadd.f32 1.0, %v2455_v36 }
 0x5cc   :  { %v2459_v39 = vpop.eup %2458  ;;  %v3387_v35 = vadd.f32 1.0, %v2457_v37 }
 0x5cd   :  { %v2461_v27 = vpop.eup %2460  ;;  %v1798_v0 = vmul.f32 %v2459_v39, %v1795_v2  ;;  %vm1803_vm8 = vweird.f32 %v2459_v39 }
 0x5ce   :  { %v2463_v15 = vpop.eup %2462  ;;  %v1836_v52 = vmul.f32 %v2461_v27, %v1833_v13  ;;  %2464 = vrcp.f32 %v3387_v35  ;;  %vm1841_vm9 = vweird.f32 %v2461_v27  ;;  %vm3394_vm12 = vmor %vm1802_vm10, %vm1803_vm8  ;;  %v1821_v28 = vand.u32 2147483647, %v3387_v35 }
 0x5cf   :  { %v1799_v63 = vsub.f32 1.0, %v1798_v0  ;;  %v3390_v14 = vadd.f32 1.0, %v2463_v15  ;;  %2466 = vrcp.f32 %v3385_v44  ;;  %vm3400_vm13 = vmor %vm1840_vm11, %vm1841_vm9  ;;  %v1823_v32 = vand.u32 2147483648, %v3387_v35 }
 0x5d0   :  { %v1837_v5 = vsub.f32 1.0, %v1836_v52  ;;  %vm1817_vm2 = vweird.f32 %v3387_v35  ;;  %vm1822_vm5 = vcmp.eq.f32.partialorder %v1821_v28, 8.507059e+37  ;;  %vm1880_vm9 = vweird.f32 %v3385_v44 }
 0x5d1   :  { %v1800_v50 = vmul.f32 %v2459_v39, %v1799_v63  ;;  %2468 = vrcp.f32 %v3390_v14  ;;  %vm1855_vm1 = vweird.f32 %v3390_v14  ;;  %v1861_v42 = vand.u32 2147483648, %v3390_v14 }
 0x5d2   :  { %v1838_v29 = vmul.f32 %v2461_v27, %v1837_v5  ;;  %2470 = vpow2.f32 %v2143_v60  ;;  %v1859_v57 = vand.u32 2147483647, %v3390_v14  ;;  %v1824_v2 = vor.u32 1.1754944e-38, %v1823_v32 }
 0x5d3   :  { %v1801_v43 = vadd.f32 %v2459_v39, %v1800_v50  ;;  %2472 = vtanh.f32 %v1783_v55  ;;  %v1862_v24 = vor.u32 1.1754944e-38, %v1861_v42  ;;  %v1886_v63 = vand.u32 2147483648, %v3385_v44 }
 0x5d4   :  { %v1839_v47 = vadd.f32 %v2461_v27, %v1838_v29  ;;  %v2465_v48 = vpop.eup %2464  ;;  %2474 = vtanh.f32 %v1787_v23  ;;  %vm1860_vm7 = vcmp.eq.f32.partialorder %v1859_v57, 8.507059e+37  ;;  %v1884_v60 = vand.u32 2147483647, %v3385_v44 }
 0x5d5   :  { %v3398_v40 = vpop.eup %2466  ;;  %v1805_v59 = vsel %vm3394_vm12, %v2459_v39, %v1801_v43  ;;  %v1813_v22 = vmul.f32 %v2465_v48, %v3387_v35  ;;  %vm1818_vm0 = vweird.f32 %v2465_v48  ;;  %v1887_v4 = vor.u32 1.1754944e-38, %v1886_v63 }
 0x5d6   :  { %v1843_v7 = vsel %vm3400_vm13, %v2461_v27, %v1839_v47  ;;  %v1810_v17 = vsel %vm1807_vm14, %v1809_v3, %v1805_v59  ;;  %v1876_v21 = vmul.f32 %v3398_v40, %v3385_v44  ;;  %vm1819_vm4 = vmor %vm1817_vm2, %vm1818_vm0  ;;  %vm1881_vm8 = vweird.f32 %v3398_v40 }
 0x5d7   :  { %v2469_v18 = vpop.eup %2468  ;;  %v1814_v8 = vsub.f32 1.0, %v1813_v22  ;;  %v1848_v33 = vsel %vm1845_vm15, %v1847_v62, %v1843_v7  ;;  %vm1882_vm11 = vmor %vm1880_vm9, %vm1881_vm8  ;;  %vm1885_vm14 = vcmp.eq.f32.partialorder %v1884_v60, 8.507059e+37 }
 0x5d8   :  { %v1851_v12 = vmul.f32 %v2469_v18, %v3390_v14  ;;  %v2471_v16 = vpop.eup %2470  ;;  %vm1856_vm3 = vweird.f32 %v2469_v18  ;;  %v1905_v58 = vmul.f32 %v1848_v33, %v3355_v6  ;;  %v1877_v9 = vsub.f32 1.0, %v1876_v21 }
 0x5d9   :  { %v1815_v41 = vmul.f32 %v2465_v48, %v1814_v8  ;;  %v1874_v45 = vadd.f32 1.0, %v2471_v16  ;;  %v2473_v46 = vpop.eup %2472  ;;  %vm1857_vm6 = vmor %vm1855_vm1, %vm1856_vm3 }
 0x5da   :  { %v1852_v34 = vsub.f32 1.0, %v1851_v12  ;;  %v1907_v1 = vmul.f32 %v2473_v46, %v1810_v17  ;;  %v2475_v19 = vpop.eup %2474  ;;  %v1878_v6 = vmul.f32 %v3398_v40, %v1877_v9 }
 0x5db   :  { %v1816_v54 = vadd.f32 %v2465_v48, %v1815_v41  ;;  %2476 = vrcp.f32 %v1874_v45  ;;  %v1901_v14 = vand.u32 2147483648, %v1874_v45  ;;  %vm1895_vm12 = vweird.f32 %v1874_v45 }
 0x5dc   :  { %v1853_v53 = vmul.f32 %v2469_v18, %v1852_v34  ;;  %v1909_v38 = vadd.f32 %v1907_v1, %v1905_v58  ;;  %v1879_v15 = vadd.f32 %v3398_v40, %v1878_v6 }
 0x5dd   :  { %v1820_v13 = vsel %vm1819_vm4, %v2465_v48, %v1816_v54  ;;  %v1902_v29 = vor.u32 1.1754944e-38, %v1901_v14 }
 0x5de   :  { %v1854_v20 = vadd.f32 %v2469_v18, %v1853_v53  ;;  %v1825_v25 = vsel %vm1822_vm5, %v1824_v2, %v1820_v13  ;;  %2478 = vtanh.f32 %v1909_v38  ;;  %v1883_v51 = vsel %vm1882_vm11, %v3398_v40, %v1879_v15 }
 0x5df   :  { %v1908_v37 = vmul.f32 %v2475_v19, %v1825_v25  ;;  %v1888_v49 = vsel %vm1885_vm14, %v1887_v4, %v1883_v51 }
 0x5e0   :  { %v1858_v36 = vsel %vm1857_vm6, %v2469_v18, %v1854_v20 }
 0x5e1   :  { %v1863_v39 = vsel %vm1860_vm7, %v1862_v24, %v1858_v36  ;;  %v2477_v27 = vpop.eup %2476 }
 0x5e2   :  { %v1906_v35 = vmul.f32 %v1863_v39, %v3366_v31  ;;  %v1891_v26 = vmul.f32 %v2477_v27, %v1874_v45  ;;  %vm1896_vm10 = vweird.f32 %v2477_v27  ;;  %v1899_v31 = vand.u32 2147483647, %v1874_v45 }
 0x5e3   :  { %vm1897_vm13 = vmor %vm1895_vm12, %vm1896_vm10 }
 0x5e4   :  { %v1910_v0 = vadd.f32 %v1908_v37, %v1906_v35  ;;  %v1892_v52 = vsub.f32 1.0, %v1891_v26  ;;  %v2479_v50 = vpop.eup %2478  ;;  %vm1900_vm15 = vcmp.eq.f32.partialorder %v1899_v31, 8.507059e+37 }
 0x5e5   :  { %v1913_v47 = vmul.f32 %v2479_v50, %v1888_v49 }
 0x5e6   :  { %2480 = vtanh.f32 %v1910_v0  ;;  %v1893_v5 = vmul.f32 %v2477_v27, %v1892_v52 }
 0x5e8   :  { %v1894_v55 = vadd.f32 %v2477_v27, %v1893_v5 }
 0x5ea   :  { %v1898_v61 = vsel %vm1897_vm13, %v2477_v27, %v1894_v55 }
 0x5eb   :  { %v1903_v43 = vsel %vm1900_vm15, %v1902_v29, %v1898_v61 }
 0x5ec   :  { %v2481_v10 = vpop.eup %2480 }
 0x5ed   :  { %v1914_v44 = vmul.f32 %v2481_v10, %v1903_v43 }
 0x5ef   :  { %v2216_v56 = vpack.c.bf16 %v1914_v44, %v1913_v47 }
 0x5f1   :  { %2224 = vst [vmem:[%s3434_s2 + $0x38] sm:$0xff] %v2216_v56  }

// kernel: rnn_forward.9
= control target key start
LH: loop header
LB: loop body
LE: loop exit
PB: predicated region body
PF: predicated region fallthrough
CT: control target
= control target key end

     0   :  { %s275_s0 = inlined_call_operand.vmem [shape: bf16[16,128], index: 0, kind: input, shape index: {}]   ;;  %s276_s1 = inlined_call_operand.vmem [shape: bf16[128,128], index: 1, kind: input, shape index: {}]   ;;  %s277_s2 = inlined_call_operand.vmem [shape: f32[1,128], index: 2, kind: input, shape index: {}]   ;;  %s278_s3 = inlined_call_operand.hbm [shape: f32[16,128], index: 3, kind: output, shape index: {}]  }
   0x1   :  { %v188_v0 = vld [vmem:[%s276_s1 + $0x38] sm:$0xff]  ;;  %v187_v1 = vld [vmem:[%s276_s1 + $0x30] sm:$0xff] }
   0x2   :  { %95 = vmatpush.bf16.msra.mxu0 %v188_v0 }
   0x3   :  { %8 = vsyncpa [#allocation4], 0  ;;  %v186_v2 = vld [vmem:[%s276_s1 + $0x28] sm:$0xff]  ;;  %v185_v3 = vld [vmem:[%s276_s1 + $0x20] sm:$0xff]  ;;  %s219_s5 = smov [#allocation3]   ;;  %s132_s9 = sshll.u32 %s278_s3, 4  ;;  %s133_s9 = int_to_ptr.hbm [resolvable:$true] %s132_s9 }
   0x4   :  { %v184_v4 = vld [vmem:[%s276_s1 + $0x18] sm:$0xff]  ;;  %v183_v5 = vld [vmem:[%s276_s1 + $0x10] sm:$0xff]  ;;  %v182_v6 = vld [vmem:[%s276_s1 + $0x8] sm:$0xff]  ;;  %s130_s6 = sshll.u32 %s219_s5, 4  ;;  %s131_s6 = int_to_ptr.vmem [resolvable:$true] %s130_s6 }
   0x5   :  { %v181_v7 = vld [vmem:[%s276_s1] sm:$0xff]  ;;  %s221_s1 = smov 8  }
   0x6   :  { %96 = vmatpush.bf16.msra.mxu0 %v187_v1  ;;  %v180_v8 = vld [vmem:[%s275_s0] sm:$0xff]  ;;  %s220_s0 = smov 128  }
   0x7   :  { %v192_v9 = vld [vmem:[%s277_s2] ss:$0 sm:$0xff] }
   0xa   :  { %97 = vmatpush.bf16.msra.mxu0 %v186_v2 }
   0xe   :  { %98 = vmatpush.bf16.msra.mxu0 %v185_v3 }
  0x12   :  { %99 = vmatpush.bf16.msra.mxu0 %v184_v4 }
  0x16   :  { %100 = vmatpush.bf16.msra.mxu0 %v183_v5 }
  0x1a   :  { %101 = vmatpush.bf16.msra.mxu0 %v182_v6 }
  0x1e   :  { %102 = vmatpush.bf16.msra.mxu0 %v181_v7 }
  0x21   :  { %103 = vmatmul.bf16.vlgmr.msra.gmra.mxu0 %v180_v8 }
  0x9e   :  { %v104_v10 = vpop.f32.mrf.mxu0 }
  0x9f   :  { %v122_v11 = vadd.f32 %v192_v9, %v104_v10 }
  0xa1   :  { %124 = vst [vmem:[#allocation3] sm:$0xff] %v122_v11 }
  0xa6   :  { %v106_v12 = vpop.f32.mrf.mxu0 }
  0xa7   :  { %v123_v13 = vadd.f32 %v192_v9, %v106_v12 }
  0xa9   :  { %125 = vst [vmem:[#allocation3 + $0x8] sm:$0xff] %v123_v13 }
  0xaa   :  { %138 = dma.vmem_to_hbm [thread:$0]  %s131_s6, 256, %s133_s9, [#allocation4], %s220_s0, %s220_s0, %s221_s1  }
  0xab   :  { %217 = dma.done.wait [#allocation4], 256  }
  0xac   :  { %218 = vsyncadd [#allocation4], 4294967040 }
  0xad   :  { %143 = vsyncpa [#allocation4], 1 }

</bundles_post_ra>
